<compile_context>
chip_gen: v6e
topology: v6e:2x2x1
jax: 0.10.0
libtpu: 0.0.40
codegen_flags: <defaults>
</compile_context>

<pallas_src>
import jax
import jax.numpy as jnp
from jax.experimental import pallas as pl
from jax.experimental.pallas import tpu as pltpu


# ------------------------------ small helpers ---------------------------------

def _round8(n):
    return ((n + 7) // 8) * 8


def _pick_tile(dim, candidates):
    for c in candidates:
        if dim % c == 0:
            return c
    return dim  # full extent (always a legal block: equals the array dim)


def _pick_bt(batch, r_in, k, max_bytes=2 << 20, max_bt=8):
    """Batch elements per block: bounded VMEM, and keep >=2 grid blocks (v7x 2 TCs) if we can."""
    best = 1
    for bt in range(1, min(batch, max_bt) + 1):
        if batch % bt:
            continue
        if bt * r_in * k * 2 > max_bytes:          # bf16 input block budget
            continue
        if batch >= 2 and batch // bt < 2:         # leave work for both TensorCores
            continue
        best = bt
    return best


# ----------------------------- Pallas kernels --------------------------------

def _make_conv_kernel(bt, r_in, r_out, q):
    """conv(4x4,s2,p1) + LeakyReLU(0.2) + per-channel shift, on space-to-depth input.

    x_ref:     (bt*r_in, K)  bf16  -- per-batch-element flattened s2d rows (K = 4*Cin)
    w_ref:     (4, K, tn)    bf16  -- one (K, tn) weight per 2x2 tap, BN scale pre-folded
    shift_ref: (1, tn)       f32   -- BN beta (shift); 0 for layer 1
    o_ref:     (bt*r_out, tn) bf16 -- rows = oh*q + ow' (ow' = q-1 column + pad rows = garbage)
    """
    offs = tuple(di * q + dj for di in range(2) for dj in range(2))

    def kernel(x_ref, w_ref, shift_ref, o_ref):
        shift = shift_ref[...]
        for e in range(bt):
            base = e * r_in
            acc = None
            for t, off in enumerate(offs):
                # Shifted window sliced in VMEM (no HBM im2col duplication).
                xs = x_ref[pl.ds(base + off, r_out), :]
                y = jnp.dot(xs, w_ref[t], preferred_element_type=jnp.float32)
                acc = y if acc is None else acc + y
            acc = jnp.where(acc >= 0.0, acc, 0.2 * acc) + shift      # LeakyReLU(0.2) + BN shift
            o_ref[pl.ds(e * r_out, r_out), :] = acc.astype(o_ref.dtype)

    return kernel


def _conv4_head_kernel(x_ref, w_ref, shift_ref, hw_ref, hb_ref, o_ref):
    # conv4 (plain matmul) + LeakyReLU + BN shift, then Linear(128,1) + Sigmoid, all in VMEM.
    y = jnp.dot(x_ref[...], w_ref[...], preferred_element_type=jnp.float32)
    y = jnp.where(y >= 0.0, y, 0.2 * y) + shift_ref[...]
    # Linear(128,1) as a VPU multiply + lane reduction (an N=1 MXU matmul would waste a push).
    v = jnp.sum(y * hw_ref[...], axis=-1, keepdims=True) + hb_ref[...]
    o_ref[...] = 1.0 / (1.0 + jnp.exp(-v))


# --------------------------- layer-level wrappers ------------------------------

def conv4x4s2_lrelu_affine(x_nhwc, w_s2d, shift, cin_pad=None):
    """y = BNshift(LeakyReLU(conv4x4_s2_p1(x))) with BN scale folded into w.  Returns NHWC bf16."""
    B, H, W, C = x_nhwc.shape
    assert H % 2 == 0 and W % 2 == 0
    cp = C if cin_pad is None else cin_pad
    if cp != C:
        x_nhwc = jnp.pad(x_nhwc, ((0, 0), (0, 0), (0, 0), (0, cp - C)))

    oh, ow = H // 2, W // 2
    pp, q = oh + 2, ow + 1                       # s2d rows/cols (incl. conv pad + 1 spare row)
    r_out = _round8(oh * q)                      # output rows per batch element (8-aligned)
    r_in = _round8(max(pp * q, q + 1 + r_out))   # input rows per batch element (8-aligned)
    assert q + 1 + r_out <= r_in                 # all shifted windows stay in-bounds

    # pad (1 top/left/right, 3 bottom = conv pad + one extra s2d row), then space-to-depth by 2:
    # the stride-2 4x4 conv becomes 4 stride-1 taps whose rows are contiguous in the flat layout.
    xp = jnp.pad(x_nhwc, ((0, 0), (1, 3), (1, 1), (0, 0)))
    xs = jnp.transpose(xp.reshape(B, pp, 2, q, 2, cp), (0, 1, 3, 2, 4, 5))
    xs = xs.reshape(B, pp * q, 4 * cp)
    if r_in != pp * q:
        xs = jnp.pad(xs, ((0, 0), (0, r_in - pp * q), (0, 0)))
    x2d = xs.reshape(B * r_in, 4 * cp)

    k = 4 * cp
    four, k2, n = w_s2d.shape
    assert four == 4 and k2 == k
    tn = _pick_tile(n, (256, 128))               # 256 fills the v6e/v7x MXU; 128 is v5e-native
    bt = _pick_bt(B, r_in, k)
    grid = (n // tn, B // bt)                    # N outer, batch inner -> weight block stationary

    out2d = pl.pallas_call(
        _make_conv_kernel(bt, r_in, r_out, q),
        out_shape=jax.ShapeDtypeStruct((B * r_out, n), jnp.bfloat16),
        grid=grid,
        in_specs=[
            pl.BlockSpec((bt * r_in, k), lambda j, b: (b, 0)),
            pl.BlockSpec((4, k, tn), lambda j, b: (0, 0, j)),
            pl.BlockSpec((1, tn), lambda j, b: (0, j)),
        ],
        out_specs=pl.BlockSpec((bt * r_out, tn), lambda j, b: (b, j)),
        compiler_params=pltpu.CompilerParams(
            dimension_semantics=("parallel", "parallel")),
    )(x2d, w_s2d, shift)

    # Drop the garbage column (ow' == ow) and the 8-alignment pad rows; XLA fuses this slice
    # into the next layer's pad/space-to-depth prep.
    h = out2d.reshape(B, r_out, n)[:, :oh * q, :].reshape(B, oh, q, n)[:, :, :ow, :]
    return h


def conv4_head(patches, w2d, shift, head_w, head_b):
    """validity = sigmoid((leaky_relu(patches @ w2d) + shift) . head_w + head_b)."""
    M, K = patches.shape
    K2, N = w2d.shape
    assert K == K2
    # Head input is only (B, 8192); full-M fallback is safe here for any realistic batch.
    tm = _pick_tile(M, (512, 256, 128))
    grid = (M // tm,)
    return pl.pallas_call(
        _conv4_head_kernel,
        out_shape=jax.ShapeDtypeStruct((M, 1), jnp.float32),
        grid=grid,
        in_specs=[
            pl.BlockSpec((tm, K), lambda i: (i, 0)),
            pl.BlockSpec((K, N), lambda i: (0, 0)),
            pl.BlockSpec((1, N), lambda i: (0, 0)),
            pl.BlockSpec((1, N), lambda i: (0, 0)),
            pl.BlockSpec((1, 1), lambda i: (0, 0)),
        ],
        out_specs=pl.BlockSpec((tm, 1), lambda i: (i, 0)),
        compiler_params=pltpu.CompilerParams(dimension_semantics=("parallel",)),
    )(patches, w2d, shift, head_w, head_b)


# ------------------------------ parameter prep --------------------------------

def _conv_w_s2d(w_oihw, cin_pad=None):
    """PyTorch (Cout, Cin, 4, 4) -> (4, 4*Cin_pad, Cout) matching the space-to-depth layout.

    Flattened input channel f = a*2*Cin_pad + b*Cin_pad + ci  (a,b = row/col parity);
    tap index t = di*2 + dj with original kernel offsets i = 2*di + a, j = 2*dj + b.
    """
    cout, cin, kh, kw = w_oihw.shape
    assert kh == 4 and kw == 4
    cp = cin if cin_pad is None else cin_pad
    w6 = w_oihw.reshape(cout, cin, 2, 2, 2, 2)            # (co, ci, di, a, dj, b)
    w6 = jnp.transpose(w6, (2, 4, 3, 5, 1, 0))            # (di, dj, a, b, ci, co)
    if cp != cin:
        w6 = jnp.pad(w6, ((0, 0), (0, 0), (0, 0), (0, 0), (0, cp - cin), (0, 0)))
    return w6.reshape(4, 4 * cp, cout)


def init_params(key, num_channels=3, num_classes=10):
    keys = jax.random.split(key, 9)

    def conv_w(k, cout, cin):                    # weights_init: normal(0, 0.02), bias=False
        return 0.02 * jax.random.normal(k, (cout, cin, 4, 4), jnp.float32)

    def bn(k, c, eps=0.8):                       # BatchNorm2d(c, eps=0.8), eval mode
        gamma = 1.0 + 0.02 * jax.random.normal(k, (c,), jnp.float32)   # > 0 in practice
        beta = jnp.zeros((c,), jnp.float32)
        # NOTE: folding the scale through LeakyReLU requires scale > 0 (true for this init;
        # guard before loading any real checkpoint with non-positive gamma).
        scale = gamma / jnp.sqrt(1.0 + eps)      # running_mean = 0, running_var = 1
        return scale, beta

    w1_1 = conv_w(keys[0], 64, num_channels)
    w1_2 = conv_w(keys[1], 64, 10)
    w2 = conv_w(keys[2], 256, 128)
    w3 = conv_w(keys[3], 512, 256)
    w4 = conv_w(keys[4], 128, 512)
    bn2_s, bn2_b = bn(keys[5], 256)
    bn3_s, bn3_b = bn(keys[6], 512)
    bn4_s, bn4_b = bn(keys[7], 128)

    # conv1 pair fused via a block-structured weight over the [img | label] channel concat.
    cin1 = num_channels + 10
    cin1_pad = _round8(cin1)                     # 13 -> 16: aligned DMA / clean MXU contraction
    w1 = jnp.zeros((128, cin1, 4, 4), jnp.float32)
    w1 = w1.at[:64, :num_channels].set(w1_1)
    w1 = w1.at[64:, num_channels:].set(w1_2)

    p = {}
    p["w1"] = _conv_w_s2d(w1, cin_pad=cin1_pad).astype(jnp.bfloat16)
    p["shift1"] = jnp.zeros((1, 128), jnp.float32)
    # BN scale folded into the conv weight (valid: leaky_relu is +-homogeneous, scale > 0).
    p["w2"] = (_conv_w_s2d(w2) * bn2_s.reshape(1, 1, -1)).astype(jnp.bfloat16)
    p["shift2"] = bn2_b.reshape(1, -1)
    p["w3"] = (_conv_w_s2d(w3) * bn3_s.reshape(1, 1, -1)).astype(jnp.bfloat16)
    p["shift3"] = bn3_b.reshape(1, -1)
    # conv4 (4x4, s1, p0 over a 4x4 map): (i, j, ci) patch order == NHWC reshape order.
    w4_2d = jnp.transpose(w4, (2, 3, 1, 0)).reshape(4 * 4 * 512, 128)
    p["w4"] = (w4_2d * bn4_s.reshape(1, -1)).astype(jnp.bfloat16)
    p["shift4"] = bn4_b.reshape(1, -1)
    # adv_layer = Linear(128, 1) + Sigmoid; weight kept in (1, 128) lane-dense layout.
    p["adv_w"] = 0.02 * jax.random.normal(keys[8], (1, 128), jnp.float32)
    p["adv_b"] = jnp.zeros((1, 1), jnp.float32)
    return p


# ------------------------------- forward pass ----------------------------------

def discriminator_forward(params, img_nchw, label_nchw):
    # bf16 up front: halves the HBM traffic of the largest raw tensors; f32 accumulation stays.
    img = jnp.transpose(img_nchw.astype(jnp.bfloat16), (0, 2, 3, 1))     # NCHW -> NHWC
    lab = jnp.transpose(label_nchw.astype(jnp.bfloat16), (0, 2, 3, 1))
    x = jnp.concatenate([img, lab], axis=-1)                             # (B, 32, 32, 13)

    cin1_pad = params["w1"].shape[1] // 4
    # x = lrelu(conv1_1(img)), y = lrelu(conv1_2(label)), cat(dim=1) -> one fused call
    h = conv4x4s2_lrelu_affine(x, params["w1"], params["shift1"], cin_pad=cin1_pad)  # (B,16,16,128)
    # conv_blocks (Dropout2d identity in eval mode; BN scale folded into weights)
    h = conv4x4s2_lrelu_affine(h, params["w2"], params["shift2"])                    # (B, 8, 8,256)
    h = conv4x4s2_lrelu_affine(h, params["w3"], params["shift3"])                    # (B, 4, 4,512)

    # conv4 + BN shift + Linear(128,1) + Sigmoid fused in one kernel; patches via plain reshape.
    B = h.shape[0]
    patches = h.reshape(B, 4 * 4 * 512)
    validity = conv4_head(patches, params["w4"], params["shift4"],
                          params["adv_w"], params["adv_b"])                          # (B, 1)
    return validity


if __name__ == "__main__":
    key = jax.random.PRNGKey(0)
    pkey, ikey, lkey = jax.random.split(key, 3)

    params = init_params(pkey, num_channels=3, num_classes=10)

    B = 2
    img = jax.random.normal(ikey, (B, 3, 32, 32), jnp.float32)
    labels = jax.random.randint(lkey, (B,), 0, 10)
    label_map = jax.nn.one_hot(labels, 10, dtype=jnp.float32)[:, :, None, None]
    label_map = jnp.broadcast_to(label_map, (B, 10, 32, 32))

    fwd = jax.jit(discriminator_forward)
    validity = jax.block_until_ready(fwd(params, img, label_map))
    assert validity.shape == (B, 1)
    assert bool(jnp.all(jnp.isfinite(validity)))
    assert bool(jnp.all((validity >= 0.0) & (validity <= 1.0)))
    print("KERNEL_OK")
</pallas_src>

<mosaic_0001>
module attributes {stable_mosaic.version = 11 : i64} {
  func.func @kernel(%arg0: i32, %arg1: i32, %arg2: memref<312x64xbf16, #tpu.memory_space<vmem>>, %arg3: memref<4x64x128xbf16, #tpu.memory_space<vmem>>, %arg4: memref<1x128xf32, #tpu.memory_space<vmem>>, %arg5: memref<272x128xbf16, #tpu.memory_space<vmem>>) attributes {dimension_semantics = [#tpu.dimension_semantics<parallel>, #tpu.dimension_semantics<parallel>], iteration_bounds = array<i64: 1, 2>, scalar_prefetch = 0 : i64, scratch_operands = 0 : i64, tpu.core_type = #tpu.core_type<tc>, window_params = [{transform_indices = @transform_0, window_bounds = array<i64: 312, 64>}, {transform_indices = @transform_1, window_bounds = array<i64: 4, 64, 128>}, {transform_indices = @transform_2, window_bounds = array<i64: 1, 128>}, {transform_indices = @transform_3, window_bounds = array<i64: 272, 128>}]} {
    %c0 = arith.constant 0 : index
    %c0_0 = arith.constant 0 : index
    %0 = vector.load %arg4[%c0, %c0_0] : memref<1x128xf32, #tpu.memory_space<vmem>>, vector<1x128xf32>
    %c0_1 = arith.constant 0 : index
    %c0_2 = arith.constant 0 : index
    %1 = vector.load %arg2[%c0_1, %c0_2] : memref<312x64xbf16, #tpu.memory_space<vmem>>, vector<272x64xbf16>
    %c0_3 = arith.constant 0 : index
    %c0_4 = arith.constant 0 : index
    %c0_5 = arith.constant 0 : index
    %2 = vector.load %arg3[%c0_3, %c0_4, %c0_5] : memref<4x64x128xbf16, #tpu.memory_space<vmem>>, vector<1x64x128xbf16>
    %3 = vector.shape_cast %2 : vector<1x64x128xbf16> to vector<64x128xbf16>
    %cst = arith.constant dense<0.000000e+00> : vector<272x128xf32>
    %4 = tpu.matmul %1, %3, %cst {dimension_numbers = #tpu.dot_dimension_numbers<[1], [0], [0], [1], [0, 0, 1, 1], [], []>} : vector<272x64xbf16>, vector<64x128xbf16>, vector<272x128xf32> -> vector<272x128xf32>
    %c1 = arith.constant 1 : index
    %c0_6 = arith.constant 0 : index
    %5 = vector.load %arg2[%c1, %c0_6] : memref<312x64xbf16, #tpu.memory_space<vmem>>, vector<272x64xbf16>
    %c1_7 = arith.constant 1 : index
    %c0_8 = arith.constant 0 : index
    %c0_9 = arith.constant 0 : index
    %6 = vector.load %arg3[%c1_7, %c0_8, %c0_9] : memref<4x64x128xbf16, #tpu.memory_space<vmem>>, vector<1x64x128xbf16>
    %7 = vector.shape_cast %6 : vector<1x64x128xbf16> to vector<64x128xbf16>
    %cst_10 = arith.constant dense<0.000000e+00> : vector<272x128xf32>
    %8 = tpu.matmul %5, %7, %cst_10 {dimension_numbers = #tpu.dot_dimension_numbers<[1], [0], [0], [1], [0, 0, 1, 1], [], []>} : vector<272x64xbf16>, vector<64x128xbf16>, vector<272x128xf32> -> vector<272x128xf32>
    %9 = arith.addf %4, %8 : vector<272x128xf32>
    %c17 = arith.constant 17 : index
    %c0_11 = arith.constant 0 : index
    %10 = vector.load %arg2[%c17, %c0_11] : memref<312x64xbf16, #tpu.memory_space<vmem>>, vector<272x64xbf16>
    %c2 = arith.constant 2 : index
    %c0_12 = arith.constant 0 : index
    %c0_13 = arith.constant 0 : index
    %11 = vector.load %arg3[%c2, %c0_12, %c0_13] : memref<4x64x128xbf16, #tpu.memory_space<vmem>>, vector<1x64x128xbf16>
    %12 = vector.shape_cast %11 : vector<1x64x128xbf16> to vector<64x128xbf16>
    %cst_14 = arith.constant dense<0.000000e+00> : vector<272x128xf32>
    %13 = tpu.matmul %10, %12, %cst_14 {dimension_numbers = #tpu.dot_dimension_numbers<[1], [0], [0], [1], [0, 0, 1, 1], [], []>} : vector<272x64xbf16>, vector<64x128xbf16>, vector<272x128xf32> -> vector<272x128xf32>
    %14 = arith.addf %9, %13 : vector<272x128xf32>
    %c18 = arith.constant 18 : index
    %c0_15 = arith.constant 0 : index
    %15 = vector.load %arg2[%c18, %c0_15] : memref<312x64xbf16, #tpu.memory_space<vmem>>, vector<272x64xbf16>
    %c3 = arith.constant 3 : index
    %c0_16 = arith.constant 0 : index
    %c0_17 = arith.constant 0 : index
    %16 = vector.load %arg3[%c3, %c0_16, %c0_17] : memref<4x64x128xbf16, #tpu.memory_space<vmem>>, vector<1x64x128xbf16>
    %17 = vector.shape_cast %16 : vector<1x64x128xbf16> to vector<64x128xbf16>
    %cst_18 = arith.constant dense<0.000000e+00> : vector<272x128xf32>
    %18 = tpu.matmul %15, %17, %cst_18 {dimension_numbers = #tpu.dot_dimension_numbers<[1], [0], [0], [1], [0, 0, 1, 1], [], []>} : vector<272x64xbf16>, vector<64x128xbf16>, vector<272x128xf32> -> vector<272x128xf32>
    %19 = arith.addf %14, %18 : vector<272x128xf32>
    %cst_19 = arith.constant 0.000000e+00 : f32
    %20 = vector.broadcast %cst_19 : f32 to vector<272x128xf32>
    %21 = arith.cmpf oge, %19, %20 : vector<272x128xf32>
    %cst_20 = arith.constant 2.000000e-01 : f32
    %22 = vector.broadcast %cst_20 : f32 to vector<272x128xf32>
    %23 = arith.mulf %22, %19 : vector<272x128xf32>
    %24 = arith.select %21, %19, %23 : vector<272x128xi1>, vector<272x128xf32>
    %25 = vector.broadcast %0 : vector<1x128xf32> to vector<272x128xf32>
    %26 = arith.addf %24, %25 : vector<272x128xf32>
    %27 = arith.truncf %26 : vector<272x128xf32> to vector<272x128xbf16>
    %c0_21 = arith.constant 0 : index
    %c0_22 = arith.constant 0 : index
    %28 = vector.load %arg5[%c0_21, %c0_22] : memref<272x128xbf16, #tpu.memory_space<vmem>>, vector<272x128xbf16>
    tpu.vector_store %arg5[%c0_21, %c0_22], %27 {strides = array<i32>} : memref<272x128xbf16, #tpu.memory_space<vmem>>, vector<272x128xbf16>,
    return
  }
  func.func @transform_0(%arg0: i32, %arg1: i32) -> (i32, i32) {
    %c0_i32 = arith.constant 0 : i32
    %c0_i32_0 = arith.constant 0 : i32
    return %arg1, %c0_i32 : i32, i32
  }
  func.func @transform_1(%arg0: i32, %arg1: i32) -> (i32, i32, i32) {
    %c0_i32 = arith.constant 0 : i32
    %c0_i32_0 = arith.constant 0 : i32
    %c0_i32_1 = arith.constant 0 : i32
    return %c0_i32, %c0_i32_0, %arg0 : i32, i32, i32
  }
  func.func @transform_2(%arg0: i32, %arg1: i32) -> (i32, i32) {
    %c0_i32 = arith.constant 0 : i32
    %c0_i32_0 = arith.constant 0 : i32
    return %c0_i32, %arg0 : i32, i32
  }
  func.func @transform_3(%arg0: i32, %arg1: i32) -> (i32, i32) {
    %c0_i32 = arith.constant 0 : i32
    return %arg1, %arg0 : i32, i32
  }
}

module attributes {stable_mosaic.version = 11 : i64} {
  func.func @kernel(%arg0: i32, %arg1: i32, %arg2: memref<96x512xbf16, #tpu.memory_space<vmem>>, %arg3: memref<4x512x256xbf16, #tpu.memory_space<vmem>>, %arg4: memref<1x256xf32, #tpu.memory_space<vmem>>, %arg5: memref<72x256xbf16, #tpu.memory_space<vmem>>) attributes {dimension_semantics = [#tpu.dimension_semantics<parallel>, #tpu.dimension_semantics<parallel>], iteration_bounds = array<i64: 1, 2>, scalar_prefetch = 0 : i64, scratch_operands = 0 : i64, tpu.core_type = #tpu.core_type<tc>, window_params = [{transform_indices = @transform_0, window_bounds = array<i64: 96, 512>}, {transform_indices = @transform_1, window_bounds = array<i64: 4, 512, 256>}, {transform_indices = @transform_2, window_bounds = array<i64: 1, 256>}, {transform_indices = @transform_3, window_bounds = array<i64: 72, 256>}]} {
    %c0 = arith.constant 0 : index
    %c0_0 = arith.constant 0 : index
    %0 = vector.load %arg4[%c0, %c0_0] : memref<1x256xf32, #tpu.memory_space<vmem>>, vector<1x256xf32>
    %c0_1 = arith.constant 0 : index
    %c0_2 = arith.constant 0 : index
    %1 = vector.load %arg2[%c0_1, %c0_2] : memref<96x512xbf16, #tpu.memory_space<vmem>>, vector<72x512xbf16>
    %c0_3 = arith.constant 0 : index
    %c0_4 = arith.constant 0 : index
    %c0_5 = arith.constant 0 : index
    %2 = vector.load %arg3[%c0_3, %c0_4, %c0_5] : memref<4x512x256xbf16, #tpu.memory_space<vmem>>, vector<1x512x256xbf16>
    %3 = vector.shape_cast %2 : vector<1x512x256xbf16> to vector<512x256xbf16>
    %cst = arith.constant dense<0.000000e+00> : vector<72x256xf32>
    %4 = tpu.matmul %1, %3, %cst {dimension_numbers = #tpu.dot_dimension_numbers<[1], [0], [0], [1], [0, 0, 1, 1], [], []>} : vector<72x512xbf16>, vector<512x256xbf16>, vector<72x256xf32> -> vector<72x256xf32>
    %c1 = arith.constant 1 : index
    %c0_6 = arith.constant 0 : index
    %5 = vector.load %arg2[%c1, %c0_6] : memref<96x512xbf16, #tpu.memory_space<vmem>>, vector<72x512xbf16>
    %c1_7 = arith.constant 1 : index
    %c0_8 = arith.constant 0 : index
    %c0_9 = arith.constant 0 : index
    %6 = vector.load %arg3[%c1_7, %c0_8, %c0_9] : memref<4x512x256xbf16, #tpu.memory_space<vmem>>, vector<1x512x256xbf16>
    %7 = vector.shape_cast %6 : vector<1x512x256xbf16> to vector<512x256xbf16>
    %cst_10 = arith.constant dense<0.000000e+00> : vector<72x256xf32>
    %8 = tpu.matmul %5, %7, %cst_10 {dimension_numbers = #tpu.dot_dimension_numbers<[1], [0], [0], [1], [0, 0, 1, 1], [], []>} : vector<72x512xbf16>, vector<512x256xbf16>, vector<72x256xf32> -> vector<72x256xf32>
    %9 = arith.addf %4, %8 : vector<72x256xf32>
    %c9 = arith.constant 9 : index
    %c0_11 = arith.constant 0 : index
    %10 = vector.load %arg2[%c9, %c0_11] : memref<96x512xbf16, #tpu.memory_space<vmem>>, vector<72x512xbf16>
    %c2 = arith.constant 2 : index
    %c0_12 = arith.constant 0 : index
    %c0_13 = arith.constant 0 : index
    %11 = vector.load %arg3[%c2, %c0_12, %c0_13] : memref<4x512x256xbf16, #tpu.memory_space<vmem>>, vector<1x512x256xbf16>
    %12 = vector.shape_cast %11 : vector<1x512x256xbf16> to vector<512x256xbf16>
    %cst_14 = arith.constant dense<0.000000e+00> : vector<72x256xf32>
    %13 = tpu.matmul %10, %12, %cst_14 {dimension_numbers = #tpu.dot_dimension_numbers<[1], [0], [0], [1], [0, 0, 1, 1], [], []>} : vector<72x512xbf16>, vector<512x256xbf16>, vector<72x256xf32> -> vector<72x256xf32>
    %14 = arith.addf %9, %13 : vector<72x256xf32>
    %c10 = arith.constant 10 : index
    %c0_15 = arith.constant 0 : index
    %15 = vector.load %arg2[%c10, %c0_15] : memref<96x512xbf16, #tpu.memory_space<vmem>>, vector<72x512xbf16>
    %c3 = arith.constant 3 : index
    %c0_16 = arith.constant 0 : index
    %c0_17 = arith.constant 0 : index
    %16 = vector.load %arg3[%c3, %c0_16, %c0_17] : memref<4x512x256xbf16, #tpu.memory_space<vmem>>, vector<1x512x256xbf16>
    %17 = vector.shape_cast %16 : vector<1x512x256xbf16> to vector<512x256xbf16>
    %cst_18 = arith.constant dense<0.000000e+00> : vector<72x256xf32>
    %18 = tpu.matmul %15, %17, %cst_18 {dimension_numbers = #tpu.dot_dimension_numbers<[1], [0], [0], [1], [0, 0, 1, 1], [], []>} : vector<72x512xbf16>, vector<512x256xbf16>, vector<72x256xf32> -> vector<72x256xf32>
    %19 = arith.addf %14, %18 : vector<72x256xf32>
    %cst_19 = arith.constant 0.000000e+00 : f32
    %20 = vector.broadcast %cst_19 : f32 to vector<72x256xf32>
    %21 = arith.cmpf oge, %19, %20 : vector<72x256xf32>
    %cst_20 = arith.constant 2.000000e-01 : f32
    %22 = vector.broadcast %cst_20 : f32 to vector<72x256xf32>
    %23 = arith.mulf %22, %19 : vector<72x256xf32>
    %24 = arith.select %21, %19, %23 : vector<72x256xi1>, vector<72x256xf32>
    %25 = vector.broadcast %0 : vector<1x256xf32> to vector<72x256xf32>
    %26 = arith.addf %24, %25 : vector<72x256xf32>
    %27 = arith.truncf %26 : vector<72x256xf32> to vector<72x256xbf16>
    %c0_21 = arith.constant 0 : index
    %c0_22 = arith.constant 0 : index
    %28 = vector.load %arg5[%c0_21, %c0_22] : memref<72x256xbf16, #tpu.memory_space<vmem>>, vector<72x256xbf16>
    tpu.vector_store %arg5[%c0_21, %c0_22], %27 {strides = array<i32>} : memref<72x256xbf16, #tpu.memory_space<vmem>>, vector<72x256xbf16>,
    return
  }
  func.func @transform_0(%arg0: i32, %arg1: i32) -> (i32, i32) {
    %c0_i32 = arith.constant 0 : i32
    %c0_i32_0 = arith.constant 0 : i32
    return %arg1, %c0_i32 : i32, i32
  }
  func.func @transform_1(%arg0: i32, %arg1: i32) -> (i32, i32, i32) {
    %c0_i32 = arith.constant 0 : i32
    %c0_i32_0 = arith.constant 0 : i32
    %c0_i32_1 = arith.constant 0 : i32
    return %c0_i32, %c0_i32_0, %arg0 : i32, i32, i32
  }
  func.func @transform_2(%arg0: i32, %arg1: i32) -> (i32, i32) {
    %c0_i32 = arith.constant 0 : i32
    %c0_i32_0 = arith.constant 0 : i32
    return %c0_i32, %arg0 : i32, i32
  }
  func.func @transform_3(%arg0: i32, %arg1: i32) -> (i32, i32) {
    %c0_i32 = arith.constant 0 : i32
    return %arg1, %arg0 : i32, i32
  }
}

module attributes {stable_mosaic.version = 11 : i64} {
  func.func @kernel(%arg0: i32, %arg1: i32, %arg2: memref<32x1024xbf16, #tpu.memory_space<vmem>>, %arg3: memref<4x1024x256xbf16, #tpu.memory_space<vmem>>, %arg4: memref<1x256xf32, #tpu.memory_space<vmem>>, %arg5: memref<24x256xbf16, #tpu.memory_space<vmem>>) attributes {dimension_semantics = [#tpu.dimension_semantics<parallel>, #tpu.dimension_semantics<parallel>], iteration_bounds = array<i64: 2, 2>, scalar_prefetch = 0 : i64, scratch_operands = 0 : i64, tpu.core_type = #tpu.core_type<tc>, window_params = [{transform_indices = @transform_0, window_bounds = array<i64: 32, 1024>}, {transform_indices = @transform_1, window_bounds = array<i64: 4, 1024, 256>}, {transform_indices = @transform_2, window_bounds = array<i64: 1, 256>}, {transform_indices = @transform_3, window_bounds = array<i64: 24, 256>}]} {
    %c0 = arith.constant 0 : index
    %c0_0 = arith.constant 0 : index
    %0 = vector.load %arg4[%c0, %c0_0] : memref<1x256xf32, #tpu.memory_space<vmem>>, vector<1x256xf32>
    %c0_1 = arith.constant 0 : index
    %c0_2 = arith.constant 0 : index
    %1 = vector.load %arg2[%c0_1, %c0_2] : memref<32x1024xbf16, #tpu.memory_space<vmem>>, vector<24x1024xbf16>
    %c0_3 = arith.constant 0 : index
    %c0_4 = arith.constant 0 : index
    %c0_5 = arith.constant 0 : index
    %2 = vector.load %arg3[%c0_3, %c0_4, %c0_5] : memref<4x1024x256xbf16, #tpu.memory_space<vmem>>, vector<1x1024x256xbf16>
    %3 = vector.shape_cast %2 : vector<1x1024x256xbf16> to vector<1024x256xbf16>
    %cst = arith.constant dense<0.000000e+00> : vector<24x256xf32>
    %4 = tpu.matmul %1, %3, %cst {dimension_numbers = #tpu.dot_dimension_numbers<[1], [0], [0], [1], [0, 0, 1, 1], [], []>} : vector<24x1024xbf16>, vector<1024x256xbf16>, vector<24x256xf32> -> vector<24x256xf32>
    %c1 = arith.constant 1 : index
    %c0_6 = arith.constant 0 : index
    %5 = vector.load %arg2[%c1, %c0_6] : memref<32x1024xbf16, #tpu.memory_space<vmem>>, vector<24x1024xbf16>
    %c1_7 = arith.constant 1 : index
    %c0_8 = arith.constant 0 : index
    %c0_9 = arith.constant 0 : index
    %6 = vector.load %arg3[%c1_7, %c0_8, %c0_9] : memref<4x1024x256xbf16, #tpu.memory_space<vmem>>, vector<1x1024x256xbf16>
    %7 = vector.shape_cast %6 : vector<1x1024x256xbf16> to vector<1024x256xbf16>
    %cst_10 = arith.constant dense<0.000000e+00> : vector<24x256xf32>
    %8 = tpu.matmul %5, %7, %cst_10 {dimension_numbers = #tpu.dot_dimension_numbers<[1], [0], [0], [1], [0, 0, 1, 1], [], []>} : vector<24x1024xbf16>, vector<1024x256xbf16>, vector<24x256xf32> -> vector<24x256xf32>
    %9 = arith.addf %4, %8 : vector<24x256xf32>
    %c5 = arith.constant 5 : index
    %c0_11 = arith.constant 0 : index
    %10 = vector.load %arg2[%c5, %c0_11] : memref<32x1024xbf16, #tpu.memory_space<vmem>>, vector<24x1024xbf16>
    %c2 = arith.constant 2 : index
    %c0_12 = arith.constant 0 : index
    %c0_13 = arith.constant 0 : index
    %11 = vector.load %arg3[%c2, %c0_12, %c0_13] : memref<4x1024x256xbf16, #tpu.memory_space<vmem>>, vector<1x1024x256xbf16>
    %12 = vector.shape_cast %11 : vector<1x1024x256xbf16> to vector<1024x256xbf16>
    %cst_14 = arith.constant dense<0.000000e+00> : vector<24x256xf32>
    %13 = tpu.matmul %10, %12, %cst_14 {dimension_numbers = #tpu.dot_dimension_numbers<[1], [0], [0], [1], [0, 0, 1, 1], [], []>} : vector<24x1024xbf16>, vector<1024x256xbf16>, vector<24x256xf32> -> vector<24x256xf32>
    %14 = arith.addf %9, %13 : vector<24x256xf32>
    %c6 = arith.constant 6 : index
    %c0_15 = arith.constant 0 : index
    %15 = vector.load %arg2[%c6, %c0_15] : memref<32x1024xbf16, #tpu.memory_space<vmem>>, vector<24x1024xbf16>
    %c3 = arith.constant 3 : index
    %c0_16 = arith.constant 0 : index
    %c0_17 = arith.constant 0 : index
    %16 = vector.load %arg3[%c3, %c0_16, %c0_17] : memref<4x1024x256xbf16, #tpu.memory_space<vmem>>, vector<1x1024x256xbf16>
    %17 = vector.shape_cast %16 : vector<1x1024x256xbf16> to vector<1024x256xbf16>
    %cst_18 = arith.constant dense<0.000000e+00> : vector<24x256xf32>
    %18 = tpu.matmul %15, %17, %cst_18 {dimension_numbers = #tpu.dot_dimension_numbers<[1], [0], [0], [1], [0, 0, 1, 1], [], []>} : vector<24x1024xbf16>, vector<1024x256xbf16>, vector<24x256xf32> -> vector<24x256xf32>
    %19 = arith.addf %14, %18 : vector<24x256xf32>
    %cst_19 = arith.constant 0.000000e+00 : f32
    %20 = vector.broadcast %cst_19 : f32 to vector<24x256xf32>
    %21 = arith.cmpf oge, %19, %20 : vector<24x256xf32>
    %cst_20 = arith.constant 2.000000e-01 : f32
    %22 = vector.broadcast %cst_20 : f32 to vector<24x256xf32>
    %23 = arith.mulf %22, %19 : vector<24x256xf32>
    %24 = arith.select %21, %19, %23 : vector<24x256xi1>, vector<24x256xf32>
    %25 = vector.broadcast %0 : vector<1x256xf32> to vector<24x256xf32>
    %26 = arith.addf %24, %25 : vector<24x256xf32>
    %27 = arith.truncf %26 : vector<24x256xf32> to vector<24x256xbf16>
    %c0_21 = arith.constant 0 : index
    %c0_22 = arith.constant 0 : index
    %28 = vector.load %arg5[%c0_21, %c0_22] : memref<24x256xbf16, #tpu.memory_space<vmem>>, vector<24x256xbf16>
    tpu.vector_store %arg5[%c0_21, %c0_22], %27 {strides = array<i32>} : memref<24x256xbf16, #tpu.memory_space<vmem>>, vector<24x256xbf16>,
    return
  }
  func.func @transform_0(%arg0: i32, %arg1: i32) -> (i32, i32) {
    %c0_i32 = arith.constant 0 : i32
    %c0_i32_0 = arith.constant 0 : i32
    return %arg1, %c0_i32 : i32, i32
  }
  func.func @transform_1(%arg0: i32, %arg1: i32) -> (i32, i32, i32) {
    %c0_i32 = arith.constant 0 : i32
    %c0_i32_0 = arith.constant 0 : i32
    %c0_i32_1 = arith.constant 0 : i32
    return %c0_i32, %c0_i32_0, %arg0 : i32, i32, i32
  }
  func.func @transform_2(%arg0: i32, %arg1: i32) -> (i32, i32) {
    %c0_i32 = arith.constant 0 : i32
    %c0_i32_0 = arith.constant 0 : i32
    return %c0_i32, %arg0 : i32, i32
  }
  func.func @transform_3(%arg0: i32, %arg1: i32) -> (i32, i32) {
    %c0_i32 = arith.constant 0 : i32
    return %arg1, %arg0 : i32, i32
  }
}

module attributes {stable_mosaic.version = 11 : i64} {
  func.func @_conv4_head_kernel(%arg0: i32, %arg1: memref<2x8192xbf16, #tpu.memory_space<vmem>>, %arg2: memref<8192x128xbf16, #tpu.memory_space<vmem>>, %arg3: memref<1x128xf32, #tpu.memory_space<vmem>>, %arg4: memref<1x128xf32, #tpu.memory_space<vmem>>, %arg5: memref<1x1xf32, #tpu.memory_space<vmem>>, %arg6: memref<2x1xf32, #tpu.memory_space<vmem>>) attributes {dimension_semantics = [#tpu.dimension_semantics<parallel>], iteration_bounds = array<i64: 1>, scalar_prefetch = 0 : i64, scratch_operands = 0 : i64, tpu.core_type = #tpu.core_type<tc>, window_params = [{transform_indices = @transform_0, window_bounds = array<i64: 2, 8192>}, {pipeline_mode = #tpu.pipeline_mode<synchronous>, transform_indices = @transform_1, window_bounds = array<i64: 8192, 128>}, {pipeline_mode = #tpu.pipeline_mode<synchronous>, transform_indices = @transform_2, window_bounds = array<i64: 1, 128>}, {pipeline_mode = #tpu.pipeline_mode<synchronous>, transform_indices = @transform_3, window_bounds = array<i64: 1, 128>}, {pipeline_mode = #tpu.pipeline_mode<synchronous>, transform_indices = @transform_4, window_bounds = array<i64: 1, 1>}, {transform_indices = @transform_5, window_bounds = array<i64: 2, 1>}]} {
    %c0 = arith.constant 0 : index
    %c0_0 = arith.constant 0 : index
    %0 = vector.load %arg1[%c0, %c0_0] : memref<2x8192xbf16, #tpu.memory_space<vmem>>, vector<2x8192xbf16>
    %c0_1 = arith.constant 0 : index
    %c0_2 = arith.constant 0 : index
    %1 = vector.load %arg2[%c0_1, %c0_2] : memref<8192x128xbf16, #tpu.memory_space<vmem>>, vector<8192x128xbf16>
    %cst = arith.constant dense<0.000000e+00> : vector<2x128xf32>
    %2 = tpu.matmul %0, %1, %cst {dimension_numbers = #tpu.dot_dimension_numbers<[1], [0], [0], [1], [0, 0, 1, 1], [], []>} : vector<2x8192xbf16>, vector<8192x128xbf16>, vector<2x128xf32> -> vector<2x128xf32>
    %cst_3 = arith.constant 0.000000e+00 : f32
    %3 = vector.broadcast %cst_3 : f32 to vector<2x128xf32>
    %4 = arith.cmpf oge, %2, %3 : vector<2x128xf32>
    %cst_4 = arith.constant 2.000000e-01 : f32
    %5 = vector.broadcast %cst_4 : f32 to vector<2x128xf32>
    %6 = arith.mulf %5, %2 : vector<2x128xf32>
    %7 = arith.select %4, %2, %6 : vector<2x128xi1>, vector<2x128xf32>
    %c0_5 = arith.constant 0 : index
    %c0_6 = arith.constant 0 : index
    %8 = vector.load %arg3[%c0_5, %c0_6] : memref<1x128xf32, #tpu.memory_space<vmem>>, vector<1x128xf32>
    %9 = vector.broadcast %8 : vector<1x128xf32> to vector<2x128xf32>
    %10 = arith.addf %7, %9 : vector<2x128xf32>
    %c0_7 = arith.constant 0 : index
    %c0_8 = arith.constant 0 : index
    %11 = vector.load %arg4[%c0_7, %c0_8] : memref<1x128xf32, #tpu.memory_space<vmem>>, vector<1x128xf32>
    %12 = vector.broadcast %11 : vector<1x128xf32> to vector<2x128xf32>
    %13 = arith.mulf %10, %12 : vector<2x128xf32>
    %cst_9 = arith.constant dense<0.000000e+00> : vector<2xf32>
    %14 = vector.multi_reduction <add>, %13, %cst_9 [1] : vector<2x128xf32> to vector<2xf32>
    %15 = vector.shape_cast %14 : vector<2xf32> to vector<2x1xf32>
    %c0_10 = arith.constant 0 : index
    %c0_11 = arith.constant 0 : index
    %16 = vector.load %arg5[%c0_10, %c0_11] : memref<1x1xf32, #tpu.memory_space<vmem>>, vector<1x1xf32>
    %17 = vector.broadcast %16 : vector<1x1xf32> to vector<2x1xf32>
    %18 = arith.addf %15, %17 : vector<2x1xf32>
    %cst_12 = arith.constant 0.000000e+00 : f32
    %19 = vector.broadcast %cst_12 : f32 to vector<2x1xf32>
    %20 = arith.subf %19, %18 : vector<2x1xf32>
    %21 = math.exp %20 : vector<2x1xf32>
    %cst_13 = arith.constant 1.000000e+00 : f32
    %22 = vector.broadcast %cst_13 : f32 to vector<2x1xf32>
    %23 = arith.addf %22, %21 : vector<2x1xf32>
    %cst_14 = arith.constant 1.000000e+00 : f32
    %24 = vector.broadcast %cst_14 : f32 to vector<2x1xf32>
    %25 = arith.divf %24, %23 : vector<2x1xf32>
    %c0_15 = arith.constant 0 : index
    %c0_16 = arith.constant 0 : index
    %26 = vector.load %arg6[%c0_15, %c0_16] : memref<2x1xf32, #tpu.memory_space<vmem>>, vector<2x1xf32>
    tpu.vector_store %arg6[%c0_15, %c0_16], %25 {strides = array<i32>} : memref<2x1xf32, #tpu.memory_space<vmem>>, vector<2x1xf32>,
    return
  }
  func.func @transform_0(%arg0: i32) -> (i32, i32) {
    %c0_i32 = arith.constant 0 : i32
    %c0_i32_0 = arith.constant 0 : i32
    return %arg0, %c0_i32 : i32, i32
  }
  func.func @transform_1(%arg0: i32) -> (i32, i32) {
    %c0_i32 = arith.constant 0 : i32
    %c0_i32_0 = arith.constant 0 : i32
    %c0_i32_1 = arith.constant 0 : i32
    return %c0_i32, %c0_i32_0 : i32, i32
  }
  func.func @transform_2(%arg0: i32) -> (i32, i32) {
    %c0_i32 = arith.constant 0 : i32
    %c0_i32_0 = arith.constant 0 : i32
    %c0_i32_1 = arith.constant 0 : i32
    return %c0_i32, %c0_i32_0 : i32, i32
  }
  func.func @transform_3(%arg0: i32) -> (i32, i32) {
    %c0_i32 = arith.constant 0 : i32
    %c0_i32_0 = arith.constant 0 : i32
    %c0_i32_1 = arith.constant 0 : i32
    return %c0_i32, %c0_i32_0 : i32, i32
  }
  func.func @transform_4(%arg0: i32) -> (i32, i32) {
    %c0_i32 = arith.constant 0 : i32
    %c0_i32_0 = arith.constant 0 : i32
    %c0_i32_1 = arith.constant 0 : i32
    return %c0_i32, %c0_i32_0 : i32, i32
  }
  func.func @transform_5(%arg0: i32) -> (i32, i32) {
    %c0_i32 = arith.constant 0 : i32
    %c0_i32_0 = arith.constant 0 : i32
    return %arg0, %c0_i32 : i32, i32
  }
}

</mosaic_0001>

<bundles_post_ra>
// kernel: discriminator_forward.4
= control target key start
LH: loop header
LB: loop body
LE: loop exit
PB: predicated region body
PF: predicated region fallthrough
CT: control target
= control target key end

     0   :  { %s3110_s12 = smov 0   ;;  %s3112_s13 = smov 0   ;;  %s3666_s0 = inlined_call_operand.vmem [shape: bf16[624,64], index: 0, kind: input, shape index: {}]   ;;  %s3667_s1 = inlined_call_operand.vmem [shape: bf16[4,64,128], index: 1, kind: input, shape index: {}]   ;;  %s3668_s2 = inlined_call_operand.vmem [shape: f32[1,128], index: 2, kind: input, shape index: {}]   ;;  %s3669_s3 = inlined_call_operand.vmem [shape: bf16[544,128], index: 3, kind: output, shape index: {}]  }
   0x1   :  { %s3114_s14 = smov 0  }
   0x2 LB: > { %s22_s15 = sadd.s32 1, %s3082_s13  ;;  %p2277_p0 = scmp.ge.s32.totalorder %s3086_s14, 1  ;;  %s3086_s14 = sphi %s3114_s14, %s13_s14   ;;  %s3082_s13 = sphi %s3112_s13, %s3671_s13   ;;  %s3078_s12 = sphi %s3110_s12, %s3670_s12  }
   0x3   : > { %p23_p1 = scmp.ge.s32.totalorder %s22_s15, 2  ;;  %p169_p2 = scmp.lt.s32.totalorder %s3086_s14, 3 }
   0x5   : > { %s3673_s15 = smov (%p23_p1, %s22_s15), 0  ;;  %p170_p3 = pnand %p2277_p0, %p169_p2 }
   0x6   : > { %s203_s22 = smul.u32 (!%p170_p3), 39, %s3078_s12 }
   0x7   : > { %173 = sbr.rel (%p170_p3) target bundleno = 502 (0x1f6), region = 32 }
   0x8   : > { %p204_p4 = scmp.lt.s32.totalorder (!%p170_p3), %s203_s22, 77  ;;  %s216_s30 = smul.u32 (!%p170_p3), 34, %s3078_s12 }
   0xa   : > { %p217_p5 = scmp.lt.s32.totalorder (!%p170_p3), %s216_s30, 67 }
   0xc   : > { %v3011_v0 = vld [vmem:[%s3667_s1 + $0x38] sm:$0xff]   ;;  %v3088_v1 = vmov 0.0   ;;  %v3013_v3 = vld [vmem:[%s3667_s1 + $0x30] sm:$0xff]   ;;  %vm3089_vm0 = vmmov 0   ;;  %v3015_v5 = vld [vmem:[%s3667_s1 + $0x28] sm:$0xff]   ;;  %s3675_s22 = smov (!%p204_p4, %s203_s22), 77 }
   0xd   : > { %2681 = vmatprep.subr.bf16.mxu0 %v3088_v1  ;;  %2757 = vmatprep.subr.bf16.mxu1 %v3088_v1  ;;  %v3012_v2 = vld [vmem:[%s3667_s1 + $0x18] sm:$0xff]   ;;  %v3014_v4 = vld [vmem:[%s3667_s1 + $0x10] sm:$0xff]   ;;  %v3016_v6 = vld [vmem:[%s3667_s1 + $0x8] sm:$0xff]   ;;  %s2278_s4 = sshll.u32 %s3675_s22, 2  ;;  %vm532_vm1 = vcmask 523264   ;;  %vm1543_vm3 = vcmask 1046528  }
   0xe   : > { %2682 = vmatpush3.bf16.msra.mxu0 %v3011_v0  ;;  %2689 = vmatprep.mubr.msk.bf16.mxu0 %vm3089_vm0, %v3088_v1  ;;  %v3017_v7 = vld [vmem:[%s3667_s1 + $0x20] sm:$0xff]   ;;  %s3168_s9 = scalar_lea.vmem %s3666_s0, %s2278_s4  ;;  %v3022_v17 = vld [vmem:[%s3667_s1 + $0x78] sm:$0xff]   ;;  %vm367_vm2 = vsmask.f32 7424  ;;  %v3028_v23 = vld [vmem:[%s3667_s1 + $0x70] sm:$0xff]   ;;  %s3677_s30 = smov (!%p217_p5, %s216_s30), 67 }
   0xf   : > { %2758 = vmatpush3.bf16.msra.mxu1 %v3012_v2  ;;  %2683 = vmatprep.subr.bf16.mxu0 %v3088_v1  ;;  %v3018_v8 = vld [vmem:[%s3667_s1] sm:$0xff]   ;;  %v3020_v10 = vld [vmem:[%s3168_s9 + $0x8] sm:$0xff]   ;;  %v3023_v14 = vld [vmem:[%s3168_s9 + $0x10] sm:$0xff]   ;;  %s2279_s5 = sshll.u32 %s3677_s30, 2 }
  0x10   : > { %2759 = vmatprep.subr.bf16.mxu1 %v3088_v1  ;;  %2765 = vmatprep.mubr.msk.bf16.mxu1 %vm3089_vm0, %v3088_v1  ;;  %v3019_v9 = vld [vmem:[%s3168_s9] sm:$0xff]   ;;  %v376_v13 = vshll.u32 %v3020_v10, 16  ;;  %v3021_v18 = vld [vmem:[%s3667_s1 + $0x58] sm:$0xff]   ;;  %v380_v20 = vshrl.u32 %v3020_v10, 16  ;;  %v384_v21 = vshll.u32 %v3023_v14, 16  ;;  %v3027_v27 = vld [vmem:[%s3667_s1 + $0x50] sm:$0xff]   ;;  %s3575_s8 = scalar_lea.vmem %s3669_s3, %s2279_s5 }
  0x11   : > { %v369_v11 = vshrl.u32 %v3019_v9, 16  ;;  %v371_v12 = vshll.u32 %v3019_v9, 16  ;;  %v3024_v24 = vld [vmem:[%s3168_s9 + $0x18] sm:$0xff]   ;;  %v388_v29 = vshrl.u32 %v3023_v14, 16  ;;  %v3033_v31 = vld [vmem:[%s3667_s1 + $0x48] sm:$0xff]   ;;  %v3025_v33 = vld [vmem:[%s3168_s9 + $0x20] sm:$0xff]  }
  0x12   : > { %2684 = vmatpush3.bf16.msra.mxu0 %v3013_v3  ;;  %v378_v16 = vrot.slane %v376_v13, 1  ;;  %v386_v26 = vrot.slane %v384_v21, 1  ;;  %v392_v30 = vshll.u32 %v3024_v24, 16  ;;  %v3034_v32 = vld [vmem:[%s3667_s1 + $0x68] sm:$0xff]   ;;  %v3039_v36 = vld [vmem:[%s3667_s1 + $0x40] sm:$0xff]   ;;  %v396_v37 = vshrl.u32 %v3024_v24, 16 }
  0x13   : > { %2760 = vmatpush3.bf16.msra.mxu1 %v3014_v4  ;;  %2685 = vmatprep.subr.bf16.mxu0 %v3088_v1  ;;  %v373_v15 = vrot.slane %v371_v12, 1  ;;  %v400_v38 = vshll.u32 %v3025_v33, 16  ;;  %v3041_v40 = vld [vmem:[%s3667_s1 + $0x60] sm:$0xff]   ;;  %v3026_v43 = vld [vmem:[%s3168_s9 + $0x28] sm:$0xff]   ;;  %v404_v45 = vshrl.u32 %v3025_v33, 16  ;;  %v3029_v47 = vld [vmem:[%s3168_s9 + $0x30] sm:$0xff]  }
  0x14   : > { %2761 = vmatprep.subr.bf16.mxu1 %v3088_v1  ;;  %v382_v25 = vor.u32 %v380_v20, %v378_v16  ;;  %v390_v34 = vor.u32 %v388_v29, %v386_v26  ;;  %v394_v35 = vrot.slane %v392_v30, 1  ;;  %v408_v46 = vshll.u32 %v3026_v43, 16  ;;  %v3030_v55 = vld [vmem:[%s3168_s9 + $0x38] sm:$0xff]   ;;  %v3031_v61 = vld [vmem:[%s3168_s9 + $0x40] sm:$0xff]   ;;  %v3032_v4 = vld [vmem:[%s3168_s9 + $0x48] sm:$0xff]  }
  0x15   : > { %v374_v19 = vor.u32 %v373_v15, %v369_v11  ;;  %v402_v42 = vrot.slane %v400_v38, 1  ;;  %v412_v50 = vshrl.u32 %v3026_v43, 16  ;;  %v416_v51 = vshll.u32 %v3029_v47, 16 }
  0x16   : > { %2686 = vmatpush3.bf16.msra.mxu0 %v3015_v5  ;;  %v387_v28 = vsel %vm367_vm2, %v382_v25, %v386_v26  ;;  %v395_v39 = vsel %vm367_vm2, %v390_v34, %v394_v35  ;;  %v398_v41 = vor.u32 %v396_v37, %v394_v35  ;;  %v410_v49 = vrot.slane %v408_v46, 1  ;;  %v3040_v34 = vld [vmem:[%s3168_s9 + $0x70] sm:$0xff]   ;;  %v3043_v46 = vld [vmem:[%s3168_s9 + $0x80] sm:$0xff]  }
  0x17   : > { %2762 = vmatpush3.bf16.msra.mxu1 %v3016_v6  ;;  %2687 = vmatprep.subr.bf16.mxu0 %v3088_v1  ;;  %v379_v22 = vsel %vm367_vm2, %v374_v19, %v378_v16  ;;  %v406_v48 = vor.u32 %v404_v45, %v402_v42  ;;  %v418_v54 = vrot.slane %v416_v51, 1  ;;  %v420_v57 = vshrl.u32 %v3029_v47, 16  ;;  %v3036_v16 = vld [vmem:[%s3168_s9 + $0x58] sm:$0xff]  }
  0x18   : > { %2763 = vmatprep.subr.bf16.mxu1 %v3088_v1  ;;  %v403_v44 = vsel %vm367_vm2, %v398_v41, %v402_v42  ;;  %v414_v53 = vor.u32 %v412_v50, %v410_v49  ;;  %v424_v58 = vshll.u32 %v3030_v55, 16  ;;  %v428_v63 = vshrl.u32 %v3030_v55, 16 }
  0x19   : > { %v411_v52 = vsel %vm367_vm2, %v406_v48, %v410_v49  ;;  %v422_v59 = vor.u32 %v420_v57, %v418_v54  ;;  %v432_v0 = vshll.u32 %v3031_v61, 16  ;;  %v436_v6 = vshrl.u32 %v3031_v61, 16 }
  0x1a   : > { %2688 = vmatpush3.bf16.msra.mxu0 %v3017_v7  ;;  %v419_v56 = vsel %vm367_vm2, %v414_v53, %v418_v54  ;;  %v426_v60 = vrot.slane %v424_v58, 1  ;;  %v440_v7 = vshll.u32 %v3032_v4, 16  ;;  %v444_v12 = vshrl.u32 %v3032_v4, 16  ;;  %v980_v53 = vld [vmem:[%s3168_s9 + $0x8] sm:$0xf] }
  0x1b   : > { %2764 = vmatpush3.bf16.msra.mxu1 %v3018_v8  ;;  %2833 = vmatprep.subr.bf16.mxu0 %v3088_v1  ;;  %v434_v3 = vrot.slane %v432_v0, 1  ;;  %v456_v19 = vshll.u32 %v3036_v16, 16  ;;  %v480_v37 = vshll.u32 %v3040_v34, 16  ;;  %v484_v42 = vshrl.u32 %v3040_v34, 16  ;;  %v981_v54 = vld [vmem:[%s3168_s9 + $0xc] sm:$0xf] }
  0x1c   : > { %2909 = vmatprep.subr.bf16.mxu1 %v3088_v1  ;;  %v427_v62 = vsel %vm367_vm2, %v422_v59, %v426_v60  ;;  %v430_v2 = vor.u32 %v428_v63, %v426_v60  ;;  %v496_v49 = vshll.u32 %v3043_v46, 16  ;;  %v2356_v58 = vcombine.low %v980_v53, %v981_v54  ;;  %v1530_v59 = vld [vmem:[%s3168_s9 + $0x8] sm:$0xe] }
  0x1d   : > { %2690 = vmatmul.mubr.msk.bf16.vlgmr.msra.gmra.mxu0 %vm532_vm1, %v379_v22  ;;  %v438_v8 = vor.u32 %v436_v6, %v434_v3  ;;  %v458_v21 = vrot.slane %v456_v19, 1  ;;  %v3037_v22 = vld [vmem:[%s3168_s9 + $0x60] sm:$0xff]   ;;  %v2403_v0 = vcombine.low %v1530_v59, %v981_v54 }
  0x1e   : > { %2766 = vmatmul.mubr.msk.bf16.vlgmr.msra.gmra.mxu1 %vm532_vm1, %v3019_v9  ;;  %2834 = vmatpush3.bf16.msra.mxu0 %v3021_v18  ;;  %v435_v5 = vsel %vm367_vm2, %v430_v2, %v434_v3  ;;  %v442_v9 = vrot.slane %v440_v7, 1  ;;  %v464_v25 = vshll.u32 %v3037_v22, 16  ;;  %v468_v30 = vshrl.u32 %v3037_v22, 16 }
  0x1f   : > { %2910 = vmatpush3.bf16.msra.mxu1 %v3022_v17  ;;  %2769 = vmatprep.mubr.msk.bf16.mxu1 %vm3089_vm0, %v3088_v1  ;;  %v498_v51 = vrot.slane %v496_v49, 1  ;;  %v1115_v63 = vshll.u32 %v2356_v58, 16  ;;  %v1113_v3 = vshrl.u32 %v2356_v58, 16  ;;  %v1544_v6 = vrot.slane %v2403_v0, 1  ;;  %v3054_v58 = vld [vmem:[%s3168_s9 + $0x48] sm:$0xff]  }
  0x20   : > { %2911 = vmatprep.subr.bf16.mxu1 %v3088_v1  ;;  %2693 = vmatprep.mubr.msk.bf16.mxu0 %vm3089_vm0, %v3088_v1  ;;  %v443_v11 = vsel %vm367_vm2, %v438_v8, %v442_v9 }
  0x21   : > { %2835 = vmatprep.subr.bf16.mxu0 %v3088_v1 }
  0x22   : > { %2836 = vmatpush3.bf16.msra.mxu0 %v3027_v27  ;;  %v466_v27 = vrot.slane %v464_v25, 1 }
  0x23   : > { %2912 = vmatpush3.bf16.msra.mxu1 %v3028_v23  ;;  %2837 = vmatprep.subr.bf16.mxu0 %v3088_v1 }
  0x24   : > { %2913 = vmatprep.subr.bf16.mxu1 %v3088_v1 }
  0x25   : > { %2694 = vmatmul.mubr.msk.bf16.gmra.mxu0 %vm532_vm1, %v387_v28  ;;  %v3038_v28 = vld [vmem:[%s3168_s9 + $0x68] sm:$0xff]  }
  0x26   : > { %2770 = vmatmul.mubr.msk.bf16.gmra.mxu1 %vm532_vm1, %v3020_v10  ;;  %2697 = vmatprep.mubr.msk.bf16.mxu0 %vm3089_vm0, %v3088_v1  ;;  %v3035_v10 = vld [vmem:[%s3168_s9 + $0x50] sm:$0xff]  }
  0x27   : > { %2773 = vmatprep.mubr.msk.bf16.mxu1 %vm3089_vm0, %v3088_v1  ;;  %2838 = vmatpush3.bf16.msra.mxu0 %v3033_v31  ;;  %v448_v13 = vshll.u32 %v3035_v10, 16  ;;  %v452_v18 = vshrl.u32 %v3035_v10, 16  ;;  %v472_v31 = vshll.u32 %v3038_v28, 16 }
  0x28   : > { %2914 = vmatpush3.bf16.msra.mxu1 %v3034_v32  ;;  %2839 = vmatprep.subr.bf16.mxu0 %v3088_v1  ;;  %v470_v32 = vor.u32 %v468_v30, %v466_v27 }
  0x29   : > { %2915 = vmatprep.subr.bf16.mxu1 %v3088_v1  ;;  %v450_v15 = vrot.slane %v448_v13, 1 }
  0x2b   : > { %2840 = vmatpush3.bf16.msra.mxu0 %v3039_v36  ;;  %v454_v20 = vor.u32 %v452_v18, %v450_v15  ;;  %v476_v36 = vshrl.u32 %v3038_v28, 16  ;;  %v3049_v18 = vld [vmem:[%s3168_s9 + $0x20] sm:$0xff]  }
  0x2c   : > { %2916 = vmatpush3.bf16.msra.mxu1 %v3041_v40  ;;  %v3042_v40 = vld [vmem:[%s3168_s9 + $0x78] sm:$0xff]  }
  0x2d   : > { %2698 = vmatmul.mubr.msk.bf16.gmra.mxu0 %vm532_vm1, %v395_v39  ;;  %v459_v23 = vsel %vm367_vm2, %v454_v20, %v458_v21  ;;  %v482_v39 = vrot.slane %v480_v37, 1  ;;  %v492_v48 = vshrl.u32 %v3042_v40, 16 }
  0x2e   : > { %2774 = vmatmul.mubr.msk.bf16.gmra.mxu1 %vm532_vm1, %v3023_v14  ;;  %2701 = vmatprep.mubr.msk.bf16.mxu0 %vm3089_vm0, %v3088_v1  ;;  %v446_v14 = vor.u32 %v444_v12, %v442_v9 }
  0x2f   : > { %2777 = vmatprep.mubr.msk.bf16.mxu1 %vm3089_vm0, %v3088_v1 }
  0x30   : > { %v451_v17 = vsel %vm367_vm2, %v446_v14, %v450_v15 }
  0x35   : > { %2702 = vmatmul.mubr.msk.bf16.gmra.mxu0 %vm532_vm1, %v403_v44  ;;  %v486_v44 = vor.u32 %v484_v42, %v482_v39  ;;  %v3052_v42 = vld [vmem:[%s3168_s9 + $0x38] sm:$0xff]  }
  0x36   : > { %2778 = vmatmul.mubr.msk.bf16.gmra.mxu1 %vm532_vm1, %v3024_v24  ;;  %2705 = vmatprep.mubr.msk.bf16.mxu0 %vm3089_vm0, %v3088_v1  ;;  %v460_v24 = vshrl.u32 %v3036_v16, 16  ;;  %v1164_v53 = vshrl.u32 %v3052_v42, 16 }
  0x37   : > { %2781 = vmatprep.mubr.msk.bf16.mxu1 %vm3089_vm0, %v3088_v1 }
  0x38   : > { %v462_v26 = vor.u32 %v460_v24, %v458_v21 }
  0x3a   : > { %v467_v29 = vsel %vm367_vm2, %v462_v26, %v466_v27  ;;  %v3050_v26 = vld [vmem:[%s3168_s9 + $0x28] sm:$0xff]  }
  0x3b   : > { %v1144_v30 = vshll.u32 %v3050_v26, 16  ;;  %v1148_v37 = vshrl.u32 %v3050_v26, 16 }
  0x3d   : > { %2706 = vmatmul.mubr.msk.bf16.gmra.mxu0 %vm532_vm1, %v411_v52  ;;  %v3044_v52 = vld [vmem:[%s3168_s9 + $0x88] ss:$0 sps:$4 sm:$0x11]  }
  0x3e   : > { %2782 = vmatmul.mubr.msk.bf16.gmra.mxu1 %vm532_vm1, %v3025_v33  ;;  %2709 = vmatprep.mubr.msk.bf16.mxu0 %vm3089_vm0, %v3088_v1  ;;  %v474_v33 = vrot.slane %v472_v31, 1  ;;  %v504_v57 = vshll.u32 %v3044_v52, 16  ;;  %v1551_v31 = vrot.slane %v3050_v26, 1 }
  0x3f   : > { %2785 = vmatprep.mubr.msk.bf16.mxu1 %vm3089_vm0, %v3088_v1 }
  0x40   : > { %v475_v35 = vsel %vm367_vm2, %v470_v32, %v474_v33  ;;  %v478_v38 = vor.u32 %v476_v36, %v474_v33  ;;  %v1146_v33 = vrot.slane %v1144_v30, 1 }
  0x42   : > { %v483_v41 = vsel %vm367_vm2, %v478_v38, %v482_v39 }
  0x45   : > { %2710 = vmatmul.mubr.msk.bf16.gmra.mxu0 %vm532_vm1, %v419_v56  ;;  %v500_v56 = vshrl.u32 %v3043_v46, 16 }
  0x46   : > { %2786 = vmatmul.mubr.msk.bf16.gmra.mxu1 %vm532_vm1, %v3026_v43  ;;  %2713 = vmatprep.mubr.msk.bf16.mxu0 %vm3089_vm0, %v3088_v1  ;;  %v488_v43 = vshll.u32 %v3042_v40, 16 }
  0x47   : > { %2789 = vmatprep.mubr.msk.bf16.mxu1 %vm3089_vm0, %v3088_v1  ;;  %v502_v60 = vor.u32 %v500_v56, %v498_v51 }
  0x48   : > { %v490_v45 = vrot.slane %v488_v43, 1 }
  0x4a   : > { %v494_v50 = vor.u32 %v492_v48, %v490_v45 }
  0x4d   : > { %2714 = vmatmul.mubr.msk.bf16.gmra.mxu0 %vm532_vm1, %v427_v62  ;;  %v3046_v62 = vld [vmem:[%s3168_s9 + $0x10] sm:$0xff]  }
  0x4e   : > { %2790 = vmatmul.mubr.msk.bf16.gmra.mxu1 %vm532_vm1, %v3029_v47  ;;  %2717 = vmatprep.mubr.msk.bf16.mxu0 %vm3089_vm0, %v3088_v1  ;;  %v491_v47 = vsel %vm367_vm2, %v486_v44, %v490_v45  ;;  %v1545_v7 = vrot.slane %v3046_v62, 1  ;;  %v1124_v13 = vshrl.u32 %v3046_v62, 16 }
  0x4f   : > { %2793 = vmatprep.mubr.msk.bf16.mxu1 %vm3089_vm0, %v3088_v1 }
  0x55   : > { %2718 = vmatmul.mubr.msk.bf16.gmra.mxu0 %vm532_vm1, %v435_v5  ;;  %v1120_v5 = vshll.u32 %v3046_v62, 16  ;;  %v1176_v62 = vshll.u32 %v3054_v58, 16 }
  0x56   : > { %2794 = vmatmul.mubr.msk.bf16.gmra.mxu1 %vm532_vm1, %v3030_v55  ;;  %2721 = vmatprep.mubr.msk.bf16.mxu0 %vm3089_vm0, %v3088_v1  ;;  %v499_v55 = vsel %vm367_vm2, %v494_v50, %v498_v51  ;;  %v3053_v50 = vld [vmem:[%s3168_s9 + $0x40] sm:$0xff]  }
  0x57   : > { %2797 = vmatprep.mubr.msk.bf16.mxu1 %vm3089_vm0, %v3088_v1  ;;  %v1122_v9 = vrot.slane %v1120_v5, 1  ;;  %v1168_v54 = vshll.u32 %v3053_v50, 16 }
  0x5d   : > { %2722 = vmatmul.mubr.msk.bf16.gmra.mxu0 %vm532_vm1, %v443_v11  ;;  %v1546_v11 = vsel %vm1543_vm3, %v1544_v6, %v1545_v7  ;;  %v1180_v6 = vshrl.u32 %v3054_v58, 16 }
  0x5e   : > { %2798 = vmatmul.mubr.msk.bf16.gmra.mxu1 %vm532_vm1, %v3031_v61  ;;  %2725 = vmatprep.mubr.msk.bf16.mxu0 %vm3089_vm0, %v3088_v1  ;;  %v506_v61 = vrot.slane %v504_v57, 1  ;;  %v1170_v57 = vrot.slane %v1168_v54, 1 }
  0x5f   : > { %2801 = vmatprep.mubr.msk.bf16.mxu1 %vm3089_vm0, %v3088_v1 }
  0x60   : > { %v507_v2 = vsel %vm367_vm2, %v502_v60, %v506_v61  ;;  %v1172_v61 = vshrl.u32 %v3053_v50, 16 }
  0x62   : > { %v1174_v0 = vor.u32 %v1172_v61, %v1170_v57 }
  0x65   : > { %2726 = vmatmul.mubr.msk.bf16.gmra.mxu0 %vm532_vm1, %v451_v17 }
  0x66   : > { %2802 = vmatmul.mubr.msk.bf16.gmra.mxu1 %vm532_vm1, %v3032_v4  ;;  %2729 = vmatprep.mubr.msk.bf16.mxu0 %vm3089_vm0, %v3088_v1  ;;  %v1117_v4 = vrot.slane %v1115_v63, 1  ;;  %v1559_v63 = vrot.slane %v3054_v58, 1 }
  0x67   : > { %2805 = vmatprep.mubr.msk.bf16.mxu1 %vm3089_vm0, %v3088_v1 }
  0x68   : > { %v1118_v8 = vor.u32 %v1117_v4, %v1113_v3  ;;  %v3055_v3 = vld [vmem:[%s3168_s9 + $0x50] sm:$0xff]  }
  0x6a   : > { %v1123_v12 = vsel %vm367_vm2, %v1118_v8, %v1122_v9 }
  0x6d   : > { %2730 = vmatmul.mubr.msk.bf16.gmra.mxu0 %vm532_vm1, %v459_v23  ;;  %v1549_v23 = vrot.slane %v3049_v18, 1 }
  0x6e   : > { %2806 = vmatmul.mubr.msk.bf16.gmra.mxu1 %vm532_vm1, %v3035_v10  ;;  %2733 = vmatprep.mubr.msk.bf16.mxu0 %vm3089_vm0, %v3088_v1  ;;  %v3048_v10 = vld [vmem:[%s3168_s9 + $0x18] sm:$0xff]  }
  0x6f   : > { %2809 = vmatprep.mubr.msk.bf16.mxu1 %vm3089_vm0, %v3088_v1  ;;  %v1128_v14 = vshll.u32 %v3048_v10, 16  ;;  %v1547_v15 = vrot.slane %v3048_v10, 1  ;;  %v1132_v21 = vshrl.u32 %v3048_v10, 16 }
  0x71   : > { %v1130_v17 = vrot.slane %v1128_v14, 1  ;;  %v1548_v19 = vsel %vm1543_vm3, %v1545_v7, %v1547_v15  ;;  %v1550_v27 = vsel %vm1543_vm3, %v1547_v15, %v1549_v23  ;;  %v1184_v7 = vshll.u32 %v3055_v3, 16  ;;  %v3056_v15 = vld [vmem:[%s3168_s9 + $0x58] sm:$0xff]  }
  0x73   : > { %v1134_v24 = vor.u32 %v1132_v21, %v1130_v17  ;;  %v1186_v14 = vrot.slane %v1184_v7, 1 }
  0x75   : > { %2734 = vmatmul.mubr.msk.bf16.gmra.mxu0 %vm532_vm1, %v467_v29  ;;  %v1140_v29 = vshrl.u32 %v3049_v18, 16 }
  0x76   : > { %2810 = vmatmul.mubr.msk.bf16.gmra.mxu1 %vm532_vm1, %v3036_v16  ;;  %2737 = vmatprep.mubr.msk.bf16.mxu0 %vm3089_vm0, %v3088_v1  ;;  %v1126_v16 = vor.u32 %v1124_v13, %v1122_v9  ;;  %v1561_v9 = vrot.slane %v3055_v3, 1 }
  0x77   : > { %2813 = vmatprep.mubr.msk.bf16.mxu1 %vm3089_vm0, %v3088_v1 }
  0x78   : > { %v1131_v20 = vsel %vm367_vm2, %v1126_v16, %v1130_v17 }
  0x7d   : > { %2738 = vmatmul.mubr.msk.bf16.gmra.mxu0 %vm532_vm1, %v475_v35  ;;  %v1552_v35 = vsel %vm1543_vm3, %v1549_v23, %v1551_v31  ;;  %v1188_v23 = vshrl.u32 %v3055_v3, 16 }
  0x7e   : > { %2814 = vmatmul.mubr.msk.bf16.gmra.mxu1 %vm532_vm1, %v3037_v22  ;;  %2741 = vmatprep.mubr.msk.bf16.mxu0 %vm3089_vm0, %v3088_v1  ;;  %v1136_v22 = vshll.u32 %v3049_v18, 16  ;;  %v1562_v18 = vsel %vm1543_vm3, %v1559_v63, %v1561_v9 }
  0x7f   : > { %2817 = vmatprep.mubr.msk.bf16.mxu1 %vm3089_vm0, %v3088_v1 }
  0x80   : > { %v1138_v25 = vrot.slane %v1136_v22, 1 }
  0x82   : > { %v1142_v32 = vor.u32 %v1140_v29, %v1138_v25 }
  0x84   : > { %v1147_v36 = vsel %vm367_vm2, %v1142_v32, %v1146_v33 }
  0x85   : > { %2742 = vmatmul.mubr.msk.bf16.gmra.mxu0 %vm532_vm1, %v483_v41 }
  0x86   : > { %2818 = vmatmul.mubr.msk.bf16.gmra.mxu1 %vm532_vm1, %v3038_v28  ;;  %2745 = vmatprep.mubr.msk.bf16.mxu0 %vm3089_vm0, %v3088_v1  ;;  %v1139_v28 = vsel %vm367_vm2, %v1134_v24, %v1138_v25  ;;  %v1192_v24 = vshll.u32 %v3056_v15, 16 }
  0x87   : > { %2821 = vmatprep.mubr.msk.bf16.mxu1 %vm3089_vm0, %v3088_v1 }
  0x88   : > { %v1194_v32 = vrot.slane %v1192_v24, 1 }
  0x8d   : > { %2746 = vmatmul.mubr.msk.bf16.gmra.mxu0 %vm532_vm1, %v491_v47  ;;  %v1555_v47 = vrot.slane %v3052_v42, 1 }
  0x8e   : > { %2822 = vmatmul.mubr.msk.bf16.gmra.mxu1 %vm532_vm1, %v3040_v34  ;;  %2749 = vmatprep.mubr.msk.bf16.mxu0 %vm3089_vm0, %v3088_v1  ;;  %v3051_v34 = vld [vmem:[%s3168_s9 + $0x30] sm:$0xff]  }
  0x8f   : > { %2825 = vmatprep.mubr.msk.bf16.mxu1 %vm3089_vm0, %v3088_v1  ;;  %v1152_v38 = vshll.u32 %v3051_v34, 16  ;;  %v1553_v39 = vrot.slane %v3051_v34, 1  ;;  %v1156_v45 = vshrl.u32 %v3051_v34, 16 }
  0x91   : > { %v1154_v41 = vrot.slane %v1152_v38, 1  ;;  %v1554_v43 = vsel %vm1543_vm3, %v1551_v31, %v1553_v39  ;;  %v1556_v51 = vsel %vm1543_vm3, %v1553_v39, %v1555_v47  ;;  %v1190_v31 = vor.u32 %v1188_v23, %v1186_v14 }
  0x93   : > { %v1158_v48 = vor.u32 %v1156_v45, %v1154_v41 }
  0x95   : > { %2750 = vmatmul.mubr.msk.bf16.gmra.mxu0 %vm532_vm1, %v499_v55  ;;  %v1557_v55 = vrot.slane %v3053_v50, 1 }
  0x96   : > { %2826 = vmatmul.mubr.msk.bf16.gmra.mxu1 %vm532_vm1, %v3042_v40  ;;  %2753 = vmatprep.mubr.msk.bf16.mxu0 %vm3089_vm0, %v3088_v1  ;;  %v1150_v40 = vor.u32 %v1148_v37, %v1146_v33  ;;  %v3057_v33 = vld [vmem:[%s3168_s9 + $0x60] sm:$0xff]  }
  0x97   : > { %2829 = vmatprep.mubr.msk.bf16.mxu1 %vm3089_vm0, %v3088_v1  ;;  %v1558_v59 = vsel %vm1543_vm3, %v1555_v47, %v1557_v55  ;;  %v1560_v4 = vsel %vm1543_vm3, %v1557_v55, %v1559_v63  ;;  %v1565_v45 = vrot.slane %v3057_v33, 1 }
  0x98   : > { %v1155_v44 = vsel %vm367_vm2, %v1150_v40, %v1154_v41  ;;  %v1195_v40 = vsel %vm367_vm2, %v1190_v31, %v1194_v32  ;;  %v1196_v41 = vshrl.u32 %v3056_v15, 16 }
  0x9d   : > { %2754 = vmatmul.mubr.msk.bf16.gmra.mxu0 %vm532_vm1, %v507_v2  ;;  %v1178_v2 = vrot.slane %v1176_v62, 1 }
  0x9e   : > { %2830 = vmatmul.mubr.msk.bf16.gmra.mxu1 %vm532_vm1, %v3043_v46  ;;  %2841 = vmatprep.mubr.msk.bf16.mxu0 %vm3089_vm0, %v3088_v1  ;;  %v1160_v46 = vshll.u32 %v3052_v42, 16  ;;  %v1200_v42 = vshll.u32 %v3057_v33, 16 }
  0x9f   : > { %2917 = vmatprep.mubr.msk.bf16.mxu1 %vm3089_vm0, %v3088_v1  ;;  %v1179_v5 = vsel %vm367_vm2, %v1174_v0, %v1178_v2  ;;  %v1182_v13 = vor.u32 %v1180_v6, %v1178_v2  ;;  %v3059_v6 = vld [vmem:[%s3168_s9 + $0x70] sm:$0xff]  }
  0xa0   : > { %v1162_v49 = vrot.slane %v1160_v46, 1  ;;  %v1202_v50 = vrot.slane %v1200_v42, 1 }
  0xa1   : > { %v1187_v22 = vsel %vm367_vm2, %v1182_v13, %v1186_v14 }
  0xa2   : > { %v1163_v52 = vsel %vm367_vm2, %v1158_v48, %v1162_v49  ;;  %v1166_v56 = vor.u32 %v1164_v53, %v1162_v49  ;;  %v1198_v49 = vor.u32 %v1196_v41, %v1194_v32 }
  0xa4   : > { %v1171_v60 = vsel %vm367_vm2, %v1166_v56, %v1170_v57  ;;  %v1203_v58 = vsel %vm367_vm2, %v1198_v49, %v1202_v50 }
  0xa5   : > { %2842 = vmatmul.mubr.msk.bf16.vlgmr.msra.gmra.mxu0 %vm532_vm1, %v1123_v12 }
  0xa6   : > { %2918 = vmatmul.mubr.msk.bf16.vlgmr.msra.gmra.mxu1 %vm532_vm1, %v1546_v11  ;;  %2845 = vmatprep.mubr.msk.bf16.mxu0 %vm3089_vm0, %v3088_v1 }
  0xa7   : > { %2921 = vmatprep.mubr.msk.bf16.mxu1 %vm3089_vm0, %v3088_v1 }
  0xad   : > { %2846 = vmatmul.mubr.msk.bf16.gmra.mxu0 %vm532_vm1, %v1131_v20 }
  0xae   : > { %2922 = vmatmul.mubr.msk.bf16.gmra.mxu1 %vm532_vm1, %v1548_v19  ;;  %2849 = vmatprep.mubr.msk.bf16.mxu0 %vm3089_vm0, %v3088_v1 }
  0xaf   : > { %2925 = vmatprep.mubr.msk.bf16.mxu1 %vm3089_vm0, %v3088_v1 }
  0xb5   : > { %2850 = vmatmul.mubr.msk.bf16.gmra.mxu0 %vm532_vm1, %v1139_v28 }
  0xb6   : > { %2926 = vmatmul.mubr.msk.bf16.gmra.mxu1 %vm532_vm1, %v1550_v27  ;;  %2853 = vmatprep.mubr.msk.bf16.mxu0 %vm3089_vm0, %v3088_v1  ;;  %v1563_v27 = vrot.slane %v3056_v15, 1 }
  0xb7   : > { %2929 = vmatprep.mubr.msk.bf16.mxu1 %vm3089_vm0, %v3088_v1 }
  0xb8   : > { %v1566_v54 = vsel %vm1543_vm3, %v1563_v27, %v1565_v45 }
  0xbd   : > { %2854 = vmatmul.mubr.msk.bf16.gmra.mxu0 %vm532_vm1, %v1147_v36  ;;  %v1564_v36 = vsel %vm1543_vm3, %v1561_v9, %v1563_v27 }
  0xbe   : > { %2930 = vmatmul.mubr.msk.bf16.gmra.mxu1 %vm532_vm1, %v1552_v35  ;;  %2857 = vmatprep.mubr.msk.bf16.mxu0 %vm3089_vm0, %v3088_v1 }
  0xbf   : > { %2933 = vmatprep.mubr.msk.bf16.mxu1 %vm3089_vm0, %v3088_v1 }
  0xc5   : > { %2858 = vmatmul.mubr.msk.bf16.gmra.mxu0 %vm532_vm1, %v1155_v44 }
  0xc6   : > { %2934 = vmatmul.mubr.msk.bf16.gmra.mxu1 %vm532_vm1, %v1554_v43  ;;  %2861 = vmatprep.mubr.msk.bf16.mxu0 %vm3089_vm0, %v3088_v1 }
  0xc7   : > { %2937 = vmatprep.mubr.msk.bf16.mxu1 %vm3089_vm0, %v3088_v1 }
  0xcd   : > { %2862 = vmatmul.mubr.msk.bf16.gmra.mxu0 %vm532_vm1, %v1163_v52 }
  0xce   : > { %2938 = vmatmul.mubr.msk.bf16.gmra.mxu1 %vm532_vm1, %v1556_v51  ;;  %2865 = vmatprep.mubr.msk.bf16.mxu0 %vm3089_vm0, %v3088_v1  ;;  %v3058_v51 = vld [vmem:[%s3168_s9 + $0x68] sm:$0xff]  }
  0xcf   : > { %2941 = vmatprep.mubr.msk.bf16.mxu1 %vm3089_vm0, %v3088_v1  ;;  %v1567_v63 = vrot.slane %v3058_v51, 1  ;;  %v1212_v15 = vshrl.u32 %v3058_v51, 16 }
  0xd1   : > { %v1568_v9 = vsel %vm1543_vm3, %v1565_v45, %v1567_v63 }
  0xd5   : > { %2866 = vmatmul.mubr.msk.bf16.gmra.mxu0 %vm532_vm1, %v1171_v60  ;;  %v1208_v60 = vshll.u32 %v3058_v51, 16 }
  0xd6   : > { %2942 = vmatmul.mubr.msk.bf16.gmra.mxu1 %vm532_vm1, %v1558_v59  ;;  %2869 = vmatprep.mubr.msk.bf16.mxu0 %vm3089_vm0, %v3088_v1  ;;  %v1204_v59 = vshrl.u32 %v3057_v33, 16 }
  0xd7   : > { %2945 = vmatprep.mubr.msk.bf16.mxu1 %vm3089_vm0, %v3088_v1 }
  0xdd   : > { %v618_v10 = vpop.f32.mrf.mxu0  ;;  %2870 = vmatmul.mubr.msk.bf16.gmra.mxu0 %vm532_vm1, %v1179_v5  ;;  %v1210_v5 = vrot.slane %v1208_v60, 1 }
  0xde   : > { %v845_v8 = vpop.f32.mrf.mxu1  ;;  %2946 = vmatmul.mubr.msk.bf16.gmra.mxu1 %vm532_vm1, %v1560_v4  ;;  %2873 = vmatprep.mubr.msk.bf16.mxu0 %vm3089_vm0, %v3088_v1  ;;  %v1206_v4 = vor.u32 %v1204_v59, %v1202_v50 }
  0xdf   : > { %2949 = vmatprep.mubr.msk.bf16.mxu1 %vm3089_vm0, %v3088_v1  ;;  %v3415_v12 = vadd.f32 %v845_v8, %v618_v10  ;;  %v2691_v16 = vpop.f32.mrf.mxu0  ;;  %v1214_v24 = vor.u32 %v1212_v15, %v1210_v5 }
  0xe0   : > { %v2767_v11 = vpop.f32.mrf.mxu1  ;;  %v1211_v14 = vsel %vm367_vm2, %v1206_v4, %v1210_v5  ;;  %v1216_v16 = vshll.u32 %v3059_v6, 16  ;;  %v3062_v4 = vld [vmem:[%s3168_s9 + $0x88] sm:$0xff]  }
  0xe1   : > { %v621_v19 = vpop.f32.mrf.mxu0  ;;  %v1240_v15 = vshll.u32 %v3062_v4, 16 }
  0xe2   : > { %v848_v17 = vpop.f32.mrf.mxu1 }
  0xe3   : > { %v3421_v21 = vadd.f32 %v848_v17, %v621_v19  ;;  %v2692_v25 = vpop.f32.mrf.mxu0  ;;  %v1569_v19 = vrot.slane %v3059_v6, 1 }
  0xe4   : > { %v2768_v20 = vpop.f32.mrf.mxu1  ;;  %v1218_v25 = vrot.slane %v1216_v16, 1 }
  0xe5   : > { %v626_v28 = vpop.f32.mrf.mxu0  ;;  %2874 = vmatmul.mubr.msk.bf16.gmra.mxu0 %vm532_vm1, %v1187_v22 }
  0xe6   : > { %v853_v26 = vpop.f32.mrf.mxu1  ;;  %2950 = vmatmul.mubr.msk.bf16.gmra.mxu1 %vm532_vm1, %v1562_v18  ;;  %2877 = vmatprep.mubr.msk.bf16.mxu0 %vm3089_vm0, %v3088_v1 }
  0xe7   : > { %2953 = vmatprep.mubr.msk.bf16.mxu1 %vm3089_vm0, %v3088_v1  ;;  %v3428_v30 = vadd.f32 %v853_v26, %v626_v28  ;;  %v2695_v34 = vpop.f32.mrf.mxu0  ;;  %v3060_v26 = vld [vmem:[%s3168_s9 + $0x78] sm:$0xff]  }
  0xe8   : > { %v2771_v29 = vpop.f32.mrf.mxu1  ;;  %v1219_v34 = vsel %vm367_vm2, %v1214_v24, %v1218_v25 }
  0xe9   : > { %v629_v37 = vpop.f32.mrf.mxu0  ;;  %v1570_v29 = vsel %vm1543_vm3, %v1567_v63, %v1569_v19 }
  0xea   : > { %v856_v35 = vpop.f32.mrf.mxu1 }
  0xeb   : > { %v3434_v39 = vadd.f32 %v856_v35, %v629_v37  ;;  %v2696_v43 = vpop.f32.mrf.mxu0  ;;  %v1220_v35 = vshrl.u32 %v3059_v6, 16 }
  0xec   : > { %v2772_v38 = vpop.f32.mrf.mxu1 }
  0xed   : > { %v634_v46 = vpop.f32.mrf.mxu0  ;;  %2878 = vmatmul.mubr.msk.bf16.gmra.mxu0 %vm532_vm1, %v1195_v40  ;;  %v1571_v40 = vrot.slane %v3060_v26, 1 }
  0xee   : > { %v861_v44 = vpop.f32.mrf.mxu1  ;;  %2954 = vmatmul.mubr.msk.bf16.gmra.mxu1 %vm532_vm1, %v1564_v36  ;;  %2881 = vmatprep.mubr.msk.bf16.mxu0 %vm3089_vm0, %v3088_v1  ;;  %v1224_v36 = vshll.u32 %v3060_v26, 16 }
  0xef   : > { %2957 = vmatprep.mubr.msk.bf16.mxu1 %vm3089_vm0, %v3088_v1  ;;  %v3441_v48 = vadd.f32 %v861_v44, %v634_v46  ;;  %v2699_v52 = vpop.f32.mrf.mxu0  ;;  %v1222_v44 = vor.u32 %v1220_v35, %v1218_v25  ;;  %v3061_v46 = vld [vmem:[%s3168_s9 + $0x80] sm:$0xff]   ;;  %v1572_v50 = vsel %vm1543_vm3, %v1569_v19, %v1571_v40  ;;  %v1242_v25 = vrot.slane %v1240_v15, 1 }
  0xf0   : > { %v2775_v47 = vpop.f32.mrf.mxu1  ;;  %v1226_v45 = vrot.slane %v1224_v36, 1  ;;  %v1573_v60 = vrot.slane %v3061_v46, 1  ;;  %v1244_v36 = vshrl.u32 %v3062_v4, 16 }
  0xf1   : > { %v637_v55 = vpop.f32.mrf.mxu0 }
  0xf2   : > { %v864_v53 = vpop.f32.mrf.mxu1 }
  0xf3   : > { %v3447_v57 = vadd.f32 %v864_v53, %v637_v55  ;;  %v2700_v61 = vpop.f32.mrf.mxu0  ;;  %v1228_v55 = vshrl.u32 %v3060_v26, 16  ;;  %v3063_v26 = vld [vmem:[%s3168_s9 + $0x90] ss:$0 sps:$4 sm:$0x11]  }
  0xf4   : > { %v2776_v56 = vpop.f32.mrf.mxu1 }
  0xf5   : > { %v642_v0 = vpop.f32.mrf.mxu0  ;;  %2882 = vmatmul.mubr.msk.bf16.gmra.mxu0 %vm532_vm1, %v1203_v58  ;;  %v1232_v56 = vshll.u32 %v3061_v46, 16 }
  0xf6   : > { %v869_v62 = vpop.f32.mrf.mxu1  ;;  %2958 = vmatmul.mubr.msk.bf16.gmra.mxu1 %vm532_vm1, %v1566_v54  ;;  %2885 = vmatprep.mubr.msk.bf16.mxu0 %vm3089_vm0, %v3088_v1  ;;  %v1227_v54 = vsel %vm367_vm2, %v1222_v44, %v1226_v45 }
  0xf7   : > { %2961 = vmatprep.mubr.msk.bf16.mxu1 %vm3089_vm0, %v3088_v1  ;;  %v3454_v3 = vadd.f32 %v869_v62, %v642_v0  ;;  %v2703_v7 = vpop.f32.mrf.mxu0  ;;  %v1230_v0 = vor.u32 %v1228_v55, %v1226_v45 }
  0xf8   : > { %v2779_v2 = vpop.f32.mrf.mxu1  ;;  %v1574_v7 = vsel %vm1543_vm3, %v1571_v40, %v1573_v60 }
  0xf9   : > { %v645_v10 = vpop.f32.mrf.mxu0  ;;  %v1234_v2 = vrot.slane %v1232_v56, 1 }
  0xfa   : > { %v872_v8 = vpop.f32.mrf.mxu1 }
  0xfb   : > { %v3460_v13 = vadd.f32 %v872_v8, %v645_v10  ;;  %v2704_v17 = vpop.f32.mrf.mxu0 }
  0xfc   : > { %v2780_v11 = vpop.f32.mrf.mxu1 }
  0xfd   : > { %v650_v20 = vpop.f32.mrf.mxu0  ;;  %2886 = vmatmul.mubr.msk.bf16.gmra.mxu0 %vm532_vm1, %v1211_v14  ;;  %v1235_v11 = vsel %vm367_vm2, %v1230_v0, %v1234_v2  ;;  %v1236_v14 = vshrl.u32 %v3061_v46, 16  ;;  %v1246_v46 = vor.u32 %v1244_v36, %v1242_v25 }
  0xfe   : > { %v877_v18 = vpop.f32.mrf.mxu1  ;;  %2962 = vmatmul.mubr.msk.bf16.gmra.mxu1 %vm532_vm1, %v1568_v9  ;;  %2889 = vmatprep.mubr.msk.bf16.mxu0 %vm3089_vm0, %v3088_v1 }
  0xff   : > { %2965 = vmatprep.mubr.msk.bf16.mxu1 %vm3089_vm0, %v3088_v1  ;;  %v3467_v23 = vadd.f32 %v877_v18, %v650_v20  ;;  %v2707_v27 = vpop.f32.mrf.mxu0  ;;  %v1575_v18 = vrot.slane %v3062_v4, 1  ;;  %v1238_v24 = vor.u32 %v1236_v14, %v1234_v2 }
 0x100   : > { %v2783_v22 = vpop.f32.mrf.mxu1 }
 0x101   : > { %v653_v31 = vpop.f32.mrf.mxu0  ;;  %v1243_v35 = vsel %vm367_vm2, %v1238_v24, %v1242_v25 }
 0x102   : > { %v880_v28 = vpop.f32.mrf.mxu1 }
 0x103   : > { %v3473_v33 = vadd.f32 %v880_v28, %v653_v31  ;;  %v2708_v37 = vpop.f32.mrf.mxu0 }
 0x104   : > { %v2784_v32 = vpop.f32.mrf.mxu1  ;;  %v1248_v37 = vshll.u32 %v3063_v26, 16 }
 0x105   : > { %v658_v41 = vpop.f32.mrf.mxu0  ;;  %2890 = vmatmul.mubr.msk.bf16.gmra.mxu0 %vm532_vm1, %v1219_v34 }
 0x106   : > { %v885_v38 = vpop.f32.mrf.mxu1  ;;  %2966 = vmatmul.mubr.msk.bf16.gmra.mxu1 %vm532_vm1, %v1570_v29  ;;  %2893 = vmatprep.mubr.msk.bf16.mxu0 %vm3089_vm0, %v3088_v1  ;;  %v1576_v29 = vsel %vm1543_vm3, %v1573_v60, %v1575_v18 }
 0x107   : > { %2969 = vmatprep.mubr.msk.bf16.mxu1 %vm3089_vm0, %v3088_v1  ;;  %v3480_v43 = vadd.f32 %v885_v38, %v658_v41  ;;  %v2711_v47 = vpop.f32.mrf.mxu0  ;;  %v1577_v41 = vrot.slane %v3063_v26, 1 }
 0x108   : > { %v2787_v42 = vpop.f32.mrf.mxu1  ;;  %v1250_v47 = vrot.slane %v1248_v37, 1 }
 0x109   : > { %v661_v51 = vpop.f32.mrf.mxu0 }
 0x10a   : > { %v888_v49 = vpop.f32.mrf.mxu1  ;;  %v1251_v56 = vsel %vm367_vm2, %v1246_v46, %v1250_v47 }
 0x10b   : > { %v3486_v53 = vadd.f32 %v888_v49, %v661_v51  ;;  %v2712_v58 = vpop.f32.mrf.mxu0  ;;  %v1578_v51 = vsel %vm1543_vm3, %v1575_v18, %v1577_v41 }
 0x10c   : > { %v2788_v52 = vpop.f32.mrf.mxu1 }
 0x10d   : > { %v666_v61 = vpop.f32.mrf.mxu0  ;;  %2894 = vmatmul.mubr.msk.bf16.gmra.mxu0 %vm532_vm1, %v1227_v54 }
 0x10e   : > { %v893_v59 = vpop.f32.mrf.mxu1  ;;  %2970 = vmatmul.mubr.msk.bf16.gmra.mxu1 %vm532_vm1, %v1572_v50  ;;  %2897 = vmatprep.mubr.msk.bf16.mxu0 %vm3089_vm0, %v3088_v1 }
 0x10f   : > { %2973 = vmatprep.mubr.msk.bf16.mxu1 %vm3089_vm0, %v3088_v1  ;;  %v3493_v63 = vadd.f32 %v893_v59, %v666_v61  ;;  %v2715_v5 = vpop.f32.mrf.mxu0 }
 0x110   : > { %v2791_v62 = vpop.f32.mrf.mxu1 }
 0x111   : > { %v669_v8 = vpop.f32.mrf.mxu0 }
 0x112   : > { %v896_v6 = vpop.f32.mrf.mxu1 }
 0x113   : > { %v3499_v10 = vadd.f32 %v896_v6, %v669_v8  ;;  %v2716_v16 = vpop.f32.mrf.mxu0 }
 0x114   : > { %v2792_v9 = vpop.f32.mrf.mxu1 }
 0x115   : > { %v674_v19 = vpop.f32.mrf.mxu0  ;;  %2898 = vmatmul.mubr.msk.bf16.gmra.mxu0 %vm532_vm1, %v1235_v11 }
 0x116   : > { %v901_v17 = vpop.f32.mrf.mxu1  ;;  %2974 = vmatmul.mubr.msk.bf16.gmra.mxu1 %vm532_vm1, %v1574_v7  ;;  %2901 = vmatprep.mubr.msk.bf16.mxu0 %vm3089_vm0, %v3088_v1 }
 0x117   : > { %2977 = vmatprep.mubr.msk.bf16.mxu1 %vm3089_vm0, %v3088_v1  ;;  %v3506_v22 = vadd.f32 %v901_v17, %v674_v19  ;;  %v2719_v27 = vpop.f32.mrf.mxu0 }
 0x118   : > { %v2795_v20 = vpop.f32.mrf.mxu1 }
 0x119   : > { %v677_v31 = vpop.f32.mrf.mxu0 }
 0x11a   : > { %v904_v28 = vpop.f32.mrf.mxu1 }
 0x11b   : > { %v3512_v34 = vadd.f32 %v904_v28, %v677_v31  ;;  %v2720_v38 = vpop.f32.mrf.mxu0 }
 0x11c   : > { %v2796_v32 = vpop.f32.mrf.mxu1 }
 0x11d   : > { %v682_v42 = vpop.f32.mrf.mxu0  ;;  %2902 = vmatmul.mubr.msk.bf16.gmra.mxu0 %vm532_vm1, %v1243_v35 }
 0x11e   : > { %v909_v40 = vpop.f32.mrf.mxu1  ;;  %2978 = vmatmul.mubr.msk.bf16.gmra.mxu1 %vm532_vm1, %v1576_v29  ;;  %2905 = vmatprep.mubr.msk.bf16.mxu0 %vm3089_vm0, %v3088_v1 }
 0x11f   : > { %2981 = vmatprep.mubr.msk.bf16.mxu1 %vm3089_vm0, %v3088_v1  ;;  %v3519_v45 = vadd.f32 %v909_v40, %v682_v42  ;;  %v2723_v49 = vpop.f32.mrf.mxu0 }
 0x120   : > { %v2799_v44 = vpop.f32.mrf.mxu1 }
 0x121   : > { %v685_v52 = vpop.f32.mrf.mxu0 }
 0x122   : > { %v912_v50 = vpop.f32.mrf.mxu1 }
 0x123   : > { %v3524_v55 = vadd.f32 %v912_v50, %v685_v52  ;;  %v2724_v58 = vpop.f32.mrf.mxu0 }
 0x124   : > { %v2800_v54 = vpop.f32.mrf.mxu1 }
 0x125   : > { %v690_v60 = vpop.f32.mrf.mxu0  ;;  %2906 = vmatmul.mubr.msk.bf16.gmra.mxu0 %vm532_vm1, %v1251_v56 }
 0x126   : > { %v917_v59 = vpop.f32.mrf.mxu1  ;;  %2982 = vmatmul.mubr.msk.bf16.gmra.mxu1 %vm532_vm1, %v1578_v51 }
 0x127   : > { %v3529_v61 = vadd.f32 %v917_v59, %v690_v60  ;;  %v2727_v62 = vpop.f32.mrf.mxu0 }
 0x128   : > { %v2803_v1 = vpop.f32.mrf.mxu1 }
 0x129   : > { %v693_v2 = vpop.f32.mrf.mxu0 }
 0x12a   : > { %v920_v0 = vpop.f32.mrf.mxu1 }
 0x12b   : > { %v3531_v5 = vadd.f32 %v920_v0, %v693_v2  ;;  %v2728_v6 = vpop.f32.mrf.mxu0 }
 0x12c   : > { %v2804_v4 = vpop.f32.mrf.mxu1 }
 0x12d   : > { %v698_v8 = vpop.f32.mrf.mxu0 }
 0x12e   : > { %v925_v7 = vpop.f32.mrf.mxu1 }
 0x12f   : > { %v3533_v11 = vadd.f32 %v925_v7, %v698_v8  ;;  %v2731_v14 = vpop.f32.mrf.mxu0 }
 0x130   : > { %v2807_v9 = vpop.f32.mrf.mxu1 }
 0x131   : > { %v701_v16 = vpop.f32.mrf.mxu0 }
 0x132   : > { %v928_v15 = vpop.f32.mrf.mxu1 }
 0x133   : > { %v3535_v18 = vadd.f32 %v928_v15, %v701_v16  ;;  %v2732_v19 = vpop.f32.mrf.mxu0 }
 0x134   : > { %v2808_v17 = vpop.f32.mrf.mxu1 }
 0x135   : > { %v706_v24 = vpop.f32.mrf.mxu0 }
 0x136   : > { %v933_v20 = vpop.f32.mrf.mxu1 }
 0x137   : > { %v3537_v26 = vadd.f32 %v933_v20, %v706_v24  ;;  %v2735_v27 = vpop.f32.mrf.mxu0 }
 0x138   : > { %v2811_v25 = vpop.f32.mrf.mxu1 }
 0x139   : > { %v709_v29 = vpop.f32.mrf.mxu0 }
 0x13a   : > { %v936_v28 = vpop.f32.mrf.mxu1 }
 0x13b   : > { %v3539_v32 = vadd.f32 %v936_v28, %v709_v29  ;;  %v2736_v35 = vpop.f32.mrf.mxu0 }
 0x13c   : > { %v2812_v31 = vpop.f32.mrf.mxu1 }
 0x13d   : > { %v714_v37 = vpop.f32.mrf.mxu0 }
 0x13e   : > { %v941_v36 = vpop.f32.mrf.mxu1 }
 0x13f   : > { %v3541_v40 = vadd.f32 %v941_v36, %v714_v37  ;;  %v2739_v41 = vpop.f32.mrf.mxu0 }
 0x140   : > { %v2815_v38 = vpop.f32.mrf.mxu1 }
 0x141   : > { %v717_v44 = vpop.f32.mrf.mxu0 }
 0x142   : > { %v944_v42 = vpop.f32.mrf.mxu1 }
 0x143   : > { %v3543_v47 = vadd.f32 %v944_v42, %v717_v44  ;;  %v2740_v49 = vpop.f32.mrf.mxu0 }
 0x144   : > { %v2816_v46 = vpop.f32.mrf.mxu1 }
 0x145   : > { %v722_v51 = vpop.f32.mrf.mxu0 }
 0x146   : > { %v949_v50 = vpop.f32.mrf.mxu1 }
 0x147   : > { %v3545_v54 = vadd.f32 %v949_v50, %v722_v51  ;;  %v2743_v56 = vpop.f32.mrf.mxu0 }
 0x148   : > { %v2819_v52 = vpop.f32.mrf.mxu1 }
 0x149   : > { %v725_v59 = vpop.f32.mrf.mxu0 }
 0x14a   : > { %v952_v58 = vpop.f32.mrf.mxu1 }
 0x14b   : > { %v3547_v1 = vadd.f32 %v952_v58, %v725_v59  ;;  %v2744_v62 = vpop.f32.mrf.mxu0 }
 0x14c   : > { %v2820_v60 = vpop.f32.mrf.mxu1 }
 0x14d   : > { %v730_v2 = vpop.f32.mrf.mxu0 }
 0x14e   : > { %v957_v0 = vpop.f32.mrf.mxu1 }
 0x14f   : > { %v3549_v6 = vadd.f32 %v957_v0, %v730_v2  ;;  %v2747_v7 = vpop.f32.mrf.mxu0 }
 0x150   : > { %v2823_v4 = vpop.f32.mrf.mxu1 }
 0x151   : > { %v733_v9 = vpop.f32.mrf.mxu0 }
 0x152   : > { %v960_v8 = vpop.f32.mrf.mxu1 }
 0x153   : > { %v3551_v15 = vadd.f32 %v960_v8, %v733_v9  ;;  %v2748_v16 = vpop.f32.mrf.mxu0 }
 0x154   : > { %v2824_v14 = vpop.f32.mrf.mxu1 }
 0x155   : > { %v738_v19 = vpop.f32.mrf.mxu0 }
 0x156   : > { %v965_v17 = vpop.f32.mrf.mxu1 }
 0x157   : > { %v3553_v24 = vadd.f32 %v965_v17, %v738_v19  ;;  %v2751_v25 = vpop.f32.mrf.mxu0 }
 0x158   : > { %v2827_v20 = vpop.f32.mrf.mxu1 }
 0x159   : > { %v741_v28 = vpop.f32.mrf.mxu0 }
 0x15a   : > { %v968_v27 = vpop.f32.mrf.mxu1 }
 0x15b   : > { %v3555_v31 = vadd.f32 %v968_v27, %v741_v28  ;;  %v2752_v35 = vpop.f32.mrf.mxu0 }
 0x15c   : > { %v2828_v29 = vpop.f32.mrf.mxu1 }
 0x15d   : > { %v746_v37 = vpop.f32.mrf.mxu0 }
 0x15e   : > { %v973_v36 = vpop.f32.mrf.mxu1 }
 0x15f   : > { %v3557_v41 = vadd.f32 %v973_v36, %v746_v37  ;;  %v2755_v42 = vpop.f32.mrf.mxu0 }
 0x160   : > { %v2831_v38 = vpop.f32.mrf.mxu1 }
 0x161   : > { %v749_v46 = vpop.f32.mrf.mxu0 }
 0x162   : > { %v976_v44 = vpop.f32.mrf.mxu1 }
 0x163   : > { %v3559_v50 = vadd.f32 %v976_v44, %v749_v46  ;;  %v2756_v51 = vpop.f32.mrf.mxu0 }
 0x164   : > { %v2832_v49 = vpop.f32.mrf.mxu1 }
 0x165   : > { %v1361_v56 = vpop.f32.mrf.mxu0 }
 0x166   : > { %v1688_v52 = vpop.f32.mrf.mxu1  ;;  %v1496_v59 = vadd.f32 %v1361_v56, %v3415_v12  ;;  %v3567_v12 = vld [vmem:[%s3668_s2] ss:$0 sm:$0xff] }
 0x167   : > { %v2843_v60 = vpop.f32.mrf.mxu0 }
 0x168   : > { %v2919_v58 = vpop.f32.mrf.mxu1  ;;  %v1823_v0 = vadd.f32 %v1688_v52, %v1496_v59 }
 0x169   : > { %v1364_v2 = vpop.f32.mrf.mxu0 }
 0x16a   : > { %v1691_v62 = vpop.f32.mrf.mxu1  ;;  %v1891_v7 = vmul.f32 0.2, %v1823_v0  ;;  %v1497_v8 = vadd.f32 %v1364_v2, %v3421_v21  ;;  %vm1857_vm4 = vcmp.ge.f32.partialorder %v1823_v0, 0.0 }
 0x16b   : > { %v2844_v9 = vpop.f32.mrf.mxu0 }
 0x16c   : > { %v2920_v4 = vpop.f32.mrf.mxu1  ;;  %v1824_v16 = vadd.f32 %v1691_v62, %v1497_v8  ;;  %v1925_v20 = vsel %vm1857_vm4, %v1823_v0, %v1891_v7 }
 0x16d   : > { %v1369_v17 = vpop.f32.mrf.mxu0  ;;  %v1965_v36 = vadd.f32 %v3567_v12, %v1925_v20 }
 0x16e   : > { %v1696_v14 = vpop.f32.mrf.mxu1  ;;  %vm1858_vm5 = vcmp.ge.f32.partialorder %v1824_v16, 0.0  ;;  %v1892_v25 = vmul.f32 0.2, %v1824_v16  ;;  %v1498_v27 = vadd.f32 %v1369_v17, %v3428_v30 }
 0x16f   : > { %v2847_v28 = vpop.f32.mrf.mxu0 }
 0x170   : > { %v2923_v19 = vpop.f32.mrf.mxu1  ;;  %v1926_v29 = vsel %vm1858_vm5, %v1824_v16, %v1892_v25  ;;  %v1825_v35 = vadd.f32 %v1696_v14, %v1498_v27 }
 0x171   : > { %v1966_v37 = vadd.f32 %v3567_v12, %v1926_v29  ;;  %v1372_v38 = vpop.f32.mrf.mxu0 }
 0x172   : > { %v1699_v21 = vpop.f32.mrf.mxu1  ;;  %v1893_v44 = vmul.f32 0.2, %v1825_v35  ;;  %v1499_v30 = vadd.f32 %v1372_v38, %v3434_v39  ;;  %vm1859_vm6 = vcmp.ge.f32.partialorder %v1825_v35, 0.0 }
 0x173   : > { %v2499_v46 = vpack.c.bf16 %v1966_v37, %v1965_v36  ;;  %v2848_v49 = vpop.f32.mrf.mxu0 }
 0x174   : > { %v2924_v42 = vpop.f32.mrf.mxu1  ;;  %v1826_v52 = vadd.f32 %v1699_v21, %v1499_v30  ;;  %v1927_v59 = vsel %vm1859_vm6, %v1825_v35, %v1893_v44 }
 0x175   : > { %2500 = vst [vmem:[%s3575_s8] sm:$0xff] %v2499_v46   ;;  %v1377_v56 = vpop.f32.mrf.mxu0  ;;  %v1967_v39 = vadd.f32 %v3567_v12, %v1927_v59 }
 0x176   : > { %v1704_v51 = vpop.f32.mrf.mxu1  ;;  %vm1860_vm7 = vcmp.ge.f32.partialorder %v1826_v52, 0.0  ;;  %v1894_v60 = vmul.f32 0.2, %v1826_v52  ;;  %v1500_v62 = vadd.f32 %v1377_v56, %v3441_v48 }
 0x177   : > { %v2851_v0 = vpop.f32.mrf.mxu0 }
 0x178   : > { %v2927_v58 = vpop.f32.mrf.mxu1  ;;  %v1928_v4 = vsel %vm1860_vm7, %v1826_v52, %v1894_v60  ;;  %v1827_v7 = vadd.f32 %v1704_v51, %v1500_v62 }
 0x179   : > { %v1968_v8 = vadd.f32 %v3567_v12, %v1928_v4  ;;  %v1380_v9 = vpop.f32.mrf.mxu0 }
 0x17a   : > { %v1707_v2 = vpop.f32.mrf.mxu1  ;;  %v1895_v16 = vmul.f32 0.2, %v1827_v7  ;;  %v1501_v17 = vadd.f32 %v1380_v9, %v3447_v57  ;;  %vm1861_vm8 = vcmp.ge.f32.partialorder %v1827_v7, 0.0 }
 0x17b   : > { %v2504_v19 = vpack.c.bf16 %v1968_v8, %v1967_v39  ;;  %v2852_v20 = vpop.f32.mrf.mxu0 }
 0x17c   : > { %v2928_v14 = vpop.f32.mrf.mxu1  ;;  %v1828_v27 = vadd.f32 %v1707_v2, %v1501_v17  ;;  %v1929_v21 = vsel %vm1861_vm8, %v1827_v7, %v1895_v16 }
 0x17d   : > { %2581 = vst [vmem:[%s3575_s8 + $0x8] sm:$0xff] %v2504_v19   ;;  %v1385_v48 = vpop.f32.mrf.mxu0  ;;  %v1969_v57 = vadd.f32 %v3567_v12, %v1929_v21 }
 0x17e   : > { %v1712_v25 = vpop.f32.mrf.mxu1  ;;  %vm1862_vm9 = vcmp.ge.f32.partialorder %v1828_v27, 0.0  ;;  %v1896_v29 = vmul.f32 0.2, %v1828_v27  ;;  %v1502_v35 = vadd.f32 %v1385_v48, %v3454_v3 }
 0x17f   : > { %v2855_v36 = vpop.f32.mrf.mxu0 }
 0x180   : > { %v2931_v28 = vpop.f32.mrf.mxu1  ;;  %v1930_v38 = vsel %vm1862_vm9, %v1828_v27, %v1896_v29  ;;  %v1829_v42 = vadd.f32 %v1712_v25, %v1502_v35 }
 0x181   : > { %v1970_v44 = vadd.f32 %v3567_v12, %v1930_v38  ;;  %v1388_v30 = vpop.f32.mrf.mxu0 }
 0x182   : > { %v1715_v37 = vpop.f32.mrf.mxu1  ;;  %v1897_v49 = vmul.f32 0.2, %v1829_v42  ;;  %v1503_v51 = vadd.f32 %v1388_v30, %v3460_v13  ;;  %vm1863_vm10 = vcmp.ge.f32.partialorder %v1829_v42, 0.0 }
 0x183   : > { %v2509_v52 = vpack.c.bf16 %v1970_v44, %v1969_v57  ;;  %v2856_v56 = vpop.f32.mrf.mxu0 }
 0x184   : > { %v2932_v46 = vpop.f32.mrf.mxu1  ;;  %v1830_v59 = vadd.f32 %v1715_v37, %v1503_v51  ;;  %v1931_v62 = vsel %vm1863_vm10, %v1829_v42, %v1897_v49 }
 0x185   : > { %2582 = vst [vmem:[%s3575_s8 + $0x10] sm:$0xff] %v2509_v52   ;;  %v1393_v3 = vpop.f32.mrf.mxu0  ;;  %v1971_v13 = vadd.f32 %v3567_v12, %v1931_v62 }
 0x186   : > { %v1720_v58 = vpop.f32.mrf.mxu1  ;;  %vm1864_vm11 = vcmp.ge.f32.partialorder %v1830_v59, 0.0  ;;  %v1898_v0 = vmul.f32 0.2, %v1830_v59  ;;  %v1504_v2 = vadd.f32 %v1393_v3, %v3467_v23 }
 0x187   : > { %v2859_v4 = vpop.f32.mrf.mxu0 }
 0x188   : > { %v2935_v60 = vpop.f32.mrf.mxu1  ;;  %v1932_v39 = vsel %vm1864_vm11, %v1830_v59, %v1898_v0  ;;  %v1831_v8 = vadd.f32 %v1720_v58, %v1504_v2 }
 0x189   : > { %v1972_v9 = vadd.f32 %v3567_v12, %v1932_v39  ;;  %v1396_v14 = vpop.f32.mrf.mxu0 }
 0x18a   : > { %v1723_v7 = vpop.f32.mrf.mxu1  ;;  %v1899_v17 = vmul.f32 0.2, %v1831_v8  ;;  %v1505_v19 = vadd.f32 %v1396_v14, %v3473_v33  ;;  %vm1865_vm12 = vcmp.ge.f32.partialorder %v1831_v8, 0.0 }
 0x18b   : > { %v2514_v20 = vpack.c.bf16 %v1972_v9, %v1971_v13  ;;  %v2860_v25 = vpop.f32.mrf.mxu0 }
 0x18c   : > { %v2936_v16 = vpop.f32.mrf.mxu1  ;;  %v1832_v48 = vadd.f32 %v1723_v7, %v1505_v19  ;;  %v1933_v21 = vsel %vm1865_vm12, %v1831_v8, %v1899_v17 }
 0x18d   : > { %2583 = vst [vmem:[%s3575_s8 + $0x18] sm:$0xff] %v2514_v20   ;;  %v1401_v23 = vpop.f32.mrf.mxu0  ;;  %v1973_v33 = vadd.f32 %v3567_v12, %v1933_v21 }
 0x18e   : > { %v1728_v27 = vpop.f32.mrf.mxu1  ;;  %vm1866_vm13 = vcmp.ge.f32.partialorder %v1832_v48, 0.0  ;;  %v1900_v29 = vmul.f32 0.2, %v1832_v48  ;;  %v1506_v35 = vadd.f32 %v1401_v23, %v3480_v43 }
 0x18f   : > { %v2863_v36 = vpop.f32.mrf.mxu0 }
 0x190   : > { %v2939_v28 = vpop.f32.mrf.mxu1  ;;  %v1934_v38 = vsel %vm1866_vm13, %v1832_v48, %v1900_v29  ;;  %v1833_v42 = vadd.f32 %v1728_v27, %v1506_v35 }
 0x191   : > { %v1974_v57 = vadd.f32 %v3567_v12, %v1934_v38  ;;  %v1404_v44 = vpop.f32.mrf.mxu0 }
 0x192   : > { %v1731_v37 = vpop.f32.mrf.mxu1  ;;  %v1901_v46 = vmul.f32 0.2, %v1833_v42  ;;  %v1507_v49 = vadd.f32 %v1404_v44, %v3486_v53  ;;  %vm1867_vm14 = vcmp.ge.f32.partialorder %v1833_v42, 0.0 }
 0x193   : > { %v2519_v51 = vpack.c.bf16 %v1974_v57, %v1973_v33  ;;  %v2864_v52 = vpop.f32.mrf.mxu0 }
 0x194   : > { %v2940_v30 = vpop.f32.mrf.mxu1  ;;  %v1834_v58 = vadd.f32 %v1731_v37, %v1507_v49  ;;  %v1935_v3 = vsel %vm1867_vm14, %v1833_v42, %v1901_v46 }
 0x195   : > { %2584 = vst [vmem:[%s3575_s8 + $0x20] sm:$0xff] %v2519_v51   ;;  %v1409_v43 = vpop.f32.mrf.mxu0  ;;  %v1975_v53 = vadd.f32 %v3567_v12, %v1935_v3 }
 0x196   : > { %v1736_v56 = vpop.f32.mrf.mxu1  ;;  %vm1868_vm15 = vcmp.ge.f32.partialorder %v1834_v58, 0.0  ;;  %v1902_v60 = vmul.f32 0.2, %v1834_v58  ;;  %v1508_v62 = vadd.f32 %v1409_v43, %v3493_v63 }
 0x197   : > { %v2867_v0 = vpop.f32.mrf.mxu0 }
 0x198   : > { %v2943_v59 = vpop.f32.mrf.mxu1  ;;  %v1936_v4 = vsel %vm1868_vm15, %v1834_v58, %v1902_v60  ;;  %v1835_v7 = vadd.f32 %v1736_v56, %v1508_v62 }
 0x199   : > { %v1976_v39 = vadd.f32 %v3567_v12, %v1936_v4  ;;  %v1412_v8 = vpop.f32.mrf.mxu0 }
 0x19a   : > { %v1739_v2 = vpop.f32.mrf.mxu1  ;;  %v1903_v9 = vmul.f32 0.2, %v1835_v7  ;;  %v1509_v14 = vadd.f32 %v1412_v8, %v3499_v10  ;;  %vm1869_vm0 = vcmp.ge.f32.partialorder %v1835_v7, 0.0 }
 0x19b   : > { %v2524_v16 = vpack.c.bf16 %v1976_v39, %v1975_v53  ;;  %v2868_v17 = vpop.f32.mrf.mxu0 }
 0x19c   : > { %v2944_v13 = vpop.f32.mrf.mxu1  ;;  %v1836_v20 = vadd.f32 %v1739_v2, %v1509_v14  ;;  %v1937_v27 = vsel %vm1869_vm0, %v1835_v7, %v1903_v9 }
 0x19d   : > { %2585 = vst [vmem:[%s3575_s8 + $0x28] sm:$0xff] %v2524_v16   ;;  %v1417_v63 = vpop.f32.mrf.mxu0  ;;  %v1977_v10 = vadd.f32 %v3567_v12, %v1937_v27 }
 0x19e   : > { %v1744_v19 = vpop.f32.mrf.mxu1  ;;  %vm1870_vm1 = vcmp.ge.f32.partialorder %v1836_v20, 0.0  ;;  %v1904_v48 = vmul.f32 0.2, %v1836_v20  ;;  %v1510_v23 = vadd.f32 %v1417_v63, %v3506_v22 }
 0x19f   : > { %v2871_v28 = vpop.f32.mrf.mxu0 }
 0x1a0   : > { %v2947_v25 = vpop.f32.mrf.mxu1  ;;  %v1938_v29 = vsel %vm1870_vm1, %v1836_v20, %v1904_v48  ;;  %v1837_v35 = vadd.f32 %v1744_v19, %v1510_v23 }
 0x1a1   : > { %v1978_v36 = vadd.f32 %v3567_v12, %v1938_v29  ;;  %v1420_v37 = vpop.f32.mrf.mxu0 }
 0x1a2   : > { %v1747_v21 = vpop.f32.mrf.mxu1  ;;  %v1905_v42 = vmul.f32 0.2, %v1837_v35  ;;  %v1511_v33 = vadd.f32 %v1420_v37, %v3512_v34  ;;  %vm1871_vm2 = vcmp.ge.f32.partialorder %v1837_v35, 0.0 }
 0x1a3   : > { %v2529_v57 = vpack.c.bf16 %v1978_v36, %v1977_v10  ;;  %v2872_v44 = vpop.f32.mrf.mxu0 }
 0x1a4   : > { %v2948_v38 = vpop.f32.mrf.mxu1  ;;  %v1838_v46 = vadd.f32 %v1747_v21, %v1511_v33  ;;  %v1939_v51 = vsel %vm1871_vm2, %v1837_v35, %v1905_v42 }
 0x1a5   : > { %2586 = vst [vmem:[%s3575_s8 + $0x30] sm:$0xff] %v2529_v57   ;;  %v1425_v22 = vpop.f32.mrf.mxu0  ;;  %v1979_v34 = vadd.f32 %v3567_v12, %v1939_v51 }
 0x1a6   : > { %v1752_v30 = vpop.f32.mrf.mxu1  ;;  %vm1872_vm3 = vcmp.ge.f32.partialorder %v1838_v46, 0.0  ;;  %v1906_v52 = vmul.f32 0.2, %v1838_v46  ;;  %v1512_v56 = vadd.f32 %v1425_v22, %v3519_v45 }
 0x1a7   : > { %v2875_v58 = vpop.f32.mrf.mxu0 }
 0x1a8   : > { %v2951_v49 = vpop.f32.mrf.mxu1  ;;  %v1940_v59 = vsel %vm1872_vm3, %v1838_v46, %v1906_v52  ;;  %v1839_v3 = vadd.f32 %v1752_v30, %v1512_v56 }
 0x1a9   : > { %v1980_v60 = vadd.f32 %v3567_v12, %v1940_v59  ;;  %v1428_v62 = vpop.f32.mrf.mxu0 }
 0x1aa   : > { %v1755_v43 = vpop.f32.mrf.mxu1  ;;  %v1907_v2 = vmul.f32 0.2, %v1839_v3  ;;  %v1513_v4 = vadd.f32 %v1428_v62, %v3524_v55  ;;  %vm1873_vm4 = vcmp.ge.f32.partialorder %v1839_v3, 0.0 }
 0x1ab   : > { %v2534_v7 = vpack.c.bf16 %v1980_v60, %v1979_v34  ;;  %v2876_v53 = vpop.f32.mrf.mxu0 }
 0x1ac   : > { %v2952_v0 = vpop.f32.mrf.mxu1  ;;  %v1840_v8 = vadd.f32 %v1755_v43, %v1513_v4  ;;  %v1941_v9 = vsel %vm1873_vm4, %v1839_v3, %v1907_v2 }
 0x1ad   : > { %2587 = vst [vmem:[%s3575_s8 + $0x38] sm:$0xff] %v2534_v7   ;;  %v1433_v45 = vpop.f32.mrf.mxu0  ;;  %v1981_v55 = vadd.f32 %v3567_v12, %v1941_v9 }
 0x1ae   : > { %v1760_v39 = vpop.f32.mrf.mxu1  ;;  %vm1874_vm5 = vcmp.ge.f32.partialorder %v1840_v8, 0.0  ;;  %v1908_v14 = vmul.f32 0.2, %v1840_v8  ;;  %v1514_v16 = vadd.f32 %v1433_v45, %v3529_v61 }
 0x1af   : > { %v2879_v17 = vpop.f32.mrf.mxu0 }
 0x1b0   : > { %v2955_v13 = vpop.f32.mrf.mxu1  ;;  %v1942_v20 = vsel %vm1874_vm5, %v1840_v8, %v1908_v14  ;;  %v1841_v63 = vadd.f32 %v1760_v39, %v1514_v16 }
 0x1b1   : > { %v1982_v25 = vadd.f32 %v3567_v12, %v1942_v20  ;;  %v1436_v27 = vpop.f32.mrf.mxu0 }
 0x1b2   : > { %v1763_v19 = vpop.f32.mrf.mxu1  ;;  %v1909_v23 = vmul.f32 0.2, %v1841_v63  ;;  %v1515_v28 = vadd.f32 %v1436_v27, %v3531_v5  ;;  %vm1875_vm6 = vcmp.ge.f32.partialorder %v1841_v63, 0.0 }
 0x1b3   : > { %v2539_v21 = vpack.c.bf16 %v1982_v25, %v1981_v55  ;;  %v2880_v29 = vpop.f32.mrf.mxu0 }
 0x1b4   : > { %v2956_v48 = vpop.f32.mrf.mxu1  ;;  %v1842_v10 = vadd.f32 %v1763_v19, %v1515_v28  ;;  %v1943_v37 = vsel %vm1875_vm6, %v1841_v63, %v1909_v23 }
 0x1b5   : > { %2588 = vst [vmem:[%s3575_s8 + $0x40] sm:$0xff] %v2539_v21   ;;  %v1441_v61 = vpop.f32.mrf.mxu0  ;;  %v1983_v5 = vadd.f32 %v3567_v12, %v1943_v37 }
 0x1b6   : > { %v1768_v35 = vpop.f32.mrf.mxu1  ;;  %vm1876_vm7 = vcmp.ge.f32.partialorder %v1842_v10, 0.0  ;;  %v1910_v38 = vmul.f32 0.2, %v1842_v10  ;;  %v1516_v42 = vadd.f32 %v1441_v61, %v3533_v11 }
 0x1b7   : > { %v2883_v33 = vpop.f32.mrf.mxu0 }
 0x1b8   : > { %v2959_v36 = vpop.f32.mrf.mxu1  ;;  %v1944_v44 = vsel %vm1876_vm7, %v1842_v10, %v1910_v38  ;;  %v1843_v30 = vadd.f32 %v1768_v35, %v1516_v42 }
 0x1b9   : > { %v1984_v46 = vadd.f32 %v3567_v12, %v1944_v44  ;;  %v1444_v22 = vpop.f32.mrf.mxu0 }
 0x1ba   : > { %v1771_v57 = vpop.f32.mrf.mxu1  ;;  %v1911_v51 = vmul.f32 0.2, %v1843_v30  ;;  %v1517_v52 = vadd.f32 %v1444_v22, %v3535_v18  ;;  %vm1877_vm8 = vcmp.ge.f32.partialorder %v1843_v30, 0.0 }
 0x1bb   : > { %v2544_v56 = vpack.c.bf16 %v1984_v46, %v1983_v5  ;;  %v2884_v58 = vpop.f32.mrf.mxu0 }
 0x1bc   : > { %v2960_v49 = vpop.f32.mrf.mxu1  ;;  %v1844_v59 = vadd.f32 %v1771_v57, %v1517_v52  ;;  %v1945_v34 = vsel %vm1877_vm8, %v1843_v30, %v1911_v51 }
 0x1bd   : > { %2589 = vst [vmem:[%s3575_s8 + $0x48] sm:$0xff] %v2544_v56   ;;  %v1449_v11 = vpop.f32.mrf.mxu0  ;;  %v1985_v18 = vadd.f32 %v3567_v12, %v1945_v34 }
 0x1be   : > { %v1776_v43 = vpop.f32.mrf.mxu1  ;;  %vm1878_vm9 = vcmp.ge.f32.partialorder %v1844_v59, 0.0  ;;  %v1912_v60 = vmul.f32 0.2, %v1844_v59  ;;  %v1518_v62 = vadd.f32 %v1449_v11, %v3537_v26 }
 0x1bf   : > { %v2887_v0 = vpop.f32.mrf.mxu0 }
 0x1c0   : > { %v2963_v3 = vpop.f32.mrf.mxu1  ;;  %v1946_v4 = vsel %vm1878_vm9, %v1844_v59, %v1912_v60  ;;  %v1845_v7 = vadd.f32 %v1776_v43, %v1518_v62 }
 0x1c1   : > { %v1986_v53 = vadd.f32 %v3567_v12, %v1946_v4  ;;  %v1452_v39 = vpop.f32.mrf.mxu0 }
 0x1c2   : > { %v1779_v2 = vpop.f32.mrf.mxu1  ;;  %v1913_v45 = vmul.f32 0.2, %v1845_v7  ;;  %v1519_v13 = vadd.f32 %v1452_v39, %v3539_v32  ;;  %vm1879_vm10 = vcmp.ge.f32.partialorder %v1845_v7, 0.0 }
 0x1c3   : > { %v2549_v9 = vpack.c.bf16 %v1986_v53, %v1985_v18  ;;  %v2888_v14 = vpop.f32.mrf.mxu0 }
 0x1c4   : > { %v2964_v8 = vpop.f32.mrf.mxu1  ;;  %v1846_v17 = vadd.f32 %v1779_v2, %v1519_v13  ;;  %v1947_v20 = vsel %vm1879_vm10, %v1845_v7, %v1913_v45 }
 0x1c5   : > { %2590 = vst [vmem:[%s3575_s8 + $0x50] sm:$0xff] %v2549_v9   ;;  %v1457_v26 = vpop.f32.mrf.mxu0  ;;  %v1987_v32 = vadd.f32 %v3567_v12, %v1947_v20 }
 0x1c6   : > { %v1784_v16 = vpop.f32.mrf.mxu1  ;;  %vm1880_vm11 = vcmp.ge.f32.partialorder %v1846_v17, 0.0  ;;  %v1914_v63 = vmul.f32 0.2, %v1846_v17  ;;  %v1520_v55 = vadd.f32 %v1457_v26, %v3541_v40 }
 0x1c7   : > { %v2891_v25 = vpop.f32.mrf.mxu0 }
 0x1c8   : > { %v2967_v19 = vpop.f32.mrf.mxu1  ;;  %v1948_v48 = vsel %vm1880_vm11, %v1846_v17, %v1914_v63  ;;  %v1847_v23 = vadd.f32 %v1784_v16, %v1520_v55 }
 0x1c9   : > { %v1988_v28 = vadd.f32 %v3567_v12, %v1948_v48  ;;  %v1460_v21 = vpop.f32.mrf.mxu0 }
 0x1ca   : > { %v1787_v27 = vpop.f32.mrf.mxu1  ;;  %v1915_v35 = vmul.f32 0.2, %v1847_v23  ;;  %v1521_v10 = vadd.f32 %v1460_v21, %v3543_v47  ;;  %vm1881_vm12 = vcmp.ge.f32.partialorder %v1847_v23, 0.0 }
 0x1cb   : > { %v2554_v61 = vpack.c.bf16 %v1988_v28, %v1987_v32  ;;  %v2892_v36 = vpop.f32.mrf.mxu0 }
 0x1cc   : > { %v2968_v29 = vpop.f32.mrf.mxu1  ;;  %v1848_v38 = vadd.f32 %v1787_v27, %v1521_v10  ;;  %v1949_v33 = vsel %vm1881_vm12, %v1847_v23, %v1915_v35 }
 0x1cd   : > { %2591 = vst [vmem:[%s3575_s8 + $0x58] sm:$0xff] %v2554_v61   ;;  %v1465_v40 = vpop.f32.mrf.mxu0  ;;  %v1989_v47 = vadd.f32 %v3567_v12, %v1949_v33 }
 0x1ce   : > { %v1792_v37 = vpop.f32.mrf.mxu1  ;;  %vm1882_vm13 = vcmp.ge.f32.partialorder %v1848_v38, 0.0  ;;  %v1916_v57 = vmul.f32 0.2, %v1848_v38  ;;  %v1522_v44 = vadd.f32 %v1465_v40, %v3545_v54 }
 0x1cf   : > { %v2895_v30 = vpop.f32.mrf.mxu0 }
 0x1d0   : > { %v2971_v42 = vpop.f32.mrf.mxu1  ;;  %v1950_v46 = vsel %vm1882_vm13, %v1848_v38, %v1916_v57  ;;  %v1849_v22 = vadd.f32 %v1792_v37, %v1522_v44 }
 0x1d1   : > { %v1990_v49 = vadd.f32 %v3567_v12, %v1950_v46  ;;  %v1468_v51 = vpop.f32.mrf.mxu0 }
 0x1d2   : > { %v1795_v5 = vpop.f32.mrf.mxu1  ;;  %v1917_v56 = vmul.f32 0.2, %v1849_v22  ;;  %v1523_v58 = vadd.f32 %v1468_v51, %v3547_v1  ;;  %vm1883_vm14 = vcmp.ge.f32.partialorder %v1849_v22, 0.0 }
 0x1d3   : > { %v2559_v43 = vpack.c.bf16 %v1990_v49, %v1989_v47  ;;  %v2896_v59 = vpop.f32.mrf.mxu0 }
 0x1d4   : > { %v2972_v52 = vpop.f32.mrf.mxu1  ;;  %v1850_v3 = vadd.f32 %v1795_v5, %v1523_v58  ;;  %v1951_v60 = vsel %vm1883_vm14, %v1849_v22, %v1917_v56 }
 0x1d5   : > { %2592 = vst [vmem:[%s3575_s8 + $0x60] sm:$0xff] %v2559_v43   ;;  %v1473_v54 = vpop.f32.mrf.mxu0  ;;  %v1991_v1 = vadd.f32 %v3567_v12, %v1951_v60 }
 0x1d6   : > { %v1800_v11 = vpop.f32.mrf.mxu1  ;;  %vm1884_vm15 = vcmp.ge.f32.partialorder %v1850_v3, 0.0  ;;  %v1918_v62 = vmul.f32 0.2, %v1850_v3  ;;  %v1524_v0 = vadd.f32 %v1473_v54, %v3549_v6 }
 0x1d7   : > { %v2899_v2 = vpop.f32.mrf.mxu0 }
 0x1d8   : > { %v2975_v34 = vpop.f32.mrf.mxu1  ;;  %v1952_v7 = vsel %vm1884_vm15, %v1850_v3, %v1918_v62  ;;  %v1851_v18 = vadd.f32 %v1800_v11, %v1524_v0 }
 0x1d9   : > { %v1992_v53 = vadd.f32 %v3567_v12, %v1952_v7  ;;  %v1476_v39 = vpop.f32.mrf.mxu0 }
 0x1da   : > { %v1803_v4 = vpop.f32.mrf.mxu1  ;;  %v1919_v45 = vmul.f32 0.2, %v1851_v18  ;;  %v1525_v13 = vadd.f32 %v1476_v39, %v3551_v15  ;;  %vm1885_vm0 = vcmp.ge.f32.partialorder %v1851_v18, 0.0 }
 0x1db   : > { %v2564_v9 = vpack.c.bf16 %v1992_v53, %v1991_v1  ;;  %v2900_v14 = vpop.f32.mrf.mxu0 }
 0x1dc   : > { %v2976_v8 = vpop.f32.mrf.mxu1  ;;  %v1852_v17 = vadd.f32 %v1803_v4, %v1525_v13  ;;  %v1953_v19 = vsel %vm1885_vm0, %v1851_v18, %v1919_v45 }
 0x1dd   : > { %2593 = vst [vmem:[%s3575_s8 + $0x68] sm:$0xff] %v2564_v9   ;;  %v1481_v6 = vpop.f32.mrf.mxu0  ;;  %v1993_v15 = vadd.f32 %v3567_v12, %v1953_v19 }
 0x1de   : > { %v1808_v16 = vpop.f32.mrf.mxu1  ;;  %vm1886_vm1 = vcmp.ge.f32.partialorder %v1852_v17, 0.0  ;;  %v1920_v20 = vmul.f32 0.2, %v1852_v17  ;;  %v1526_v63 = vadd.f32 %v1481_v6, %v3553_v24 }
 0x1df   : > { %v2903_v55 = vpop.f32.mrf.mxu0 }
 0x1e0   : > { %v2979_v26 = vpop.f32.mrf.mxu1  ;;  %v1954_v27 = vsel %vm1886_vm1, %v1852_v17, %v1920_v20  ;;  %v1853_v48 = vadd.f32 %v1808_v16, %v1526_v63 }
 0x1e1   : > { %v1994_v23 = vadd.f32 %v3567_v12, %v1954_v27  ;;  %v1484_v32 = vpop.f32.mrf.mxu0 }
 0x1e2   : > { %v1811_v25 = vpop.f32.mrf.mxu1  ;;  %v1921_v21 = vmul.f32 0.2, %v1853_v48  ;;  %v1527_v29 = vadd.f32 %v1484_v32, %v3555_v31  ;;  %vm1887_vm2 = vcmp.ge.f32.partialorder %v1853_v48, 0.0 }
 0x1e3   : > { %v2569_v35 = vpack.c.bf16 %v1994_v23, %v1993_v15  ;;  %v2904_v10 = vpop.f32.mrf.mxu0 }
 0x1e4   : > { %v2980_v28 = vpop.f32.mrf.mxu1  ;;  %v1854_v36 = vadd.f32 %v1811_v25, %v1527_v29  ;;  %v1955_v38 = vsel %vm1887_vm2, %v1853_v48, %v1921_v21 }
 0x1e5   : > { %2594 = vst [vmem:[%s3575_s8 + $0x70] sm:$0xff] %v2569_v35   ;;  %v1489_v24 = vpop.f32.mrf.mxu0  ;;  %v1995_v31 = vadd.f32 %v3567_v12, %v1955_v38 }
 0x1e6   : > { %v1816_v61 = vpop.f32.mrf.mxu1  ;;  %vm1888_vm3 = vcmp.ge.f32.partialorder %v1854_v36, 0.0  ;;  %v1922_v40 = vmul.f32 0.2, %v1854_v36  ;;  %v1528_v42 = vadd.f32 %v1489_v24, %v3557_v41 }
 0x1e7   : > { %v2907_v33 = vpop.f32.mrf.mxu0 }
 0x1e8   : > { %v2983_v37 = vpop.f32.mrf.mxu1  ;;  %v1956_v44 = vsel %vm1888_vm3, %v1854_v36, %v1922_v40  ;;  %v1855_v30 = vadd.f32 %v1816_v61, %v1528_v42 }
 0x1e9   : > { %v1996_v5 = vadd.f32 %v3567_v12, %v1956_v44  ;;  %v1492_v46 = vpop.f32.mrf.mxu0 }
 0x1ea   : > { %v1819_v57 = vpop.f32.mrf.mxu1  ;;  %v1923_v47 = vmul.f32 0.2, %v1855_v30  ;;  %v1529_v49 = vadd.f32 %v1492_v46, %v3559_v50  ;;  %vm1889_vm4 = vcmp.ge.f32.partialorder %v1855_v30, 0.0 }
 0x1eb   : > { %v2574_v51 = vpack.c.bf16 %v1996_v5, %v1995_v31  ;;  %v2908_v52 = vpop.f32.mrf.mxu0 }
 0x1ec   : > { %v2984_v22 = vpop.f32.mrf.mxu1  ;;  %v1856_v56 = vadd.f32 %v1819_v57, %v1529_v49  ;;  %v1957_v41 = vsel %vm1889_vm4, %v1855_v30, %v1923_v47 }
 0x1ed   : > { %2595 = vst [vmem:[%s3575_s8 + $0x78] sm:$0xff] %v2574_v51   ;;  %v1997_v59 = vadd.f32 %v3567_v12, %v1957_v41 }
 0x1ee   : > { %vm1890_vm5 = vcmp.ge.f32.partialorder %v1856_v56, 0.0  ;;  %v1924_v58 = vmul.f32 0.2, %v1856_v56 }
 0x1f0   : > { %v1958_v43 = vsel %vm1890_vm5, %v1856_v56, %v1924_v58 }
 0x1f1   : > { %v1998_v11 = vadd.f32 %v3567_v12, %v1958_v43 }
 0x1f3   : > { %v2579_v3 = vpack.c.bf16 %v1998_v11, %v1997_v59 }
 0x1f5   : > { %2596 = vst [vmem:[%s3575_s8 + $0x80] sm:$0xff] %v2579_v3  }
 0x1f6 PF: > { %s13_s14 = sadd.s32 1, %s3086_s14   ;;  %s3670_s12 = smov %s3082_s13 }
 0x1f7   : > { %p10_p6 = scmp.ge.s32.totalorder %s13_s14, 4   ;;  %s3671_s13 = smov %s3673_s15 }
 0x1f9   :  { %12 = sbr.rel (!%p10_p6) target bundleno = 2 (0x2), region = 71 }

// kernel: discriminator_forward.5
= control target key start
LH: loop header
LB: loop body
LE: loop exit
PB: predicated region body
PF: predicated region fallthrough
CT: control target
= control target key end

     0   :  { %s4407_s12 = smov 0   ;;  %s4409_s13 = smov 0   ;;  %s5922_s0 = inlined_call_operand.vmem [shape: bf16[192,512], index: 0, kind: input, shape index: {}]   ;;  %s5923_s1 = inlined_call_operand.vmem [shape: bf16[4,512,256], index: 1, kind: input, shape index: {}]   ;;  %s5924_s2 = inlined_call_operand.vmem [shape: f32[1,256], index: 2, kind: input, shape index: {}]   ;;  %s5925_s3 = inlined_call_operand.vmem [shape: bf16[144,256], index: 3, kind: output, shape index: {}]  }
   0x1   :  { %s4411_s14 = smov 0  }
   0x2 LB: > { %s22_s15 = sadd.s32 1, %s4381_s13  ;;  %p3378_p0 = scmp.ge.s32.totalorder %s4385_s14, 1  ;;  %s4385_s14 = sphi %s4411_s14, %s13_s14   ;;  %s4381_s13 = sphi %s4409_s13, %s5937_s13   ;;  %s4377_s12 = sphi %s4407_s12, %s5936_s12  }
   0x3   : > { %p23_p1 = scmp.ge.s32.totalorder %s22_s15, 2  ;;  %p174_p2 = scmp.lt.s32.totalorder %s4385_s14, 3 }
   0x5   : > { %s5939_s15 = smov (%p23_p1, %s22_s15), 0  ;;  %p175_p3 = pnand %p3378_p0, %p174_p2 }
   0x6   : > { %s213_s30 = smul.u32 (!%p175_p3), 12, %s4377_s12 }
   0x7   : > { %178 = sbr.rel (%p175_p3) target bundleno = 509 (0x1fd), region = 32 }
   0x8   : > { %p214_p4 = scmp.lt.s32.totalorder (!%p175_p3), %s213_s30, 23  ;;  %s231_s17 = smul.u32 (!%p175_p3), 9, %s4377_s12 }
   0xa   : > { %p233_p5 = scmp.lt.s32.totalorder (!%p175_p3), %s231_s17, 17 }
   0xc   : > { %v3925_v0 = vld [vmem:[%s5923_s1 + $0x274] ss:$8 sps:$4 sm:$0xff]   ;;  %v3929_v2 = vld [vmem:[%s5923_s1 + $0x270] ss:$8 sps:$4 sm:$0xff]   ;;  %v3931_v4 = vld [vmem:[%s5923_s1 + $0x264] ss:$8 sps:$4 sm:$0xff]  }
   0xd   : > { %v3927_v1 = vld [vmem:[%s5923_s1 + $0x374] ss:$8 sps:$4 sm:$0xff]   ;;  %970 = vmatprep.subr.bf16.mxu0 %v3925_v0  ;;  %v3930_v3 = vld [vmem:[%s5923_s1 + $0x370] ss:$8 sps:$4 sm:$0xff]   ;;  %v3933_v5 = vld [vmem:[%s5923_s1 + $0x364] ss:$8 sps:$4 sm:$0xff]  }
   0xe   : > { %1051 = vmatprep.subr.bf16.mxu1 %v3927_v1  ;;  %971 = vmatpush1.bf16.msra.mxu0 %v3929_v2  ;;  %v3935_v6 = vld [vmem:[%s5923_s1 + $0x260] ss:$8 sps:$4 sm:$0xff]   ;;  %v3937_v8 = vld [vmem:[%s5923_s1 + $0x254] ss:$8 sps:$4 sm:$0xff]   ;;  %v3941_v10 = vld [vmem:[%s5923_s1 + $0x250] ss:$8 sps:$4 sm:$0xff]  }
   0xf   : > { %1052 = vmatpush1.bf16.msra.mxu1 %v3930_v3  ;;  %972 = vmatprep.subr.bf16.mxu0 %v3931_v4  ;;  %v3936_v7 = vld [vmem:[%s5923_s1 + $0x360] ss:$8 sps:$4 sm:$0xff]   ;;  %v3939_v9 = vld [vmem:[%s5923_s1 + $0x354] ss:$8 sps:$4 sm:$0xff]   ;;  %v3942_v11 = vld [vmem:[%s5923_s1 + $0x350] ss:$8 sps:$4 sm:$0xff]  }
  0x10   : > { %1053 = vmatprep.subr.bf16.mxu1 %v3933_v5  ;;  %v3943_v12 = vld [vmem:[%s5923_s1 + $0x244] ss:$8 sps:$4 sm:$0xff]   ;;  %v3947_v14 = vld [vmem:[%s5923_s1 + $0x240] ss:$8 sps:$4 sm:$0xff]   ;;  %v3949_v16 = vld [vmem:[%s5923_s1 + $0x234] ss:$8 sps:$4 sm:$0xff]  }
  0x11   : > { %v3945_v13 = vld [vmem:[%s5923_s1 + $0x344] ss:$8 sps:$4 sm:$0xff]   ;;  %v3948_v15 = vld [vmem:[%s5923_s1 + $0x340] ss:$8 sps:$4 sm:$0xff]   ;;  %v3951_v17 = vld [vmem:[%s5923_s1 + $0x334] ss:$8 sps:$4 sm:$0xff]  }
  0x12   : > { %973 = vmatpush1.bf16.msra.mxu0 %v3935_v6  ;;  %v3953_v18 = vld [vmem:[%s5923_s1 + $0x230] ss:$8 sps:$4 sm:$0xff]   ;;  %v3955_v20 = vld [vmem:[%s5923_s1 + $0x224] ss:$8 sps:$4 sm:$0xff]   ;;  %v3959_v22 = vld [vmem:[%s5923_s1 + $0x220] ss:$8 sps:$4 sm:$0xff]  }
  0x13   : > { %1054 = vmatpush1.bf16.msra.mxu1 %v3936_v7  ;;  %974 = vmatprep.subr.bf16.mxu0 %v3937_v8  ;;  %v3954_v19 = vld [vmem:[%s5923_s1 + $0x330] ss:$8 sps:$4 sm:$0xff]   ;;  %v3957_v21 = vld [vmem:[%s5923_s1 + $0x324] ss:$8 sps:$4 sm:$0xff]   ;;  %v3960_v23 = vld [vmem:[%s5923_s1 + $0x320] ss:$8 sps:$4 sm:$0xff]  }
  0x14   : > { %1055 = vmatprep.subr.bf16.mxu1 %v3939_v9  ;;  %v3961_v24 = vld [vmem:[%s5923_s1 + $0x214] ss:$8 sps:$4 sm:$0xff]   ;;  %v3965_v26 = vld [vmem:[%s5923_s1 + $0x210] ss:$8 sps:$4 sm:$0xff]   ;;  %v3967_v28 = vld [vmem:[%s5923_s1 + $0x204] ss:$8 sps:$4 sm:$0xff]  }
  0x15   : > { %v3963_v25 = vld [vmem:[%s5923_s1 + $0x314] ss:$8 sps:$4 sm:$0xff]   ;;  %v3966_v27 = vld [vmem:[%s5923_s1 + $0x310] ss:$8 sps:$4 sm:$0xff]   ;;  %v3969_v29 = vld [vmem:[%s5923_s1 + $0x304] ss:$8 sps:$4 sm:$0xff]  }
  0x16   : > { %975 = vmatpush1.bf16.msra.mxu0 %v3941_v10  ;;  %v3971_v30 = vld [vmem:[%s5923_s1 + $0x200] ss:$8 sps:$4 sm:$0xff]   ;;  %v3973_v32 = vld [vmem:[%s5923_s1 + $0x2f4] ss:$8 sps:$4 sm:$0xff]   ;;  %v3977_v34 = vld [vmem:[%s5923_s1 + $0x2f0] ss:$8 sps:$4 sm:$0xff]  }
  0x17   : > { %1056 = vmatpush1.bf16.msra.mxu1 %v3942_v11  ;;  %976 = vmatprep.subr.bf16.mxu0 %v3943_v12  ;;  %v3972_v31 = vld [vmem:[%s5923_s1 + $0x300] ss:$8 sps:$4 sm:$0xff]   ;;  %v3975_v33 = vld [vmem:[%s5923_s1 + $0x3f4] ss:$8 sps:$4 sm:$0xff]   ;;  %v3978_v35 = vld [vmem:[%s5923_s1 + $0x3f0] ss:$8 sps:$4 sm:$0xff]  }
  0x18   : > { %1057 = vmatprep.subr.bf16.mxu1 %v3945_v13  ;;  %v3979_v36 = vld [vmem:[%s5923_s1 + $0x2e4] ss:$8 sps:$4 sm:$0xff]   ;;  %s5941_s30 = smov (!%p214_p4, %s213_s30), 23  ;;  %v3983_v38 = vld [vmem:[%s5923_s1 + $0x2e0] ss:$8 sps:$4 sm:$0xff]   ;;  %vm2556_vm1 = vcmask 1046528  }
  0x19   : > { %v3981_v37 = vld [vmem:[%s5923_s1 + $0x3e4] ss:$8 sps:$4 sm:$0xff]   ;;  %v3984_v39 = vld [vmem:[%s5923_s1 + $0x3e0] ss:$8 sps:$4 sm:$0xff]   ;;  %v3985_v40 = vld [vmem:[%s5923_s1 + $0x2d4] ss:$8 sps:$4 sm:$0xff]  }
  0x1a   : > { %977 = vmatpush1.bf16.msra.mxu0 %v3947_v14  ;;  %v3987_v41 = vld [vmem:[%s5923_s1 + $0x3d4] ss:$8 sps:$4 sm:$0xff]   ;;  %s3890_s6 = sshll.u32 %s5941_s30, 4  ;;  %v3989_v42 = vld [vmem:[%s5923_s1 + $0x2d0] ss:$8 sps:$4 sm:$0xff]   ;;  %s5943_s17 = smov (!%p233_p5, %s231_s17), 17 }
  0x1b   : > { %1058 = vmatpush1.bf16.msra.mxu1 %v3948_v15  ;;  %978 = vmatprep.subr.bf16.mxu0 %v3949_v16  ;;  %v3990_v43 = vld [vmem:[%s5923_s1 + $0x3d0] ss:$8 sps:$4 sm:$0xff]   ;;  %v3991_v44 = vld [vmem:[%s5923_s1 + $0x2c4] ss:$8 sps:$4 sm:$0xff]   ;;  %s4569_s20 = scalar_lea.vmem %s5922_s0, %s3890_s6  ;;  %v3995_v46 = vld [vmem:[%s5923_s1 + $0x2c0] ss:$8 sps:$4 sm:$0xff]  }
  0x1c   : > { %1059 = vmatprep.subr.bf16.mxu1 %v3951_v17  ;;  %v3993_v45 = vld [vmem:[%s5923_s1 + $0x3c4] ss:$8 sps:$4 sm:$0xff]   ;;  %v3996_v47 = vld [vmem:[%s5923_s1 + $0x3c0] ss:$8 sps:$4 sm:$0xff]   ;;  %v3997_v48 = vld [vmem:[%s5923_s1 + $0x2b4] ss:$8 sps:$4 sm:$0xff]  }
  0x1d   : > { %v3999_v49 = vld [vmem:[%s5923_s1 + $0x3b4] ss:$8 sps:$4 sm:$0xff]   ;;  %vm473_vm0 = vsmask.f32 7424  ;;  %v4001_v52 = vld [vmem:[%s5923_s1 + $0x2b0] ss:$8 sps:$4 sm:$0xff]  }
  0x1e   : > { %979 = vmatpush1.bf16.msra.mxu0 %v3953_v18  ;;  %v4584_v50 = vld [vmem:[%s4569_s20 + $0x4] ss:$16 sps:$4 sm:$0xff]   ;;  %v4596_v56 = vld [vmem:[%s4569_s20 + $0xc] ss:$16 sps:$4 sm:$0xff]   ;;  %v4002_v57 = vld [vmem:[%s5923_s1 + $0x3b0] ss:$8 sps:$4 sm:$0xff]  }
  0x1f   : > { %1060 = vmatpush1.bf16.msra.mxu1 %v3954_v19  ;;  %980 = vmatprep.subr.bf16.mxu0 %v3955_v20  ;;  %v4587_v51 = vld [vmem:[%s4569_s20 + $0x24] ss:$16 sps:$4 sm:$0xff]   ;;  %v487_v53 = vshrl.u32 %v4584_v50, 16  ;;  %v489_v54 = vshll.u32 %v4584_v50, 16  ;;  %v4602_v58 = vld [vmem:[%s4569_s20 + $0x2c] ss:$16 sps:$4 sm:$0xff]  }
  0x20   : > { %1061 = vmatprep.subr.bf16.mxu1 %v3957_v21  ;;  %v494_v55 = vshll.u32 %v4587_v51, 16  ;;  %v4605_v59 = vld [vmem:[%s4569_s20] ss:$16 sps:$4 sm:$0xff]   ;;  %v511_v62 = vshrl.u32 %v4596_v56, 16  ;;  %v513_v63 = vshll.u32 %v4596_v56, 16  ;;  %v518_v3 = vshll.u32 %v4602_v58, 16 }
  0x21   : > { %v491_v60 = vrot.slane %v489_v54, 1  ;;  %v4612_v0 = vld [vmem:[%s4569_s20 + $0x8] ss:$16 sps:$4 sm:$0xff]   ;;  %v4003_v1 = vld [vmem:[%s5923_s1 + $0x2a4] ss:$8 sps:$4 sm:$0xff]   ;;  %v477_v13 = vshll.u32 %v4605_v59, 16 }
  0x22   : > { %981 = vmatpush1.bf16.msra.mxu0 %v3959_v22  ;;  %v4607_v61 = vrot.slane %v494_v55, 1  ;;  %v4005_v2 = vld [vmem:[%s5923_s1 + $0x3a4] ss:$8 sps:$4 sm:$0xff]   ;;  %v4007_v4 = vld [vmem:[%s5923_s1 + $0x2a0] ss:$8 sps:$4 sm:$0xff]   ;;  %v515_v7 = vrot.slane %v513_v63, 1 }
  0x23   : > { %1062 = vmatpush1.bf16.msra.mxu1 %v3960_v23  ;;  %982 = vmatprep.subr.bf16.mxu0 %v3961_v24  ;;  %v4008_v5 = vld [vmem:[%s5923_s1 + $0x3a0] ss:$8 sps:$4 sm:$0xff]   ;;  %v492_v6 = vor.u32 %v491_v60, %v487_v53  ;;  %v4009_v8 = vld [vmem:[%s5923_s1 + $0x294] ss:$8 sps:$4 sm:$0xff]   ;;  %v4630_v9 = vrot.slane %v518_v3, 1  ;;  %v501_v15 = vshll.u32 %v4612_v0, 16 }
  0x24   : > { %1063 = vmatprep.subr.bf16.mxu1 %v3963_v25  ;;  %v4633_v10 = vld [vmem:[%s4569_s20 + $0x20] ss:$16 sps:$4 sm:$0xff]   ;;  %v516_v12 = vor.u32 %v515_v7, %v511_v62  ;;  %v4639_v14 = vld [vmem:[%s4569_s20 + $0x28] ss:$16 sps:$4 sm:$0xff]   ;;  %v4011_v16 = vld [vmem:[%s5923_s1 + $0x394] ss:$8 sps:$4 sm:$0xff]  }
  0x25   : > { %v497_v11 = vsel %vm473_vm0, %v492_v6, %v4607_v61  ;;  %v4013_v17 = vld [vmem:[%s5923_s1 + $0x290] ss:$8 sps:$4 sm:$0xff]   ;;  %v4015_v20 = vld [vmem:[%s5923_s1 + $0x284] ss:$8 sps:$4 sm:$0xff]   ;;  %v475_v21 = vshrl.u32 %v4605_v59, 16  ;;  %v482_v22 = vshll.u32 %v4633_v10, 16 }
  0x26   : > { %983 = vmatpush1.bf16.msra.mxu0 %v3965_v26  ;;  %v4014_v18 = vld [vmem:[%s5923_s1 + $0x390] ss:$8 sps:$4 sm:$0xff]   ;;  %1002 = vmatprep.mubr.bf16.mxu0 %v497_v11  ;;  %v521_v19 = vsel %vm473_vm0, %v516_v12, %v4630_v9  ;;  %v479_v23 = vrot.slane %v477_v13, 1  ;;  %v499_v24 = vshrl.u32 %v4612_v0, 16  ;;  %v503_v25 = vrot.slane %v501_v15, 1  ;;  %v4716_v55 = vld [vmem:[%s4569_s20 + $0x48] sm:$0xff] }
  0x27   : > { %1064 = vmatpush1.bf16.msra.mxu1 %v3966_v27  ;;  %984 = vmatprep.subr.bf16.mxu0 %v3967_v28  ;;  %v506_v26 = vshll.u32 %v4639_v14, 16  ;;  %v4017_v27 = vld [vmem:[%s5923_s1 + $0x384] ss:$8 sps:$4 sm:$0xff]   ;;  %v4019_v28 = vld [vmem:[%s5923_s1 + $0x280] ss:$8 sps:$4 sm:$0xff]   ;;  %v538_v53 = vshrl.u32 %v4639_v14, 16 }
  0x28   : > { %1065 = vmatprep.subr.bf16.mxu1 %v3969_v29  ;;  %1083 = vmatprep.mubr.bf16.mxu1 %v521_v19  ;;  %v4020_v29 = vld [vmem:[%s5923_s1 + $0x380] ss:$8 sps:$4 sm:$0xff]   ;;  %v4045_v62 = vld [vmem:[%s5923_s1 + $0x50] ss:$8 sps:$4 sm:$0xff]   ;;  %v4053_v3 = vld [vmem:[%s5923_s1 + $0x44] ss:$8 sps:$4 sm:$0xff]  }
  0x29   : > { %v4048_v63 = vld [vmem:[%s5923_s1 + $0x150] ss:$8 sps:$4 sm:$0xff]   ;;  %v4051_v15 = vld [vmem:[%s5923_s1 + $0x40] ss:$8 sps:$4 sm:$0xff]   ;;  %s3891_s12 = sshll.u32 %s5943_s17, 3 }
  0x2a   : > { %985 = vmatpush1.bf16.msra.mxu0 %v3971_v30  ;;  %v480_v30 = vor.u32 %v479_v23, %v475_v21  ;;  %v4062_v21 = vld [vmem:[%s5923_s1 + $0x134] ss:$8 sps:$4 sm:$0xff]   ;;  %s5861_s22 = scalar_lea.vmem %s5925_s3, %s3891_s12 }
  0x2b   : > { %1066 = vmatpush1.bf16.msra.mxu1 %v3972_v31  ;;  %986 = vmatprep.subr.bf16.mxu0 %v3973_v32  ;;  %v484_v31 = vrot.slane %v482_v22, 1  ;;  %v504_v32 = vor.u32 %v503_v25, %v499_v24  ;;  %v256_v24 = vld [vmem:[%s4569_s20 + $0x60] sm:$0xff]  ;;  %v4767_v25 = vld [vmem:[%s4569_s20 + $0x70] sm:$0xff] }
  0x2c   : > { %1067 = vmatprep.subr.bf16.mxu1 %v3975_v33  ;;  %v508_v33 = vrot.slane %v506_v26, 1 }
  0x2e   : > { %987 = vmatpush2.bf16.msra.mxu0 %v3977_v34  ;;  %v4035_v34 = vld [vmem:[%s5923_s1 + $0x74] ss:$8 sps:$4 sm:$0xff]   ;;  %v540_v13 = vor.u32 %v538_v53, %v508_v33 }
  0x2f   : > { %1068 = vmatpush2.bf16.msra.mxu1 %v3978_v35  ;;  %988 = vmatprep.subr.bf16.mxu0 %v3979_v36  ;;  %v4038_v35 = vld [vmem:[%s5923_s1 + $0x174] ss:$8 sps:$4 sm:$0xff]   ;;  %v4033_v36 = vld [vmem:[%s5923_s1 + $0x70] ss:$8 sps:$4 sm:$0xff]  }
  0x30   : > { %1069 = vmatprep.subr.bf16.mxu1 %v3981_v37  ;;  %v4036_v37 = vld [vmem:[%s5923_s1 + $0x170] ss:$8 sps:$4 sm:$0xff]  }
  0x32   : > { %989 = vmatpush2.bf16.msra.mxu0 %v3983_v38  ;;  %v485_v38 = vsel %vm473_vm0, %v480_v30, %v484_v31  ;;  %v4774_v30 = vcombine.high %v256_v24, %v4767_v25 }
  0x33   : > { %1070 = vmatpush2.bf16.msra.mxu1 %v3984_v39  ;;  %990 = vmatprep.subr.bf16.mxu0 %v3985_v40  ;;  %v509_v39 = vsel %vm473_vm0, %v504_v32, %v508_v33  ;;  %v4041_v40 = vld [vmem:[%s5923_s1 + $0x64] ss:$8 sps:$4 sm:$0xff]   ;;  %v4778_v32 = vld [vmem:[%s4569_s20 + $0x78] sm:$0xff] }
  0x34   : > { %1071 = vmatprep.subr.bf16.mxu1 %v3987_v41  ;;  %v4044_v41 = vld [vmem:[%s5923_s1 + $0x164] ss:$8 sps:$4 sm:$0xff]  }
  0x36   : > { %991 = vmatpush2.bf16.msra.mxu0 %v3989_v42  ;;  %v4039_v42 = vld [vmem:[%s5923_s1 + $0x60] ss:$8 sps:$4 sm:$0xff]  }
  0x37   : > { %1072 = vmatpush2.bf16.msra.mxu1 %v3990_v43  ;;  %992 = vmatprep.subr.bf16.mxu0 %v3991_v44  ;;  %v4042_v43 = vld [vmem:[%s5923_s1 + $0x160] ss:$8 sps:$4 sm:$0xff]   ;;  %v4047_v44 = vld [vmem:[%s5923_s1 + $0x54] ss:$8 sps:$4 sm:$0xff]  }
  0x38   : > { %1073 = vmatprep.subr.bf16.mxu1 %v3993_v45  ;;  %v530_v45 = vshrl.u32 %v4587_v51, 16 }
  0x3a   : > { %993 = vmatpush2.bf16.msra.mxu0 %v3995_v46  ;;  %v522_v46 = vshrl.u32 %v4633_v10, 16 }
  0x3b   : > { %1074 = vmatpush2.bf16.msra.mxu1 %v3996_v47  ;;  %994 = vmatprep.subr.bf16.mxu0 %v3997_v48  ;;  %v4050_v47 = vld [vmem:[%s5923_s1 + $0x154] ss:$8 sps:$4 sm:$0xff]   ;;  %v4704_v48 = vld [vmem:[%s4569_s20 + $0x40] sm:$0xff] }
  0x3c   : > { %1075 = vmatprep.subr.bf16.mxu1 %v3999_v49  ;;  %v4707_v49 = vld [vmem:[%s4569_s20 + $0x50] sm:$0xff]  ;;  %v524_v6 = vor.u32 %v522_v46, %v484_v31  ;;  %v257_v31 = vld [vmem:[%s4569_s20 + $0x68] sm:$0xff] }
  0x3d   : > { %v4713_v54 = vcombine.high %v4704_v48, %v4707_v49  ;;  %v4723_v60 = vcombine.low %v4704_v48, %v4707_v49 }
  0x3e   : > { %995 = vmatpush2.bf16.msra.mxu0 %v4001_v52  ;;  %v546_v52 = vshrl.u32 %v4602_v58, 16 }
  0x3f   : > { %1076 = vmatpush2.bf16.msra.mxu1 %v4002_v57  ;;  %996 = vmatprep.subr.bf16.mxu0 %v4003_v1  ;;  %v4719_v57 = vld [vmem:[%s4569_s20 + $0x58] sm:$0xff]  ;;  %v526_v7 = vshll.u32 %v4723_v60, 16  ;;  %v562_v26 = vshrl.u32 %v4713_v54, 16  ;;  %v554_v33 = vshrl.u32 %v4723_v60, 16 }
  0x40   : > { %1077 = vmatprep.subr.bf16.mxu1 %v4005_v2  ;;  %v4733_v1 = vcombine.high %v4716_v55, %v4719_v57  ;;  %v4737_v2 = vcombine.low %v4716_v55, %v4719_v57  ;;  %v548_v11 = vor.u32 %v546_v52, %v4630_v9  ;;  %v4059_v9 = vld [vmem:[%s5923_s1 + $0x34] ss:$8 sps:$4 sm:$0xff]   ;;  %v4068_v52 = vld [vmem:[%s5923_s1 + $0x124] ss:$8 sps:$4 sm:$0xff]  }
  0x42   : > { %997 = vmatpush2.bf16.msra.mxu0 %v4007_v4  ;;  %v532_v4 = vor.u32 %v530_v45, %v4607_v61  ;;  %v550_v12 = vshll.u32 %v4733_v1, 16  ;;  %v542_v61 = vshll.u32 %v4737_v2, 16 }
  0x43   : > { %1078 = vmatpush2.bf16.msra.mxu1 %v4008_v5  ;;  %998 = vmatprep.subr.bf16.mxu0 %v4009_v8  ;;  %v534_v5 = vshll.u32 %v4713_v54, 16  ;;  %v4056_v8 = vld [vmem:[%s5923_s1 + $0x144] ss:$8 sps:$4 sm:$0xff]  }
  0x44   : > { %1079 = vmatprep.subr.bf16.mxu1 %v4011_v16  ;;  %v4054_v16 = vld [vmem:[%s5923_s1 + $0x140] ss:$8 sps:$4 sm:$0xff]   ;;  %v552_v19 = vrot.slane %v550_v12, 1 }
  0x46   : > { %999 = vmatpush2.bf16.msra.mxu0 %v4013_v17  ;;  %v536_v17 = vrot.slane %v534_v5, 1  ;;  %v4066_v5 = vld [vmem:[%s5923_s1 + $0x120] ss:$8 sps:$4 sm:$0xff]  }
  0x47   : > { %1080 = vmatpush2.bf16.msra.mxu1 %v4014_v18  ;;  %1000 = vmatprep.subr.bf16.mxu0 %v4015_v20  ;;  %v528_v18 = vrot.slane %v526_v7, 1  ;;  %v544_v20 = vrot.slane %v542_v61, 1  ;;  %v4820_v7 = vcombine.low %v4707_v49, %v256_v24 }
  0x48   : > { %1081 = vmatprep.subr.bf16.mxu1 %v4017_v27  ;;  %v537_v22 = vsel %vm473_vm0, %v532_v4, %v536_v17  ;;  %v578_v27 = vshrl.u32 %v4733_v1, 16  ;;  %v4063_v4 = vld [vmem:[%s5923_s1 + $0x20] ss:$8 sps:$4 sm:$0xff]  }
  0x49   : > { %v529_v23 = vsel %vm473_vm0, %v524_v6, %v528_v18  ;;  %v556_v45 = vor.u32 %v554_v33, %v528_v18  ;;  %v327_v18 = vld [vmem:[%s4569_s20 + $0x98] sm:$0x11] }
  0x4a   : > { %1001 = vmatpush2.bf16.msra.mxu0 %v4019_v28  ;;  %v553_v28 = vsel %vm473_vm0, %v548_v11, %v552_v19  ;;  %v4071_v11 = vld [vmem:[%s5923_s1 + $0x14] ss:$8 sps:$4 sm:$0xff]  }
  0x4b   : > { %1082 = vmatpush2.bf16.msra.mxu1 %v4020_v29  ;;  %1476 = vmatprep.subr.bf16.mxu0 %v4035_v34  ;;  %v545_v29 = vsel %vm473_vm0, %v540_v13, %v544_v20  ;;  %v4057_v34 = vld [vmem:[%s5923_s1 + $0x30] ss:$8 sps:$4 sm:$0xff]  }
  0x4c   : > { %1557 = vmatprep.subr.bf16.mxu1 %v4038_v35  ;;  %v564_v35 = vor.u32 %v562_v26, %v536_v17  ;;  %v4834_v17 = vld [vmem:[%s4569_s20 + $0x88] sm:$0xff] }
  0x4d   : > { %1003 = vmatmul.mubr.bf16.vlgmr.msra.gmra.mxu0 %v485_v38  ;;  %v4060_v38 = vld [vmem:[%s5923_s1 + $0x130] ss:$8 sps:$4 sm:$0xff]   ;;  %v3466_v26 = vcombine.high %v4834_v17, %v327_v18 }
  0x4e   : > { %1084 = vmatmul.mubr.bf16.vlgmr.msra.gmra.mxu1 %v509_v39  ;;  %1477 = vmatpush1.bf16.msra.mxu0 %v4033_v36  ;;  %v4785_v36 = vcombine.high %v257_v31, %v4778_v32  ;;  %v566_v39 = vshll.u32 %v4774_v30, 16 }
  0x4f   : > { %1558 = vmatpush1.bf16.msra.mxu1 %v4036_v37  ;;  %1478 = vmatprep.subr.bf16.mxu0 %v4041_v40  ;;  %v570_v37 = vshrl.u32 %v4737_v2, 16  ;;  %v580_v40 = vor.u32 %v578_v27, %v552_v19 }
  0x50   : > { %1559 = vmatprep.subr.bf16.mxu1 %v4044_v41  ;;  %1012 = vmatprep.mubr.bf16.mxu0 %v537_v22  ;;  %v4793_v41 = vcombine.low %v256_v24, %v4767_v25  ;;  %v568_v53 = vrot.slane %v566_v39, 1 }
  0x51   : > { %1093 = vmatprep.mubr.bf16.mxu1 %v553_v28  ;;  %v572_v46 = vor.u32 %v570_v37, %v544_v20  ;;  %v4074_v20 = vld [vmem:[%s5923_s1 + $0x114] ss:$8 sps:$4 sm:$0xff]   ;;  %v4069_v28 = vld [vmem:[%s5923_s1 + $0x10] ss:$8 sps:$4 sm:$0xff]  }
  0x52   : > { %1479 = vmatpush1.bf16.msra.mxu0 %v4039_v42  ;;  %v4796_v42 = vcombine.low %v257_v31, %v4778_v32  ;;  %v569_v12 = vsel %vm473_vm0, %v564_v35, %v568_v53  ;;  %v586_v19 = vshrl.u32 %v4793_v41, 16  ;;  %v4081_v35 = vld [vmem:[%s5923_s1 + $0x4] ss:$8 sps:$4 sm:$0xff]  }
  0x53   : > { %1560 = vmatpush1.bf16.msra.mxu1 %v4042_v43  ;;  %1480 = vmatprep.subr.bf16.mxu0 %v4047_v44  ;;  %v4065_v43 = vld [vmem:[%s5923_s1 + $0x24] ss:$8 sps:$4 sm:$0xff]   ;;  %v582_v44 = vshll.u32 %v4785_v36, 16 }
  0x54   : > { %1561 = vmatprep.subr.bf16.mxu1 %v4050_v47  ;;  %v4803_v47 = vcombine.high %v4707_v49, %v256_v24  ;;  %v602_v24 = vshrl.u32 %v4796_v42, 16 }
  0x55   : > { %1013 = vmatmul.mubr.bf16.gmra.mxu0 %v529_v23  ;;  %v584_v6 = vrot.slane %v582_v44, 1 }
  0x56   : > { %1481 = vmatpush1.bf16.msra.mxu0 %v4045_v62  ;;  %1094 = vmatmul.mubr.bf16.gmra.mxu1 %v545_v29  ;;  %v558_v62 = vshll.u32 %v4793_v41, 16  ;;  %v4072_v29 = vld [vmem:[%s5923_s1 + $0x110] ss:$8 sps:$4 sm:$0xff]  }
  0x57   : > { %1562 = vmatpush1.bf16.msra.mxu1 %v4048_v63  ;;  %1482 = vmatprep.subr.bf16.mxu0 %v4053_v3  ;;  %v574_v63 = vshll.u32 %v4796_v42, 16  ;;  %v4811_v3 = vcombine.high %v4719_v57, %v257_v31  ;;  %v585_v49 = vsel %vm473_vm0, %v580_v40, %v584_v6 }
  0x58   : > { %1563 = vmatprep.subr.bf16.mxu1 %v4056_v8  ;;  %v4823_v8 = vcombine.low %v4719_v57, %v257_v31  ;;  %v560_v13 = vrot.slane %v558_v62, 1  ;;  %v326_v57 = vld [vmem:[%s4569_s20 + $0x90] sm:$0x11]  ;;  %1022 = vmatprep.mubr.bf16.mxu0 %v569_v12  ;;  %v627_v12 = vshrl.u32 %v3466_v26, 16 }
  0x59   : > { %v576_v61 = vrot.slane %v574_v63, 1  ;;  %1103 = vmatprep.mubr.bf16.mxu1 %v585_v49  ;;  %v4087_v49 = vld [vmem:[%s5923_s1 + $0xf4] ss:$8 sps:$4 sm:$0xff]  }
  0x5a   : > { %1483 = vmatpush1.bf16.msra.mxu0 %v4051_v15  ;;  %v4830_v15 = vld [vmem:[%s4569_s20 + $0x80] sm:$0xff]  ;;  %v588_v39 = vor.u32 %v586_v19, %v560_v13  ;;  %v1863_v19 = vshll.u32 %v4803_v47, 16 }
  0x5b   : > { %1564 = vmatpush1.bf16.msra.mxu1 %v4054_v16  ;;  %1484 = vmatprep.subr.bf16.mxu0 %v4059_v9  ;;  %v594_v16 = vshrl.u32 %v4774_v30, 16  ;;  %v610_v9 = vshrl.u32 %v4785_v36, 16  ;;  %v577_v22 = vsel %vm473_vm0, %v572_v46, %v576_v61  ;;  %v3464_v23 = vcombine.high %v4830_v15, %v326_v57 }
  0x5c   : > { %1565 = vmatprep.subr.bf16.mxu1 %v4062_v21  ;;  %v561_v21 = vsel %vm473_vm0, %v556_v45, %v560_v13  ;;  %v4850_v27 = vcombine.low %v4830_v15, %v326_v57  ;;  %v604_v45 = vor.u32 %v602_v24, %v576_v61  ;;  %v4868_v63 = vcombine.high %v4767_v25, %v4830_v15  ;;  %v4082_v13 = vld [vmem:[%s5923_s1 + $0x100] ss:$8 sps:$4 sm:$0xff]   ;;  %v4090_v57 = vld [vmem:[%s5923_s1 + $0x1f4] ss:$8 sps:$4 sm:$0xff]  }
  0x5d   : > { %1023 = vmatmul.mubr.bf16.gmra.mxu0 %v561_v21  ;;  %v596_v31 = vor.u32 %v594_v16, %v568_v53  ;;  %v598_v33 = vshll.u32 %v3464_v23, 16  ;;  %v612_v37 = vor.u32 %v610_v9, %v584_v6  ;;  %v4085_v21 = vld [vmem:[%s5923_s1 + $0xf0] ss:$8 sps:$4 sm:$0xff]  }
  0x5e   : > { %1485 = vmatpush1.bf16.msra.mxu0 %v4057_v34  ;;  %1104 = vmatmul.mubr.bf16.gmra.mxu1 %v577_v22  ;;  %v3465_v34 = vcombine.low %v4834_v17, %v327_v18  ;;  %v590_v40 = vshll.u32 %v4850_v27, 16 }
  0x5f   : > { %1566 = vmatpush1.bf16.msra.mxu1 %v4060_v38  ;;  %1486 = vmatprep.subr.bf16.mxu0 %v4065_v43  ;;  %v614_v38 = vshll.u32 %v3466_v26, 16  ;;  %v4084_v43 = vld [vmem:[%s5923_s1 + $0x104] ss:$8 sps:$4 sm:$0xff]   ;;  %v600_v44 = vrot.slane %v598_v33, 1  ;;  %v4901_v26 = vcombine.low %v4778_v32, %v4834_v17  ;;  %v1855_v33 = vshll.u32 %v4820_v7, 16 }
  0x60   : > { %1567 = vmatprep.subr.bf16.mxu1 %v4068_v52  ;;  %v606_v46 = vshll.u32 %v3465_v34, 16  ;;  %v621_v52 = vshrl.u32 %v3464_v23, 16  ;;  %v592_v62 = vrot.slane %v590_v40, 1  ;;  %v618_v23 = vshrl.u32 %v4850_v27, 16 }
  0x61   : > { %v616_v53 = vrot.slane %v614_v38, 1  ;;  %v601_v6 = vsel %vm473_vm0, %v596_v31, %v600_v44  ;;  %v624_v24 = vshrl.u32 %v3465_v34, 16  ;;  %v1891_v27 = vshrl.u32 %v4803_v47, 16  ;;  %v4095_v34 = vld [vmem:[%s5923_s1 + $0xe0] ss:$8 sps:$4 sm:$0xff]  }
  0x62   : > { %1487 = vmatpush1.bf16.msra.mxu0 %v4063_v4  ;;  %v4872_v4 = vcombine.high %v4778_v32, %v4834_v17  ;;  %v593_v16 = vsel %vm473_vm0, %v588_v39, %v592_v62  ;;  %v623_v9 = vor.u32 %v621_v52, %v600_v44  ;;  %1032 = vmatprep.mubr.bf16.mxu0 %v601_v6  ;;  %v4100_v32 = vld [vmem:[%s5923_s1 + $0x1e4] ss:$8 sps:$4 sm:$0xff]   ;;  %v4914_v31 = vrot.slane %v1863_v19, 1 }
  0x63   : > { %1568 = vmatpush1.bf16.msra.mxu1 %v4066_v5  ;;  %1488 = vmatprep.subr.bf16.mxu0 %v4071_v11  ;;  %v4079_v5 = vld [vmem:[%s5923_s1] ss:$8 sps:$4 sm:$0xff]   ;;  %v608_v11 = vrot.slane %v606_v46, 1  ;;  %v617_v61 = vsel %vm473_vm0, %v612_v37, %v616_v53  ;;  %v629_v22 = vor.u32 %v627_v12, %v616_v53  ;;  %v620_v37 = vor.u32 %v618_v23, %v592_v62  ;;  %v4103_v46 = vld [vmem:[%s5923_s1 + $0xd4] ss:$8 sps:$4 sm:$0xff]  }
  0x64   : > { %1569 = vmatprep.subr.bf16.mxu1 %v4074_v20  ;;  %v4893_v20 = vcombine.low %v4767_v25, %v4830_v15  ;;  %1113 = vmatprep.mubr.bf16.mxu1 %v617_v61  ;;  %v1879_v25 = vshll.u32 %v4811_v3, 16  ;;  %v1871_v39 = vshll.u32 %v4823_v8, 16  ;;  %v1895_v44 = vshll.u32 %v4868_v63, 16  ;;  %v4106_v62 = vld [vmem:[%s5923_s1 + $0x1d4] ss:$8 sps:$4 sm:$0xff]  }
  0x65   : > { %v609_v18 = vsel %vm473_vm0, %v604_v45, %v608_v11  ;;  %1033 = vmatmul.mubr.bf16.gmra.mxu0 %v593_v16  ;;  %v626_v38 = vor.u32 %v624_v24, %v608_v11  ;;  %v1907_v45 = vshrl.u32 %v4811_v3, 16  ;;  %v1911_v52 = vshll.u32 %v4872_v4, 16  ;;  %v4101_v61 = vld [vmem:[%s5923_s1 + $0xd0] ss:$8 sps:$4 sm:$0xff]   ;;  %v4116_v23 = vld [vmem:[%s5923_s1 + $0x1c4] ss:$8 sps:$4 sm:$0xff]  }
  0x66   : > { %1489 = vmatpush1.bf16.msra.mxu0 %v4069_v28  ;;  %v4088_v28 = vld [vmem:[%s5923_s1 + $0x1f0] ss:$8 sps:$4 sm:$0xff]   ;;  %1114 = vmatmul.mubr.bf16.gmra.mxu1 %v609_v18  ;;  %v4924_v40 = vrot.slane %v1879_v25, 1  ;;  %v1883_v53 = vshrl.u32 %v4820_v7, 16  ;;  %v4939_v6 = vrot.slane %v1895_v44, 1  ;;  %v4942_v12 = vrot.slane %v1871_v39, 1 }
  0x67   : > { %1570 = vmatpush1.bf16.msra.mxu1 %v4072_v29  ;;  %1490 = vmatprep.subr.bf16.mxu0 %v4081_v35  ;;  %v4097_v29 = vld [vmem:[%s5923_s1 + $0xe4] ss:$8 sps:$4 sm:$0xff]   ;;  %v4098_v35 = vld [vmem:[%s5923_s1 + $0x1e0] ss:$8 sps:$4 sm:$0xff]   ;;  %v1899_v18 = vshrl.u32 %v4823_v8, 16 }
  0x68   : > { %1571 = vmatprep.subr.bf16.mxu1 %v4084_v43  ;;  %1042 = vmatprep.mubr.bf16.mxu0 %v623_v9  ;;  %v1893_v43 = vor.u32 %v1891_v27, %v4914_v31  ;;  %v1909_v11 = vor.u32 %v1907_v45, %v4924_v40  ;;  %v4104_v9 = vld [vmem:[%s5923_s1 + $0x1d0] ss:$8 sps:$4 sm:$0xff]   ;;  %v4123_v39 = vld [vmem:[%s5923_s1 + $0xa0] ss:$8 sps:$4 sm:$0xff]   ;;  %v4131_v44 = vld [vmem:[%s5923_s1 + $0x94] ss:$8 sps:$4 sm:$0xff]  }
  0x69   : > { %1123 = vmatprep.mubr.bf16.mxu1 %v629_v22  ;;  %v4113_v22 = vld [vmem:[%s5923_s1 + $0xc4] ss:$8 sps:$4 sm:$0xff]   ;;  %v4134_v45 = vld [vmem:[%s5923_s1 + $0x194] ss:$8 sps:$4 sm:$0xff]  }
  0x6a   : > { %1491 = vmatpush1.bf16.msra.mxu0 %v4079_v5  ;;  %v4937_v5 = vrot.slane %v1855_v33, 1  ;;  %v4951_v16 = vsel %vm473_vm0, %v1893_v43, %v4939_v6  ;;  %v4122_v33 = vld [vmem:[%s5923_s1 + $0x1b4] ss:$8 sps:$4 sm:$0xff]   ;;  %v4126_v43 = vld [vmem:[%s5923_s1 + $0x1a0] ss:$8 sps:$4 sm:$0xff]  }
  0x6b   : > { %1572 = vmatpush1.bf16.msra.mxu1 %v4082_v13  ;;  %1492 = vmatprep.subr.bf16.mxu0 %v4087_v49  ;;  %v4944_v13 = vrot.slane %v1911_v52, 1  ;;  %v4132_v52 = vld [vmem:[%s5923_s1 + $0x190] ss:$8 sps:$4 sm:$0xff]  }
  0x6c   : > { %1573 = vmatprep.subr.bf16.mxu1 %v4090_v57  ;;  %v1885_v49 = vor.u32 %v1883_v53, %v4937_v5  ;;  %v1887_v57 = vshll.u32 %v4893_v20, 16  ;;  %v4137_v53 = vld [vmem:[%s5923_s1 + $0x84] ss:$8 sps:$4 sm:$0xff]  }
  0x6d   : > { %1043 = vmatmul.mubr.bf16.gmra.mxu0 %v620_v37  ;;  %v4961_v19 = vsel %vm473_vm0, %v1909_v11, %v4944_v13  ;;  %v4125_v37 = vld [vmem:[%s5923_s1 + $0xa4] ss:$8 sps:$4 sm:$0xff]   ;;  %v4135_v11 = vld [vmem:[%s5923_s1 + $0x80] ss:$8 sps:$4 sm:$0xff]  }
  0x6e   : > { %1493 = vmatpush2.bf16.msra.mxu0 %v4085_v21  ;;  %1124 = vmatmul.mubr.bf16.gmra.mxu1 %v626_v38  ;;  %v1903_v21 = vshll.u32 %v4901_v26, 16  ;;  %v4970_v24 = vrot.slane %v1887_v57, 1  ;;  %v4128_v38 = vld [vmem:[%s5923_s1 + $0x1a4] ss:$8 sps:$4 sm:$0xff]   ;;  %v4146_v57 = vld [vmem:[%s5923_s1 + $0x574] ss:$8 sps:$4 sm:$0xff]  }
  0x6f   : > { %1574 = vmatpush2.bf16.msra.mxu1 %v4088_v28  ;;  %1494 = vmatprep.subr.bf16.mxu0 %v4097_v29  ;;  %v1901_v28 = vor.u32 %v1899_v18, %v4942_v12  ;;  %v4111_v29 = vld [vmem:[%s5923_s1 + $0xc0] ss:$8 sps:$4 sm:$0xff]   ;;  %v4141_v18 = vld [vmem:[%s5923_s1 + $0x470] ss:$8 sps:$4 sm:$0xff]  }
  0x70   : > { %1575 = vmatprep.subr.bf16.mxu1 %v4100_v32  ;;  %1508 = vmatprep.mubr.bf16.mxu0 %v4584_v50  ;;  %v4975_v25 = vrot.slane %v1903_v21, 1  ;;  %v4982_v27 = vsel %vm473_vm0, %v1885_v49, %v4970_v24  ;;  %v4114_v32 = vld [vmem:[%s5923_s1 + $0x1c0] ss:$8 sps:$4 sm:$0xff]   ;;  %v4143_v49 = vld [vmem:[%s5923_s1 + $0x474] ss:$8 sps:$4 sm:$0xff]  }
  0x71   : > { %1589 = vmatprep.mubr.bf16.mxu1 %v4596_v56  ;;  %v4119_v56 = vld [vmem:[%s5923_s1 + $0xb4] ss:$8 sps:$4 sm:$0xff]   ;;  %v4149_v21 = vld [vmem:[%s5923_s1 + $0x464] ss:$8 sps:$4 sm:$0xff]  }
  0x72   : > { %1495 = vmatpush2.bf16.msra.mxu0 %v4095_v34  ;;  %v4989_v50 = vsel %vm473_vm0, %v1901_v28, %v4975_v25  ;;  %v4117_v34 = vld [vmem:[%s5923_s1 + $0xb0] ss:$8 sps:$4 sm:$0xff]   ;;  %v4150_v28 = vld [vmem:[%s5923_s1 + $0x560] ss:$8 sps:$4 sm:$0xff]  }
  0x73   : > { %1576 = vmatpush2.bf16.msra.mxu1 %v4098_v35  ;;  %1496 = vmatprep.subr.bf16.mxu0 %v4103_v46  ;;  %v4120_v35 = vld [vmem:[%s5923_s1 + $0x1b0] ss:$8 sps:$4 sm:$0xff]  }
  0x74   : > { %1577 = vmatprep.subr.bf16.mxu1 %v4106_v62  ;;  %v4129_v46 = vld [vmem:[%s5923_s1 + $0x90] ss:$8 sps:$4 sm:$0xff]   ;;  %v4140_v62 = vld [vmem:[%s5923_s1 + $0x184] ss:$8 sps:$4 sm:$0xff]  }
  0x76   : > { %1497 = vmatpush2.bf16.msra.mxu0 %v4101_v61  ;;  %v4138_v61 = vld [vmem:[%s5923_s1 + $0x180] ss:$8 sps:$4 sm:$0xff]  }
  0x77   : > { %1578 = vmatpush2.bf16.msra.mxu1 %v4104_v9  ;;  %1498 = vmatprep.subr.bf16.mxu0 %v4113_v22  ;;  %v4144_v9 = vld [vmem:[%s5923_s1 + $0x570] ss:$8 sps:$4 sm:$0xff]   ;;  %v4152_v22 = vld [vmem:[%s5923_s1 + $0x564] ss:$8 sps:$4 sm:$0xff]  }
  0x78   : > { %1579 = vmatprep.subr.bf16.mxu1 %v4116_v23  ;;  %v4147_v23 = vld [vmem:[%s5923_s1 + $0x460] ss:$8 sps:$4 sm:$0xff]  }
  0x7a   : > { %1499 = vmatpush2.bf16.msra.mxu0 %v4111_v29  ;;  %v4155_v29 = vld [vmem:[%s5923_s1 + $0x454] ss:$8 sps:$4 sm:$0xff]  }
  0x7b   : > { %1580 = vmatpush2.bf16.msra.mxu1 %v4114_v32  ;;  %1500 = vmatprep.subr.bf16.mxu0 %v4119_v56  ;;  %v4156_v32 = vld [vmem:[%s5923_s1 + $0x550] ss:$8 sps:$4 sm:$0xff]   ;;  %v4161_v56 = vld [vmem:[%s5923_s1 + $0x444] ss:$8 sps:$4 sm:$0xff]  }
  0x7c   : > { %1581 = vmatprep.subr.bf16.mxu1 %v4122_v33  ;;  %v4162_v33 = vld [vmem:[%s5923_s1 + $0x540] ss:$8 sps:$4 sm:$0xff]  }
  0x7e   : > { %1501 = vmatpush2.bf16.msra.mxu0 %v4117_v34  ;;  %v2571_v34 = vrot.slane %v4803_v47, 1 }
  0x7f   : > { %1582 = vmatpush2.bf16.msra.mxu1 %v4120_v35  ;;  %1502 = vmatprep.subr.bf16.mxu0 %v4125_v37  ;;  %v2579_v35 = vrot.slane %v4868_v63, 1  ;;  %v2575_v37 = vrot.slane %v4811_v3, 1 }
  0x80   : > { %1583 = vmatprep.subr.bf16.mxu1 %v4128_v38  ;;  %v2569_v38 = vrot.slane %v4820_v7, 1  ;;  %v3533_v7 = vcombine.low %v4834_v17, %v4834_v17 }
  0x82   : > { %1503 = vmatpush2.bf16.msra.mxu0 %v4123_v39  ;;  %v2583_v39 = vrot.slane %v4872_v4, 1 }
  0x83   : > { %1584 = vmatpush2.bf16.msra.mxu1 %v4126_v43  ;;  %1504 = vmatprep.subr.bf16.mxu0 %v4131_v44  ;;  %v2577_v43 = vrot.slane %v4893_v20, 1  ;;  %v5110_v44 = vsel %vm2556_vm1, %v2571_v34, %v2579_v35 }
  0x84   : > { %1585 = vmatprep.subr.bf16.mxu1 %v4134_v45  ;;  %v4165_v45 = vld [vmem:[%s5923_s1 + $0x430] ss:$8 sps:$4 sm:$0xff]  }
  0x86   : > { %1505 = vmatpush2.bf16.msra.mxu0 %v4129_v46  ;;  %v4168_v46 = vld [vmem:[%s5923_s1 + $0x530] ss:$8 sps:$4 sm:$0xff]  }
  0x87   : > { %1586 = vmatpush2.bf16.msra.mxu1 %v4132_v52  ;;  %1506 = vmatprep.subr.bf16.mxu0 %v4137_v53  ;;  %v5125_v52 = vsel %vm2556_vm1, %v2575_v37, %v2583_v39  ;;  %v4173_v53 = vld [vmem:[%s5923_s1 + $0x424] ss:$8 sps:$4 sm:$0xff]  }
  0x88   : > { %1587 = vmatprep.subr.bf16.mxu1 %v4140_v62  ;;  %v5141_v62 = vld [vmem:[%s4569_s20 + $0x10] sm:$0xff] }
  0x8a   : > { %1507 = vmatpush2.bf16.msra.mxu0 %v4135_v11  ;;  %v5144_v11 = vld [vmem:[%s4569_s20 + $0x20] sm:$0xff] }
  0x8b   : > { %1588 = vmatpush2.bf16.msra.mxu1 %v4138_v61  ;;  %2299 = vmatprep.subr.bf16.mxu0 %v4143_v49  ;;  %v5147_v61 = vld [vmem:[%s4569_s20 + $0x18] sm:$0xff]  ;;  %v5150_v49 = vld [vmem:[%s4569_s20 + $0x28] sm:$0xff] }
  0x8c   : > { %2380 = vmatprep.subr.bf16.mxu1 %v4146_v57  ;;  %v1642_v57 = vld [vmem:[%s4569_s20 + $0x30] sm:$0xff] }
  0x8d   : > { %1509 = vmatmul.mubr.bf16.vlgmr.msra.gmra.mxu0 %v4605_v59  ;;  %v4158_v59 = vld [vmem:[%s5923_s1 + $0x554] ss:$8 sps:$4 sm:$0xff]  }
  0x8e   : > { %1590 = vmatmul.mubr.bf16.vlgmr.msra.gmra.mxu1 %v4612_v0  ;;  %2300 = vmatpush1.bf16.msra.mxu0 %v4141_v18  ;;  %v4153_v0 = vld [vmem:[%s5923_s1 + $0x450] ss:$8 sps:$4 sm:$0xff]   ;;  %v5155_v18 = vcombine.high %v5141_v62, %v5144_v11 }
  0x8f   : > { %2381 = vmatpush1.bf16.msra.mxu1 %v4144_v9  ;;  %2301 = vmatprep.subr.bf16.mxu0 %v4149_v21  ;;  %v4171_v9 = vld [vmem:[%s5923_s1 + $0x420] ss:$8 sps:$4 sm:$0xff]  }
  0x90   : > { %2382 = vmatprep.subr.bf16.mxu1 %v4152_v22  ;;  %1518 = vmatprep.mubr.bf16.mxu0 %v4587_v51  ;;  %v4164_v51 = vld [vmem:[%s5923_s1 + $0x544] ss:$8 sps:$4 sm:$0xff]   ;;  %v4174_v21 = vld [vmem:[%s5923_s1 + $0x520] ss:$8 sps:$4 sm:$0xff]   ;;  %v3666_v22 = vcombine.high %v5147_v61, %v5150_v49 }
  0x91   : > { %1599 = vmatprep.mubr.bf16.mxu1 %v4602_v58  ;;  %v4159_v58 = vld [vmem:[%s5923_s1 + $0x440] ss:$8 sps:$4 sm:$0xff]  }
  0x92   : > { %2302 = vmatpush1.bf16.msra.mxu0 %v4147_v23  ;;  %v1643_v23 = vld [vmem:[%s4569_s20 + $0x38] sm:$0xff] }
  0x93   : > { %2383 = vmatpush1.bf16.msra.mxu1 %v4150_v28  ;;  %2303 = vmatprep.subr.bf16.mxu0 %v4155_v29  ;;  %v5175_v28 = vcombine.high %v1642_v57, %v4704_v48  ;;  %v1818_v29 = vshll.u32 %v5155_v18, 16 }
  0x94   : > { %2384 = vmatprep.subr.bf16.mxu1 %v4158_v59  ;;  %v4177_v59 = vld [vmem:[%s5923_s1 + $0x410] ss:$8 sps:$4 sm:$0xff]  }
  0x95   : > { %1519 = vmatmul.mubr.bf16.gmra.mxu0 %v4633_v10  ;;  %v4167_v10 = vld [vmem:[%s5923_s1 + $0x434] ss:$8 sps:$4 sm:$0xff]  }
  0x96   : > { %1600 = vmatmul.mubr.bf16.gmra.mxu1 %v4639_v14  ;;  %2304 = vmatpush1.bf16.msra.mxu0 %v4153_v0  ;;  %v4170_v14 = vld [vmem:[%s5923_s1 + $0x534] ss:$8 sps:$4 sm:$0xff]   ;;  %v4180_v0 = vld [vmem:[%s5923_s1 + $0x510] ss:$8 sps:$4 sm:$0xff]  }
  0x97   : > { %2385 = vmatpush1.bf16.msra.mxu1 %v4156_v32  ;;  %2305 = vmatprep.subr.bf16.mxu0 %v4161_v56  ;;  %v5187_v32 = vcombine.high %v1643_v23, %v4716_v55  ;;  %v1842_v56 = vshll.u32 %v3666_v22, 16 }
  0x98   : > { %2386 = vmatprep.subr.bf16.mxu1 %v4164_v51  ;;  %1528 = vmatprep.mubr.bf16.mxu0 %v4713_v54  ;;  %v5132_v54 = vsel %vm2556_vm1, %v2569_v38, %v2577_v43  ;;  %v3532_v51 = vcombine.high %v4830_v15, %v4830_v15 }
  0x99   : > { %1609 = vmatprep.mubr.bf16.mxu1 %v4733_v1  ;;  %v4176_v1 = vld [vmem:[%s5923_s1 + $0x524] ss:$8 sps:$4 sm:$0xff]  }
  0x9a   : > { %2306 = vmatpush1.bf16.msra.mxu0 %v4159_v58  ;;  %v3534_v58 = vcombine.high %v4834_v17, %v4834_v17  ;;  %v4201_v17 = vld [vmem:[%s5923_s1 + $0x4e4] ss:$8 sps:$4 sm:$0xff]  }
  0x9b   : > { %2387 = vmatpush1.bf16.msra.mxu1 %v4162_v33  ;;  %2307 = vmatprep.subr.bf16.mxu0 %v4167_v10  ;;  %v5200_v33 = vcombine.low %v1642_v57, %v4704_v48  ;;  %v2573_v10 = vrot.slane %v4823_v8, 1  ;;  %v1840_v48 = vshrl.u32 %v3666_v22, 16  ;;  %v2561_v57 = vrot.slane %v5175_v28, 1  ;;  %v4186_v22 = vld [vmem:[%s5923_s1 + $0x500] ss:$8 sps:$4 sm:$0xff]  }
  0x9c   : > { %2388 = vmatprep.subr.bf16.mxu1 %v4170_v14  ;;  %v1816_v14 = vshrl.u32 %v5155_v18, 16  ;;  %v5930_v8 = vrot.slane %v5187_v32, 1  ;;  %v1844_v18 = vrot.slane %v1842_v56, 1 }
  0x9d   : > { %1529 = vmatmul.mubr.bf16.gmra.mxu0 %v4723_v60  ;;  %v4179_v60 = vld [vmem:[%s5923_s1 + $0x414] ss:$8 sps:$4 sm:$0xff]  }
  0x9e   : > { %1610 = vmatmul.mubr.bf16.gmra.mxu1 %v4737_v2  ;;  %2308 = vmatpush1.bf16.msra.mxu0 %v4165_v45  ;;  %v4182_v2 = vld [vmem:[%s5923_s1 + $0x514] ss:$8 sps:$4 sm:$0xff]   ;;  %v1823_v45 = vshll.u32 %v5175_v28, 16 }
  0x9f   : > { %2389 = vmatpush1.bf16.msra.mxu1 %v4168_v46  ;;  %2309 = vmatprep.subr.bf16.mxu0 %v4173_v53  ;;  %v5206_v46 = vcombine.low %v1643_v23, %v4716_v55  ;;  %v2581_v53 = vrot.slane %v4901_v26, 1  ;;  %v1847_v55 = vshll.u32 %v5187_v32, 16 }
  0xa0   : > { %2390 = vmatprep.subr.bf16.mxu1 %v4176_v1  ;;  %1538 = vmatprep.mubr.bf16.mxu0 %v4774_v30  ;;  %v4185_v30 = vld [vmem:[%s5923_s1 + $0x404] ss:$8 sps:$4 sm:$0xff]   ;;  %v4183_v1 = vld [vmem:[%s5923_s1 + $0x400] ss:$8 sps:$4 sm:$0xff]  }
  0xa1   : > { %1619 = vmatprep.mubr.bf16.mxu1 %v4785_v36  ;;  %v4188_v36 = vld [vmem:[%s5923_s1 + $0x504] ss:$8 sps:$4 sm:$0xff]   ;;  %v2564_v23 = vrot.slane %v5206_v46, 1  ;;  %v5268_v56 = vrot.slane %v1847_v55, 1 }
  0xa2   : > { %2310 = vmatpush1.bf16.msra.mxu0 %v4171_v9  ;;  %v1820_v9 = vrot.slane %v1818_v29, 1  ;;  %v5308_v55 = vld [vmem:[%s4569_s20 + $0x94] ss:$16 sps:$4 sm:$0x1f]  }
  0xa3   : > { %2391 = vmatpush1.bf16.msra.mxu1 %v4174_v21  ;;  %2311 = vmatprep.subr.bf16.mxu0 %v4179_v60  ;;  %v2558_v21 = vrot.slane %v5200_v33, 1  ;;  %v4193_v60 = vld [vmem:[%s5923_s1 + $0x4f4] ss:$8 sps:$4 sm:$0xff]   ;;  %v5252_v3 = vsel %vm2556_vm1, %v2564_v23, %v2573_v10 }
  0xa4   : > { %2392 = vmatprep.subr.bf16.mxu1 %v4182_v2  ;;  %v4196_v2 = vld [vmem:[%s5923_s1 + $0x5f4] ss:$8 sps:$4 sm:$0xff]   ;;  %v1821_v29 = vor.u32 %v1820_v9, %v1816_v14  ;;  %v4208_v9 = vld [vmem:[%s5923_s1 + $0x5d0] ss:$8 sps:$4 sm:$0xff]  }
  0xa5   : > { %1539 = vmatmul.mubr.bf16.gmra.mxu0 %v4793_v41  ;;  %v5230_v41 = vsel %vm2556_vm1, %v2561_v57, %v2571_v34  ;;  %v5247_v47 = vsel %vm2556_vm1, %v2558_v21, %v2569_v38  ;;  %v5257_v34 = vsel %vm2556_vm1, %v2573_v10, %v2581_v53  ;;  %v4191_v38 = vld [vmem:[%s5923_s1 + $0x4f0] ss:$8 sps:$4 sm:$0xff]   ;;  %v4202_v10 = vld [vmem:[%s5923_s1 + $0x5e0] ss:$8 sps:$4 sm:$0xff]   ;;  %v4207_v14 = vld [vmem:[%s5923_s1 + $0x4d4] ss:$8 sps:$4 sm:$0xff]  }
  0xa6   : > { %1620 = vmatmul.mubr.bf16.gmra.mxu1 %v4796_v42  ;;  %2312 = vmatpush1.bf16.msra.mxu0 %v4177_v59  ;;  %v5237_v42 = vsel %vm2556_vm1, %v5930_v8, %v2575_v37  ;;  %v3531_v37 = vcombine.low %v4830_v15, %v4830_v15  ;;  %v5266_v59 = vrot.slane %v1823_v45, 1  ;;  %v4194_v15 = vld [vmem:[%s5923_s1 + $0x5f0] ss:$8 sps:$4 sm:$0xff]   ;;  %v4210_v45 = vld [vmem:[%s5923_s1 + $0x5d4] ss:$8 sps:$4 sm:$0xff]  }
  0xa7   : > { %2393 = vmatpush1.bf16.msra.mxu1 %v4180_v0  ;;  %2313 = vmatprep.subr.bf16.mxu0 %v4185_v30  ;;  %v1845_v0 = vor.u32 %v1844_v18, %v1840_v48  ;;  %v4204_v30 = vld [vmem:[%s5923_s1 + $0x5e4] ss:$8 sps:$4 sm:$0xff]  }
  0xa8   : > { %2394 = vmatprep.subr.bf16.mxu1 %v4188_v36  ;;  %1548 = vmatprep.mubr.bf16.mxu0 %v3532_v51  ;;  %v1826_v36 = vsel %vm473_vm0, %v1821_v29, %v5266_v59  ;;  %v4213_v48 = vld [vmem:[%s5923_s1 + $0x4c4] ss:$8 sps:$4 sm:$0xff]   ;;  %v5929_v29 = vrot.slane %v5308_v55, 1 }
  0xa9   : > { %1629 = vmatprep.mubr.bf16.mxu1 %v3534_v58  ;;  %v1850_v51 = vsel %vm473_vm0, %v1845_v0, %v5268_v56  ;;  %v4199_v58 = vld [vmem:[%s5923_s1 + $0x4e0] ss:$8 sps:$4 sm:$0xff]   ;;  %v4216_v18 = vld [vmem:[%s5923_s1 + $0x5c4] ss:$8 sps:$4 sm:$0xff]  }
  0xaa   : > { %2314 = vmatpush1.bf16.msra.mxu0 %v4183_v1  ;;  %v4205_v1 = vld [vmem:[%s5923_s1 + $0x4d0] ss:$8 sps:$4 sm:$0xff]  }
  0xab   : > { %2395 = vmatpush1.bf16.msra.mxu1 %v4186_v22  ;;  %2315 = vmatprep.subr.bf16.mxu0 %v4193_v60  ;;  %v4211_v22 = vld [vmem:[%s5923_s1 + $0x4c0] ss:$8 sps:$4 sm:$0xff]  }
  0xac   : > { %2396 = vmatprep.subr.bf16.mxu1 %v4196_v2  ;;  %v4214_v60 = vld [vmem:[%s5923_s1 + $0x5c0] ss:$8 sps:$4 sm:$0xff]   ;;  %v5317_v2 = vld [vmem:[%s4569_s20 + $0x9c] ss:$16 sps:$4 sm:$0x1f]  }
  0xad   : > { %1549 = vmatmul.mubr.bf16.gmra.mxu0 %v3531_v37  ;;  %v4219_v37 = vld [vmem:[%s5923_s1 + $0x4b4] ss:$8 sps:$4 sm:$0xff]   ;;  %v5330_v0 = vld [vmem:[%s4569_s20 + $0x98] ss:$16 sps:$4 sm:$0x1f]  }
  0xae   : > { %1630 = vmatmul.mubr.bf16.gmra.mxu1 %v3533_v7  ;;  %2316 = vmatpush2.bf16.msra.mxu0 %v4191_v38  ;;  %v4222_v7 = vld [vmem:[%s5923_s1 + $0x5b4] ss:$8 sps:$4 sm:$0xff]   ;;  %v5326_v38 = vld [vmem:[%s4569_s20 + $0x90] ss:$16 sps:$4 sm:$0x1f]  }
  0xaf   : > { %2397 = vmatpush2.bf16.msra.mxu1 %v4194_v15  ;;  %2317 = vmatprep.subr.bf16.mxu0 %v4201_v17  ;;  %v5928_v15 = vrot.slane %v5317_v2, 1  ;;  %v5338_v17 = vsel %vm2556_vm1, %v2579_v35, %v5929_v29  ;;  %v4220_v35 = vld [vmem:[%s5923_s1 + $0x5b0] ss:$8 sps:$4 sm:$0xff]  }
  0xb0   : > { %2398 = vmatprep.subr.bf16.mxu1 %v4204_v30  ;;  %2331 = vmatprep.mubr.bf16.mxu0 %v1826_v36  ;;  %v5927_v30 = vrot.slane %v5326_v38, 1  ;;  %v4217_v36 = vld [vmem:[%s5923_s1 + $0x4b0] ss:$8 sps:$4 sm:$0xff]  }
  0xb1   : > { %2412 = vmatprep.mubr.bf16.mxu1 %v1850_v51  ;;  %v5349_v51 = vsel %vm2556_vm1, %v2583_v39, %v5928_v15  ;;  %v4251_v15 = vld [vmem:[%s5923_s1 + $0x674] ss:$8 sps:$4 sm:$0xff]  }
  0xb2   : > { %2318 = vmatpush2.bf16.msra.mxu0 %v4199_v58  ;;  %v5926_v58 = vrot.slane %v5330_v0, 1  ;;  %v5364_v39 = vsel %vm2556_vm1, %v2577_v43, %v5927_v30  ;;  %v4223_v43 = vld [vmem:[%s5923_s1 + $0x4a0] ss:$8 sps:$4 sm:$0xff]   ;;  %v4240_v30 = vld [vmem:[%s5923_s1 + $0x584] ss:$8 sps:$4 sm:$0xff]  }
  0xb3   : > { %2399 = vmatpush2.bf16.msra.mxu1 %v4202_v10  ;;  %2319 = vmatprep.subr.bf16.mxu0 %v4207_v14  ;;  %v3663_v10 = vcombine.low %v5141_v62, %v5144_v11  ;;  %v3665_v14 = vcombine.low %v5147_v61, %v5150_v49  ;;  %v4228_v62 = vld [vmem:[%s5923_s1 + $0x5a4] ss:$8 sps:$4 sm:$0xff]   ;;  %v2480_v29 = vld [vmem:[%s4569_s20 + $0x18] sm:$0xee] }
  0xb4   : > { %2400 = vmatprep.subr.bf16.mxu1 %v4210_v45  ;;  %v4225_v45 = vld [vmem:[%s5923_s1 + $0x4a4] ss:$8 sps:$4 sm:$0xff]   ;;  %v5377_v61 = vsel %vm2556_vm1, %v2581_v53, %v5926_v58  ;;  %v4234_v53 = vld [vmem:[%s5923_s1 + $0x594] ss:$8 sps:$4 sm:$0xff]  }
  0xb5   : > { %v4237_v58 = vld [vmem:[%s5923_s1 + $0x484] ss:$8 sps:$4 sm:$0xff]  }
  0xb6   : > { %2320 = vmatpush2.bf16.msra.mxu0 %v4205_v1  ;;  %v4226_v1 = vld [vmem:[%s5923_s1 + $0x5a0] ss:$8 sps:$4 sm:$0xff]  }
  0xb7   : > { %2401 = vmatpush2.bf16.msra.mxu1 %v4208_v9  ;;  %2321 = vmatprep.subr.bf16.mxu0 %v4213_v48  ;;  %v1806_v9 = vshll.u32 %v3663_v10, 16  ;;  %v1830_v48 = vshll.u32 %v3665_v14, 16 }
  0xb8   : > { %2402 = vmatprep.subr.bf16.mxu1 %v4216_v18  ;;  %v4231_v18 = vld [vmem:[%s5923_s1 + $0x494] ss:$8 sps:$4 sm:$0xff]  }
  0xba   : > { %2322 = vmatpush2.bf16.msra.mxu0 %v4211_v22  ;;  %v4229_v22 = vld [vmem:[%s5923_s1 + $0x490] ss:$8 sps:$4 sm:$0xff]  }
  0xbb   : > { %2403 = vmatpush2.bf16.msra.mxu1 %v4214_v60  ;;  %2323 = vmatprep.subr.bf16.mxu0 %v4219_v37  ;;  %v4232_v60 = vld [vmem:[%s5923_s1 + $0x590] ss:$8 sps:$4 sm:$0xff]   ;;  %v1804_v37 = vshrl.u32 %v3663_v10, 16  ;;  %v1859_v10 = vshrl.u32 %v5175_v28, 16 }
  0xbc   : > { %2404 = vmatprep.subr.bf16.mxu1 %v4222_v7  ;;  %v1811_v7 = vshll.u32 %v5200_v33, 16 }
  0xbe   : > { %2324 = vmatpush2.bf16.msra.mxu0 %v4217_v36  ;;  %v1808_v36 = vrot.slane %v1806_v9, 1 }
  0xbf   : > { %2405 = vmatpush2.bf16.msra.mxu1 %v4220_v35  ;;  %2325 = vmatprep.subr.bf16.mxu0 %v4225_v45  ;;  %v1828_v35 = vshrl.u32 %v3665_v14, 16  ;;  %v1832_v45 = vrot.slane %v1830_v48, 1  ;;  %v1875_v14 = vshrl.u32 %v5187_v32, 16  ;;  %v1813_v48 = vrot.slane %v1811_v7, 1  ;;  %v4252_v7 = vld [vmem:[%s5923_s1 + $0x770] ss:$8 sps:$4 sm:$0xff]  }
  0xc0   : > { %2406 = vmatprep.subr.bf16.mxu1 %v4228_v62  ;;  %v1835_v62 = vshll.u32 %v5206_v46, 16  ;;  %v1809_v9 = vor.u32 %v1808_v36, %v1804_v37  ;;  %v1861_v37 = vor.u32 %v1859_v10, %v5266_v59  ;;  %v4257_v59 = vld [vmem:[%s5923_s1 + $0x664] ss:$8 sps:$4 sm:$0xff]  }
  0xc2   : > { %2326 = vmatpush2.bf16.msra.mxu0 %v4223_v43  ;;  %v4235_v43 = vld [vmem:[%s5923_s1 + $0x480] ss:$8 sps:$4 sm:$0xff]  }
  0xc3   : > { %2407 = vmatpush2.bf16.msra.mxu1 %v4226_v1  ;;  %2327 = vmatprep.subr.bf16.mxu0 %v4231_v18  ;;  %v4238_v1 = vld [vmem:[%s5923_s1 + $0x580] ss:$8 sps:$4 sm:$0xff]   ;;  %v1833_v18 = vor.u32 %v1832_v45, %v1828_v35  ;;  %v1851_v35 = vshrl.u32 %v5200_v33, 16  ;;  %v1867_v45 = vshrl.u32 %v5206_v46, 16  ;;  %v4265_v46 = vld [vmem:[%s5923_s1 + $0x650] ss:$8 sps:$4 sm:$0xff]  }
  0xc4   : > { %2408 = vmatprep.subr.bf16.mxu1 %v4234_v53  ;;  %v1837_v53 = vrot.slane %v1835_v62, 1  ;;  %v2479_v62 = vld [vmem:[%s4569_s20 + $0x10] sm:$0xee] }
  0xc5   : > { %v3811_v10 = vcombine.low %v2479_v62, %v5144_v11 }
  0xc6   : > { %2328 = vmatpush2.bf16.msra.mxu0 %v4229_v22  ;;  %v4254_v22 = vld [vmem:[%s5923_s1 + $0x774] ss:$8 sps:$4 sm:$0xff]   ;;  %v1838_v36 = vsel %vm473_vm0, %v1833_v18, %v1837_v53 }
  0xc7   : > { %2409 = vmatpush2.bf16.msra.mxu1 %v4232_v60  ;;  %2329 = vmatprep.subr.bf16.mxu0 %v4237_v58  ;;  %v4249_v60 = vld [vmem:[%s5923_s1 + $0x670] ss:$8 sps:$4 sm:$0xff]   ;;  %v1814_v58 = vsel %vm473_vm0, %v1809_v9, %v1813_v48  ;;  %v2557_v18 = vrot.slane %v3811_v10, 1 }
  0xc8   : > { %2410 = vmatprep.subr.bf16.mxu1 %v4240_v30  ;;  %v1877_v30 = vor.u32 %v1875_v14, %v5268_v56  ;;  %v4260_v56 = vld [vmem:[%s5923_s1 + $0x764] ss:$8 sps:$4 sm:$0xff]   ;;  %v3813_v14 = vcombine.low %v2480_v29, %v5150_v49 }
  0xca   : > { %2330 = vmatpush2.bf16.msra.mxu0 %v4235_v43  ;;  %v3812_v43 = vcombine.high %v2479_v62, %v5144_v11  ;;  %v1882_v9 = vsel %vm473_vm0, %v1877_v30, %v4924_v40  ;;  %v2563_v8 = vrot.slane %v3813_v14, 1  ;;  %v4255_v11 = vld [vmem:[%s5923_s1 + $0x660] ss:$8 sps:$4 sm:$0xff]   ;;  %v4267_v40 = vld [vmem:[%s5923_s1 + $0x654] ss:$8 sps:$4 sm:$0xff]   ;;  %v5931_v30 = vrot.slane %v5187_v32, 1 }
  0xcb   : > { %2411 = vmatpush2.bf16.msra.mxu1 %v4238_v1  ;;  %2933 = vmatprep.subr.bf16.mxu0 %v4251_v15  ;;  %v1866_v1 = vsel %vm473_vm0, %v1861_v37, %v4914_v31  ;;  %v3814_v15 = vcombine.high %v2480_v29, %v5150_v49  ;;  %v4258_v31 = vld [vmem:[%s5923_s1 + $0x760] ss:$8 sps:$4 sm:$0xff]   ;;  %v1853_v37 = vor.u32 %v1851_v35, %v1813_v48  ;;  %v4273_v32 = vld [vmem:[%s5923_s1 + $0x644] ss:$8 sps:$4 sm:$0xff]   ;;  %v1915_v62 = vshrl.u32 %v4893_v20, 16 }
  0xcc   : > { %3014 = vmatprep.subr.bf16.mxu1 %v4254_v22  ;;  %v2560_v22 = vrot.slane %v3812_v43, 1  ;;  %v1869_v49 = vor.u32 %v1867_v45, %v1837_v53  ;;  %v5467_v48 = vsel %vm2556_vm1, %v2557_v18, %v2558_v21  ;;  %v5472_v53 = vsel %vm2556_vm1, %v2563_v8, %v2564_v23  ;;  %v4274_v35 = vld [vmem:[%s5923_s1 + $0x740] ss:$8 sps:$4 sm:$0xff]   ;;  %v4281_v14 = vld [vmem:[%s5923_s1 + $0x630] ss:$8 sps:$4 sm:$0xff]  }
  0xcd   : > { %2332 = vmatmul.mubr.bf16.vlgmr.msra.gmra.mxu0 %v1814_v58  ;;  %v2566_v29 = vrot.slane %v3814_v15, 1  ;;  %v1858_v28 = vsel %vm473_vm0, %v1853_v37, %v4937_v5  ;;  %v4276_v5 = vld [vmem:[%s5923_s1 + $0x744] ss:$8 sps:$4 sm:$0xff]   ;;  %v1927_v8 = vshll.u32 %v5308_v55, 16  ;;  %v1939_v21 = vshrl.u32 %v4872_v4, 16 }
  0xce   : > { %2413 = vmatmul.mubr.bf16.vlgmr.msra.gmra.mxu1 %v1838_v36  ;;  %2934 = vmatpush1.bf16.msra.mxu0 %v4249_v60  ;;  %v4270_v60 = vld [vmem:[%s5923_s1 + $0x754] ss:$8 sps:$4 sm:$0xff]   ;;  %v1874_v33 = vsel %vm473_vm0, %v1869_v49, %v4942_v12  ;;  %v1923_v12 = vshrl.u32 %v4868_v63, 16  ;;  %v1943_v23 = vshll.u32 %v5317_v2, 16  ;;  %v4271_v36 = vld [vmem:[%s5923_s1 + $0x640] ss:$8 sps:$4 sm:$0xff]   ;;  %v1917_v18 = vor.u32 %v1915_v62, %v4970_v24 }
  0xcf   : > { %3015 = vmatpush1.bf16.msra.mxu1 %v4252_v7  ;;  %2935 = vmatprep.subr.bf16.mxu0 %v4257_v59  ;;  %v5462_v7 = vsel %vm2556_vm1, %v2560_v22, %v2561_v57  ;;  %v5477_v58 = vsel %vm2556_vm1, %v2566_v29, %v5931_v30  ;;  %v4268_v57 = vld [vmem:[%s5923_s1 + $0x750] ss:$8 sps:$4 sm:$0xff]   ;;  %v4283_v63 = vld [vmem:[%s5923_s1 + $0x634] ss:$8 sps:$4 sm:$0xff]   ;;  %v1929_v59 = vrot.slane %v1927_v8, 1  ;;  %v1931_v43 = vshrl.u32 %v4901_v26, 16 }
  0xd0   : > { %3016 = vmatprep.subr.bf16.mxu1 %v4260_v56  ;;  %2341 = vmatprep.mubr.bf16.mxu0 %v1866_v1  ;;  %v4286_v4 = vld [vmem:[%s5923_s1 + $0x734] ss:$8 sps:$4 sm:$0xff]   ;;  %v1925_v45 = vor.u32 %v1923_v12, %v4939_v6  ;;  %v1941_v56 = vor.u32 %v1939_v21, %v4944_v13  ;;  %v1945_v10 = vrot.slane %v1943_v23, 1  ;;  %v1919_v6 = vshll.u32 %v5326_v38, 16  ;;  %v4289_v26 = vld [vmem:[%s5923_s1 + $0x624] ss:$8 sps:$4 sm:$0xff]  }
  0xd1   : > { %2422 = vmatprep.mubr.bf16.mxu1 %v1882_v9  ;;  %v1935_v20 = vshll.u32 %v5330_v0, 16  ;;  %v4292_v13 = vld [vmem:[%s5923_s1 + $0x724] ss:$8 sps:$4 sm:$0xff]   ;;  %v4287_v15 = vld [vmem:[%s5923_s1 + $0x620] ss:$8 sps:$4 sm:$0xff]   ;;  %v1950_v37 = vshrl.u32 %v5308_v55, 16 }
  0xd2   : > { %2936 = vmatpush1.bf16.msra.mxu0 %v4255_v11  ;;  %v1946_v1 = vsel %vm473_vm0, %v1941_v56, %v1945_v10  ;;  %v4290_v9 = vld [vmem:[%s5923_s1 + $0x720] ss:$8 sps:$4 sm:$0xff]   ;;  %v1921_v22 = vrot.slane %v1919_v6, 1  ;;  %v4301_v11 = vld [vmem:[%s5923_s1 + $0x614] ss:$8 sps:$4 sm:$0xff]   ;;  %v1956_v24 = vshrl.u32 %v5317_v2, 16 }
  0xd3   : > { %3017 = vmatpush1.bf16.msra.mxu1 %v4258_v31  ;;  %2937 = vmatprep.subr.bf16.mxu0 %v4267_v40  ;;  %v4304_v31 = vld [vmem:[%s5923_s1 + $0x714] ss:$8 sps:$4 sm:$0xff]   ;;  %v4299_v29 = vld [vmem:[%s5923_s1 + $0x610] ss:$8 sps:$4 sm:$0xff]   ;;  %v4310_v30 = vld [vmem:[%s5923_s1 + $0x704] ss:$8 sps:$4 sm:$0xff]  }
  0xd4   : > { %3018 = vmatprep.subr.bf16.mxu1 %v4270_v60  ;;  %v4302_v40 = vld [vmem:[%s5923_s1 + $0x710] ss:$8 sps:$4 sm:$0xff]   ;;  %v4307_v60 = vld [vmem:[%s5923_s1 + $0x604] ss:$8 sps:$4 sm:$0xff]   ;;  %v4313_v12 = vld [vmem:[%s5923_s1 + $0x6f4] ss:$8 sps:$4 sm:$0xff]  }
  0xd5   : > { %2342 = vmatmul.mubr.bf16.gmra.mxu0 %v1858_v28  ;;  %v1952_v28 = vor.u32 %v1950_v37, %v1929_v59  ;;  %v4316_v8 = vld [vmem:[%s5923_s1 + $0x7f4] ss:$8 sps:$4 sm:$0xff]   ;;  %v4320_v62 = vld [vmem:[%s5923_s1 + $0x7e0] ss:$8 sps:$4 sm:$0xff]  }
  0xd6   : > { %2423 = vmatmul.mubr.bf16.gmra.mxu1 %v1874_v33  ;;  %2938 = vmatpush1.bf16.msra.mxu0 %v4265_v46  ;;  %v1958_v33 = vor.u32 %v1956_v24, %v1945_v10  ;;  %v1947_v46 = vshrl.u32 %v5326_v38, 16  ;;  %v4328_v56 = vld [vmem:[%s5923_s1 + $0x7d4] ss:$8 sps:$4 sm:$0xff]   ;;  %v4323_v10 = vld [vmem:[%s5923_s1 + $0x6d0] ss:$8 sps:$4 sm:$0xff]  }
  0xd7   : > { %3019 = vmatpush1.bf16.msra.mxu1 %v4268_v57  ;;  %2939 = vmatprep.subr.bf16.mxu0 %v4273_v32  ;;  %v1953_v57 = vshrl.u32 %v5330_v0, 16  ;;  %v4305_v32 = vld [vmem:[%s5923_s1 + $0x600] ss:$8 sps:$4 sm:$0xff]   ;;  %v4337_v6 = vld [vmem:[%s5923_s1 + $0x6b4] ss:$8 sps:$4 sm:$0xff]  }
  0xd8   : > { %3020 = vmatprep.subr.bf16.mxu1 %v4276_v5  ;;  %2351 = vmatprep.mubr.bf16.mxu0 %v4951_v16  ;;  %v4284_v16 = vld [vmem:[%s5923_s1 + $0x730] ss:$8 sps:$4 sm:$0xff]   ;;  %v4308_v5 = vld [vmem:[%s5923_s1 + $0x700] ss:$8 sps:$4 sm:$0xff]   ;;  %v1949_v21 = vor.u32 %v1947_v46, %v1921_v22 }
  0xd9   : > { %2432 = vmatprep.mubr.bf16.mxu1 %v4961_v19  ;;  %v1930_v19 = vsel %vm473_vm0, %v1925_v45, %v1929_v59  ;;  %v4317_v45 = vld [vmem:[%s5923_s1 + $0x6e0] ss:$8 sps:$4 sm:$0xff]   ;;  %v4325_v59 = vld [vmem:[%s5923_s1 + $0x6d4] ss:$8 sps:$4 sm:$0xff]  }
  0xda   : > { %2940 = vmatpush1.bf16.msra.mxu0 %v4271_v36  ;;  %v4311_v36 = vld [vmem:[%s5923_s1 + $0x6f0] ss:$8 sps:$4 sm:$0xff]   ;;  %v4353_v37 = vld [vmem:[%s5923_s1 + $0x680] ss:$8 sps:$4 sm:$0xff]  }
  0xdb   : > { %3021 = vmatpush1.bf16.msra.mxu1 %v4274_v35  ;;  %2941 = vmatprep.subr.bf16.mxu0 %v4283_v63  ;;  %v4314_v35 = vld [vmem:[%s5923_s1 + $0x7f0] ss:$8 sps:$4 sm:$0xff]   ;;  %v4319_v63 = vld [vmem:[%s5923_s1 + $0x6e4] ss:$8 sps:$4 sm:$0xff]   ;;  %v4356_v24 = vld [vmem:[%s5923_s1 + $0x780] ss:$8 sps:$4 sm:$0xff]  }
  0xdc   : > { %3022 = vmatprep.subr.bf16.mxu1 %v4286_v4  ;;  %v4322_v4 = vld [vmem:[%s5923_s1 + $0x7e4] ss:$8 sps:$4 sm:$0xff]  }
  0xdd   : > { %2352 = vmatmul.mubr.bf16.gmra.mxu0 %v4982_v27  ;;  %v1933_v27 = vor.u32 %v1931_v43, %v4975_v25  ;;  %v1922_v25 = vsel %vm473_vm0, %v1917_v18, %v1921_v22  ;;  %v4326_v43 = vld [vmem:[%s5923_s1 + $0x7d0] ss:$8 sps:$4 sm:$0xff]   ;;  %v4349_v18 = vld [vmem:[%s5923_s1 + $0x694] ss:$8 sps:$4 sm:$0xff]  }
  0xde   : > { %2433 = vmatmul.mubr.bf16.gmra.mxu1 %v4989_v50  ;;  %2942 = vmatpush1.bf16.msra.mxu0 %v4281_v14  ;;  %v1937_v50 = vrot.slane %v1935_v20, 1  ;;  %v4331_v14 = vld [vmem:[%s5923_s1 + $0x6c4] ss:$8 sps:$4 sm:$0xff]   ;;  %v4340_v20 = vld [vmem:[%s5923_s1 + $0x7b4] ss:$8 sps:$4 sm:$0xff]  }
  0xdf   : > { %3023 = vmatpush1.bf16.msra.mxu1 %v4284_v16  ;;  %2943 = vmatprep.subr.bf16.mxu0 %v4289_v26  ;;  %v4332_v16 = vld [vmem:[%s5923_s1 + $0x7c0] ss:$8 sps:$4 sm:$0xff]   ;;  %v4335_v26 = vld [vmem:[%s5923_s1 + $0x6b0] ss:$8 sps:$4 sm:$0xff]   ;;  %v4352_v22 = vld [vmem:[%s5923_s1 + $0x794] ss:$8 sps:$4 sm:$0xff]  }
  0xe0   : > { %3024 = vmatprep.subr.bf16.mxu1 %v4292_v13  ;;  %2361 = vmatprep.mubr.bf16.mxu0 %v1930_v19  ;;  %v1938_v49 = vsel %vm473_vm0, %v1933_v27, %v1937_v50  ;;  %v1955_v23 = vor.u32 %v1953_v57, %v1937_v50  ;;  %v4338_v13 = vld [vmem:[%s5923_s1 + $0x7b0] ss:$8 sps:$4 sm:$0xff]   ;;  %v4343_v19 = vld [vmem:[%s5923_s1 + $0x6a4] ss:$8 sps:$4 sm:$0xff]  }
  0xe1   : > { %2442 = vmatprep.mubr.bf16.mxu1 %v1946_v1  ;;  %v4346_v1 = vld [vmem:[%s5923_s1 + $0x7a4] ss:$8 sps:$4 sm:$0xff]   ;;  %v4347_v27 = vld [vmem:[%s5923_s1 + $0x690] ss:$8 sps:$4 sm:$0xff]  }
  0xe2   : > { %2944 = vmatpush1.bf16.msra.mxu0 %v4287_v15  ;;  %v4341_v15 = vld [vmem:[%s5923_s1 + $0x6a0] ss:$8 sps:$4 sm:$0xff]   ;;  %v4350_v50 = vld [vmem:[%s5923_s1 + $0x790] ss:$8 sps:$4 sm:$0xff]  }
  0xe3   : > { %3025 = vmatpush1.bf16.msra.mxu1 %v4290_v9  ;;  %2945 = vmatprep.subr.bf16.mxu0 %v4301_v11  ;;  %v4344_v9 = vld [vmem:[%s5923_s1 + $0x7a0] ss:$8 sps:$4 sm:$0xff]   ;;  %v4355_v11 = vld [vmem:[%s5923_s1 + $0x684] ss:$8 sps:$4 sm:$0xff]  }
  0xe4   : > { %3026 = vmatprep.subr.bf16.mxu1 %v4304_v31  ;;  %v4358_v31 = vld [vmem:[%s5923_s1 + $0x784] ss:$8 sps:$4 sm:$0xff]  }
  0xe5   : > { %2362 = vmatmul.mubr.bf16.gmra.mxu0 %v1922_v25 }
  0xe6   : > { %2443 = vmatmul.mubr.bf16.gmra.mxu1 %v1938_v49  ;;  %2946 = vmatpush1.bf16.msra.mxu0 %v4299_v29 }
  0xe7   : > { %3027 = vmatpush1.bf16.msra.mxu1 %v4302_v40  ;;  %2947 = vmatprep.subr.bf16.mxu0 %v4307_v60 }
  0xe8   : > { %3028 = vmatprep.subr.bf16.mxu1 %v4310_v30  ;;  %2371 = vmatprep.mubr.bf16.mxu0 %v1952_v28 }
  0xe9   : > { %2452 = vmatprep.mubr.bf16.mxu1 %v1958_v33 }
  0xea   : > { %2948 = vmatpush1.bf16.msra.mxu0 %v4305_v32 }
  0xeb   : > { %3029 = vmatpush1.bf16.msra.mxu1 %v4308_v5  ;;  %2949 = vmatprep.subr.bf16.mxu0 %v4313_v12 }
  0xec   : > { %3030 = vmatprep.subr.bf16.mxu1 %v4316_v8 }
  0xed   : > { %2372 = vmatmul.mubr.bf16.gmra.mxu0 %v1949_v21 }
  0xee   : > { %2453 = vmatmul.mubr.bf16.gmra.mxu1 %v1955_v23  ;;  %2950 = vmatpush2.bf16.msra.mxu0 %v4311_v36 }
  0xef   : > { %3031 = vmatpush2.bf16.msra.mxu1 %v4314_v35  ;;  %2951 = vmatprep.subr.bf16.mxu0 %v4319_v63 }
  0xf0   : > { %3032 = vmatprep.subr.bf16.mxu1 %v4322_v4  ;;  %2965 = vmatprep.mubr.bf16.mxu0 %v5462_v7  ;;  %v4334_v7 = vld [vmem:[%s5923_s1 + $0x7c4] ss:$8 sps:$4 sm:$0xff]  }
  0xf1   : > { %3046 = vmatprep.mubr.bf16.mxu1 %v5477_v58  ;;  %v4329_v58 = vld [vmem:[%s5923_s1 + $0x6c0] ss:$8 sps:$4 sm:$0xff]  }
  0xf2   : > { %2952 = vmatpush2.bf16.msra.mxu0 %v4317_v45 }
  0xf3   : > { %3033 = vmatpush2.bf16.msra.mxu1 %v4320_v62  ;;  %2953 = vmatprep.subr.bf16.mxu0 %v4325_v59  ;;  %v5933_v62 = vrot.slane %v5317_v2, 1  ;;  %v5935_v2 = vrot.slane %v5330_v0, 1 }
  0xf4   : > { %3034 = vmatprep.subr.bf16.mxu1 %v4328_v56 }
  0xf6   : > { %2954 = vmatpush2.bf16.msra.mxu0 %v4323_v10 }
  0xf7   : > { %3035 = vmatpush2.bf16.msra.mxu1 %v4326_v43  ;;  %2955 = vmatprep.subr.bf16.mxu0 %v4331_v14 }
  0xf8   : > { %3036 = vmatprep.subr.bf16.mxu1 %v4334_v7 }
  0xfa   : > { %2956 = vmatpush2.bf16.msra.mxu0 %v4329_v58 }
  0xfb   : > { %3037 = vmatpush2.bf16.msra.mxu1 %v4332_v16  ;;  %2957 = vmatprep.subr.bf16.mxu0 %v4337_v6 }
  0xfc   : > { %3038 = vmatprep.subr.bf16.mxu1 %v4340_v20 }
  0xfe   : > { %2958 = vmatpush2.bf16.msra.mxu0 %v4335_v26 }
  0xff   : > { %3039 = vmatpush2.bf16.msra.mxu1 %v4338_v13  ;;  %2959 = vmatprep.subr.bf16.mxu0 %v4343_v19 }
 0x100   : > { %3040 = vmatprep.subr.bf16.mxu1 %v4346_v1 }
 0x102   : > { %2960 = vmatpush2.bf16.msra.mxu0 %v4341_v15 }
 0x103   : > { %3041 = vmatpush2.bf16.msra.mxu1 %v4344_v9  ;;  %2961 = vmatprep.subr.bf16.mxu0 %v4349_v18 }
 0x104   : > { %3042 = vmatprep.subr.bf16.mxu1 %v4352_v22 }
 0x106   : > { %2962 = vmatpush2.bf16.msra.mxu0 %v4347_v27 }
 0x107   : > { %3043 = vmatpush2.bf16.msra.mxu1 %v4350_v50  ;;  %2963 = vmatprep.subr.bf16.mxu0 %v4355_v11 }
 0x108   : > { %3044 = vmatprep.subr.bf16.mxu1 %v4358_v31 }
 0x10a   : > { %2964 = vmatpush2.bf16.msra.mxu0 %v4353_v37 }
 0x10b   : > { %3045 = vmatpush2.bf16.msra.mxu1 %v4356_v24 }
 0x10d   : > { %v1004_v25 = vpop.f32.mrf.mxu0  ;;  %2966 = vmatmul.mubr.bf16.vlgmr.msra.gmra.mxu0 %v5467_v48 }
 0x10e   : > { %v1085_v49 = vpop.f32.mrf.mxu1  ;;  %3047 = vmatmul.mubr.bf16.vlgmr.msra.gmra.mxu1 %v5472_v53  ;;  %2975 = vmatprep.mubr.bf16.mxu0 %v5230_v41 }
 0x10f   : > { %v5673_v29 = vadd.f32 %v1085_v49, %v1004_v25  ;;  %3056 = vmatprep.mubr.bf16.mxu1 %v5237_v42  ;;  %v1006_v40 = vpop.f32.mrf.mxu0 }
 0x110   : > { %v1087_v60 = vpop.f32.mrf.mxu1 }
 0x111   : > { %v5677_v30 = vadd.f32 %v1087_v60, %v1006_v40  ;;  %v1008_v28 = vpop.f32.mrf.mxu0 }
 0x112   : > { %v1089_v33 = vpop.f32.mrf.mxu1 }
 0x113   : > { %v5679_v46 = vadd.f32 %v1089_v33, %v1008_v28  ;;  %v1010_v57 = vpop.f32.mrf.mxu0 }
 0x114   : > { %v1091_v32 = vpop.f32.mrf.mxu1 }
 0x115   : > { %v5681_v5 = vadd.f32 %v1091_v32, %v1010_v57  ;;  %2976 = vmatmul.mubr.bf16.gmra.mxu0 %v5247_v47  ;;  %v1014_v41 = vpop.f32.mrf.mxu0 }
 0x116   : > { %3057 = vmatmul.mubr.bf16.gmra.mxu1 %v5252_v3  ;;  %2985 = vmatprep.mubr.bf16.mxu0 %v5110_v44  ;;  %v1095_v42 = vpop.f32.mrf.mxu1 }
 0x117   : > { %3066 = vmatprep.mubr.bf16.mxu1 %v5125_v52  ;;  %v5687_v48 = vadd.f32 %v1095_v42, %v1014_v41  ;;  %v1016_v53 = vpop.f32.mrf.mxu0 }
 0x118   : > { %v1097_v12 = vpop.f32.mrf.mxu1 }
 0x119   : > { %v5689_v8 = vadd.f32 %v1097_v12, %v1016_v53  ;;  %v1018_v21 = vpop.f32.mrf.mxu0 }
 0x11a   : > { %v1099_v47 = vpop.f32.mrf.mxu1 }
 0x11b   : > { %v5695_v44 = vadd.f32 %v1099_v47, %v1018_v21  ;;  %v1020_v52 = vpop.f32.mrf.mxu0 }
 0x11c   : > { %v1101_v3 = vpop.f32.mrf.mxu1 }
 0x11d   : > { %2986 = vmatmul.mubr.bf16.gmra.mxu0 %v5132_v54  ;;  %v5697_v23 = vadd.f32 %v1101_v3, %v1020_v52  ;;  %v1024_v36 = vpop.f32.mrf.mxu0 }
 0x11e   : > { %3067 = vmatmul.mubr.bf16.gmra.mxu1 %v5257_v34  ;;  %2995 = vmatprep.mubr.bf16.mxu0 %v5338_v17  ;;  %v1105_v35 = vpop.f32.mrf.mxu1 }
 0x11f   : > { %3076 = vmatprep.mubr.bf16.mxu1 %v5349_v51  ;;  %v5699_v63 = vadd.f32 %v1105_v35, %v1024_v36  ;;  %v1026_v4 = vpop.f32.mrf.mxu0  ;;  %v5932_v51 = vrot.slane %v5308_v55, 1  ;;  %v5934_v55 = vrot.slane %v5326_v38, 1 }
 0x120   : > { %v1107_v54 = vpop.f32.mrf.mxu1 }
 0x121   : > { %v5701_v45 = vadd.f32 %v1107_v54, %v1026_v4  ;;  %v1028_v34 = vpop.f32.mrf.mxu0 }
 0x122   : > { %v1109_v17 = vpop.f32.mrf.mxu1 }
 0x123   : > { %v5709_v59 = vadd.f32 %v1109_v17, %v1028_v34  ;;  %v1030_v56 = vpop.f32.mrf.mxu0 }
 0x124   : > { %v1111_v10 = vpop.f32.mrf.mxu1 }
 0x125   : > { %2996 = vmatmul.mubr.bf16.gmra.mxu0 %v5364_v39  ;;  %v5711_v43 = vadd.f32 %v1111_v10, %v1030_v56  ;;  %v1034_v14 = vpop.f32.mrf.mxu0 }
 0x126   : > { %3077 = vmatmul.mubr.bf16.gmra.mxu1 %v5377_v61  ;;  %3005 = vmatprep.mubr.bf16.mxu0 %v5932_v51  ;;  %v1115_v7 = vpop.f32.mrf.mxu1 }
 0x127   : > { %3086 = vmatprep.mubr.bf16.mxu1 %v5933_v62  ;;  %v5713_v58 = vadd.f32 %v1115_v7, %v1034_v14  ;;  %v1036_v39 = vpop.f32.mrf.mxu0 }
 0x128   : > { %v1117_v61 = vpop.f32.mrf.mxu1 }
 0x129   : > { %v5715_v16 = vadd.f32 %v1117_v61, %v1036_v39  ;;  %v1038_v6 = vpop.f32.mrf.mxu0 }
 0x12a   : > { %v1119_v20 = vpop.f32.mrf.mxu1 }
 0x12b   : > { %v5721_v26 = vadd.f32 %v1119_v20, %v1038_v6  ;;  %v1040_v13 = vpop.f32.mrf.mxu0 }
 0x12c   : > { %v1121_v19 = vpop.f32.mrf.mxu1 }
 0x12d   : > { %3006 = vmatmul.mubr.bf16.gmra.mxu0 %v5934_v55  ;;  %v5723_v1 = vadd.f32 %v1121_v19, %v1040_v13  ;;  %v1044_v15 = vpop.f32.mrf.mxu0 }
 0x12e   : > { %3087 = vmatmul.mubr.bf16.gmra.mxu1 %v5935_v2  ;;  %v1125_v9 = vpop.f32.mrf.mxu1 }
 0x12f   : > { %v5725_v18 = vadd.f32 %v1125_v9, %v1044_v15  ;;  %v1046_v22 = vpop.f32.mrf.mxu0 }
 0x130   : > { %v1127_v27 = vpop.f32.mrf.mxu1 }
 0x131   : > { %v5727_v50 = vadd.f32 %v1127_v27, %v1046_v22  ;;  %v1048_v38 = vpop.f32.mrf.mxu0 }
 0x132   : > { %v1129_v11 = vpop.f32.mrf.mxu1 }
 0x133   : > { %v1049_v0 = vpop.f32.mrf.mxu0 }
 0x134   : > { %v1130_v31 = vpop.f32.mrf.mxu1 }
 0x14d   : > { %v1510_v37 = vpop.f32.mrf.mxu0 }
 0x14e   : > { %v1591_v24 = vpop.f32.mrf.mxu1  ;;  %v1511_v25 = vadd.f32 %v1510_v37, %v5673_v29 }
 0x14f   : > { %v1512_v49 = vpop.f32.mrf.mxu0 }
 0x150   : > { %v1593_v40 = vpop.f32.mrf.mxu1  ;;  %v5730_v60 = vadd.f32 %v1591_v24, %v1511_v25  ;;  %v1513_v28 = vadd.f32 %v1512_v49, %v5677_v30 }
 0x151   : > { %v1514_v33 = vpop.f32.mrf.mxu0 }
 0x152   : > { %v1595_v57 = vpop.f32.mrf.mxu1  ;;  %v5733_v32 = vadd.f32 %v1593_v40, %v1513_v28  ;;  %v1515_v41 = vadd.f32 %v1514_v33, %v5679_v46 }
 0x153   : > { %v1516_v42 = vpop.f32.mrf.mxu0 }
 0x154   : > { %v1597_v53 = vpop.f32.mrf.mxu1  ;;  %v5736_v12 = vadd.f32 %v1595_v57, %v1515_v41  ;;  %v1517_v21 = vadd.f32 %v1516_v42, %v5681_v5 }
 0x155   : > { %v1520_v47 = vpop.f32.mrf.mxu0 }
 0x156   : > { %v1601_v29 = vpop.f32.mrf.mxu1  ;;  %v5739_v52 = vadd.f32 %v1597_v53, %v1517_v21  ;;  %v1521_v3 = vadd.f32 %v1520_v47, %v5687_v48 }
 0x157   : > { %v1522_v36 = vpop.f32.mrf.mxu0 }
 0x158   : > { %v1603_v30 = vpop.f32.mrf.mxu1  ;;  %v1523_v35 = vadd.f32 %v1522_v36, %v5689_v8  ;;  %v5743_v4 = vadd.f32 %v1601_v29, %v1521_v3 }
 0x159   : > { %v1524_v54 = vpop.f32.mrf.mxu0 }
 0x15a   : > { %v1605_v46 = vpop.f32.mrf.mxu1  ;;  %v1525_v34 = vadd.f32 %v1524_v54, %v5695_v44  ;;  %v5746_v17 = vadd.f32 %v1603_v30, %v1523_v35 }
 0x15b   : > { %v1526_v51 = vpop.f32.mrf.mxu0 }
 0x15c   : > { %v1607_v5 = vpop.f32.mrf.mxu1  ;;  %v1527_v62 = vadd.f32 %v1526_v51, %v5697_v23  ;;  %v5749_v56 = vadd.f32 %v1605_v46, %v1525_v34 }
 0x15d   : > { %v1530_v10 = vpop.f32.mrf.mxu0 }
 0x15e   : > { %v1611_v48 = vpop.f32.mrf.mxu1  ;;  %v1531_v14 = vadd.f32 %v1530_v10, %v5699_v63  ;;  %v5752_v7 = vadd.f32 %v1607_v5, %v1527_v62 }
 0x15f   : > { %v1532_v8 = vpop.f32.mrf.mxu0 }
 0x160   : > { %v1613_v39 = vpop.f32.mrf.mxu1  ;;  %v1533_v61 = vadd.f32 %v1532_v8, %v5701_v45  ;;  %v5755_v55 = vadd.f32 %v1611_v48, %v1531_v14 }
 0x161   : > { %v1534_v44 = vpop.f32.mrf.mxu0 }
 0x162   : > { %v1615_v2 = vpop.f32.mrf.mxu1  ;;  %v1535_v6 = vadd.f32 %v1534_v44, %v5709_v59  ;;  %v5758_v20 = vadd.f32 %v1613_v39, %v1533_v61 }
 0x163   : > { %v1536_v23 = vpop.f32.mrf.mxu0 }
 0x164   : > { %v1617_v13 = vpop.f32.mrf.mxu1  ;;  %v1537_v19 = vadd.f32 %v1536_v23, %v5711_v43  ;;  %v5761_v15 = vadd.f32 %v1615_v2, %v1535_v6 }
 0x165   : > { %v1540_v63 = vpop.f32.mrf.mxu0 }
 0x166   : > { %v1621_v9 = vpop.f32.mrf.mxu1  ;;  %v1541_v22 = vadd.f32 %v1540_v63, %v5713_v58  ;;  %v5764_v27 = vadd.f32 %v1617_v13, %v1537_v19 }
 0x167   : > { %v1542_v45 = vpop.f32.mrf.mxu0 }
 0x168   : > { %v1623_v38 = vpop.f32.mrf.mxu1  ;;  %v1543_v11 = vadd.f32 %v1542_v45, %v5715_v16  ;;  %v5767_v0 = vadd.f32 %v1621_v9, %v1541_v22 }
 0x169   : > { %v1544_v59 = vpop.f32.mrf.mxu0 }
 0x16a   : > { %v1625_v31 = vpop.f32.mrf.mxu1  ;;  %v1545_v37 = vadd.f32 %v1544_v59, %v5721_v26  ;;  %v5770_v24 = vadd.f32 %v1623_v38, %v1543_v11 }
 0x16b   : > { %v1546_v43 = vpop.f32.mrf.mxu0 }
 0x16c   : > { %v1627_v25 = vpop.f32.mrf.mxu1  ;;  %v1547_v49 = vadd.f32 %v1546_v43, %v5723_v1  ;;  %v1626_v40 = vadd.f32 %v1625_v31, %v1545_v37 }
 0x16d   : > { %v1550_v58 = vpop.f32.mrf.mxu0 }
 0x16e   : > { %v1631_v28 = vpop.f32.mrf.mxu1  ;;  %v1551_v33 = vadd.f32 %v1550_v58, %v5725_v18  ;;  %v5774_v57 = vadd.f32 %v1627_v25, %v1547_v49 }
 0x16f   : > { %v1552_v16 = vpop.f32.mrf.mxu0 }
 0x170   : > { %v1633_v41 = vpop.f32.mrf.mxu1  ;;  %v1553_v42 = vadd.f32 %v1552_v16, %v5727_v50  ;;  %v1632_v53 = vadd.f32 %v1631_v28, %v1551_v33 }
 0x171   : > { %v1554_v21 = vpop.f32.mrf.mxu0 }
 0x172   : > { %v1635_v26 = vpop.f32.mrf.mxu1  ;;  %v5777_v47 = vadd.f32 %v1633_v41, %v1553_v42 }
 0x173   : > { %v1555_v29 = vpop.f32.mrf.mxu0 }
 0x174   : > { %v1636_v3 = vpop.f32.mrf.mxu1 }
 0x18d   : > { %v2333_v36 = vpop.f32.mrf.mxu0 }
 0x18e   : > { %v2414_v1 = vpop.f32.mrf.mxu1 }
 0x18f   : > { %v2415_v30 = vadd.f32 %v2414_v1, %v2333_v36  ;;  %v2335_v35 = vpop.f32.mrf.mxu0 }
 0x190   : > { %v2416_v54 = vpop.f32.mrf.mxu1 }
 0x191   : > { %v5780_v18 = vadd.f32 %v2415_v30, %v5730_v60  ;;  %v2337_v46 = vpop.f32.mrf.mxu0 }
 0x192   : > { %v2418_v34 = vpop.f32.mrf.mxu1 }
 0x193   : > { %v2419_v51 = vadd.f32 %v2418_v34, %v2337_v46  ;;  %v5782_v5 = vpop.f32.mrf.mxu0 }
 0x194   : > { %v5784_v50 = vpop.f32.mrf.mxu1 }
 0x195   : > { %v5787_v62 = vadd.f32 %v2419_v51, %v5736_v12  ;;  %v2343_v10 = vpop.f32.mrf.mxu0  ;;  %v3168_v51 = vlaneseq }
 0x196   : > { %v2424_v48 = vpop.f32.mrf.mxu1 }
 0x197   : > { %v2425_v14 = vadd.f32 %v2424_v48, %v2343_v10  ;;  %v5789_v8 = vpop.f32.mrf.mxu0  ;;  %v3169_v10 = vshrl.u32 %v3168_v51, 7  ;;  %v2417_v48 = vadd.f32 %v2416_v54, %v2335_v35  ;;  %v2421_v35 = vadd.f32 %v5784_v50, %v5782_v5 }
 0x198   : > { %v5791_v39 = vpop.f32.mrf.mxu1 }
 0x199   : > { %v5794_v60 = vadd.f32 %v2425_v14, %v5743_v4  ;;  %v2347_v61 = vpop.f32.mrf.mxu0 }
 0x19a   : > { %v2428_v44 = vpop.f32.mrf.mxu1 }
 0x19b   : > { %v2429_v2 = vadd.f32 %v2428_v44, %v2347_v61  ;;  %v5796_v6 = vpop.f32.mrf.mxu0  ;;  %v3170_v44 = vsub.s32 0, %v3169_v10 }
 0x19c   : > { %v5798_v23 = vpop.f32.mrf.mxu1 }
 0x19d   : > { %v5801_v12 = vadd.f32 %v2429_v2, %v5749_v56  ;;  %v2353_v13 = vpop.f32.mrf.mxu0 }
 0x19e   : > { %v2434_v19 = vpop.f32.mrf.mxu1 }
 0x19f   : > { %v2435_v63 = vadd.f32 %v2434_v19, %v2353_v13  ;;  %v5803_v9 = vpop.f32.mrf.mxu0  ;;  %v3174_v19 = vsub.s32 1, %v3169_v10 }
 0x1a0   : > { %v5805_v22 = vpop.f32.mrf.mxu1 }
 0x1a1   : > { %v5808_v4 = vadd.f32 %v2435_v63, %v5755_v55  ;;  %v2357_v45 = vpop.f32.mrf.mxu0  ;;  %v2462_v63 = vadd.f32 %v2417_v48, %v5733_v32  ;;  %v2427_v32 = vadd.f32 %v5791_v39, %v5789_v8 }
 0x1a2   : > { %v2438_v38 = vpop.f32.mrf.mxu1 }
 0x1a3   : > { %v2439_v11 = vadd.f32 %v2438_v38, %v2357_v45  ;;  %v5810_v59 = vpop.f32.mrf.mxu0 }
 0x1a4   : > { %v5812_v31 = vpop.f32.mrf.mxu1 }
 0x1a5   : > { %v5815_v56 = vadd.f32 %v2439_v11, %v5761_v15  ;;  %v2363_v37 = vpop.f32.mrf.mxu0 }
 0x1a6   : > { %v2444_v43 = vpop.f32.mrf.mxu1 }
 0x1a7   : > { %v2445_v25 = vadd.f32 %v2444_v43, %v2363_v37  ;;  %v5817_v49 = vpop.f32.mrf.mxu0 }
 0x1a8   : > { %v5819_v58 = vpop.f32.mrf.mxu1 }
 0x1a9   : > { %v5822_v55 = vadd.f32 %v2445_v25, %v5767_v0  ;;  %v2367_v28 = vpop.f32.mrf.mxu0 }
 0x1aa   : > { %v2448_v33 = vpop.f32.mrf.mxu1 }
 0x1ab   : > { %v2449_v16 = vadd.f32 %v2448_v33, %v2367_v28  ;;  %v5824_v41 = vpop.f32.mrf.mxu0 }
 0x1ac   : > { %v5826_v42 = vpop.f32.mrf.mxu1 }
 0x1ad   : > { %v5828_v15 = vadd.f32 %v2449_v16, %v1626_v40  ;;  %v2373_v21 = vpop.f32.mrf.mxu0 }
 0x1ae   : > { %v2454_v26 = vpop.f32.mrf.mxu1 }
 0x1af   : > { %v2455_v29 = vadd.f32 %v2454_v26, %v2373_v21  ;;  %v5830_v3 = vpop.f32.mrf.mxu0  ;;  %v2464_v26 = vadd.f32 %v2421_v35, %v5739_v52 }
 0x1b0   : > { %v5832_v36 = vpop.f32.mrf.mxu1 }
 0x1b1   : > { %v5834_v1 = vadd.f32 %v2455_v29, %v1632_v53  ;;  %v2377_v0 = vpop.f32.mrf.mxu0  ;;  %v243_v53 = vld [vmem:[%s5924_s2] sm:$0x3] }
 0x1b2   : > { %v2458_v30 = vpop.f32.mrf.mxu1  ;;  %v5848_v28 = vrot.slane %v243_v53, %v3170_v44  ;;  %v5850_v33 = vrot.slane %v243_v53, %v3174_v19  ;;  %v2431_v44 = vadd.f32 %v5798_v23, %v5796_v6 }
 0x1b3   : > { %v2378_v46 = vpop.f32.mrf.mxu0 }
 0x1b4   : > { %v2459_v34 = vpop.f32.mrf.mxu1 }
 0x1cd   : > { %v2967_v14 = vpop.f32.mrf.mxu0 }
 0x1ce   : > { %v3048_v40 = vpop.f32.mrf.mxu1 }
 0x1cf   : > { %v3049_v61 = vadd.f32 %v3048_v40, %v2967_v14  ;;  %v2969_v2 = vpop.f32.mrf.mxu0  ;;  %v2466_v40 = vadd.f32 %v2427_v32, %v5746_v17 }
 0x1d0   : > { %v3050_v13 = vpop.f32.mrf.mxu1 }
 0x1d1   : > { %v3095_v45 = vadd.f32 %v3049_v61, %v5780_v18  ;;  %v3051_v38 = vadd.f32 %v3050_v13, %v2969_v2  ;;  %v2971_v54 = vpop.f32.mrf.mxu0 }
 0x1d2   : > { %v3052_v11 = vpop.f32.mrf.mxu1 }
 0x1d3   : > { %vm3113_vm2 = vcmp.ge.f32.partialorder %v3095_v45, 0.0  ;;  %v3131_v37 = vmul.f32 0.2, %v3095_v45  ;;  %v3096_v43 = vadd.f32 %v3051_v38, %v2462_v63  ;;  %v3053_v25 = vadd.f32 %v3052_v11, %v2971_v54  ;;  %v2973_v18 = vpop.f32.mrf.mxu0 }
 0x1d4   : > { %v3054_v16 = vpop.f32.mrf.mxu1  ;;  %v2437_v38 = vadd.f32 %v5805_v22, %v5803_v9 }
 0x1d5   : > { %v3149_v21 = vsel %vm3113_vm2, %v3095_v45, %v3131_v37  ;;  %vm3114_vm3 = vcmp.ge.f32.partialorder %v3096_v43, 0.0  ;;  %v3132_v5 = vmul.f32 0.2, %v3096_v43  ;;  %v3097_v50 = vadd.f32 %v3053_v25, %v5787_v62  ;;  %v2977_v0 = vpop.f32.mrf.mxu0 }
 0x1d6   : > { %v3055_v29 = vadd.f32 %v3054_v16, %v2973_v18  ;;  %v3058_v30 = vpop.f32.mrf.mxu1  ;;  %v3178_v34 = vadd.f32 %v5848_v28, %v3149_v21 }
 0x1d7   : > { %v3150_v46 = vsel %vm3114_vm3, %v3096_v43, %v3132_v5  ;;  %vm3115_vm4 = vcmp.ge.f32.partialorder %v3097_v50, 0.0  ;;  %v3133_v8 = vmul.f32 0.2, %v3097_v50  ;;  %v3059_v39 = vadd.f32 %v3058_v30, %v2977_v0  ;;  %v2979_v48 = vpop.f32.mrf.mxu0 }
 0x1d8   : > { %v3179_v51 = vadd.f32 %v5850_v33, %v3150_v46  ;;  %v3098_v10 = vadd.f32 %v3055_v29, %v2464_v26  ;;  %v3060_v14 = vpop.f32.mrf.mxu1  ;;  %v2468_v43 = vadd.f32 %v2431_v44, %v5752_v7  ;;  %v2470_v7 = vadd.f32 %v2437_v38, %v5758_v20 }
 0x1d9   : > { %v3151_v52 = vsel %vm3115_vm4, %v3097_v50, %v3133_v8  ;;  %v3099_v62 = vadd.f32 %v3059_v39, %v5794_v60  ;;  %v3061_v61 = vadd.f32 %v3060_v14, %v2979_v48  ;;  %v2981_v19 = vpop.f32.mrf.mxu0 }
 0x1da   : > { %v3892_v2 = vpack.c.bf16 %v3179_v51, %v3178_v34  ;;  %vm3116_vm5 = vcmp.ge.f32.partialorder %v3098_v10, 0.0  ;;  %v3134_v13 = vmul.f32 0.2, %v3098_v10  ;;  %v3062_v63 = vpop.f32.mrf.mxu1  ;;  %v3180_v35 = vadd.f32 %v5848_v28, %v3151_v52 }
 0x1db   : > { %vm3117_vm6 = vcmp.ge.f32.partialorder %v3099_v62, 0.0  ;;  %v3135_v17 = vmul.f32 0.2, %v3099_v62  ;;  %v3100_v53 = vadd.f32 %v3061_v61, %v2466_v40  ;;  %v3063_v45 = vadd.f32 %v3062_v63, %v2981_v19  ;;  %v2983_v54 = vpop.f32.mrf.mxu0 }
 0x1dc   : > { %3252 = vst [vmem:[%s5861_s22] sm:$0xff] %v3892_v2  ;;  %v3152_v60 = vsel %vm3116_vm5, %v3098_v10, %v3134_v13  ;;  %v3064_v11 = vpop.f32.mrf.mxu1  ;;  %v2447_v52 = vadd.f32 %v5819_v58, %v5817_v49 }
 0x1dd   : > { %v3181_v6 = vadd.f32 %v5850_v33, %v3152_v60  ;;  %v3153_v23 = vsel %vm3117_vm6, %v3099_v62, %v3135_v17  ;;  %vm3118_vm7 = vcmp.ge.f32.partialorder %v3100_v53, 0.0  ;;  %v3136_v37 = vmul.f32 0.2, %v3100_v53  ;;  %v2987_v18 = vpop.f32.mrf.mxu0 }
 0x1de   : > { %v3101_v25 = vadd.f32 %v3063_v45, %v5801_v12  ;;  %v3065_v32 = vadd.f32 %v3064_v11, %v2983_v54  ;;  %v3068_v16 = vpop.f32.mrf.mxu1  ;;  %v3182_v22 = vadd.f32 %v5848_v28, %v3153_v23  ;;  %v2441_v12 = vadd.f32 %v5812_v31, %v5810_v59 }
 0x1df   : > { %v3893_v9 = vpack.c.bf16 %v3181_v6, %v3180_v35  ;;  %v3154_v21 = vsel %vm3118_vm7, %v3100_v53, %v3136_v37  ;;  %v3069_v5 = vadd.f32 %v3068_v16, %v2987_v18  ;;  %v2989_v0 = vpop.f32.mrf.mxu0 }
 0x1e0   : > { %v3183_v50 = vadd.f32 %v5850_v33, %v3154_v21  ;;  %vm3119_vm8 = vcmp.ge.f32.partialorder %v3101_v25, 0.0  ;;  %v3137_v26 = vmul.f32 0.2, %v3101_v25  ;;  %v3102_v29 = vadd.f32 %v3065_v32, %v2468_v43  ;;  %v3070_v30 = vpop.f32.mrf.mxu1 }
 0x1e1   : > { %3253 = vst [vmem:[%s5861_s22 + $0x8] sm:$0xff] %v3893_v9  ;;  %v3103_v46 = vadd.f32 %v3069_v5, %v5808_v4  ;;  %v3071_v8 = vadd.f32 %v3070_v30, %v2989_v0  ;;  %v2991_v10 = vpop.f32.mrf.mxu0  ;;  %v2472_v13 = vadd.f32 %v2441_v12, %v5764_v27  ;;  %v2474_v27 = vadd.f32 %v2447_v52, %v5770_v24 }
 0x1e2   : > { %v3894_v39 = vpack.c.bf16 %v3183_v50, %v3182_v22  ;;  %v3155_v34 = vsel %vm3119_vm8, %v3101_v25, %v3137_v26  ;;  %vm3120_vm9 = vcmp.ge.f32.partialorder %v3102_v29, 0.0  ;;  %v3138_v51 = vmul.f32 0.2, %v3102_v29  ;;  %v3072_v48 = vpop.f32.mrf.mxu1 }
 0x1e3   : > { %vm3121_vm10 = vcmp.ge.f32.partialorder %v3103_v46, 0.0  ;;  %v3139_v14 = vmul.f32 0.2, %v3103_v46  ;;  %v3104_v40 = vadd.f32 %v3071_v8, %v2470_v7  ;;  %v3184_v20 = vadd.f32 %v5848_v28, %v3155_v34  ;;  %v2993_v62 = vpop.f32.mrf.mxu0 }
 0x1e4   : > { %3254 = vst [vmem:[%s5861_s22 + $0x10] sm:$0xff] %v3894_v39  ;;  %v3156_v59 = vsel %vm3120_vm9, %v3102_v29, %v3138_v51  ;;  %v3073_v31 = vadd.f32 %v3072_v48, %v2991_v10  ;;  %v3074_v4 = vpop.f32.mrf.mxu1  ;;  %v2457_v21 = vadd.f32 %v5832_v36, %v5830_v3 }
 0x1e5   : > { %v3185_v61 = vadd.f32 %v5850_v33, %v3156_v59  ;;  %v3157_v44 = vsel %vm3121_vm10, %v3103_v46, %v3139_v14  ;;  %vm3122_vm11 = vcmp.ge.f32.partialorder %v3104_v40, 0.0  ;;  %v3140_v2 = vmul.f32 0.2, %v3104_v40  ;;  %v2997_v17 = vpop.f32.mrf.mxu0 }
 0x1e6   : > { %v3105_v19 = vadd.f32 %v3073_v31, %v5815_v56  ;;  %v3075_v63 = vadd.f32 %v3074_v4, %v2993_v62  ;;  %v3078_v49 = vpop.f32.mrf.mxu1  ;;  %v3186_v53 = vadd.f32 %v5848_v28, %v3157_v44  ;;  %v2451_v56 = vadd.f32 %v5826_v42, %v5824_v41 }
 0x1e7   : > { %v3895_v58 = vpack.c.bf16 %v3185_v61, %v3184_v20  ;;  %v3158_v45 = vsel %vm3122_vm11, %v3104_v40, %v3140_v2  ;;  %v3079_v38 = vadd.f32 %v3078_v49, %v2997_v17  ;;  %v2999_v11 = vpop.f32.mrf.mxu0 }
 0x1e8   : > { %v3187_v35 = vadd.f32 %v5850_v33, %v3158_v45  ;;  %vm3123_vm12 = vcmp.ge.f32.partialorder %v3105_v19, 0.0  ;;  %v3141_v60 = vmul.f32 0.2, %v3105_v19  ;;  %v3106_v54 = vadd.f32 %v3075_v63, %v2472_v13  ;;  %v3080_v6 = vpop.f32.mrf.mxu1 }
 0x1e9   : > { %3255 = vst [vmem:[%s5861_s22 + $0x18] sm:$0xff] %v3895_v58  ;;  %v3107_v23 = vadd.f32 %v3079_v38, %v5822_v55  ;;  %v3081_v37 = vadd.f32 %v3080_v6, %v2999_v11  ;;  %v3001_v18 = vpop.f32.mrf.mxu0  ;;  %v2476_v0 = vadd.f32 %v2451_v56, %v5774_v57  ;;  %v2478_v57 = vadd.f32 %v2457_v21, %v5777_v47 }
 0x1ea   : > { %v3896_v43 = vpack.c.bf16 %v3187_v35, %v3186_v53  ;;  %v3159_v25 = vsel %vm3123_vm12, %v3105_v19, %v3141_v60  ;;  %vm3124_vm13 = vcmp.ge.f32.partialorder %v3106_v54, 0.0  ;;  %v3142_v32 = vmul.f32 0.2, %v3106_v54  ;;  %v3082_v16 = vpop.f32.mrf.mxu1 }
 0x1eb   : > { %vm3125_vm14 = vcmp.ge.f32.partialorder %v3107_v23, 0.0  ;;  %v3143_v9 = vmul.f32 0.2, %v3107_v23  ;;  %v3108_v22 = vadd.f32 %v3081_v37, %v2474_v27  ;;  %v3188_v24 = vadd.f32 %v5848_v28, %v3159_v25  ;;  %v3003_v5 = vpop.f32.mrf.mxu0 }
 0x1ec   : > { %3256 = vst [vmem:[%s5861_s22 + $0x20] sm:$0xff] %v3896_v43  ;;  %v3160_v41 = vsel %vm3124_vm13, %v3106_v54, %v3142_v32  ;;  %v3083_v42 = vadd.f32 %v3082_v16, %v3001_v18  ;;  %v3084_v55 = vpop.f32.mrf.mxu1 }
 0x1ed   : > { %v3189_v50 = vadd.f32 %v5850_v33, %v3160_v41  ;;  %v3161_v26 = vsel %vm3125_vm14, %v3107_v23, %v3143_v9  ;;  %vm3126_vm15 = vcmp.ge.f32.partialorder %v3108_v22, 0.0  ;;  %v3144_v29 = vmul.f32 0.2, %v3108_v22  ;;  %v3007_v12 = vpop.f32.mrf.mxu0 }
 0x1ee   : > { %v3109_v30 = vadd.f32 %v3083_v42, %v5828_v15  ;;  %v3085_v7 = vadd.f32 %v3084_v55, %v3003_v5  ;;  %v3088_v3 = vpop.f32.mrf.mxu1  ;;  %v3190_v46 = vadd.f32 %v5848_v28, %v3161_v26 }
 0x1ef   : > { %v3897_v36 = vpack.c.bf16 %v3189_v50, %v3188_v24  ;;  %v3162_v8 = vsel %vm3126_vm15, %v3108_v22, %v3144_v29  ;;  %v3089_v39 = vadd.f32 %v3088_v3, %v3007_v12  ;;  %v3009_v48 = vpop.f32.mrf.mxu0 }
 0x1f0   : > { %v3191_v34 = vadd.f32 %v5850_v33, %v3162_v8  ;;  %vm3127_vm0 = vcmp.ge.f32.partialorder %v3109_v30, 0.0  ;;  %v3145_v51 = vmul.f32 0.2, %v3109_v30  ;;  %v3110_v10 = vadd.f32 %v3085_v7, %v2476_v0  ;;  %v3090_v14 = vpop.f32.mrf.mxu1 }
 0x1f1   : > { %3257 = vst [vmem:[%s5861_s22 + $0x28] sm:$0xff] %v3897_v36  ;;  %v3111_v15 = vadd.f32 %v3089_v39, %v5834_v1  ;;  %v3091_v40 = vadd.f32 %v3090_v14, %v3009_v48  ;;  %v3011_v31 = vpop.f32.mrf.mxu0 }
 0x1f2   : > { %v3898_v52 = vpack.c.bf16 %v3191_v34, %v3190_v46  ;;  %v3163_v20 = vsel %vm3127_vm0, %v3109_v30, %v3145_v51  ;;  %vm3128_vm1 = vcmp.ge.f32.partialorder %v3110_v10, 0.0  ;;  %v3146_v59 = vmul.f32 0.2, %v3110_v10  ;;  %v3092_v62 = vpop.f32.mrf.mxu1 }
 0x1f3   : > { %vm3129_vm2 = vcmp.ge.f32.partialorder %v3111_v15, 0.0  ;;  %v3147_v4 = vmul.f32 0.2, %v3111_v15  ;;  %v3112_v61 = vadd.f32 %v3091_v40, %v2478_v57  ;;  %v3192_v44 = vadd.f32 %v5848_v28, %v3163_v20  ;;  %v3012_v47 = vpop.f32.mrf.mxu0 }
 0x1f4   : > { %3258 = vst [vmem:[%s5861_s22 + $0x30] sm:$0xff] %v3898_v52  ;;  %v3164_v2 = vsel %vm3128_vm1, %v3110_v10, %v3146_v59  ;;  %v3093_v13 = vpop.f32.mrf.mxu1 }
 0x1f5   : > { %v3193_v1 = vadd.f32 %v5850_v33, %v3164_v2  ;;  %v3165_v19 = vsel %vm3129_vm2, %v3111_v15, %v3147_v4  ;;  %vm3130_vm3 = vcmp.ge.f32.partialorder %v3112_v61, 0.0  ;;  %v3148_v63 = vmul.f32 0.2, %v3112_v61 }
 0x1f6   : > { %v3194_v58 = vadd.f32 %v5848_v28, %v3165_v19 }
 0x1f7   : > { %v3899_v17 = vpack.c.bf16 %v3193_v1, %v3192_v44  ;;  %v3166_v49 = vsel %vm3130_vm3, %v3112_v61, %v3148_v63 }
 0x1f8   : > { %v3195_v53 = vadd.f32 %v5850_v33, %v3166_v49 }
 0x1f9   : > { %3259 = vst [vmem:[%s5861_s22 + $0x38] sm:$0xff] %v3899_v17 }
 0x1fa   : > { %v3900_v45 = vpack.c.bf16 %v3195_v53, %v3194_v58 }
 0x1fc   : > { %3260 = vst [vmem:[%s5861_s22 + $0x40] sm:$0xff] %v3900_v45 }
 0x1fd PF: > { %s13_s14 = sadd.s32 1, %s4385_s14   ;;  %s5936_s12 = smov %s4381_s13 }
 0x1fe   : > { %p10_p6 = scmp.ge.s32.totalorder %s13_s14, 4   ;;  %s5937_s13 = smov %s5939_s15 }
 0x200   :  { %12 = sbr.rel (!%p10_p6) target bundleno = 2 (0x2), region = 71 }

// kernel: discriminator_forward.6
= control target key start
LH: loop header
LB: loop body
LE: loop exit
PB: predicated region body
PF: predicated region fallthrough
CT: control target
= control target key end

     0   :  { %s11006_s12 = smov 0   ;;  %s11008_s13 = smov 0   ;;  %s13144_s0 = inlined_call_operand.vmem [shape: bf16[64,1024], index: 0, kind: input, shape index: {}]   ;;  %s13145_s1 = inlined_call_operand.vmem [shape: bf16[4,1024,512], index: 1, kind: input, shape index: {}]   ;;  %s13146_s2 = inlined_call_operand.vmem [shape: f32[1,512], index: 2, kind: input, shape index: {}]   ;;  %s13147_s3 = inlined_call_operand.vmem [shape: bf16[48,512], index: 3, kind: output, shape index: {}]  }
   0x1   :  { %s11010_s14 = smov 0   ;;  %s11012_s15 = smov 0  }
   0x2   :  { %s11014_s16 = smov 0   ;;  %s11016_s17 = smov 0  }
   0x3   :  { %s11018_s18 = smov 0   ;;  %s11020_s19 = smov 0  }
   0x4   :  { %s11022_s20 = smov 0  }
   0x5 LB: > { %s22_s21 = sadd.s32 1, %s10976_s18  ;;  %s25_s22 = sadd.s32 1, %s10980_s19  ;;  %s10984_s20 = sphi %s11022_s20, %s13_s20   ;;  %s10980_s19 = sphi %s11020_s19, %s13157_s19   ;;  %s10976_s18 = sphi %s11018_s18, %s13156_s18   ;;  %s10972_s17 = sphi %s11016_s17, %s13155_s17   ;;  %s10968_s16 = sphi %s11014_s16, %s13154_s16   ;;  %s10964_s15 = sphi %s11012_s15, %s13153_s15   ;;  %s10960_s14 = sphi %s11010_s14, %s13152_s14   ;;  %s10956_s13 = sphi %s11008_s13, %s13151_s13   ;;  %s10952_s12 = sphi %s11006_s12, %s13150_s12  }
   0x6   : > { %p23_p0 = scmp.ge.s32.totalorder %s22_s21, 2  ;;  %p65_p1 = scmp.ne.s32.totalorder %s10964_s15, %s10960_s14 }
   0x7   : > { %s9074_s23 = sadd.s32 4294967295, %s10984_s20   ;;  %p66_p2 = scmp.eq.s32.totalorder %s10984_s20, 0 }
   0x8   : > { %s13159_s21 = smov (%p23_p0, %s22_s21), 0  ;;  %s13161_s22 = smov (!%p23_p0, %s25_s22), %s10980_s19 }
   0x9   : > { %p27_p3 = scmp.ge.s32.totalorder %s13161_s22, 2  ;;  %s107_s24 = ssub.s32 %s10976_s18, %s13159_s21 }
   0xa   : > { %p11062_p4 = por %p66_p2, %p65_p1  ;;  %p122_p5 = scmp.ne.s32.totalorder %s10956_s13, %s10952_s12 }
   0xb   : > { %s13163_s22 = smov (%p27_p3, %s13161_s22), 0  ;;  %s58_s26 = sadd.s32 1, %s10964_s15 }
   0xc   : > { %p123_p6 = scmp.eq.s32.totalorder %s9074_s23, 3  ;;  %s55_s27 = ssub.s32 %s10980_s19, %s13163_s22 }
   0xd   : > { %s112_s28 = sadd.s32 1, %s10956_s13  ;;  %p56_p7 = scmp.eq.s32.totalorder %s55_s27, 0 }
   0xe   : > { %s109_s29 = sor.u32 %s107_s24, %s55_s27  ;;  %p11074_p9 = por %p123_p6, %p122_p5 }
   0xf   : > { %p110_p8 = scmp.eq.s32.totalorder %s109_s29, 0  ;;  %p9077_p10 = scmp.ge.s32.totalorder %s10984_s20, 4 }
  0x10   : > { %s11079_s4 = scalar_select %p56_p7, %s10964_s15, %s58_s26  }
  0x11   : > { %s11082_s5 = scalar_select %p110_p8, %s10956_s13, %s112_s28  }
  0x12   : > { %145 = sbr.rel (%p9077_p10) target bundleno = 283 (0x11b), region = 16 }
  0x17   : > { %158 = sbr.rel (!%p11062_p4) target bundleno = 283 (0x11b), region = 24  ;;  %s160_s6 = sand.u32 (%p11062_p4), 1, %s10964_s15  }
  0x18   : > { %s10047_s7 = sshll.u32 (%p11062_p4), %s10980_s19, 3  ;;  %s9078_s8 = sshll.u32 (%p11062_p4), %s160_s6, 12 }
  0x19   : > { %s11092_s11 = scalar_lea.vmem (%p11062_p4), %s13145_s1, %s10047_s7  ;;  %s11097_s23 = scalar_lea.vmem (%p11062_p4), [#allocation2], %s9078_s8 }
  0x1a   : > { %v1219_v0 = vld [vmem:[%s11092_s11] sm:$0xff] (%p11062_p4)  ;;  %v1221_v1 = vld [vmem:[%s11092_s11 + $0x10] sm:$0xff] (%p11062_p4) }
  0x1b   : > { %v1223_v2 = vld [vmem:[%s11092_s11 + $0x20] sm:$0xff] (%p11062_p4)  ;;  %1220 = vst [vmem:[%s11097_s23] sm:$0xff] (%p11062_p4), %v1219_v0  ;;  %1222 = vst [vmem:[%s11097_s23 + $0x8] sm:$0xff] (%p11062_p4), %v1221_v1  ;;  %v1225_v3 = vld [vmem:[%s11092_s11 + $0x30] sm:$0xff] (%p11062_p4) }
  0x1c   : > { %1224 = vst [vmem:[%s11097_s23 + $0x10] sm:$0xff] %v1223_v2  ;;  %v1227_v4 = vld [vmem:[%s11092_s11 + $0x40] sm:$0xff]  ;;  %v1229_v5 = vld [vmem:[%s11092_s11 + $0x50] sm:$0xff]  ;;  %1226 = vst [vmem:[%s11097_s23 + $0x18] sm:$0xff] %v1225_v3 }
  0x1d   : > { %1228 = vst [vmem:[%s11097_s23 + $0x20] sm:$0xff] %v1227_v4  ;;  %1230 = vst [vmem:[%s11097_s23 + $0x28] sm:$0xff] %v1229_v5  ;;  %v1231_v6 = vld [vmem:[%s11092_s11 + $0x60] sm:$0xff]  ;;  %v1233_v7 = vld [vmem:[%s11092_s11 + $0x70] sm:$0xff] }
  0x1e   : > { %v1235_v8 = vld [vmem:[%s11092_s11 + $0x80] sm:$0xff]  ;;  %1232 = vst [vmem:[%s11097_s23 + $0x30] sm:$0xff] %v1231_v6  ;;  %1234 = vst [vmem:[%s11097_s23 + $0x38] sm:$0xff] %v1233_v7  ;;  %v1237_v9 = vld [vmem:[%s11092_s11 + $0x90] sm:$0xff] }
  0x1f   : > { %1236 = vst [vmem:[%s11097_s23 + $0x40] sm:$0xff] %v1235_v8  ;;  %v1239_v10 = vld [vmem:[%s11092_s11 + $0xa0] sm:$0xff]  ;;  %v1241_v11 = vld [vmem:[%s11092_s11 + $0xb0] sm:$0xff]  ;;  %1238 = vst [vmem:[%s11097_s23 + $0x48] sm:$0xff] %v1237_v9 }
  0x20   : > { %1240 = vst [vmem:[%s11097_s23 + $0x50] sm:$0xff] %v1239_v10  ;;  %1242 = vst [vmem:[%s11097_s23 + $0x58] sm:$0xff] %v1241_v11  ;;  %v1243_v12 = vld [vmem:[%s11092_s11 + $0xc0] sm:$0xff]  ;;  %v1245_v13 = vld [vmem:[%s11092_s11 + $0xd0] sm:$0xff] }
  0x21   : > { %v1247_v14 = vld [vmem:[%s11092_s11 + $0xe0] sm:$0xff]  ;;  %1244 = vst [vmem:[%s11097_s23 + $0x60] sm:$0xff] %v1243_v12  ;;  %1246 = vst [vmem:[%s11097_s23 + $0x68] sm:$0xff] %v1245_v13  ;;  %v1249_v15 = vld [vmem:[%s11092_s11 + $0xf0] sm:$0xff] }
  0x22   : > { %1248 = vst [vmem:[%s11097_s23 + $0x70] sm:$0xff] %v1247_v14  ;;  %v1251_v16 = vld [vmem:[%s11092_s11 + $0x100] sm:$0xff]  ;;  %v1253_v17 = vld [vmem:[%s11092_s11 + $0x110] sm:$0xff]  ;;  %1250 = vst [vmem:[%s11097_s23 + $0x78] sm:$0xff] %v1249_v15 }
  0x23   : > { %1252 = vst [vmem:[%s11097_s23 + $0x80] sm:$0xff] %v1251_v16  ;;  %1254 = vst [vmem:[%s11097_s23 + $0x88] sm:$0xff] %v1253_v17  ;;  %v1255_v18 = vld [vmem:[%s11092_s11 + $0x120] sm:$0xff]  ;;  %v1257_v19 = vld [vmem:[%s11092_s11 + $0x130] sm:$0xff] }
  0x24   : > { %v1259_v20 = vld [vmem:[%s11092_s11 + $0x140] sm:$0xff]  ;;  %1256 = vst [vmem:[%s11097_s23 + $0x90] sm:$0xff] %v1255_v18  ;;  %1258 = vst [vmem:[%s11097_s23 + $0x98] sm:$0xff] %v1257_v19  ;;  %v1261_v21 = vld [vmem:[%s11092_s11 + $0x150] sm:$0xff] }
  0x25   : > { %1260 = vst [vmem:[%s11097_s23 + $0xa0] sm:$0xff] %v1259_v20  ;;  %v1263_v22 = vld [vmem:[%s11092_s11 + $0x160] sm:$0xff]  ;;  %v1265_v23 = vld [vmem:[%s11092_s11 + $0x170] sm:$0xff]  ;;  %1262 = vst [vmem:[%s11097_s23 + $0xa8] sm:$0xff] %v1261_v21 }
  0x26   : > { %1264 = vst [vmem:[%s11097_s23 + $0xb0] sm:$0xff] %v1263_v22  ;;  %1266 = vst [vmem:[%s11097_s23 + $0xb8] sm:$0xff] %v1265_v23  ;;  %v1267_v24 = vld [vmem:[%s11092_s11 + $0x180] sm:$0xff]  ;;  %v1269_v25 = vld [vmem:[%s11092_s11 + $0x190] sm:$0xff] }
  0x27   : > { %v1271_v26 = vld [vmem:[%s11092_s11 + $0x1a0] sm:$0xff]  ;;  %1268 = vst [vmem:[%s11097_s23 + $0xc0] sm:$0xff] %v1267_v24  ;;  %1270 = vst [vmem:[%s11097_s23 + $0xc8] sm:$0xff] %v1269_v25  ;;  %v1273_v27 = vld [vmem:[%s11092_s11 + $0x1b0] sm:$0xff] }
  0x28   : > { %1272 = vst [vmem:[%s11097_s23 + $0xd0] sm:$0xff] %v1271_v26  ;;  %v1275_v28 = vld [vmem:[%s11092_s11 + $0x1c0] sm:$0xff]  ;;  %v1277_v29 = vld [vmem:[%s11092_s11 + $0x1d0] sm:$0xff]  ;;  %1274 = vst [vmem:[%s11097_s23 + $0xd8] sm:$0xff] %v1273_v27 }
  0x29   : > { %1276 = vst [vmem:[%s11097_s23 + $0xe0] sm:$0xff] %v1275_v28  ;;  %1278 = vst [vmem:[%s11097_s23 + $0xe8] sm:$0xff] %v1277_v29  ;;  %v1279_v30 = vld [vmem:[%s11092_s11 + $0x1e0] sm:$0xff]  ;;  %v1281_v31 = vld [vmem:[%s11092_s11 + $0x1f0] sm:$0xff] }
  0x2a   : > { %v1283_v32 = vld [vmem:[%s11092_s11 + $0x200] sm:$0xff]  ;;  %1280 = vst [vmem:[%s11097_s23 + $0xf0] sm:$0xff] %v1279_v30  ;;  %1282 = vst [vmem:[%s11097_s23 + $0xf8] sm:$0xff] %v1281_v31  ;;  %v1285_v33 = vld [vmem:[%s11092_s11 + $0x210] sm:$0xff] }
  0x2b   : > { %1284 = vst [vmem:[%s11097_s23 + $0x100] sm:$0xff] %v1283_v32  ;;  %v1287_v34 = vld [vmem:[%s11092_s11 + $0x220] sm:$0xff]  ;;  %v1289_v35 = vld [vmem:[%s11092_s11 + $0x230] sm:$0xff]  ;;  %1286 = vst [vmem:[%s11097_s23 + $0x108] sm:$0xff] %v1285_v33 }
  0x2c   : > { %1288 = vst [vmem:[%s11097_s23 + $0x110] sm:$0xff] %v1287_v34  ;;  %1290 = vst [vmem:[%s11097_s23 + $0x118] sm:$0xff] %v1289_v35  ;;  %v1291_v36 = vld [vmem:[%s11092_s11 + $0x240] sm:$0xff]  ;;  %v1293_v37 = vld [vmem:[%s11092_s11 + $0x250] sm:$0xff] }
  0x2d   : > { %v1295_v38 = vld [vmem:[%s11092_s11 + $0x260] sm:$0xff]  ;;  %1292 = vst [vmem:[%s11097_s23 + $0x120] sm:$0xff] %v1291_v36  ;;  %1294 = vst [vmem:[%s11097_s23 + $0x128] sm:$0xff] %v1293_v37  ;;  %v1297_v39 = vld [vmem:[%s11092_s11 + $0x270] sm:$0xff] }
  0x2e   : > { %1296 = vst [vmem:[%s11097_s23 + $0x130] sm:$0xff] %v1295_v38  ;;  %v1299_v40 = vld [vmem:[%s11092_s11 + $0x280] sm:$0xff]  ;;  %v1301_v41 = vld [vmem:[%s11092_s11 + $0x290] sm:$0xff]  ;;  %1298 = vst [vmem:[%s11097_s23 + $0x138] sm:$0xff] %v1297_v39 }
  0x2f   : > { %1300 = vst [vmem:[%s11097_s23 + $0x140] sm:$0xff] %v1299_v40  ;;  %1302 = vst [vmem:[%s11097_s23 + $0x148] sm:$0xff] %v1301_v41  ;;  %v1303_v42 = vld [vmem:[%s11092_s11 + $0x2a0] sm:$0xff]  ;;  %v1305_v43 = vld [vmem:[%s11092_s11 + $0x2b0] sm:$0xff] }
  0x30   : > { %v1307_v44 = vld [vmem:[%s11092_s11 + $0x2c0] sm:$0xff]  ;;  %1304 = vst [vmem:[%s11097_s23 + $0x150] sm:$0xff] %v1303_v42  ;;  %1306 = vst [vmem:[%s11097_s23 + $0x158] sm:$0xff] %v1305_v43  ;;  %v1309_v45 = vld [vmem:[%s11092_s11 + $0x2d0] sm:$0xff] }
  0x31   : > { %1308 = vst [vmem:[%s11097_s23 + $0x160] sm:$0xff] %v1307_v44  ;;  %v1311_v46 = vld [vmem:[%s11092_s11 + $0x2e0] sm:$0xff]  ;;  %v1313_v47 = vld [vmem:[%s11092_s11 + $0x2f0] sm:$0xff]  ;;  %1310 = vst [vmem:[%s11097_s23 + $0x168] sm:$0xff] %v1309_v45 }
  0x32   : > { %1312 = vst [vmem:[%s11097_s23 + $0x170] sm:$0xff] %v1311_v46  ;;  %1314 = vst [vmem:[%s11097_s23 + $0x178] sm:$0xff] %v1313_v47  ;;  %v1315_v48 = vld [vmem:[%s11092_s11 + $0x300] sm:$0xff]  ;;  %v1317_v49 = vld [vmem:[%s11092_s11 + $0x310] sm:$0xff] }
  0x33   : > { %v1319_v50 = vld [vmem:[%s11092_s11 + $0x320] sm:$0xff]  ;;  %1316 = vst [vmem:[%s11097_s23 + $0x180] sm:$0xff] %v1315_v48  ;;  %1318 = vst [vmem:[%s11097_s23 + $0x188] sm:$0xff] %v1317_v49  ;;  %v1321_v51 = vld [vmem:[%s11092_s11 + $0x330] sm:$0xff] }
  0x34   : > { %1320 = vst [vmem:[%s11097_s23 + $0x190] sm:$0xff] %v1319_v50  ;;  %v1323_v52 = vld [vmem:[%s11092_s11 + $0x340] sm:$0xff]  ;;  %v1325_v53 = vld [vmem:[%s11092_s11 + $0x350] sm:$0xff]  ;;  %1322 = vst [vmem:[%s11097_s23 + $0x198] sm:$0xff] %v1321_v51 }
  0x35   : > { %1324 = vst [vmem:[%s11097_s23 + $0x1a0] sm:$0xff] %v1323_v52  ;;  %1326 = vst [vmem:[%s11097_s23 + $0x1a8] sm:$0xff] %v1325_v53  ;;  %v1327_v54 = vld [vmem:[%s11092_s11 + $0x360] sm:$0xff]  ;;  %v1329_v55 = vld [vmem:[%s11092_s11 + $0x370] sm:$0xff] }
  0x36   : > { %v1331_v56 = vld [vmem:[%s11092_s11 + $0x380] sm:$0xff]  ;;  %1328 = vst [vmem:[%s11097_s23 + $0x1b0] sm:$0xff] %v1327_v54  ;;  %1330 = vst [vmem:[%s11097_s23 + $0x1b8] sm:$0xff] %v1329_v55  ;;  %v1333_v57 = vld [vmem:[%s11092_s11 + $0x390] sm:$0xff] }
  0x37   : > { %1332 = vst [vmem:[%s11097_s23 + $0x1c0] sm:$0xff] %v1331_v56  ;;  %v1335_v58 = vld [vmem:[%s11092_s11 + $0x3a0] sm:$0xff]  ;;  %v1337_v59 = vld [vmem:[%s11092_s11 + $0x3b0] sm:$0xff]  ;;  %1334 = vst [vmem:[%s11097_s23 + $0x1c8] sm:$0xff] %v1333_v57 }
  0x38   : > { %1336 = vst [vmem:[%s11097_s23 + $0x1d0] sm:$0xff] %v1335_v58  ;;  %1338 = vst [vmem:[%s11097_s23 + $0x1d8] sm:$0xff] %v1337_v59  ;;  %v1339_v60 = vld [vmem:[%s11092_s11 + $0x3c0] sm:$0xff]  ;;  %v1341_v61 = vld [vmem:[%s11092_s11 + $0x3d0] sm:$0xff] }
  0x39   : > { %v1343_v62 = vld [vmem:[%s11092_s11 + $0x3e0] sm:$0xff]  ;;  %1340 = vst [vmem:[%s11097_s23 + $0x1e0] sm:$0xff] %v1339_v60  ;;  %1342 = vst [vmem:[%s11097_s23 + $0x1e8] sm:$0xff] %v1341_v61  ;;  %v1345_v63 = vld [vmem:[%s11092_s11 + $0x3f0] sm:$0xff] }
  0x3a   : > { %1344 = vst [vmem:[%s11097_s23 + $0x1f0] sm:$0xff] %v1343_v62  ;;  %v1347_v0 = vld [vmem:[%s11092_s11 + $0x400] sm:$0xff]  ;;  %v1349_v1 = vld [vmem:[%s11092_s11 + $0x410] sm:$0xff]  ;;  %1346 = vst [vmem:[%s11097_s23 + $0x1f8] sm:$0xff] %v1345_v63 }
  0x3b   : > { %1348 = vst [vmem:[%s11097_s23 + $0x200] sm:$0xff] %v1347_v0  ;;  %1350 = vst [vmem:[%s11097_s23 + $0x208] sm:$0xff] %v1349_v1  ;;  %v1351_v2 = vld [vmem:[%s11092_s11 + $0x420] sm:$0xff]  ;;  %v1353_v3 = vld [vmem:[%s11092_s11 + $0x430] sm:$0xff] }
  0x3c   : > { %v1355_v4 = vld [vmem:[%s11092_s11 + $0x440] sm:$0xff]  ;;  %1352 = vst [vmem:[%s11097_s23 + $0x210] sm:$0xff] %v1351_v2  ;;  %1354 = vst [vmem:[%s11097_s23 + $0x218] sm:$0xff] %v1353_v3  ;;  %v1357_v5 = vld [vmem:[%s11092_s11 + $0x450] sm:$0xff] }
  0x3d   : > { %1356 = vst [vmem:[%s11097_s23 + $0x220] sm:$0xff] %v1355_v4  ;;  %v1359_v6 = vld [vmem:[%s11092_s11 + $0x460] sm:$0xff]  ;;  %v1361_v7 = vld [vmem:[%s11092_s11 + $0x470] sm:$0xff]  ;;  %1358 = vst [vmem:[%s11097_s23 + $0x228] sm:$0xff] %v1357_v5 }
  0x3e   : > { %1360 = vst [vmem:[%s11097_s23 + $0x230] sm:$0xff] %v1359_v6  ;;  %1362 = vst [vmem:[%s11097_s23 + $0x238] sm:$0xff] %v1361_v7  ;;  %v1363_v8 = vld [vmem:[%s11092_s11 + $0x480] sm:$0xff]  ;;  %v1365_v9 = vld [vmem:[%s11092_s11 + $0x490] sm:$0xff] }
  0x3f   : > { %v1367_v10 = vld [vmem:[%s11092_s11 + $0x4a0] sm:$0xff]  ;;  %1364 = vst [vmem:[%s11097_s23 + $0x240] sm:$0xff] %v1363_v8  ;;  %1366 = vst [vmem:[%s11097_s23 + $0x248] sm:$0xff] %v1365_v9  ;;  %v1369_v11 = vld [vmem:[%s11092_s11 + $0x4b0] sm:$0xff] }
  0x40   : > { %1368 = vst [vmem:[%s11097_s23 + $0x250] sm:$0xff] %v1367_v10  ;;  %v1371_v12 = vld [vmem:[%s11092_s11 + $0x4c0] sm:$0xff]  ;;  %v1373_v13 = vld [vmem:[%s11092_s11 + $0x4d0] sm:$0xff]  ;;  %1370 = vst [vmem:[%s11097_s23 + $0x258] sm:$0xff] %v1369_v11 }
  0x41   : > { %1372 = vst [vmem:[%s11097_s23 + $0x260] sm:$0xff] %v1371_v12  ;;  %1374 = vst [vmem:[%s11097_s23 + $0x268] sm:$0xff] %v1373_v13  ;;  %v1375_v14 = vld [vmem:[%s11092_s11 + $0x4e0] sm:$0xff]  ;;  %v1377_v15 = vld [vmem:[%s11092_s11 + $0x4f0] sm:$0xff] }
  0x42   : > { %v1379_v16 = vld [vmem:[%s11092_s11 + $0x500] sm:$0xff]  ;;  %1376 = vst [vmem:[%s11097_s23 + $0x270] sm:$0xff] %v1375_v14  ;;  %1378 = vst [vmem:[%s11097_s23 + $0x278] sm:$0xff] %v1377_v15  ;;  %v1381_v17 = vld [vmem:[%s11092_s11 + $0x510] sm:$0xff] }
  0x43   : > { %1380 = vst [vmem:[%s11097_s23 + $0x280] sm:$0xff] %v1379_v16  ;;  %v1383_v18 = vld [vmem:[%s11092_s11 + $0x520] sm:$0xff]  ;;  %v1385_v19 = vld [vmem:[%s11092_s11 + $0x530] sm:$0xff]  ;;  %1382 = vst [vmem:[%s11097_s23 + $0x288] sm:$0xff] %v1381_v17 }
  0x44   : > { %1384 = vst [vmem:[%s11097_s23 + $0x290] sm:$0xff] %v1383_v18  ;;  %1386 = vst [vmem:[%s11097_s23 + $0x298] sm:$0xff] %v1385_v19  ;;  %v1387_v20 = vld [vmem:[%s11092_s11 + $0x540] sm:$0xff]  ;;  %v1389_v21 = vld [vmem:[%s11092_s11 + $0x550] sm:$0xff] }
  0x45   : > { %v1391_v22 = vld [vmem:[%s11092_s11 + $0x560] sm:$0xff]  ;;  %1388 = vst [vmem:[%s11097_s23 + $0x2a0] sm:$0xff] %v1387_v20  ;;  %1390 = vst [vmem:[%s11097_s23 + $0x2a8] sm:$0xff] %v1389_v21  ;;  %v1393_v23 = vld [vmem:[%s11092_s11 + $0x570] sm:$0xff] }
  0x46   : > { %1392 = vst [vmem:[%s11097_s23 + $0x2b0] sm:$0xff] %v1391_v22  ;;  %v1395_v24 = vld [vmem:[%s11092_s11 + $0x580] sm:$0xff]  ;;  %v1397_v25 = vld [vmem:[%s11092_s11 + $0x590] sm:$0xff]  ;;  %1394 = vst [vmem:[%s11097_s23 + $0x2b8] sm:$0xff] %v1393_v23 }
  0x47   : > { %1396 = vst [vmem:[%s11097_s23 + $0x2c0] sm:$0xff] %v1395_v24  ;;  %1398 = vst [vmem:[%s11097_s23 + $0x2c8] sm:$0xff] %v1397_v25  ;;  %v1399_v26 = vld [vmem:[%s11092_s11 + $0x5a0] sm:$0xff]  ;;  %v1401_v27 = vld [vmem:[%s11092_s11 + $0x5b0] sm:$0xff] }
  0x48   : > { %v1403_v28 = vld [vmem:[%s11092_s11 + $0x5c0] sm:$0xff]  ;;  %1400 = vst [vmem:[%s11097_s23 + $0x2d0] sm:$0xff] %v1399_v26  ;;  %1402 = vst [vmem:[%s11097_s23 + $0x2d8] sm:$0xff] %v1401_v27  ;;  %v1405_v29 = vld [vmem:[%s11092_s11 + $0x5d0] sm:$0xff] }
  0x49   : > { %1404 = vst [vmem:[%s11097_s23 + $0x2e0] sm:$0xff] %v1403_v28  ;;  %v1407_v30 = vld [vmem:[%s11092_s11 + $0x5e0] sm:$0xff]  ;;  %v1409_v31 = vld [vmem:[%s11092_s11 + $0x5f0] sm:$0xff]  ;;  %1406 = vst [vmem:[%s11097_s23 + $0x2e8] sm:$0xff] %v1405_v29 }
  0x4a   : > { %1408 = vst [vmem:[%s11097_s23 + $0x2f0] sm:$0xff] %v1407_v30  ;;  %1410 = vst [vmem:[%s11097_s23 + $0x2f8] sm:$0xff] %v1409_v31  ;;  %v1411_v32 = vld [vmem:[%s11092_s11 + $0x600] sm:$0xff]  ;;  %v1413_v33 = vld [vmem:[%s11092_s11 + $0x610] sm:$0xff] }
  0x4b   : > { %v1415_v34 = vld [vmem:[%s11092_s11 + $0x620] sm:$0xff]  ;;  %1412 = vst [vmem:[%s11097_s23 + $0x300] sm:$0xff] %v1411_v32  ;;  %1414 = vst [vmem:[%s11097_s23 + $0x308] sm:$0xff] %v1413_v33  ;;  %v1417_v35 = vld [vmem:[%s11092_s11 + $0x630] sm:$0xff] }
  0x4c   : > { %1416 = vst [vmem:[%s11097_s23 + $0x310] sm:$0xff] %v1415_v34  ;;  %v1419_v36 = vld [vmem:[%s11092_s11 + $0x640] sm:$0xff]  ;;  %v1421_v37 = vld [vmem:[%s11092_s11 + $0x650] sm:$0xff]  ;;  %1418 = vst [vmem:[%s11097_s23 + $0x318] sm:$0xff] %v1417_v35 }
  0x4d   : > { %1420 = vst [vmem:[%s11097_s23 + $0x320] sm:$0xff] %v1419_v36  ;;  %1422 = vst [vmem:[%s11097_s23 + $0x328] sm:$0xff] %v1421_v37  ;;  %v1423_v38 = vld [vmem:[%s11092_s11 + $0x660] sm:$0xff]  ;;  %v1425_v39 = vld [vmem:[%s11092_s11 + $0x670] sm:$0xff] }
  0x4e   : > { %v1427_v40 = vld [vmem:[%s11092_s11 + $0x680] sm:$0xff]  ;;  %1424 = vst [vmem:[%s11097_s23 + $0x330] sm:$0xff] %v1423_v38  ;;  %1426 = vst [vmem:[%s11097_s23 + $0x338] sm:$0xff] %v1425_v39  ;;  %v1429_v41 = vld [vmem:[%s11092_s11 + $0x690] sm:$0xff] }
  0x4f   : > { %1428 = vst [vmem:[%s11097_s23 + $0x340] sm:$0xff] %v1427_v40  ;;  %v1431_v42 = vld [vmem:[%s11092_s11 + $0x6a0] sm:$0xff]  ;;  %v1433_v43 = vld [vmem:[%s11092_s11 + $0x6b0] sm:$0xff]  ;;  %1430 = vst [vmem:[%s11097_s23 + $0x348] sm:$0xff] %v1429_v41 }
  0x50   : > { %1432 = vst [vmem:[%s11097_s23 + $0x350] sm:$0xff] %v1431_v42  ;;  %1434 = vst [vmem:[%s11097_s23 + $0x358] sm:$0xff] %v1433_v43  ;;  %v1435_v44 = vld [vmem:[%s11092_s11 + $0x6c0] sm:$0xff]  ;;  %v1437_v45 = vld [vmem:[%s11092_s11 + $0x6d0] sm:$0xff] }
  0x51   : > { %v1439_v46 = vld [vmem:[%s11092_s11 + $0x6e0] sm:$0xff]  ;;  %1436 = vst [vmem:[%s11097_s23 + $0x360] sm:$0xff] %v1435_v44  ;;  %1438 = vst [vmem:[%s11097_s23 + $0x368] sm:$0xff] %v1437_v45  ;;  %v1441_v47 = vld [vmem:[%s11092_s11 + $0x6f0] sm:$0xff] }
  0x52   : > { %1440 = vst [vmem:[%s11097_s23 + $0x370] sm:$0xff] %v1439_v46  ;;  %v1443_v48 = vld [vmem:[%s11092_s11 + $0x700] sm:$0xff]  ;;  %v1445_v49 = vld [vmem:[%s11092_s11 + $0x710] sm:$0xff]  ;;  %1442 = vst [vmem:[%s11097_s23 + $0x378] sm:$0xff] %v1441_v47 }
  0x53   : > { %1444 = vst [vmem:[%s11097_s23 + $0x380] sm:$0xff] %v1443_v48  ;;  %1446 = vst [vmem:[%s11097_s23 + $0x388] sm:$0xff] %v1445_v49  ;;  %v1447_v50 = vld [vmem:[%s11092_s11 + $0x720] sm:$0xff]  ;;  %v1449_v51 = vld [vmem:[%s11092_s11 + $0x730] sm:$0xff] }
  0x54   : > { %v1451_v52 = vld [vmem:[%s11092_s11 + $0x740] sm:$0xff]  ;;  %1448 = vst [vmem:[%s11097_s23 + $0x390] sm:$0xff] %v1447_v50  ;;  %1450 = vst [vmem:[%s11097_s23 + $0x398] sm:$0xff] %v1449_v51  ;;  %v1453_v53 = vld [vmem:[%s11092_s11 + $0x750] sm:$0xff] }
  0x55   : > { %1452 = vst [vmem:[%s11097_s23 + $0x3a0] sm:$0xff] %v1451_v52  ;;  %v1455_v54 = vld [vmem:[%s11092_s11 + $0x760] sm:$0xff]  ;;  %v1457_v55 = vld [vmem:[%s11092_s11 + $0x770] sm:$0xff]  ;;  %1454 = vst [vmem:[%s11097_s23 + $0x3a8] sm:$0xff] %v1453_v53 }
  0x56   : > { %1456 = vst [vmem:[%s11097_s23 + $0x3b0] sm:$0xff] %v1455_v54  ;;  %1458 = vst [vmem:[%s11097_s23 + $0x3b8] sm:$0xff] %v1457_v55  ;;  %v1459_v56 = vld [vmem:[%s11092_s11 + $0x780] sm:$0xff]  ;;  %v1461_v57 = vld [vmem:[%s11092_s11 + $0x790] sm:$0xff] }
  0x57   : > { %v1463_v58 = vld [vmem:[%s11092_s11 + $0x7a0] sm:$0xff]  ;;  %1460 = vst [vmem:[%s11097_s23 + $0x3c0] sm:$0xff] %v1459_v56  ;;  %1462 = vst [vmem:[%s11097_s23 + $0x3c8] sm:$0xff] %v1461_v57  ;;  %v1465_v59 = vld [vmem:[%s11092_s11 + $0x7b0] sm:$0xff] }
  0x58   : > { %1464 = vst [vmem:[%s11097_s23 + $0x3d0] sm:$0xff] %v1463_v58  ;;  %v1467_v60 = vld [vmem:[%s11092_s11 + $0x7c0] sm:$0xff]  ;;  %v1469_v61 = vld [vmem:[%s11092_s11 + $0x7d0] sm:$0xff]  ;;  %1466 = vst [vmem:[%s11097_s23 + $0x3d8] sm:$0xff] %v1465_v59 }
  0x59   : > { %1468 = vst [vmem:[%s11097_s23 + $0x3e0] sm:$0xff] %v1467_v60  ;;  %1470 = vst [vmem:[%s11097_s23 + $0x3e8] sm:$0xff] %v1469_v61  ;;  %v1471_v62 = vld [vmem:[%s11092_s11 + $0x7e0] sm:$0xff]  ;;  %v1473_v63 = vld [vmem:[%s11092_s11 + $0x7f0] sm:$0xff] }
  0x5a   : > { %v1475_v0 = vld [vmem:[%s11092_s11 + $0x800] sm:$0xff]  ;;  %1472 = vst [vmem:[%s11097_s23 + $0x3f0] sm:$0xff] %v1471_v62  ;;  %1474 = vst [vmem:[%s11097_s23 + $0x3f8] sm:$0xff] %v1473_v63  ;;  %v1477_v1 = vld [vmem:[%s11092_s11 + $0x810] sm:$0xff] }
  0x5b   : > { %1476 = vst [vmem:[%s11097_s23 + $0x400] sm:$0xff] %v1475_v0  ;;  %v1479_v2 = vld [vmem:[%s11092_s11 + $0x820] sm:$0xff]  ;;  %v1481_v3 = vld [vmem:[%s11092_s11 + $0x830] sm:$0xff]  ;;  %1478 = vst [vmem:[%s11097_s23 + $0x408] sm:$0xff] %v1477_v1 }
  0x5c   : > { %1480 = vst [vmem:[%s11097_s23 + $0x410] sm:$0xff] %v1479_v2  ;;  %1482 = vst [vmem:[%s11097_s23 + $0x418] sm:$0xff] %v1481_v3  ;;  %v1483_v4 = vld [vmem:[%s11092_s11 + $0x840] sm:$0xff]  ;;  %v1485_v5 = vld [vmem:[%s11092_s11 + $0x850] sm:$0xff] }
  0x5d   : > { %v1487_v6 = vld [vmem:[%s11092_s11 + $0x860] sm:$0xff]  ;;  %1484 = vst [vmem:[%s11097_s23 + $0x420] sm:$0xff] %v1483_v4  ;;  %1486 = vst [vmem:[%s11097_s23 + $0x428] sm:$0xff] %v1485_v5  ;;  %v1489_v7 = vld [vmem:[%s11092_s11 + $0x870] sm:$0xff] }
  0x5e   : > { %1488 = vst [vmem:[%s11097_s23 + $0x430] sm:$0xff] %v1487_v6  ;;  %v1491_v8 = vld [vmem:[%s11092_s11 + $0x880] sm:$0xff]  ;;  %v1493_v9 = vld [vmem:[%s11092_s11 + $0x890] sm:$0xff]  ;;  %1490 = vst [vmem:[%s11097_s23 + $0x438] sm:$0xff] %v1489_v7 }
  0x5f   : > { %1492 = vst [vmem:[%s11097_s23 + $0x440] sm:$0xff] %v1491_v8  ;;  %1494 = vst [vmem:[%s11097_s23 + $0x448] sm:$0xff] %v1493_v9  ;;  %v1495_v10 = vld [vmem:[%s11092_s11 + $0x8a0] sm:$0xff]  ;;  %v1497_v11 = vld [vmem:[%s11092_s11 + $0x8b0] sm:$0xff] }
  0x60   : > { %v1499_v12 = vld [vmem:[%s11092_s11 + $0x8c0] sm:$0xff]  ;;  %1496 = vst [vmem:[%s11097_s23 + $0x450] sm:$0xff] %v1495_v10  ;;  %1498 = vst [vmem:[%s11097_s23 + $0x458] sm:$0xff] %v1497_v11  ;;  %v1501_v13 = vld [vmem:[%s11092_s11 + $0x8d0] sm:$0xff] }
  0x61   : > { %1500 = vst [vmem:[%s11097_s23 + $0x460] sm:$0xff] %v1499_v12  ;;  %v1503_v14 = vld [vmem:[%s11092_s11 + $0x8e0] sm:$0xff]  ;;  %v1505_v15 = vld [vmem:[%s11092_s11 + $0x8f0] sm:$0xff]  ;;  %1502 = vst [vmem:[%s11097_s23 + $0x468] sm:$0xff] %v1501_v13 }
  0x62   : > { %1504 = vst [vmem:[%s11097_s23 + $0x470] sm:$0xff] %v1503_v14  ;;  %1506 = vst [vmem:[%s11097_s23 + $0x478] sm:$0xff] %v1505_v15  ;;  %v1507_v16 = vld [vmem:[%s11092_s11 + $0x900] sm:$0xff]  ;;  %v1509_v17 = vld [vmem:[%s11092_s11 + $0x910] sm:$0xff] }
  0x63   : > { %v1511_v18 = vld [vmem:[%s11092_s11 + $0x920] sm:$0xff]  ;;  %1508 = vst [vmem:[%s11097_s23 + $0x480] sm:$0xff] %v1507_v16  ;;  %1510 = vst [vmem:[%s11097_s23 + $0x488] sm:$0xff] %v1509_v17  ;;  %v1513_v19 = vld [vmem:[%s11092_s11 + $0x930] sm:$0xff] }
  0x64   : > { %1512 = vst [vmem:[%s11097_s23 + $0x490] sm:$0xff] %v1511_v18  ;;  %v1515_v20 = vld [vmem:[%s11092_s11 + $0x940] sm:$0xff]  ;;  %v1517_v21 = vld [vmem:[%s11092_s11 + $0x950] sm:$0xff]  ;;  %1514 = vst [vmem:[%s11097_s23 + $0x498] sm:$0xff] %v1513_v19 }
  0x65   : > { %1516 = vst [vmem:[%s11097_s23 + $0x4a0] sm:$0xff] %v1515_v20  ;;  %1518 = vst [vmem:[%s11097_s23 + $0x4a8] sm:$0xff] %v1517_v21  ;;  %v1519_v22 = vld [vmem:[%s11092_s11 + $0x960] sm:$0xff]  ;;  %v1521_v23 = vld [vmem:[%s11092_s11 + $0x970] sm:$0xff] }
  0x66   : > { %v1523_v24 = vld [vmem:[%s11092_s11 + $0x980] sm:$0xff]  ;;  %1520 = vst [vmem:[%s11097_s23 + $0x4b0] sm:$0xff] %v1519_v22  ;;  %1522 = vst [vmem:[%s11097_s23 + $0x4b8] sm:$0xff] %v1521_v23  ;;  %v1525_v25 = vld [vmem:[%s11092_s11 + $0x990] sm:$0xff] }
  0x67   : > { %1524 = vst [vmem:[%s11097_s23 + $0x4c0] sm:$0xff] %v1523_v24  ;;  %v1527_v26 = vld [vmem:[%s11092_s11 + $0x9a0] sm:$0xff]  ;;  %v1529_v27 = vld [vmem:[%s11092_s11 + $0x9b0] sm:$0xff]  ;;  %1526 = vst [vmem:[%s11097_s23 + $0x4c8] sm:$0xff] %v1525_v25 }
  0x68   : > { %1528 = vst [vmem:[%s11097_s23 + $0x4d0] sm:$0xff] %v1527_v26  ;;  %1530 = vst [vmem:[%s11097_s23 + $0x4d8] sm:$0xff] %v1529_v27  ;;  %v1531_v28 = vld [vmem:[%s11092_s11 + $0x9c0] sm:$0xff]  ;;  %v1533_v29 = vld [vmem:[%s11092_s11 + $0x9d0] sm:$0xff] }
  0x69   : > { %v1535_v30 = vld [vmem:[%s11092_s11 + $0x9e0] sm:$0xff]  ;;  %1532 = vst [vmem:[%s11097_s23 + $0x4e0] sm:$0xff] %v1531_v28  ;;  %1534 = vst [vmem:[%s11097_s23 + $0x4e8] sm:$0xff] %v1533_v29  ;;  %v1537_v31 = vld [vmem:[%s11092_s11 + $0x9f0] sm:$0xff] }
  0x6a   : > { %1536 = vst [vmem:[%s11097_s23 + $0x4f0] sm:$0xff] %v1535_v30  ;;  %v1539_v32 = vld [vmem:[%s11092_s11 + $0xa00] sm:$0xff]  ;;  %v1541_v33 = vld [vmem:[%s11092_s11 + $0xa10] sm:$0xff]  ;;  %1538 = vst [vmem:[%s11097_s23 + $0x4f8] sm:$0xff] %v1537_v31 }
  0x6b   : > { %1540 = vst [vmem:[%s11097_s23 + $0x500] sm:$0xff] %v1539_v32  ;;  %1542 = vst [vmem:[%s11097_s23 + $0x508] sm:$0xff] %v1541_v33  ;;  %v1543_v34 = vld [vmem:[%s11092_s11 + $0xa20] sm:$0xff]  ;;  %v1545_v35 = vld [vmem:[%s11092_s11 + $0xa30] sm:$0xff] }
  0x6c   : > { %v1547_v36 = vld [vmem:[%s11092_s11 + $0xa40] sm:$0xff]  ;;  %1544 = vst [vmem:[%s11097_s23 + $0x510] sm:$0xff] %v1543_v34  ;;  %1546 = vst [vmem:[%s11097_s23 + $0x518] sm:$0xff] %v1545_v35  ;;  %v1549_v37 = vld [vmem:[%s11092_s11 + $0xa50] sm:$0xff] }
  0x6d   : > { %1548 = vst [vmem:[%s11097_s23 + $0x520] sm:$0xff] %v1547_v36  ;;  %v1551_v38 = vld [vmem:[%s11092_s11 + $0xa60] sm:$0xff]  ;;  %v1553_v39 = vld [vmem:[%s11092_s11 + $0xa70] sm:$0xff]  ;;  %1550 = vst [vmem:[%s11097_s23 + $0x528] sm:$0xff] %v1549_v37 }
  0x6e   : > { %1552 = vst [vmem:[%s11097_s23 + $0x530] sm:$0xff] %v1551_v38  ;;  %1554 = vst [vmem:[%s11097_s23 + $0x538] sm:$0xff] %v1553_v39  ;;  %v1555_v40 = vld [vmem:[%s11092_s11 + $0xa80] sm:$0xff]  ;;  %v1557_v41 = vld [vmem:[%s11092_s11 + $0xa90] sm:$0xff] }
  0x6f   : > { %v1559_v42 = vld [vmem:[%s11092_s11 + $0xaa0] sm:$0xff]  ;;  %1556 = vst [vmem:[%s11097_s23 + $0x540] sm:$0xff] %v1555_v40  ;;  %1558 = vst [vmem:[%s11097_s23 + $0x548] sm:$0xff] %v1557_v41  ;;  %v1561_v43 = vld [vmem:[%s11092_s11 + $0xab0] sm:$0xff] }
  0x70   : > { %1560 = vst [vmem:[%s11097_s23 + $0x550] sm:$0xff] %v1559_v42  ;;  %v1563_v44 = vld [vmem:[%s11092_s11 + $0xac0] sm:$0xff]  ;;  %v1565_v45 = vld [vmem:[%s11092_s11 + $0xad0] sm:$0xff]  ;;  %1562 = vst [vmem:[%s11097_s23 + $0x558] sm:$0xff] %v1561_v43 }
  0x71   : > { %1564 = vst [vmem:[%s11097_s23 + $0x560] sm:$0xff] %v1563_v44  ;;  %1566 = vst [vmem:[%s11097_s23 + $0x568] sm:$0xff] %v1565_v45  ;;  %v1567_v46 = vld [vmem:[%s11092_s11 + $0xae0] sm:$0xff]  ;;  %v1569_v47 = vld [vmem:[%s11092_s11 + $0xaf0] sm:$0xff] }
  0x72   : > { %v1571_v48 = vld [vmem:[%s11092_s11 + $0xb00] sm:$0xff]  ;;  %1568 = vst [vmem:[%s11097_s23 + $0x570] sm:$0xff] %v1567_v46  ;;  %1570 = vst [vmem:[%s11097_s23 + $0x578] sm:$0xff] %v1569_v47  ;;  %v1573_v49 = vld [vmem:[%s11092_s11 + $0xb10] sm:$0xff] }
  0x73   : > { %1572 = vst [vmem:[%s11097_s23 + $0x580] sm:$0xff] %v1571_v48  ;;  %v1575_v50 = vld [vmem:[%s11092_s11 + $0xb20] sm:$0xff]  ;;  %v1577_v51 = vld [vmem:[%s11092_s11 + $0xb30] sm:$0xff]  ;;  %1574 = vst [vmem:[%s11097_s23 + $0x588] sm:$0xff] %v1573_v49 }
  0x74   : > { %1576 = vst [vmem:[%s11097_s23 + $0x590] sm:$0xff] %v1575_v50  ;;  %1578 = vst [vmem:[%s11097_s23 + $0x598] sm:$0xff] %v1577_v51  ;;  %v1579_v52 = vld [vmem:[%s11092_s11 + $0xb40] sm:$0xff]  ;;  %v1581_v53 = vld [vmem:[%s11092_s11 + $0xb50] sm:$0xff] }
  0x75   : > { %v1583_v54 = vld [vmem:[%s11092_s11 + $0xb60] sm:$0xff]  ;;  %1580 = vst [vmem:[%s11097_s23 + $0x5a0] sm:$0xff] %v1579_v52  ;;  %1582 = vst [vmem:[%s11097_s23 + $0x5a8] sm:$0xff] %v1581_v53  ;;  %v1585_v55 = vld [vmem:[%s11092_s11 + $0xb70] sm:$0xff] }
  0x76   : > { %1584 = vst [vmem:[%s11097_s23 + $0x5b0] sm:$0xff] %v1583_v54  ;;  %v1587_v56 = vld [vmem:[%s11092_s11 + $0xb80] sm:$0xff]  ;;  %v1589_v57 = vld [vmem:[%s11092_s11 + $0xb90] sm:$0xff]  ;;  %1586 = vst [vmem:[%s11097_s23 + $0x5b8] sm:$0xff] %v1585_v55 }
  0x77   : > { %1588 = vst [vmem:[%s11097_s23 + $0x5c0] sm:$0xff] %v1587_v56  ;;  %1590 = vst [vmem:[%s11097_s23 + $0x5c8] sm:$0xff] %v1589_v57  ;;  %v1591_v58 = vld [vmem:[%s11092_s11 + $0xba0] sm:$0xff]  ;;  %v1593_v59 = vld [vmem:[%s11092_s11 + $0xbb0] sm:$0xff] }
  0x78   : > { %v1595_v60 = vld [vmem:[%s11092_s11 + $0xbc0] sm:$0xff]  ;;  %1592 = vst [vmem:[%s11097_s23 + $0x5d0] sm:$0xff] %v1591_v58  ;;  %1594 = vst [vmem:[%s11097_s23 + $0x5d8] sm:$0xff] %v1593_v59  ;;  %v1597_v61 = vld [vmem:[%s11092_s11 + $0xbd0] sm:$0xff] }
  0x79   : > { %1596 = vst [vmem:[%s11097_s23 + $0x5e0] sm:$0xff] %v1595_v60  ;;  %v1599_v62 = vld [vmem:[%s11092_s11 + $0xbe0] sm:$0xff]  ;;  %v1601_v63 = vld [vmem:[%s11092_s11 + $0xbf0] sm:$0xff]  ;;  %1598 = vst [vmem:[%s11097_s23 + $0x5e8] sm:$0xff] %v1597_v61 }
  0x7a   : > { %1600 = vst [vmem:[%s11097_s23 + $0x5f0] sm:$0xff] %v1599_v62  ;;  %1602 = vst [vmem:[%s11097_s23 + $0x5f8] sm:$0xff] %v1601_v63  ;;  %v1603_v0 = vld [vmem:[%s11092_s11 + $0xc00] sm:$0xff]  ;;  %v1605_v1 = vld [vmem:[%s11092_s11 + $0xc10] sm:$0xff] }
  0x7b   : > { %v1607_v2 = vld [vmem:[%s11092_s11 + $0xc20] sm:$0xff]  ;;  %1604 = vst [vmem:[%s11097_s23 + $0x600] sm:$0xff] %v1603_v0  ;;  %1606 = vst [vmem:[%s11097_s23 + $0x608] sm:$0xff] %v1605_v1  ;;  %v1609_v3 = vld [vmem:[%s11092_s11 + $0xc30] sm:$0xff] }
  0x7c   : > { %1608 = vst [vmem:[%s11097_s23 + $0x610] sm:$0xff] %v1607_v2  ;;  %v1611_v4 = vld [vmem:[%s11092_s11 + $0xc40] sm:$0xff]  ;;  %v1613_v5 = vld [vmem:[%s11092_s11 + $0xc50] sm:$0xff]  ;;  %1610 = vst [vmem:[%s11097_s23 + $0x618] sm:$0xff] %v1609_v3 }
  0x7d   : > { %1612 = vst [vmem:[%s11097_s23 + $0x620] sm:$0xff] %v1611_v4  ;;  %1614 = vst [vmem:[%s11097_s23 + $0x628] sm:$0xff] %v1613_v5  ;;  %v1615_v6 = vld [vmem:[%s11092_s11 + $0xc60] sm:$0xff]  ;;  %v1617_v7 = vld [vmem:[%s11092_s11 + $0xc70] sm:$0xff] }
  0x7e   : > { %v1619_v8 = vld [vmem:[%s11092_s11 + $0xc80] sm:$0xff]  ;;  %1616 = vst [vmem:[%s11097_s23 + $0x630] sm:$0xff] %v1615_v6  ;;  %1618 = vst [vmem:[%s11097_s23 + $0x638] sm:$0xff] %v1617_v7  ;;  %v1621_v9 = vld [vmem:[%s11092_s11 + $0xc90] sm:$0xff] }
  0x7f   : > { %1620 = vst [vmem:[%s11097_s23 + $0x640] sm:$0xff] %v1619_v8  ;;  %v1623_v10 = vld [vmem:[%s11092_s11 + $0xca0] sm:$0xff]  ;;  %v1625_v11 = vld [vmem:[%s11092_s11 + $0xcb0] sm:$0xff]  ;;  %1622 = vst [vmem:[%s11097_s23 + $0x648] sm:$0xff] %v1621_v9 }
  0x80   : > { %1624 = vst [vmem:[%s11097_s23 + $0x650] sm:$0xff] %v1623_v10  ;;  %1626 = vst [vmem:[%s11097_s23 + $0x658] sm:$0xff] %v1625_v11  ;;  %v1627_v12 = vld [vmem:[%s11092_s11 + $0xcc0] sm:$0xff]  ;;  %v1629_v13 = vld [vmem:[%s11092_s11 + $0xcd0] sm:$0xff] }
  0x81   : > { %v1631_v14 = vld [vmem:[%s11092_s11 + $0xce0] sm:$0xff]  ;;  %1628 = vst [vmem:[%s11097_s23 + $0x660] sm:$0xff] %v1627_v12  ;;  %1630 = vst [vmem:[%s11097_s23 + $0x668] sm:$0xff] %v1629_v13  ;;  %v1633_v15 = vld [vmem:[%s11092_s11 + $0xcf0] sm:$0xff] }
  0x82   : > { %1632 = vst [vmem:[%s11097_s23 + $0x670] sm:$0xff] %v1631_v14  ;;  %v1635_v16 = vld [vmem:[%s11092_s11 + $0xd00] sm:$0xff]  ;;  %v1637_v17 = vld [vmem:[%s11092_s11 + $0xd10] sm:$0xff]  ;;  %1634 = vst [vmem:[%s11097_s23 + $0x678] sm:$0xff] %v1633_v15 }
  0x83   : > { %1636 = vst [vmem:[%s11097_s23 + $0x680] sm:$0xff] %v1635_v16  ;;  %1638 = vst [vmem:[%s11097_s23 + $0x688] sm:$0xff] %v1637_v17  ;;  %v1639_v18 = vld [vmem:[%s11092_s11 + $0xd20] sm:$0xff]  ;;  %v1641_v19 = vld [vmem:[%s11092_s11 + $0xd30] sm:$0xff] }
  0x84   : > { %v1643_v20 = vld [vmem:[%s11092_s11 + $0xd40] sm:$0xff]  ;;  %1640 = vst [vmem:[%s11097_s23 + $0x690] sm:$0xff] %v1639_v18  ;;  %1642 = vst [vmem:[%s11097_s23 + $0x698] sm:$0xff] %v1641_v19  ;;  %v1645_v21 = vld [vmem:[%s11092_s11 + $0xd50] sm:$0xff] }
  0x85   : > { %1644 = vst [vmem:[%s11097_s23 + $0x6a0] sm:$0xff] %v1643_v20  ;;  %v1647_v22 = vld [vmem:[%s11092_s11 + $0xd60] sm:$0xff]  ;;  %v1649_v23 = vld [vmem:[%s11092_s11 + $0xd70] sm:$0xff]  ;;  %1646 = vst [vmem:[%s11097_s23 + $0x6a8] sm:$0xff] %v1645_v21 }
  0x86   : > { %1648 = vst [vmem:[%s11097_s23 + $0x6b0] sm:$0xff] %v1647_v22  ;;  %1650 = vst [vmem:[%s11097_s23 + $0x6b8] sm:$0xff] %v1649_v23  ;;  %v1651_v24 = vld [vmem:[%s11092_s11 + $0xd80] sm:$0xff]  ;;  %v1653_v25 = vld [vmem:[%s11092_s11 + $0xd90] sm:$0xff] }
  0x87   : > { %v1655_v26 = vld [vmem:[%s11092_s11 + $0xda0] sm:$0xff]  ;;  %1652 = vst [vmem:[%s11097_s23 + $0x6c0] sm:$0xff] %v1651_v24  ;;  %1654 = vst [vmem:[%s11097_s23 + $0x6c8] sm:$0xff] %v1653_v25  ;;  %v1657_v27 = vld [vmem:[%s11092_s11 + $0xdb0] sm:$0xff] }
  0x88   : > { %1656 = vst [vmem:[%s11097_s23 + $0x6d0] sm:$0xff] %v1655_v26  ;;  %v1659_v28 = vld [vmem:[%s11092_s11 + $0xdc0] sm:$0xff]  ;;  %v1661_v29 = vld [vmem:[%s11092_s11 + $0xdd0] sm:$0xff]  ;;  %1658 = vst [vmem:[%s11097_s23 + $0x6d8] sm:$0xff] %v1657_v27 }
  0x89   : > { %1660 = vst [vmem:[%s11097_s23 + $0x6e0] sm:$0xff] %v1659_v28  ;;  %1662 = vst [vmem:[%s11097_s23 + $0x6e8] sm:$0xff] %v1661_v29  ;;  %v1663_v30 = vld [vmem:[%s11092_s11 + $0xde0] sm:$0xff]  ;;  %v1665_v31 = vld [vmem:[%s11092_s11 + $0xdf0] sm:$0xff] }
  0x8a   : > { %v1667_v32 = vld [vmem:[%s11092_s11 + $0xe00] sm:$0xff]  ;;  %1664 = vst [vmem:[%s11097_s23 + $0x6f0] sm:$0xff] %v1663_v30  ;;  %1666 = vst [vmem:[%s11097_s23 + $0x6f8] sm:$0xff] %v1665_v31  ;;  %v1669_v33 = vld [vmem:[%s11092_s11 + $0xe10] sm:$0xff] }
  0x8b   : > { %1668 = vst [vmem:[%s11097_s23 + $0x700] sm:$0xff] %v1667_v32  ;;  %v1671_v34 = vld [vmem:[%s11092_s11 + $0xe20] sm:$0xff]  ;;  %v1673_v35 = vld [vmem:[%s11092_s11 + $0xe30] sm:$0xff]  ;;  %1670 = vst [vmem:[%s11097_s23 + $0x708] sm:$0xff] %v1669_v33 }
  0x8c   : > { %1672 = vst [vmem:[%s11097_s23 + $0x710] sm:$0xff] %v1671_v34  ;;  %1674 = vst [vmem:[%s11097_s23 + $0x718] sm:$0xff] %v1673_v35  ;;  %v1675_v36 = vld [vmem:[%s11092_s11 + $0xe40] sm:$0xff]  ;;  %v1677_v37 = vld [vmem:[%s11092_s11 + $0xe50] sm:$0xff] }
  0x8d   : > { %v1679_v38 = vld [vmem:[%s11092_s11 + $0xe60] sm:$0xff]  ;;  %1676 = vst [vmem:[%s11097_s23 + $0x720] sm:$0xff] %v1675_v36  ;;  %1678 = vst [vmem:[%s11097_s23 + $0x728] sm:$0xff] %v1677_v37  ;;  %v1681_v39 = vld [vmem:[%s11092_s11 + $0xe70] sm:$0xff] }
  0x8e   : > { %1680 = vst [vmem:[%s11097_s23 + $0x730] sm:$0xff] %v1679_v38  ;;  %v1683_v40 = vld [vmem:[%s11092_s11 + $0xe80] sm:$0xff]  ;;  %v1685_v41 = vld [vmem:[%s11092_s11 + $0xe90] sm:$0xff]  ;;  %1682 = vst [vmem:[%s11097_s23 + $0x738] sm:$0xff] %v1681_v39 }
  0x8f   : > { %1684 = vst [vmem:[%s11097_s23 + $0x740] sm:$0xff] %v1683_v40  ;;  %1686 = vst [vmem:[%s11097_s23 + $0x748] sm:$0xff] %v1685_v41  ;;  %v1687_v42 = vld [vmem:[%s11092_s11 + $0xea0] sm:$0xff]  ;;  %v1689_v43 = vld [vmem:[%s11092_s11 + $0xeb0] sm:$0xff] }
  0x90   : > { %v1691_v44 = vld [vmem:[%s11092_s11 + $0xec0] sm:$0xff]  ;;  %1688 = vst [vmem:[%s11097_s23 + $0x750] sm:$0xff] %v1687_v42  ;;  %1690 = vst [vmem:[%s11097_s23 + $0x758] sm:$0xff] %v1689_v43  ;;  %v1693_v45 = vld [vmem:[%s11092_s11 + $0xed0] sm:$0xff] }
  0x91   : > { %1692 = vst [vmem:[%s11097_s23 + $0x760] sm:$0xff] %v1691_v44  ;;  %v1695_v46 = vld [vmem:[%s11092_s11 + $0xee0] sm:$0xff]  ;;  %v1697_v47 = vld [vmem:[%s11092_s11 + $0xef0] sm:$0xff]  ;;  %1694 = vst [vmem:[%s11097_s23 + $0x768] sm:$0xff] %v1693_v45 }
  0x92   : > { %1696 = vst [vmem:[%s11097_s23 + $0x770] sm:$0xff] %v1695_v46  ;;  %1698 = vst [vmem:[%s11097_s23 + $0x778] sm:$0xff] %v1697_v47  ;;  %v1699_v48 = vld [vmem:[%s11092_s11 + $0xf00] sm:$0xff]  ;;  %v1701_v49 = vld [vmem:[%s11092_s11 + $0xf10] sm:$0xff] }
  0x93   : > { %v1703_v50 = vld [vmem:[%s11092_s11 + $0xf20] sm:$0xff]  ;;  %1700 = vst [vmem:[%s11097_s23 + $0x780] sm:$0xff] %v1699_v48  ;;  %1702 = vst [vmem:[%s11097_s23 + $0x788] sm:$0xff] %v1701_v49  ;;  %v1705_v51 = vld [vmem:[%s11092_s11 + $0xf30] sm:$0xff] }
  0x94   : > { %1704 = vst [vmem:[%s11097_s23 + $0x790] sm:$0xff] %v1703_v50  ;;  %v1707_v52 = vld [vmem:[%s11092_s11 + $0xf40] sm:$0xff]  ;;  %v1709_v53 = vld [vmem:[%s11092_s11 + $0xf50] sm:$0xff]  ;;  %1706 = vst [vmem:[%s11097_s23 + $0x798] sm:$0xff] %v1705_v51 }
  0x95   : > { %1708 = vst [vmem:[%s11097_s23 + $0x7a0] sm:$0xff] %v1707_v52  ;;  %1710 = vst [vmem:[%s11097_s23 + $0x7a8] sm:$0xff] %v1709_v53  ;;  %v1711_v54 = vld [vmem:[%s11092_s11 + $0xf60] sm:$0xff]  ;;  %v1713_v55 = vld [vmem:[%s11092_s11 + $0xf70] sm:$0xff] }
  0x96   : > { %v1715_v56 = vld [vmem:[%s11092_s11 + $0xf80] sm:$0xff]  ;;  %1712 = vst [vmem:[%s11097_s23 + $0x7b0] sm:$0xff] %v1711_v54  ;;  %1714 = vst [vmem:[%s11097_s23 + $0x7b8] sm:$0xff] %v1713_v55  ;;  %v1717_v57 = vld [vmem:[%s11092_s11 + $0xf90] sm:$0xff] }
  0x97   : > { %1716 = vst [vmem:[%s11097_s23 + $0x7c0] sm:$0xff] %v1715_v56  ;;  %v1719_v58 = vld [vmem:[%s11092_s11 + $0xfa0] sm:$0xff]  ;;  %v1721_v59 = vld [vmem:[%s11092_s11 + $0xfb0] sm:$0xff]  ;;  %1718 = vst [vmem:[%s11097_s23 + $0x7c8] sm:$0xff] %v1717_v57 }
  0x98   : > { %1720 = vst [vmem:[%s11097_s23 + $0x7d0] sm:$0xff] %v1719_v58  ;;  %1722 = vst [vmem:[%s11097_s23 + $0x7d8] sm:$0xff] %v1721_v59  ;;  %v1723_v60 = vld [vmem:[%s11092_s11 + $0xfc0] sm:$0xff]  ;;  %v1725_v61 = vld [vmem:[%s11092_s11 + $0xfd0] sm:$0xff] }
  0x99   : > { %v1727_v62 = vld [vmem:[%s11092_s11 + $0xfe0] sm:$0xff]  ;;  %1724 = vst [vmem:[%s11097_s23 + $0x7e0] sm:$0xff] %v1723_v60  ;;  %1726 = vst [vmem:[%s11097_s23 + $0x7e8] sm:$0xff] %v1725_v61  ;;  %v1729_v63 = vld [vmem:[%s11092_s11 + $0xff0] sm:$0xff] }
  0x9a   : > { %1728 = vst [vmem:[%s11097_s23 + $0x7f0] sm:$0xff] %v1727_v62  ;;  %v1731_v0 = vld [vmem:[%s11092_s11 + $0x1000] sm:$0xff]  ;;  %v1733_v1 = vld [vmem:[%s11092_s11 + $0x1010] sm:$0xff]  ;;  %1730 = vst [vmem:[%s11097_s23 + $0x7f8] sm:$0xff] %v1729_v63 }
  0x9b   : > { %1732 = vst [vmem:[%s11097_s23 + $0x800] sm:$0xff] %v1731_v0  ;;  %1734 = vst [vmem:[%s11097_s23 + $0x808] sm:$0xff] %v1733_v1  ;;  %v1735_v2 = vld [vmem:[%s11092_s11 + $0x1020] sm:$0xff]  ;;  %v1737_v3 = vld [vmem:[%s11092_s11 + $0x1030] sm:$0xff] }
  0x9c   : > { %v1739_v4 = vld [vmem:[%s11092_s11 + $0x1040] sm:$0xff]  ;;  %1736 = vst [vmem:[%s11097_s23 + $0x810] sm:$0xff] %v1735_v2  ;;  %1738 = vst [vmem:[%s11097_s23 + $0x818] sm:$0xff] %v1737_v3  ;;  %v1741_v5 = vld [vmem:[%s11092_s11 + $0x1050] sm:$0xff] }
  0x9d   : > { %1740 = vst [vmem:[%s11097_s23 + $0x820] sm:$0xff] %v1739_v4  ;;  %v1743_v6 = vld [vmem:[%s11092_s11 + $0x1060] sm:$0xff]  ;;  %v1745_v7 = vld [vmem:[%s11092_s11 + $0x1070] sm:$0xff]  ;;  %1742 = vst [vmem:[%s11097_s23 + $0x828] sm:$0xff] %v1741_v5 }
  0x9e   : > { %1744 = vst [vmem:[%s11097_s23 + $0x830] sm:$0xff] %v1743_v6  ;;  %1746 = vst [vmem:[%s11097_s23 + $0x838] sm:$0xff] %v1745_v7  ;;  %v1747_v8 = vld [vmem:[%s11092_s11 + $0x1080] sm:$0xff]  ;;  %v1749_v9 = vld [vmem:[%s11092_s11 + $0x1090] sm:$0xff] }
  0x9f   : > { %v1751_v10 = vld [vmem:[%s11092_s11 + $0x10a0] sm:$0xff]  ;;  %1748 = vst [vmem:[%s11097_s23 + $0x840] sm:$0xff] %v1747_v8  ;;  %1750 = vst [vmem:[%s11097_s23 + $0x848] sm:$0xff] %v1749_v9  ;;  %v1753_v11 = vld [vmem:[%s11092_s11 + $0x10b0] sm:$0xff] }
  0xa0   : > { %1752 = vst [vmem:[%s11097_s23 + $0x850] sm:$0xff] %v1751_v10  ;;  %v1755_v12 = vld [vmem:[%s11092_s11 + $0x10c0] sm:$0xff]  ;;  %v1757_v13 = vld [vmem:[%s11092_s11 + $0x10d0] sm:$0xff]  ;;  %1754 = vst [vmem:[%s11097_s23 + $0x858] sm:$0xff] %v1753_v11 }
  0xa1   : > { %1756 = vst [vmem:[%s11097_s23 + $0x860] sm:$0xff] %v1755_v12  ;;  %1758 = vst [vmem:[%s11097_s23 + $0x868] sm:$0xff] %v1757_v13  ;;  %v1759_v14 = vld [vmem:[%s11092_s11 + $0x10e0] sm:$0xff]  ;;  %v1761_v15 = vld [vmem:[%s11092_s11 + $0x10f0] sm:$0xff] }
  0xa2   : > { %v1763_v16 = vld [vmem:[%s11092_s11 + $0x1100] sm:$0xff]  ;;  %1760 = vst [vmem:[%s11097_s23 + $0x870] sm:$0xff] %v1759_v14  ;;  %1762 = vst [vmem:[%s11097_s23 + $0x878] sm:$0xff] %v1761_v15  ;;  %v1765_v17 = vld [vmem:[%s11092_s11 + $0x1110] sm:$0xff] }
  0xa3   : > { %1764 = vst [vmem:[%s11097_s23 + $0x880] sm:$0xff] %v1763_v16  ;;  %v1767_v18 = vld [vmem:[%s11092_s11 + $0x1120] sm:$0xff]  ;;  %v1769_v19 = vld [vmem:[%s11092_s11 + $0x1130] sm:$0xff]  ;;  %1766 = vst [vmem:[%s11097_s23 + $0x888] sm:$0xff] %v1765_v17 }
  0xa4   : > { %1768 = vst [vmem:[%s11097_s23 + $0x890] sm:$0xff] %v1767_v18  ;;  %1770 = vst [vmem:[%s11097_s23 + $0x898] sm:$0xff] %v1769_v19  ;;  %v1771_v20 = vld [vmem:[%s11092_s11 + $0x1140] sm:$0xff]  ;;  %v1773_v21 = vld [vmem:[%s11092_s11 + $0x1150] sm:$0xff] }
  0xa5   : > { %v1775_v22 = vld [vmem:[%s11092_s11 + $0x1160] sm:$0xff]  ;;  %1772 = vst [vmem:[%s11097_s23 + $0x8a0] sm:$0xff] %v1771_v20  ;;  %1774 = vst [vmem:[%s11097_s23 + $0x8a8] sm:$0xff] %v1773_v21  ;;  %v1777_v23 = vld [vmem:[%s11092_s11 + $0x1170] sm:$0xff] }
  0xa6   : > { %1776 = vst [vmem:[%s11097_s23 + $0x8b0] sm:$0xff] %v1775_v22  ;;  %v1779_v24 = vld [vmem:[%s11092_s11 + $0x1180] sm:$0xff]  ;;  %v1781_v25 = vld [vmem:[%s11092_s11 + $0x1190] sm:$0xff]  ;;  %1778 = vst [vmem:[%s11097_s23 + $0x8b8] sm:$0xff] %v1777_v23 }
  0xa7   : > { %1780 = vst [vmem:[%s11097_s23 + $0x8c0] sm:$0xff] %v1779_v24  ;;  %1782 = vst [vmem:[%s11097_s23 + $0x8c8] sm:$0xff] %v1781_v25  ;;  %v1783_v26 = vld [vmem:[%s11092_s11 + $0x11a0] sm:$0xff]  ;;  %v1785_v27 = vld [vmem:[%s11092_s11 + $0x11b0] sm:$0xff] }
  0xa8   : > { %v1787_v28 = vld [vmem:[%s11092_s11 + $0x11c0] sm:$0xff]  ;;  %1784 = vst [vmem:[%s11097_s23 + $0x8d0] sm:$0xff] %v1783_v26  ;;  %1786 = vst [vmem:[%s11097_s23 + $0x8d8] sm:$0xff] %v1785_v27  ;;  %v1789_v29 = vld [vmem:[%s11092_s11 + $0x11d0] sm:$0xff] }
  0xa9   : > { %1788 = vst [vmem:[%s11097_s23 + $0x8e0] sm:$0xff] %v1787_v28  ;;  %v1791_v30 = vld [vmem:[%s11092_s11 + $0x11e0] sm:$0xff]  ;;  %v1793_v31 = vld [vmem:[%s11092_s11 + $0x11f0] sm:$0xff]  ;;  %1790 = vst [vmem:[%s11097_s23 + $0x8e8] sm:$0xff] %v1789_v29 }
  0xaa   : > { %1792 = vst [vmem:[%s11097_s23 + $0x8f0] sm:$0xff] %v1791_v30  ;;  %1794 = vst [vmem:[%s11097_s23 + $0x8f8] sm:$0xff] %v1793_v31  ;;  %v1795_v32 = vld [vmem:[%s11092_s11 + $0x1200] sm:$0xff]  ;;  %v1797_v33 = vld [vmem:[%s11092_s11 + $0x1210] sm:$0xff] }
  0xab   : > { %v1799_v34 = vld [vmem:[%s11092_s11 + $0x1220] sm:$0xff]  ;;  %1796 = vst [vmem:[%s11097_s23 + $0x900] sm:$0xff] %v1795_v32  ;;  %1798 = vst [vmem:[%s11097_s23 + $0x908] sm:$0xff] %v1797_v33  ;;  %v1801_v35 = vld [vmem:[%s11092_s11 + $0x1230] sm:$0xff] }
  0xac   : > { %1800 = vst [vmem:[%s11097_s23 + $0x910] sm:$0xff] %v1799_v34  ;;  %v1803_v36 = vld [vmem:[%s11092_s11 + $0x1240] sm:$0xff]  ;;  %v1805_v37 = vld [vmem:[%s11092_s11 + $0x1250] sm:$0xff]  ;;  %1802 = vst [vmem:[%s11097_s23 + $0x918] sm:$0xff] %v1801_v35 }
  0xad   : > { %1804 = vst [vmem:[%s11097_s23 + $0x920] sm:$0xff] %v1803_v36  ;;  %1806 = vst [vmem:[%s11097_s23 + $0x928] sm:$0xff] %v1805_v37  ;;  %v1807_v38 = vld [vmem:[%s11092_s11 + $0x1260] sm:$0xff]  ;;  %v1809_v39 = vld [vmem:[%s11092_s11 + $0x1270] sm:$0xff] }
  0xae   : > { %v1811_v40 = vld [vmem:[%s11092_s11 + $0x1280] sm:$0xff]  ;;  %1808 = vst [vmem:[%s11097_s23 + $0x930] sm:$0xff] %v1807_v38  ;;  %1810 = vst [vmem:[%s11097_s23 + $0x938] sm:$0xff] %v1809_v39  ;;  %v1813_v41 = vld [vmem:[%s11092_s11 + $0x1290] sm:$0xff] }
  0xaf   : > { %1812 = vst [vmem:[%s11097_s23 + $0x940] sm:$0xff] %v1811_v40  ;;  %v1815_v42 = vld [vmem:[%s11092_s11 + $0x12a0] sm:$0xff]  ;;  %v1817_v43 = vld [vmem:[%s11092_s11 + $0x12b0] sm:$0xff]  ;;  %1814 = vst [vmem:[%s11097_s23 + $0x948] sm:$0xff] %v1813_v41 }
  0xb0   : > { %1816 = vst [vmem:[%s11097_s23 + $0x950] sm:$0xff] %v1815_v42  ;;  %1818 = vst [vmem:[%s11097_s23 + $0x958] sm:$0xff] %v1817_v43  ;;  %v1819_v44 = vld [vmem:[%s11092_s11 + $0x12c0] sm:$0xff]  ;;  %v1821_v45 = vld [vmem:[%s11092_s11 + $0x12d0] sm:$0xff] }
  0xb1   : > { %v1823_v46 = vld [vmem:[%s11092_s11 + $0x12e0] sm:$0xff]  ;;  %1820 = vst [vmem:[%s11097_s23 + $0x960] sm:$0xff] %v1819_v44  ;;  %1822 = vst [vmem:[%s11097_s23 + $0x968] sm:$0xff] %v1821_v45  ;;  %v1825_v47 = vld [vmem:[%s11092_s11 + $0x12f0] sm:$0xff] }
  0xb2   : > { %1824 = vst [vmem:[%s11097_s23 + $0x970] sm:$0xff] %v1823_v46  ;;  %v1827_v48 = vld [vmem:[%s11092_s11 + $0x1300] sm:$0xff]  ;;  %v1829_v49 = vld [vmem:[%s11092_s11 + $0x1310] sm:$0xff]  ;;  %1826 = vst [vmem:[%s11097_s23 + $0x978] sm:$0xff] %v1825_v47 }
  0xb3   : > { %1828 = vst [vmem:[%s11097_s23 + $0x980] sm:$0xff] %v1827_v48  ;;  %1830 = vst [vmem:[%s11097_s23 + $0x988] sm:$0xff] %v1829_v49  ;;  %v1831_v50 = vld [vmem:[%s11092_s11 + $0x1320] sm:$0xff]  ;;  %v1833_v51 = vld [vmem:[%s11092_s11 + $0x1330] sm:$0xff] }
  0xb4   : > { %v1835_v52 = vld [vmem:[%s11092_s11 + $0x1340] sm:$0xff]  ;;  %1832 = vst [vmem:[%s11097_s23 + $0x990] sm:$0xff] %v1831_v50  ;;  %1834 = vst [vmem:[%s11097_s23 + $0x998] sm:$0xff] %v1833_v51  ;;  %v1837_v53 = vld [vmem:[%s11092_s11 + $0x1350] sm:$0xff] }
  0xb5   : > { %1836 = vst [vmem:[%s11097_s23 + $0x9a0] sm:$0xff] %v1835_v52  ;;  %v1839_v54 = vld [vmem:[%s11092_s11 + $0x1360] sm:$0xff]  ;;  %v1841_v55 = vld [vmem:[%s11092_s11 + $0x1370] sm:$0xff]  ;;  %1838 = vst [vmem:[%s11097_s23 + $0x9a8] sm:$0xff] %v1837_v53 }
  0xb6   : > { %1840 = vst [vmem:[%s11097_s23 + $0x9b0] sm:$0xff] %v1839_v54  ;;  %1842 = vst [vmem:[%s11097_s23 + $0x9b8] sm:$0xff] %v1841_v55  ;;  %v1843_v56 = vld [vmem:[%s11092_s11 + $0x1380] sm:$0xff]  ;;  %v1845_v57 = vld [vmem:[%s11092_s11 + $0x1390] sm:$0xff] }
  0xb7   : > { %v1847_v58 = vld [vmem:[%s11092_s11 + $0x13a0] sm:$0xff]  ;;  %1844 = vst [vmem:[%s11097_s23 + $0x9c0] sm:$0xff] %v1843_v56  ;;  %1846 = vst [vmem:[%s11097_s23 + $0x9c8] sm:$0xff] %v1845_v57  ;;  %v1849_v59 = vld [vmem:[%s11092_s11 + $0x13b0] sm:$0xff] }
  0xb8   : > { %1848 = vst [vmem:[%s11097_s23 + $0x9d0] sm:$0xff] %v1847_v58  ;;  %v1851_v60 = vld [vmem:[%s11092_s11 + $0x13c0] sm:$0xff]  ;;  %v1853_v61 = vld [vmem:[%s11092_s11 + $0x13d0] sm:$0xff]  ;;  %1850 = vst [vmem:[%s11097_s23 + $0x9d8] sm:$0xff] %v1849_v59 }
  0xb9   : > { %1852 = vst [vmem:[%s11097_s23 + $0x9e0] sm:$0xff] %v1851_v60  ;;  %1854 = vst [vmem:[%s11097_s23 + $0x9e8] sm:$0xff] %v1853_v61  ;;  %v1855_v62 = vld [vmem:[%s11092_s11 + $0x13e0] sm:$0xff]  ;;  %v1857_v63 = vld [vmem:[%s11092_s11 + $0x13f0] sm:$0xff] }
  0xba   : > { %v1859_v0 = vld [vmem:[%s11092_s11 + $0x1400] sm:$0xff]  ;;  %1856 = vst [vmem:[%s11097_s23 + $0x9f0] sm:$0xff] %v1855_v62  ;;  %1858 = vst [vmem:[%s11097_s23 + $0x9f8] sm:$0xff] %v1857_v63  ;;  %v1861_v1 = vld [vmem:[%s11092_s11 + $0x1410] sm:$0xff] }
  0xbb   : > { %1860 = vst [vmem:[%s11097_s23 + $0xa00] sm:$0xff] %v1859_v0  ;;  %v1863_v2 = vld [vmem:[%s11092_s11 + $0x1420] sm:$0xff]  ;;  %v1865_v3 = vld [vmem:[%s11092_s11 + $0x1430] sm:$0xff]  ;;  %1862 = vst [vmem:[%s11097_s23 + $0xa08] sm:$0xff] %v1861_v1 }
  0xbc   : > { %1864 = vst [vmem:[%s11097_s23 + $0xa10] sm:$0xff] %v1863_v2  ;;  %1866 = vst [vmem:[%s11097_s23 + $0xa18] sm:$0xff] %v1865_v3  ;;  %v1867_v4 = vld [vmem:[%s11092_s11 + $0x1440] sm:$0xff]  ;;  %v1869_v5 = vld [vmem:[%s11092_s11 + $0x1450] sm:$0xff] }
  0xbd   : > { %v1871_v6 = vld [vmem:[%s11092_s11 + $0x1460] sm:$0xff]  ;;  %1868 = vst [vmem:[%s11097_s23 + $0xa20] sm:$0xff] %v1867_v4  ;;  %1870 = vst [vmem:[%s11097_s23 + $0xa28] sm:$0xff] %v1869_v5  ;;  %v1873_v7 = vld [vmem:[%s11092_s11 + $0x1470] sm:$0xff] }
  0xbe   : > { %1872 = vst [vmem:[%s11097_s23 + $0xa30] sm:$0xff] %v1871_v6  ;;  %v1875_v8 = vld [vmem:[%s11092_s11 + $0x1480] sm:$0xff]  ;;  %v1877_v9 = vld [vmem:[%s11092_s11 + $0x1490] sm:$0xff]  ;;  %1874 = vst [vmem:[%s11097_s23 + $0xa38] sm:$0xff] %v1873_v7 }
  0xbf   : > { %1876 = vst [vmem:[%s11097_s23 + $0xa40] sm:$0xff] %v1875_v8  ;;  %1878 = vst [vmem:[%s11097_s23 + $0xa48] sm:$0xff] %v1877_v9  ;;  %v1879_v10 = vld [vmem:[%s11092_s11 + $0x14a0] sm:$0xff]  ;;  %v1881_v11 = vld [vmem:[%s11092_s11 + $0x14b0] sm:$0xff] }
  0xc0   : > { %v1883_v12 = vld [vmem:[%s11092_s11 + $0x14c0] sm:$0xff]  ;;  %1880 = vst [vmem:[%s11097_s23 + $0xa50] sm:$0xff] %v1879_v10  ;;  %1882 = vst [vmem:[%s11097_s23 + $0xa58] sm:$0xff] %v1881_v11  ;;  %v1885_v13 = vld [vmem:[%s11092_s11 + $0x14d0] sm:$0xff] }
  0xc1   : > { %1884 = vst [vmem:[%s11097_s23 + $0xa60] sm:$0xff] %v1883_v12  ;;  %v1887_v14 = vld [vmem:[%s11092_s11 + $0x14e0] sm:$0xff]  ;;  %v1889_v15 = vld [vmem:[%s11092_s11 + $0x14f0] sm:$0xff]  ;;  %1886 = vst [vmem:[%s11097_s23 + $0xa68] sm:$0xff] %v1885_v13 }
  0xc2   : > { %1888 = vst [vmem:[%s11097_s23 + $0xa70] sm:$0xff] %v1887_v14  ;;  %1890 = vst [vmem:[%s11097_s23 + $0xa78] sm:$0xff] %v1889_v15  ;;  %v1891_v16 = vld [vmem:[%s11092_s11 + $0x1500] sm:$0xff]  ;;  %v1893_v17 = vld [vmem:[%s11092_s11 + $0x1510] sm:$0xff] }
  0xc3   : > { %v1895_v18 = vld [vmem:[%s11092_s11 + $0x1520] sm:$0xff]  ;;  %1892 = vst [vmem:[%s11097_s23 + $0xa80] sm:$0xff] %v1891_v16  ;;  %1894 = vst [vmem:[%s11097_s23 + $0xa88] sm:$0xff] %v1893_v17  ;;  %v1897_v19 = vld [vmem:[%s11092_s11 + $0x1530] sm:$0xff] }
  0xc4   : > { %1896 = vst [vmem:[%s11097_s23 + $0xa90] sm:$0xff] %v1895_v18  ;;  %v1899_v20 = vld [vmem:[%s11092_s11 + $0x1540] sm:$0xff]  ;;  %v1901_v21 = vld [vmem:[%s11092_s11 + $0x1550] sm:$0xff]  ;;  %1898 = vst [vmem:[%s11097_s23 + $0xa98] sm:$0xff] %v1897_v19 }
  0xc5   : > { %1900 = vst [vmem:[%s11097_s23 + $0xaa0] sm:$0xff] %v1899_v20  ;;  %1902 = vst [vmem:[%s11097_s23 + $0xaa8] sm:$0xff] %v1901_v21  ;;  %v1903_v22 = vld [vmem:[%s11092_s11 + $0x1560] sm:$0xff]  ;;  %v1905_v23 = vld [vmem:[%s11092_s11 + $0x1570] sm:$0xff] }
  0xc6   : > { %v1907_v24 = vld [vmem:[%s11092_s11 + $0x1580] sm:$0xff]  ;;  %1904 = vst [vmem:[%s11097_s23 + $0xab0] sm:$0xff] %v1903_v22  ;;  %1906 = vst [vmem:[%s11097_s23 + $0xab8] sm:$0xff] %v1905_v23  ;;  %v1909_v25 = vld [vmem:[%s11092_s11 + $0x1590] sm:$0xff] }
  0xc7   : > { %1908 = vst [vmem:[%s11097_s23 + $0xac0] sm:$0xff] %v1907_v24  ;;  %v1911_v26 = vld [vmem:[%s11092_s11 + $0x15a0] sm:$0xff]  ;;  %v1913_v27 = vld [vmem:[%s11092_s11 + $0x15b0] sm:$0xff]  ;;  %1910 = vst [vmem:[%s11097_s23 + $0xac8] sm:$0xff] %v1909_v25 }
  0xc8   : > { %1912 = vst [vmem:[%s11097_s23 + $0xad0] sm:$0xff] %v1911_v26  ;;  %1914 = vst [vmem:[%s11097_s23 + $0xad8] sm:$0xff] %v1913_v27  ;;  %v1915_v28 = vld [vmem:[%s11092_s11 + $0x15c0] sm:$0xff]  ;;  %v1917_v29 = vld [vmem:[%s11092_s11 + $0x15d0] sm:$0xff] }
  0xc9   : > { %v1919_v30 = vld [vmem:[%s11092_s11 + $0x15e0] sm:$0xff]  ;;  %1916 = vst [vmem:[%s11097_s23 + $0xae0] sm:$0xff] %v1915_v28  ;;  %1918 = vst [vmem:[%s11097_s23 + $0xae8] sm:$0xff] %v1917_v29  ;;  %v1921_v31 = vld [vmem:[%s11092_s11 + $0x15f0] sm:$0xff] }
  0xca   : > { %1920 = vst [vmem:[%s11097_s23 + $0xaf0] sm:$0xff] %v1919_v30  ;;  %v1923_v32 = vld [vmem:[%s11092_s11 + $0x1600] sm:$0xff]  ;;  %v1925_v33 = vld [vmem:[%s11092_s11 + $0x1610] sm:$0xff]  ;;  %1922 = vst [vmem:[%s11097_s23 + $0xaf8] sm:$0xff] %v1921_v31 }
  0xcb   : > { %1924 = vst [vmem:[%s11097_s23 + $0xb00] sm:$0xff] %v1923_v32  ;;  %1926 = vst [vmem:[%s11097_s23 + $0xb08] sm:$0xff] %v1925_v33  ;;  %v1927_v34 = vld [vmem:[%s11092_s11 + $0x1620] sm:$0xff]  ;;  %v1929_v35 = vld [vmem:[%s11092_s11 + $0x1630] sm:$0xff] }
  0xcc   : > { %v1931_v36 = vld [vmem:[%s11092_s11 + $0x1640] sm:$0xff]  ;;  %1928 = vst [vmem:[%s11097_s23 + $0xb10] sm:$0xff] %v1927_v34  ;;  %1930 = vst [vmem:[%s11097_s23 + $0xb18] sm:$0xff] %v1929_v35  ;;  %v1933_v37 = vld [vmem:[%s11092_s11 + $0x1650] sm:$0xff] }
  0xcd   : > { %1932 = vst [vmem:[%s11097_s23 + $0xb20] sm:$0xff] %v1931_v36  ;;  %v1935_v38 = vld [vmem:[%s11092_s11 + $0x1660] sm:$0xff]  ;;  %v1937_v39 = vld [vmem:[%s11092_s11 + $0x1670] sm:$0xff]  ;;  %1934 = vst [vmem:[%s11097_s23 + $0xb28] sm:$0xff] %v1933_v37 }
  0xce   : > { %1936 = vst [vmem:[%s11097_s23 + $0xb30] sm:$0xff] %v1935_v38  ;;  %1938 = vst [vmem:[%s11097_s23 + $0xb38] sm:$0xff] %v1937_v39  ;;  %v1939_v40 = vld [vmem:[%s11092_s11 + $0x1680] sm:$0xff]  ;;  %v1941_v41 = vld [vmem:[%s11092_s11 + $0x1690] sm:$0xff] }
  0xcf   : > { %v1943_v42 = vld [vmem:[%s11092_s11 + $0x16a0] sm:$0xff]  ;;  %1940 = vst [vmem:[%s11097_s23 + $0xb40] sm:$0xff] %v1939_v40  ;;  %1942 = vst [vmem:[%s11097_s23 + $0xb48] sm:$0xff] %v1941_v41  ;;  %v1945_v43 = vld [vmem:[%s11092_s11 + $0x16b0] sm:$0xff] }
  0xd0   : > { %1944 = vst [vmem:[%s11097_s23 + $0xb50] sm:$0xff] %v1943_v42  ;;  %v1947_v44 = vld [vmem:[%s11092_s11 + $0x16c0] sm:$0xff]  ;;  %v1949_v45 = vld [vmem:[%s11092_s11 + $0x16d0] sm:$0xff]  ;;  %1946 = vst [vmem:[%s11097_s23 + $0xb58] sm:$0xff] %v1945_v43 }
  0xd1   : > { %1948 = vst [vmem:[%s11097_s23 + $0xb60] sm:$0xff] %v1947_v44  ;;  %1950 = vst [vmem:[%s11097_s23 + $0xb68] sm:$0xff] %v1949_v45  ;;  %v1951_v46 = vld [vmem:[%s11092_s11 + $0x16e0] sm:$0xff]  ;;  %v1953_v47 = vld [vmem:[%s11092_s11 + $0x16f0] sm:$0xff] }
  0xd2   : > { %v1955_v48 = vld [vmem:[%s11092_s11 + $0x1700] sm:$0xff]  ;;  %1952 = vst [vmem:[%s11097_s23 + $0xb70] sm:$0xff] %v1951_v46  ;;  %1954 = vst [vmem:[%s11097_s23 + $0xb78] sm:$0xff] %v1953_v47  ;;  %v1957_v49 = vld [vmem:[%s11092_s11 + $0x1710] sm:$0xff] }
  0xd3   : > { %1956 = vst [vmem:[%s11097_s23 + $0xb80] sm:$0xff] %v1955_v48  ;;  %v1959_v50 = vld [vmem:[%s11092_s11 + $0x1720] sm:$0xff]  ;;  %v1961_v51 = vld [vmem:[%s11092_s11 + $0x1730] sm:$0xff]  ;;  %1958 = vst [vmem:[%s11097_s23 + $0xb88] sm:$0xff] %v1957_v49 }
  0xd4   : > { %1960 = vst [vmem:[%s11097_s23 + $0xb90] sm:$0xff] %v1959_v50  ;;  %1962 = vst [vmem:[%s11097_s23 + $0xb98] sm:$0xff] %v1961_v51  ;;  %v1963_v52 = vld [vmem:[%s11092_s11 + $0x1740] sm:$0xff]  ;;  %v1965_v53 = vld [vmem:[%s11092_s11 + $0x1750] sm:$0xff] }
  0xd5   : > { %v1967_v54 = vld [vmem:[%s11092_s11 + $0x1760] sm:$0xff]  ;;  %1964 = vst [vmem:[%s11097_s23 + $0xba0] sm:$0xff] %v1963_v52  ;;  %1966 = vst [vmem:[%s11097_s23 + $0xba8] sm:$0xff] %v1965_v53  ;;  %v1969_v55 = vld [vmem:[%s11092_s11 + $0x1770] sm:$0xff] }
  0xd6   : > { %1968 = vst [vmem:[%s11097_s23 + $0xbb0] sm:$0xff] %v1967_v54  ;;  %v1971_v56 = vld [vmem:[%s11092_s11 + $0x1780] sm:$0xff]  ;;  %v1973_v57 = vld [vmem:[%s11092_s11 + $0x1790] sm:$0xff]  ;;  %1970 = vst [vmem:[%s11097_s23 + $0xbb8] sm:$0xff] %v1969_v55 }
  0xd7   : > { %1972 = vst [vmem:[%s11097_s23 + $0xbc0] sm:$0xff] %v1971_v56  ;;  %1974 = vst [vmem:[%s11097_s23 + $0xbc8] sm:$0xff] %v1973_v57  ;;  %v1975_v58 = vld [vmem:[%s11092_s11 + $0x17a0] sm:$0xff]  ;;  %v1977_v59 = vld [vmem:[%s11092_s11 + $0x17b0] sm:$0xff] }
  0xd8   : > { %v1979_v60 = vld [vmem:[%s11092_s11 + $0x17c0] sm:$0xff]  ;;  %1976 = vst [vmem:[%s11097_s23 + $0xbd0] sm:$0xff] %v1975_v58  ;;  %1978 = vst [vmem:[%s11097_s23 + $0xbd8] sm:$0xff] %v1977_v59  ;;  %v1981_v61 = vld [vmem:[%s11092_s11 + $0x17d0] sm:$0xff] }
  0xd9   : > { %1980 = vst [vmem:[%s11097_s23 + $0xbe0] sm:$0xff] %v1979_v60  ;;  %v1983_v62 = vld [vmem:[%s11092_s11 + $0x17e0] sm:$0xff]  ;;  %v1985_v63 = vld [vmem:[%s11092_s11 + $0x17f0] sm:$0xff]  ;;  %1982 = vst [vmem:[%s11097_s23 + $0xbe8] sm:$0xff] %v1981_v61 }
  0xda   : > { %1984 = vst [vmem:[%s11097_s23 + $0xbf0] sm:$0xff] %v1983_v62  ;;  %1986 = vst [vmem:[%s11097_s23 + $0xbf8] sm:$0xff] %v1985_v63  ;;  %v1987_v0 = vld [vmem:[%s11092_s11 + $0x1800] sm:$0xff]  ;;  %v1989_v1 = vld [vmem:[%s11092_s11 + $0x1810] sm:$0xff] }
  0xdb   : > { %v1991_v2 = vld [vmem:[%s11092_s11 + $0x1820] sm:$0xff]  ;;  %1988 = vst [vmem:[%s11097_s23 + $0xc00] sm:$0xff] %v1987_v0  ;;  %1990 = vst [vmem:[%s11097_s23 + $0xc08] sm:$0xff] %v1989_v1  ;;  %v1993_v3 = vld [vmem:[%s11092_s11 + $0x1830] sm:$0xff] }
  0xdc   : > { %1992 = vst [vmem:[%s11097_s23 + $0xc10] sm:$0xff] %v1991_v2  ;;  %v1995_v4 = vld [vmem:[%s11092_s11 + $0x1840] sm:$0xff]  ;;  %v1997_v5 = vld [vmem:[%s11092_s11 + $0x1850] sm:$0xff]  ;;  %1994 = vst [vmem:[%s11097_s23 + $0xc18] sm:$0xff] %v1993_v3 }
  0xdd   : > { %1996 = vst [vmem:[%s11097_s23 + $0xc20] sm:$0xff] %v1995_v4  ;;  %1998 = vst [vmem:[%s11097_s23 + $0xc28] sm:$0xff] %v1997_v5  ;;  %v1999_v6 = vld [vmem:[%s11092_s11 + $0x1860] sm:$0xff]  ;;  %v2001_v7 = vld [vmem:[%s11092_s11 + $0x1870] sm:$0xff] }
  0xde   : > { %v2003_v8 = vld [vmem:[%s11092_s11 + $0x1880] sm:$0xff]  ;;  %2000 = vst [vmem:[%s11097_s23 + $0xc30] sm:$0xff] %v1999_v6  ;;  %2002 = vst [vmem:[%s11097_s23 + $0xc38] sm:$0xff] %v2001_v7  ;;  %v2005_v9 = vld [vmem:[%s11092_s11 + $0x1890] sm:$0xff] }
  0xdf   : > { %2004 = vst [vmem:[%s11097_s23 + $0xc40] sm:$0xff] %v2003_v8  ;;  %v2007_v10 = vld [vmem:[%s11092_s11 + $0x18a0] sm:$0xff]  ;;  %v2009_v11 = vld [vmem:[%s11092_s11 + $0x18b0] sm:$0xff]  ;;  %2006 = vst [vmem:[%s11097_s23 + $0xc48] sm:$0xff] %v2005_v9 }
  0xe0   : > { %2008 = vst [vmem:[%s11097_s23 + $0xc50] sm:$0xff] %v2007_v10  ;;  %2010 = vst [vmem:[%s11097_s23 + $0xc58] sm:$0xff] %v2009_v11  ;;  %v2011_v12 = vld [vmem:[%s11092_s11 + $0x18c0] sm:$0xff]  ;;  %v2013_v13 = vld [vmem:[%s11092_s11 + $0x18d0] sm:$0xff] }
  0xe1   : > { %v2015_v14 = vld [vmem:[%s11092_s11 + $0x18e0] sm:$0xff]  ;;  %2012 = vst [vmem:[%s11097_s23 + $0xc60] sm:$0xff] %v2011_v12  ;;  %2014 = vst [vmem:[%s11097_s23 + $0xc68] sm:$0xff] %v2013_v13  ;;  %v2017_v15 = vld [vmem:[%s11092_s11 + $0x18f0] sm:$0xff] }
  0xe2   : > { %2016 = vst [vmem:[%s11097_s23 + $0xc70] sm:$0xff] %v2015_v14  ;;  %v2019_v16 = vld [vmem:[%s11092_s11 + $0x1900] sm:$0xff]  ;;  %v2021_v17 = vld [vmem:[%s11092_s11 + $0x1910] sm:$0xff]  ;;  %2018 = vst [vmem:[%s11097_s23 + $0xc78] sm:$0xff] %v2017_v15 }
  0xe3   : > { %2020 = vst [vmem:[%s11097_s23 + $0xc80] sm:$0xff] %v2019_v16  ;;  %2022 = vst [vmem:[%s11097_s23 + $0xc88] sm:$0xff] %v2021_v17  ;;  %v2023_v18 = vld [vmem:[%s11092_s11 + $0x1920] sm:$0xff]  ;;  %v2025_v19 = vld [vmem:[%s11092_s11 + $0x1930] sm:$0xff] }
  0xe4   : > { %v2027_v20 = vld [vmem:[%s11092_s11 + $0x1940] sm:$0xff]  ;;  %2024 = vst [vmem:[%s11097_s23 + $0xc90] sm:$0xff] %v2023_v18  ;;  %2026 = vst [vmem:[%s11097_s23 + $0xc98] sm:$0xff] %v2025_v19  ;;  %v2029_v21 = vld [vmem:[%s11092_s11 + $0x1950] sm:$0xff] }
  0xe5   : > { %2028 = vst [vmem:[%s11097_s23 + $0xca0] sm:$0xff] %v2027_v20  ;;  %v2031_v22 = vld [vmem:[%s11092_s11 + $0x1960] sm:$0xff]  ;;  %v2033_v23 = vld [vmem:[%s11092_s11 + $0x1970] sm:$0xff]  ;;  %2030 = vst [vmem:[%s11097_s23 + $0xca8] sm:$0xff] %v2029_v21 }
  0xe6   : > { %2032 = vst [vmem:[%s11097_s23 + $0xcb0] sm:$0xff] %v2031_v22  ;;  %2034 = vst [vmem:[%s11097_s23 + $0xcb8] sm:$0xff] %v2033_v23  ;;  %v2035_v24 = vld [vmem:[%s11092_s11 + $0x1980] sm:$0xff]  ;;  %v2037_v25 = vld [vmem:[%s11092_s11 + $0x1990] sm:$0xff] }
  0xe7   : > { %v2039_v26 = vld [vmem:[%s11092_s11 + $0x19a0] sm:$0xff]  ;;  %2036 = vst [vmem:[%s11097_s23 + $0xcc0] sm:$0xff] %v2035_v24  ;;  %2038 = vst [vmem:[%s11097_s23 + $0xcc8] sm:$0xff] %v2037_v25  ;;  %v2041_v27 = vld [vmem:[%s11092_s11 + $0x19b0] sm:$0xff] }
  0xe8   : > { %2040 = vst [vmem:[%s11097_s23 + $0xcd0] sm:$0xff] %v2039_v26  ;;  %v2043_v28 = vld [vmem:[%s11092_s11 + $0x19c0] sm:$0xff]  ;;  %v2045_v29 = vld [vmem:[%s11092_s11 + $0x19d0] sm:$0xff]  ;;  %2042 = vst [vmem:[%s11097_s23 + $0xcd8] sm:$0xff] %v2041_v27 }
  0xe9   : > { %2044 = vst [vmem:[%s11097_s23 + $0xce0] sm:$0xff] %v2043_v28  ;;  %2046 = vst [vmem:[%s11097_s23 + $0xce8] sm:$0xff] %v2045_v29  ;;  %v2047_v30 = vld [vmem:[%s11092_s11 + $0x19e0] sm:$0xff]  ;;  %v2049_v31 = vld [vmem:[%s11092_s11 + $0x19f0] sm:$0xff] }
  0xea   : > { %v2051_v32 = vld [vmem:[%s11092_s11 + $0x1a00] sm:$0xff]  ;;  %2048 = vst [vmem:[%s11097_s23 + $0xcf0] sm:$0xff] %v2047_v30  ;;  %2050 = vst [vmem:[%s11097_s23 + $0xcf8] sm:$0xff] %v2049_v31  ;;  %v2053_v33 = vld [vmem:[%s11092_s11 + $0x1a10] sm:$0xff] }
  0xeb   : > { %2052 = vst [vmem:[%s11097_s23 + $0xd00] sm:$0xff] %v2051_v32  ;;  %v2055_v34 = vld [vmem:[%s11092_s11 + $0x1a20] sm:$0xff]  ;;  %v2057_v35 = vld [vmem:[%s11092_s11 + $0x1a30] sm:$0xff]  ;;  %2054 = vst [vmem:[%s11097_s23 + $0xd08] sm:$0xff] %v2053_v33 }
  0xec   : > { %2056 = vst [vmem:[%s11097_s23 + $0xd10] sm:$0xff] %v2055_v34  ;;  %2058 = vst [vmem:[%s11097_s23 + $0xd18] sm:$0xff] %v2057_v35  ;;  %v2059_v36 = vld [vmem:[%s11092_s11 + $0x1a40] sm:$0xff]  ;;  %v2061_v37 = vld [vmem:[%s11092_s11 + $0x1a50] sm:$0xff] }
  0xed   : > { %v2063_v38 = vld [vmem:[%s11092_s11 + $0x1a60] sm:$0xff]  ;;  %2060 = vst [vmem:[%s11097_s23 + $0xd20] sm:$0xff] %v2059_v36  ;;  %2062 = vst [vmem:[%s11097_s23 + $0xd28] sm:$0xff] %v2061_v37  ;;  %v2065_v39 = vld [vmem:[%s11092_s11 + $0x1a70] sm:$0xff] }
  0xee   : > { %2064 = vst [vmem:[%s11097_s23 + $0xd30] sm:$0xff] %v2063_v38  ;;  %v2067_v40 = vld [vmem:[%s11092_s11 + $0x1a80] sm:$0xff]  ;;  %v2069_v41 = vld [vmem:[%s11092_s11 + $0x1a90] sm:$0xff]  ;;  %2066 = vst [vmem:[%s11097_s23 + $0xd38] sm:$0xff] %v2065_v39 }
  0xef   : > { %2068 = vst [vmem:[%s11097_s23 + $0xd40] sm:$0xff] %v2067_v40  ;;  %2070 = vst [vmem:[%s11097_s23 + $0xd48] sm:$0xff] %v2069_v41  ;;  %v2071_v42 = vld [vmem:[%s11092_s11 + $0x1aa0] sm:$0xff]  ;;  %v2073_v43 = vld [vmem:[%s11092_s11 + $0x1ab0] sm:$0xff] }
  0xf0   : > { %v2075_v44 = vld [vmem:[%s11092_s11 + $0x1ac0] sm:$0xff]  ;;  %2072 = vst [vmem:[%s11097_s23 + $0xd50] sm:$0xff] %v2071_v42  ;;  %2074 = vst [vmem:[%s11097_s23 + $0xd58] sm:$0xff] %v2073_v43  ;;  %v2077_v45 = vld [vmem:[%s11092_s11 + $0x1ad0] sm:$0xff] }
  0xf1   : > { %2076 = vst [vmem:[%s11097_s23 + $0xd60] sm:$0xff] %v2075_v44  ;;  %v2079_v46 = vld [vmem:[%s11092_s11 + $0x1ae0] sm:$0xff]  ;;  %v2081_v47 = vld [vmem:[%s11092_s11 + $0x1af0] sm:$0xff]  ;;  %2078 = vst [vmem:[%s11097_s23 + $0xd68] sm:$0xff] %v2077_v45 }
  0xf2   : > { %2080 = vst [vmem:[%s11097_s23 + $0xd70] sm:$0xff] %v2079_v46  ;;  %2082 = vst [vmem:[%s11097_s23 + $0xd78] sm:$0xff] %v2081_v47  ;;  %v2083_v48 = vld [vmem:[%s11092_s11 + $0x1b00] sm:$0xff]  ;;  %v2085_v49 = vld [vmem:[%s11092_s11 + $0x1b10] sm:$0xff] }
  0xf3   : > { %v2087_v50 = vld [vmem:[%s11092_s11 + $0x1b20] sm:$0xff]  ;;  %2084 = vst [vmem:[%s11097_s23 + $0xd80] sm:$0xff] %v2083_v48  ;;  %2086 = vst [vmem:[%s11097_s23 + $0xd88] sm:$0xff] %v2085_v49  ;;  %v2089_v51 = vld [vmem:[%s11092_s11 + $0x1b30] sm:$0xff] }
  0xf4   : > { %2088 = vst [vmem:[%s11097_s23 + $0xd90] sm:$0xff] %v2087_v50  ;;  %v2091_v52 = vld [vmem:[%s11092_s11 + $0x1b40] sm:$0xff]  ;;  %v2093_v53 = vld [vmem:[%s11092_s11 + $0x1b50] sm:$0xff]  ;;  %2090 = vst [vmem:[%s11097_s23 + $0xd98] sm:$0xff] %v2089_v51 }
  0xf5   : > { %2092 = vst [vmem:[%s11097_s23 + $0xda0] sm:$0xff] %v2091_v52  ;;  %2094 = vst [vmem:[%s11097_s23 + $0xda8] sm:$0xff] %v2093_v53  ;;  %v2095_v54 = vld [vmem:[%s11092_s11 + $0x1b60] sm:$0xff]  ;;  %v2097_v55 = vld [vmem:[%s11092_s11 + $0x1b70] sm:$0xff] }
  0xf6   : > { %v2099_v56 = vld [vmem:[%s11092_s11 + $0x1b80] sm:$0xff]  ;;  %2096 = vst [vmem:[%s11097_s23 + $0xdb0] sm:$0xff] %v2095_v54  ;;  %2098 = vst [vmem:[%s11097_s23 + $0xdb8] sm:$0xff] %v2097_v55  ;;  %v2101_v57 = vld [vmem:[%s11092_s11 + $0x1b90] sm:$0xff] }
  0xf7   : > { %2100 = vst [vmem:[%s11097_s23 + $0xdc0] sm:$0xff] %v2099_v56  ;;  %v2103_v58 = vld [vmem:[%s11092_s11 + $0x1ba0] sm:$0xff]  ;;  %v2105_v59 = vld [vmem:[%s11092_s11 + $0x1bb0] sm:$0xff]  ;;  %2102 = vst [vmem:[%s11097_s23 + $0xdc8] sm:$0xff] %v2101_v57 }
  0xf8   : > { %2104 = vst [vmem:[%s11097_s23 + $0xdd0] sm:$0xff] %v2103_v58  ;;  %2106 = vst [vmem:[%s11097_s23 + $0xdd8] sm:$0xff] %v2105_v59  ;;  %v2107_v60 = vld [vmem:[%s11092_s11 + $0x1bc0] sm:$0xff]  ;;  %v2109_v61 = vld [vmem:[%s11092_s11 + $0x1bd0] sm:$0xff] }
  0xf9   : > { %v2111_v62 = vld [vmem:[%s11092_s11 + $0x1be0] sm:$0xff]  ;;  %2108 = vst [vmem:[%s11097_s23 + $0xde0] sm:$0xff] %v2107_v60  ;;  %2110 = vst [vmem:[%s11097_s23 + $0xde8] sm:$0xff] %v2109_v61  ;;  %v2113_v63 = vld [vmem:[%s11092_s11 + $0x1bf0] sm:$0xff] }
  0xfa   : > { %2112 = vst [vmem:[%s11097_s23 + $0xdf0] sm:$0xff] %v2111_v62  ;;  %v2115_v0 = vld [vmem:[%s11092_s11 + $0x1c00] sm:$0xff]  ;;  %v2117_v1 = vld [vmem:[%s11092_s11 + $0x1c10] sm:$0xff]  ;;  %2114 = vst [vmem:[%s11097_s23 + $0xdf8] sm:$0xff] %v2113_v63 }
  0xfb   : > { %2116 = vst [vmem:[%s11097_s23 + $0xe00] sm:$0xff] %v2115_v0  ;;  %2118 = vst [vmem:[%s11097_s23 + $0xe08] sm:$0xff] %v2117_v1  ;;  %v2119_v2 = vld [vmem:[%s11092_s11 + $0x1c20] sm:$0xff]  ;;  %v2121_v3 = vld [vmem:[%s11092_s11 + $0x1c30] sm:$0xff] }
  0xfc   : > { %v2123_v4 = vld [vmem:[%s11092_s11 + $0x1c40] sm:$0xff]  ;;  %2120 = vst [vmem:[%s11097_s23 + $0xe10] sm:$0xff] %v2119_v2  ;;  %2122 = vst [vmem:[%s11097_s23 + $0xe18] sm:$0xff] %v2121_v3  ;;  %v2125_v5 = vld [vmem:[%s11092_s11 + $0x1c50] sm:$0xff] }
  0xfd   : > { %2124 = vst [vmem:[%s11097_s23 + $0xe20] sm:$0xff] %v2123_v4  ;;  %v2127_v6 = vld [vmem:[%s11092_s11 + $0x1c60] sm:$0xff]  ;;  %v2129_v7 = vld [vmem:[%s11092_s11 + $0x1c70] sm:$0xff]  ;;  %2126 = vst [vmem:[%s11097_s23 + $0xe28] sm:$0xff] %v2125_v5 }
  0xfe   : > { %2128 = vst [vmem:[%s11097_s23 + $0xe30] sm:$0xff] %v2127_v6  ;;  %2130 = vst [vmem:[%s11097_s23 + $0xe38] sm:$0xff] %v2129_v7  ;;  %v2131_v8 = vld [vmem:[%s11092_s11 + $0x1c80] sm:$0xff]  ;;  %v2133_v9 = vld [vmem:[%s11092_s11 + $0x1c90] sm:$0xff] }
  0xff   : > { %v2135_v10 = vld [vmem:[%s11092_s11 + $0x1ca0] sm:$0xff]  ;;  %2132 = vst [vmem:[%s11097_s23 + $0xe40] sm:$0xff] %v2131_v8  ;;  %2134 = vst [vmem:[%s11097_s23 + $0xe48] sm:$0xff] %v2133_v9  ;;  %v2137_v11 = vld [vmem:[%s11092_s11 + $0x1cb0] sm:$0xff] }
 0x100   : > { %2136 = vst [vmem:[%s11097_s23 + $0xe50] sm:$0xff] %v2135_v10  ;;  %v2139_v12 = vld [vmem:[%s11092_s11 + $0x1cc0] sm:$0xff]  ;;  %v2141_v13 = vld [vmem:[%s11092_s11 + $0x1cd0] sm:$0xff]  ;;  %2138 = vst [vmem:[%s11097_s23 + $0xe58] sm:$0xff] %v2137_v11 }
 0x101   : > { %2140 = vst [vmem:[%s11097_s23 + $0xe60] sm:$0xff] %v2139_v12  ;;  %2142 = vst [vmem:[%s11097_s23 + $0xe68] sm:$0xff] %v2141_v13  ;;  %v2143_v14 = vld [vmem:[%s11092_s11 + $0x1ce0] sm:$0xff]  ;;  %v2145_v15 = vld [vmem:[%s11092_s11 + $0x1cf0] sm:$0xff] }
 0x102   : > { %v2147_v16 = vld [vmem:[%s11092_s11 + $0x1d00] sm:$0xff]  ;;  %2144 = vst [vmem:[%s11097_s23 + $0xe70] sm:$0xff] %v2143_v14  ;;  %2146 = vst [vmem:[%s11097_s23 + $0xe78] sm:$0xff] %v2145_v15  ;;  %v2149_v17 = vld [vmem:[%s11092_s11 + $0x1d10] sm:$0xff] }
 0x103   : > { %2148 = vst [vmem:[%s11097_s23 + $0xe80] sm:$0xff] %v2147_v16  ;;  %v2151_v18 = vld [vmem:[%s11092_s11 + $0x1d20] sm:$0xff]  ;;  %v2153_v19 = vld [vmem:[%s11092_s11 + $0x1d30] sm:$0xff]  ;;  %2150 = vst [vmem:[%s11097_s23 + $0xe88] sm:$0xff] %v2149_v17 }
 0x104   : > { %2152 = vst [vmem:[%s11097_s23 + $0xe90] sm:$0xff] %v2151_v18  ;;  %2154 = vst [vmem:[%s11097_s23 + $0xe98] sm:$0xff] %v2153_v19  ;;  %v2155_v20 = vld [vmem:[%s11092_s11 + $0x1d40] sm:$0xff]  ;;  %v2157_v21 = vld [vmem:[%s11092_s11 + $0x1d50] sm:$0xff] }
 0x105   : > { %v2159_v22 = vld [vmem:[%s11092_s11 + $0x1d60] sm:$0xff]  ;;  %2156 = vst [vmem:[%s11097_s23 + $0xea0] sm:$0xff] %v2155_v20  ;;  %2158 = vst [vmem:[%s11097_s23 + $0xea8] sm:$0xff] %v2157_v21  ;;  %v2161_v23 = vld [vmem:[%s11092_s11 + $0x1d70] sm:$0xff] }
 0x106   : > { %2160 = vst [vmem:[%s11097_s23 + $0xeb0] sm:$0xff] %v2159_v22  ;;  %v2163_v24 = vld [vmem:[%s11092_s11 + $0x1d80] sm:$0xff]  ;;  %v2165_v25 = vld [vmem:[%s11092_s11 + $0x1d90] sm:$0xff]  ;;  %2162 = vst [vmem:[%s11097_s23 + $0xeb8] sm:$0xff] %v2161_v23 }
 0x107   : > { %2164 = vst [vmem:[%s11097_s23 + $0xec0] sm:$0xff] %v2163_v24  ;;  %2166 = vst [vmem:[%s11097_s23 + $0xec8] sm:$0xff] %v2165_v25  ;;  %v2167_v26 = vld [vmem:[%s11092_s11 + $0x1da0] sm:$0xff]  ;;  %v2169_v27 = vld [vmem:[%s11092_s11 + $0x1db0] sm:$0xff] }
 0x108   : > { %v2171_v28 = vld [vmem:[%s11092_s11 + $0x1dc0] sm:$0xff]  ;;  %2168 = vst [vmem:[%s11097_s23 + $0xed0] sm:$0xff] %v2167_v26  ;;  %2170 = vst [vmem:[%s11097_s23 + $0xed8] sm:$0xff] %v2169_v27  ;;  %v2173_v29 = vld [vmem:[%s11092_s11 + $0x1dd0] sm:$0xff] }
 0x109   : > { %2172 = vst [vmem:[%s11097_s23 + $0xee0] sm:$0xff] %v2171_v28  ;;  %v2175_v30 = vld [vmem:[%s11092_s11 + $0x1de0] sm:$0xff]  ;;  %v2177_v31 = vld [vmem:[%s11092_s11 + $0x1df0] sm:$0xff]  ;;  %2174 = vst [vmem:[%s11097_s23 + $0xee8] sm:$0xff] %v2173_v29 }
 0x10a   : > { %2176 = vst [vmem:[%s11097_s23 + $0xef0] sm:$0xff] %v2175_v30  ;;  %2178 = vst [vmem:[%s11097_s23 + $0xef8] sm:$0xff] %v2177_v31  ;;  %v2179_v32 = vld [vmem:[%s11092_s11 + $0x1e00] sm:$0xff]  ;;  %v2181_v33 = vld [vmem:[%s11092_s11 + $0x1e10] sm:$0xff] }
 0x10b   : > { %v2183_v34 = vld [vmem:[%s11092_s11 + $0x1e20] sm:$0xff]  ;;  %2180 = vst [vmem:[%s11097_s23 + $0xf00] sm:$0xff] %v2179_v32  ;;  %2182 = vst [vmem:[%s11097_s23 + $0xf08] sm:$0xff] %v2181_v33  ;;  %v2185_v35 = vld [vmem:[%s11092_s11 + $0x1e30] sm:$0xff] }
 0x10c   : > { %2184 = vst [vmem:[%s11097_s23 + $0xf10] sm:$0xff] %v2183_v34  ;;  %v2187_v36 = vld [vmem:[%s11092_s11 + $0x1e40] sm:$0xff]  ;;  %v2189_v37 = vld [vmem:[%s11092_s11 + $0x1e50] sm:$0xff]  ;;  %2186 = vst [vmem:[%s11097_s23 + $0xf18] sm:$0xff] %v2185_v35 }
 0x10d   : > { %2188 = vst [vmem:[%s11097_s23 + $0xf20] sm:$0xff] %v2187_v36  ;;  %2190 = vst [vmem:[%s11097_s23 + $0xf28] sm:$0xff] %v2189_v37  ;;  %v2191_v38 = vld [vmem:[%s11092_s11 + $0x1e60] sm:$0xff]  ;;  %v2193_v39 = vld [vmem:[%s11092_s11 + $0x1e70] sm:$0xff] }
 0x10e   : > { %v2195_v40 = vld [vmem:[%s11092_s11 + $0x1e80] sm:$0xff]  ;;  %2192 = vst [vmem:[%s11097_s23 + $0xf30] sm:$0xff] %v2191_v38  ;;  %2194 = vst [vmem:[%s11097_s23 + $0xf38] sm:$0xff] %v2193_v39  ;;  %v2197_v41 = vld [vmem:[%s11092_s11 + $0x1e90] sm:$0xff] }
 0x10f   : > { %2196 = vst [vmem:[%s11097_s23 + $0xf40] sm:$0xff] %v2195_v40  ;;  %v2199_v42 = vld [vmem:[%s11092_s11 + $0x1ea0] sm:$0xff]  ;;  %v2201_v43 = vld [vmem:[%s11092_s11 + $0x1eb0] sm:$0xff]  ;;  %2198 = vst [vmem:[%s11097_s23 + $0xf48] sm:$0xff] %v2197_v41 }
 0x110   : > { %2200 = vst [vmem:[%s11097_s23 + $0xf50] sm:$0xff] %v2199_v42  ;;  %2202 = vst [vmem:[%s11097_s23 + $0xf58] sm:$0xff] %v2201_v43  ;;  %v2203_v44 = vld [vmem:[%s11092_s11 + $0x1ec0] sm:$0xff]  ;;  %v2205_v45 = vld [vmem:[%s11092_s11 + $0x1ed0] sm:$0xff] }
 0x111   : > { %v2207_v46 = vld [vmem:[%s11092_s11 + $0x1ee0] sm:$0xff]  ;;  %2204 = vst [vmem:[%s11097_s23 + $0xf60] sm:$0xff] %v2203_v44  ;;  %2206 = vst [vmem:[%s11097_s23 + $0xf68] sm:$0xff] %v2205_v45  ;;  %v2209_v47 = vld [vmem:[%s11092_s11 + $0x1ef0] sm:$0xff] }
 0x112   : > { %2208 = vst [vmem:[%s11097_s23 + $0xf70] sm:$0xff] %v2207_v46  ;;  %v2211_v48 = vld [vmem:[%s11092_s11 + $0x1f00] sm:$0xff]  ;;  %v2213_v49 = vld [vmem:[%s11092_s11 + $0x1f10] sm:$0xff]  ;;  %2210 = vst [vmem:[%s11097_s23 + $0xf78] sm:$0xff] %v2209_v47 }
 0x113   : > { %2212 = vst [vmem:[%s11097_s23 + $0xf80] sm:$0xff] %v2211_v48  ;;  %2214 = vst [vmem:[%s11097_s23 + $0xf88] sm:$0xff] %v2213_v49  ;;  %v2215_v50 = vld [vmem:[%s11092_s11 + $0x1f20] sm:$0xff]  ;;  %v2217_v51 = vld [vmem:[%s11092_s11 + $0x1f30] sm:$0xff] }
 0x114   : > { %v2219_v52 = vld [vmem:[%s11092_s11 + $0x1f40] sm:$0xff]  ;;  %2216 = vst [vmem:[%s11097_s23 + $0xf90] sm:$0xff] %v2215_v50  ;;  %2218 = vst [vmem:[%s11097_s23 + $0xf98] sm:$0xff] %v2217_v51  ;;  %v2221_v53 = vld [vmem:[%s11092_s11 + $0x1f50] sm:$0xff] }
 0x115   : > { %2220 = vst [vmem:[%s11097_s23 + $0xfa0] sm:$0xff] %v2219_v52  ;;  %v2223_v54 = vld [vmem:[%s11092_s11 + $0x1f60] sm:$0xff]  ;;  %v2225_v55 = vld [vmem:[%s11092_s11 + $0x1f70] sm:$0xff]  ;;  %2222 = vst [vmem:[%s11097_s23 + $0xfa8] sm:$0xff] %v2221_v53 }
 0x116   : > { %2224 = vst [vmem:[%s11097_s23 + $0xfb0] sm:$0xff] %v2223_v54  ;;  %2226 = vst [vmem:[%s11097_s23 + $0xfb8] sm:$0xff] %v2225_v55  ;;  %v2227_v56 = vld [vmem:[%s11092_s11 + $0x1f80] sm:$0xff]  ;;  %v2229_v57 = vld [vmem:[%s11092_s11 + $0x1f90] sm:$0xff] }
 0x117   : > { %v2231_v58 = vld [vmem:[%s11092_s11 + $0x1fa0] sm:$0xff]  ;;  %2228 = vst [vmem:[%s11097_s23 + $0xfc0] sm:$0xff] %v2227_v56  ;;  %2230 = vst [vmem:[%s11097_s23 + $0xfc8] sm:$0xff] %v2229_v57  ;;  %v2233_v59 = vld [vmem:[%s11092_s11 + $0x1fb0] sm:$0xff] }
 0x118   : > { %2232 = vst [vmem:[%s11097_s23 + $0xfd0] sm:$0xff] %v2231_v58  ;;  %v2235_v60 = vld [vmem:[%s11092_s11 + $0x1fc0] sm:$0xff]  ;;  %v2237_v61 = vld [vmem:[%s11092_s11 + $0x1fd0] sm:$0xff]  ;;  %2234 = vst [vmem:[%s11097_s23 + $0xfd8] sm:$0xff] %v2233_v59 }
 0x119   : > { %2236 = vst [vmem:[%s11097_s23 + $0xfe0] sm:$0xff] %v2235_v60  ;;  %2238 = vst [vmem:[%s11097_s23 + $0xfe8] sm:$0xff] %v2237_v61  ;;  %v2239_v62 = vld [vmem:[%s11092_s11 + $0x1fe0] sm:$0xff]  ;;  %v2241_v63 = vld [vmem:[%s11092_s11 + $0x1ff0] sm:$0xff] }
 0x11a   : > { %2240 = vst [vmem:[%s11097_s23 + $0xff0] sm:$0xff] %v2239_v62  ;;  %2242 = vst [vmem:[%s11097_s23 + $0xff8] sm:$0xff] %v2241_v63 }
 0x11b PF: > { %p9081_p11 = scmp.ge.s32.totalorder %s10984_s20, 1  ;;  %p4340_p12 = scmp.lt.s32.totalorder %s10984_s20, 5 }
 0x11d   : > { %p4341_p13 = pnand %p9081_p11, %p4340_p12 }
 0x11e   : > { %s4347_s24 = sand.u32 (!%p4341_p13), 1, %s10960_s14   ;;  %s9083_s14 = sshll.u32 (!%p4341_p13), %s10968_s16, 2 }
 0x11f   : > { %4344 = sbr.rel (%p4341_p13) target bundleno = 1030 (0x406), region = 80  ;;  %s9082_s25 = sshll.u32 (!%p4341_p13), %s4347_s24, 12 }
 0x120   : > { %s12123_s26 = scalar_lea.vmem (!%p4341_p13), [#allocation2], %s9082_s25  ;;  %p4380_p0 = scmp.lt.s32.totalorder (!%p4341_p13), %s9083_s14, 7 }
 0x121   : > { %s13096_s7 = sshll.u32 (!%p4341_p13), %s10972_s17, 1  ;;  %s4376_s17 = sand.u32 (!%p4341_p13), 1, %s10952_s12  }
 0x122   : > { %p4388_p1 = scmp.lt.s32.totalorder (!%p4341_p13), %s13096_s7, 3  ;;  %s10053_s23 = smul.u32 (!%p4341_p13), 24, %s4376_s17 }
 0x124   : > { %v10126_v0 = vld [vmem:[%s12123_s26 + $0x474] ss:$8 sps:$4 sm:$0xff]   ;;  %v10130_v2 = vld [vmem:[%s12123_s26 + $0x470] ss:$8 sps:$4 sm:$0xff]   ;;  %v10132_v4 = vld [vmem:[%s12123_s26 + $0x464] ss:$8 sps:$4 sm:$0xff]  }
 0x125   : > { %v10128_v1 = vld [vmem:[%s12123_s26 + $0x574] ss:$8 sps:$4 sm:$0xff]   ;;  %5521 = vmatprep.subr.bf16.mxu0 %v10126_v0  ;;  %v10131_v3 = vld [vmem:[%s12123_s26 + $0x570] ss:$8 sps:$4 sm:$0xff]   ;;  %v10134_v5 = vld [vmem:[%s12123_s26 + $0x564] ss:$8 sps:$4 sm:$0xff]  }
 0x126   : > { %5572 = vmatprep.subr.bf16.mxu1 %v10128_v1  ;;  %5522 = vmatpush1.bf16.msra.mxu0 %v10130_v2  ;;  %v10136_v6 = vld [vmem:[%s12123_s26 + $0x460] ss:$8 sps:$4 sm:$0xff]   ;;  %v10138_v8 = vld [vmem:[%s12123_s26 + $0x454] ss:$8 sps:$4 sm:$0xff]   ;;  %v10142_v10 = vld [vmem:[%s12123_s26 + $0x450] ss:$8 sps:$4 sm:$0xff]  }
 0x127   : > { %5573 = vmatpush1.bf16.msra.mxu1 %v10131_v3  ;;  %5523 = vmatprep.subr.bf16.mxu0 %v10132_v4  ;;  %v10137_v7 = vld [vmem:[%s12123_s26 + $0x560] ss:$8 sps:$4 sm:$0xff]   ;;  %v10140_v9 = vld [vmem:[%s12123_s26 + $0x554] ss:$8 sps:$4 sm:$0xff]   ;;  %v10143_v11 = vld [vmem:[%s12123_s26 + $0x550] ss:$8 sps:$4 sm:$0xff]  }
 0x128   : > { %5574 = vmatprep.subr.bf16.mxu1 %v10134_v5  ;;  %v10144_v12 = vld [vmem:[%s12123_s26 + $0x444] ss:$8 sps:$4 sm:$0xff]   ;;  %v10148_v14 = vld [vmem:[%s12123_s26 + $0x440] ss:$8 sps:$4 sm:$0xff]   ;;  %v10150_v16 = vld [vmem:[%s12123_s26 + $0x434] ss:$8 sps:$4 sm:$0xff]  }
 0x129   : > { %v10146_v13 = vld [vmem:[%s12123_s26 + $0x544] ss:$8 sps:$4 sm:$0xff]   ;;  %v10149_v15 = vld [vmem:[%s12123_s26 + $0x540] ss:$8 sps:$4 sm:$0xff]   ;;  %v10152_v17 = vld [vmem:[%s12123_s26 + $0x534] ss:$8 sps:$4 sm:$0xff]  }
 0x12a   : > { %5524 = vmatpush1.bf16.msra.mxu0 %v10136_v6  ;;  %v10154_v18 = vld [vmem:[%s12123_s26 + $0x430] ss:$8 sps:$4 sm:$0xff]   ;;  %v10156_v20 = vld [vmem:[%s12123_s26 + $0x424] ss:$8 sps:$4 sm:$0xff]   ;;  %v10160_v22 = vld [vmem:[%s12123_s26 + $0x420] ss:$8 sps:$4 sm:$0xff]  }
 0x12b   : > { %5575 = vmatpush1.bf16.msra.mxu1 %v10137_v7  ;;  %5525 = vmatprep.subr.bf16.mxu0 %v10138_v8  ;;  %v10155_v19 = vld [vmem:[%s12123_s26 + $0x530] ss:$8 sps:$4 sm:$0xff]   ;;  %v10158_v21 = vld [vmem:[%s12123_s26 + $0x524] ss:$8 sps:$4 sm:$0xff]   ;;  %v10161_v23 = vld [vmem:[%s12123_s26 + $0x520] ss:$8 sps:$4 sm:$0xff]  }
 0x12c   : > { %5576 = vmatprep.subr.bf16.mxu1 %v10140_v9  ;;  %v10162_v24 = vld [vmem:[%s12123_s26 + $0x414] ss:$8 sps:$4 sm:$0xff]   ;;  %v10166_v26 = vld [vmem:[%s12123_s26 + $0x410] ss:$8 sps:$4 sm:$0xff]   ;;  %v10168_v28 = vld [vmem:[%s12123_s26 + $0x404] ss:$8 sps:$4 sm:$0xff]  }
 0x12d   : > { %v10164_v25 = vld [vmem:[%s12123_s26 + $0x514] ss:$8 sps:$4 sm:$0xff]   ;;  %v10167_v27 = vld [vmem:[%s12123_s26 + $0x510] ss:$8 sps:$4 sm:$0xff]   ;;  %v10170_v29 = vld [vmem:[%s12123_s26 + $0x504] ss:$8 sps:$4 sm:$0xff]  }
 0x12e   : > { %5526 = vmatpush1.bf16.msra.mxu0 %v10142_v10  ;;  %v10172_v30 = vld [vmem:[%s12123_s26 + $0x400] ss:$8 sps:$4 sm:$0xff]   ;;  %v10174_v32 = vld [vmem:[%s12123_s26 + $0x4f4] ss:$8 sps:$4 sm:$0xff]   ;;  %v10178_v34 = vld [vmem:[%s12123_s26 + $0x4f0] ss:$8 sps:$4 sm:$0xff]  }
 0x12f   : > { %5577 = vmatpush1.bf16.msra.mxu1 %v10143_v11  ;;  %5527 = vmatprep.subr.bf16.mxu0 %v10144_v12  ;;  %v10173_v31 = vld [vmem:[%s12123_s26 + $0x500] ss:$8 sps:$4 sm:$0xff]   ;;  %v10176_v33 = vld [vmem:[%s12123_s26 + $0x5f4] ss:$8 sps:$4 sm:$0xff]   ;;  %v10179_v35 = vld [vmem:[%s12123_s26 + $0x5f0] ss:$8 sps:$4 sm:$0xff]  }
 0x130   : > { %5578 = vmatprep.subr.bf16.mxu1 %v10146_v13  ;;  %v10180_v36 = vld [vmem:[%s12123_s26 + $0x4e4] ss:$8 sps:$4 sm:$0xff]   ;;  %s13165_s14 = smov (!%p4380_p0, %s9083_s14), 7  ;;  %v10184_v38 = vld [vmem:[%s12123_s26 + $0x4e0] ss:$8 sps:$4 sm:$0xff]   ;;  %vm7970_vm2 = vcmask 1044480  }
 0x131   : > { %v10182_v37 = vld [vmem:[%s12123_s26 + $0x5e4] ss:$8 sps:$4 sm:$0xff]   ;;  %v10185_v39 = vld [vmem:[%s12123_s26 + $0x5e0] ss:$8 sps:$4 sm:$0xff]   ;;  %v10186_v40 = vld [vmem:[%s12123_s26 + $0x4d4] ss:$8 sps:$4 sm:$0xff]  }
 0x132   : > { %5528 = vmatpush1.bf16.msra.mxu0 %v10148_v14  ;;  %s10048_s27 = sshll.u32 %s13165_s14, 5  ;;  %v10188_v41 = vld [vmem:[%s12123_s26 + $0x5d4] ss:$8 sps:$4 sm:$0xff]   ;;  %v10190_v42 = vld [vmem:[%s12123_s26 + $0x4d0] ss:$8 sps:$4 sm:$0xff]   ;;  %s4378_s12 = scalar_lea.vmem [#allocation3], %s10053_s23 }
 0x133   : > { %5579 = vmatpush1.bf16.msra.mxu1 %v10149_v15  ;;  %5529 = vmatprep.subr.bf16.mxu0 %v10150_v16  ;;  %v10191_v43 = vld [vmem:[%s12123_s26 + $0x5d0] ss:$8 sps:$4 sm:$0xff]   ;;  %s12173_s6 = scalar_lea.vmem %s13144_s0, %s10048_s27  ;;  %v10192_v44 = vld [vmem:[%s12123_s26 + $0x4c4] ss:$8 sps:$4 sm:$0xff]   ;;  %v10196_v46 = vld [vmem:[%s12123_s26 + $0x4c0] ss:$8 sps:$4 sm:$0xff]  }
 0x134   : > { %5580 = vmatprep.subr.bf16.mxu1 %v10152_v17  ;;  %v10194_v45 = vld [vmem:[%s12123_s26 + $0x5c4] ss:$8 sps:$4 sm:$0xff]   ;;  %v10197_v47 = vld [vmem:[%s12123_s26 + $0x5c0] ss:$8 sps:$4 sm:$0xff]   ;;  %v10198_v49 = vld [vmem:[%s12123_s26 + $0x4b4] ss:$8 sps:$4 sm:$0xff]  }
 0x135   : > { %v4535_v48 = vld [vmem:[%s12173_s6] sm:$0xff]  ;;  %v10200_v50 = vld [vmem:[%s12123_s26 + $0x5b4] ss:$8 sps:$4 sm:$0xff]   ;;  %v4536_v56 = vld [vmem:[%s12173_s6 + $0x8] sm:$0xff]  ;;  %vm4744_vm0 = vsmask.f32 7424 }
 0x136   : > { %5530 = vmatpush1.bf16.msra.mxu0 %v10154_v18  ;;  %v4539_v51 = vld [vmem:[%s12173_s6 + $0x20] sm:$0xff]  ;;  %v4540_v57 = vld [vmem:[%s12173_s6 + $0x28] sm:$0xff]  ;;  %v10202_v1 = vld [vmem:[%s12123_s26 + $0x4b0] ss:$8 sps:$4 sm:$0xff]   ;;  %vm6814_vm1 = vsmask.f32 5376 }
 0x137   : > { %5581 = vmatpush1.bf16.msra.mxu1 %v10155_v19  ;;  %5531 = vmatprep.subr.bf16.mxu0 %v10156_v20  ;;  %v4543_v52 = vld [vmem:[%s12173_s6 + $0x40] sm:$0xff]  ;;  %v12185_v54 = vcombine.high %v4535_v48, %v4539_v51  ;;  %v4544_v58 = vld [vmem:[%s12173_s6 + $0x48] sm:$0xff]  ;;  %v12193_v60 = vcombine.high %v4536_v56, %v4540_v57  ;;  %v10203_v2 = vld [vmem:[%s12123_s26 + $0x5b0] ss:$8 sps:$4 sm:$0xff]   ;;  %v12204_v5 = vcombine.low %v4535_v48, %v4539_v51  ;;  %s4389_s8 = scalar_select %p4388_p1, %s13096_s7, 3 }
 0x138   : > { %5582 = vmatprep.subr.bf16.mxu1 %v10158_v21  ;;  %v4547_v53 = vld [vmem:[%s12173_s6 + $0x60] sm:$0x11]  ;;  %v4548_v59 = vld [vmem:[%s12173_s6 + $0x68] sm:$0x11]  ;;  %v12209_v9 = vcombine.low %v4536_v56, %v4540_v57  ;;  %v10222_v48 = vld [vmem:[%s12123_s26 + $0x670] ss:$8 sps:$4 sm:$0xff]  }
 0x139   : > { %v12187_v55 = vcombine.high %v4543_v52, %v4547_v53  ;;  %v4758_v61 = vshrl.u32 %v12185_v54, 16  ;;  %v4760_v62 = vshll.u32 %v12185_v54, 16  ;;  %v12198_v0 = vcombine.high %v4544_v58, %v4548_v59  ;;  %v10204_v10 = vld [vmem:[%s12123_s26 + $0x4a4] ss:$8 sps:$4 sm:$0xff]   ;;  %v10208_v15 = vld [vmem:[%s12123_s26 + $0x4a0] ss:$8 sps:$4 sm:$0xff]   ;;  %s4390_s11 = scalar_lea.vmem %s13146_s2, %s4389_s8 }
 0x13a   : > { %5532 = vmatpush1.bf16.msra.mxu0 %v10160_v22  ;;  %v4782_v3 = vshrl.u32 %v12193_v60, 16  ;;  %v4784_v4 = vshll.u32 %v12193_v60, 16  ;;  %v10206_v11 = vld [vmem:[%s12123_s26 + $0x5a4] ss:$8 sps:$4 sm:$0xff]   ;;  %v12214_v17 = vcombine.low %v4543_v52, %v4547_v53  ;;  %v10209_v18 = vld [vmem:[%s12123_s26 + $0x5a0] ss:$8 sps:$4 sm:$0xff]   ;;  %v12220_v21 = vcombine.low %v4544_v58, %v4548_v59 }
 0x13b   : > { %5583 = vmatpush1.bf16.msra.mxu1 %v10161_v23  ;;  %5533 = vmatprep.subr.bf16.mxu0 %v10162_v24  ;;  %v4765_v63 = vshll.u32 %v12187_v55, 16  ;;  %v4762_v6 = vrot.slane %v4760_v62, 1  ;;  %v4789_v8 = vshll.u32 %v12198_v0, 16  ;;  %v4748_v20 = vshll.u32 %v12204_v5, 16  ;;  %v10210_v23 = vld [vmem:[%s12123_s26 + $0x494] ss:$8 sps:$4 sm:$0xff]  }
 0x13c   : > { %5584 = vmatprep.subr.bf16.mxu1 %v10164_v25  ;;  %v4786_v12 = vrot.slane %v4784_v4, 1  ;;  %v4772_v22 = vshll.u32 %v12209_v9, 16  ;;  %v10212_v24 = vld [vmem:[%s12123_s26 + $0x594] ss:$8 sps:$4 sm:$0xff]   ;;  %v10233_v51 = vld [vmem:[%s12123_s26 + $0x764] ss:$8 sps:$4 sm:$0xff]  }
 0x13d   : > { %v12206_v7 = vrot.slane %v4765_v63, 1  ;;  %v4763_v13 = vor.u32 %v4762_v6, %v4758_v61  ;;  %v4791_v14 = vrot.slane %v4789_v8, 1  ;;  %v4847_v56 = vshrl.u32 %v12220_v21, 16  ;;  %v10228_v57 = vld [vmem:[%s12123_s26 + $0x660] ss:$8 sps:$4 sm:$0xff]   ;;  %s10052_s24 = smul.u32 (%p11074_p9), 12, %s10968_s16 }
 0x13e   : > { %5534 = vmatpush1.bf16.msra.mxu0 %v10166_v26  ;;  %v4787_v16 = vor.u32 %v4786_v12, %v4782_v3  ;;  %v10214_v26 = vld [vmem:[%s12123_s26 + $0x490] ss:$8 sps:$4 sm:$0xff]   ;;  %v10231_v58 = vld [vmem:[%s12123_s26 + $0x760] ss:$8 sps:$4 sm:$0xff]   ;;  %v10236_v59 = vld [vmem:[%s12123_s26 + $0x654] ss:$8 sps:$4 sm:$0xff]  }
 0x13f   : > { %5585 = vmatpush1.bf16.msra.mxu1 %v10167_v27  ;;  %5535 = vmatprep.subr.bf16.mxu0 %v10168_v28  ;;  %v4768_v19 = vsel %vm4744_vm0, %v4763_v13, %v12206_v7  ;;  %v10215_v27 = vld [vmem:[%s12123_s26 + $0x590] ss:$8 sps:$4 sm:$0xff]   ;;  %v4746_v28 = vshrl.u32 %v12204_v5, 16  ;;  %v10239_v61 = vld [vmem:[%s12123_s26 + $0x754] ss:$8 sps:$4 sm:$0xff]   ;;  %s8929_s25 = sadd.s32 (%p11074_p9), %s10052_s24, %s13096_s7 }
 0x140   : > { %5586 = vmatprep.subr.bf16.mxu1 %v10170_v29  ;;  %v4792_v25 = vsel %vm4744_vm0, %v4787_v16, %v4791_v14  ;;  %5553 = vmatprep.mubr.bf16.mxu0 %v4768_v19  ;;  %v4753_v29 = vshll.u32 %v12214_v17, 16  ;;  %v10245_v3 = vld [vmem:[%s12123_s26 + $0x744] ss:$8 sps:$4 sm:$0xff]   ;;  %v10240_v4 = vld [vmem:[%s12123_s26 + $0x640] ss:$8 sps:$4 sm:$0xff]  }
 0x141   : > { %5604 = vmatprep.mubr.bf16.mxu1 %v4792_v25  ;;  %v10243_v6 = vld [vmem:[%s12123_s26 + $0x740] ss:$8 sps:$4 sm:$0xff]   ;;  %v10251_v8 = vld [vmem:[%s12123_s26 + $0x734] ss:$8 sps:$4 sm:$0xff]   ;;  %v10254_v12 = vld [vmem:[%s12123_s26 + $0x624] ss:$8 sps:$4 sm:$0xff]  }
 0x142   : > { %5536 = vmatpush1.bf16.msra.mxu0 %v10172_v30  ;;  %v4750_v30 = vrot.slane %v4748_v20, 1  ;;  %v10257_v13 = vld [vmem:[%s12123_s26 + $0x724] ss:$8 sps:$4 sm:$0xff]   ;;  %v10260_v16 = vld [vmem:[%s12123_s26 + $0x614] ss:$8 sps:$4 sm:$0xff]  }
 0x143   : > { %5587 = vmatpush1.bf16.msra.mxu1 %v10173_v31  ;;  %5537 = vmatprep.subr.bf16.mxu0 %v10174_v32  ;;  %v4770_v31 = vshrl.u32 %v12209_v9, 16  ;;  %v4774_v32 = vrot.slane %v4772_v22, 1  ;;  %v10261_v19 = vld [vmem:[%s12123_s26 + $0x710] ss:$8 sps:$4 sm:$0xff]   ;;  %v10266_v20 = vld [vmem:[%s12123_s26 + $0x604] ss:$8 sps:$4 sm:$0xff]  }
 0x144   : > { %5588 = vmatprep.subr.bf16.mxu1 %v10176_v33  ;;  %v4777_v33 = vshll.u32 %v12220_v21, 16  ;;  %v10269_v21 = vld [vmem:[%s12123_s26 + $0x704] ss:$8 sps:$4 sm:$0xff]   ;;  %v10264_v22 = vld [vmem:[%s12123_s26 + $0x600] ss:$8 sps:$4 sm:$0xff]   ;;  %v12279_v25 = vld [vmem:[%s12173_s6 + $0x30] sm:$0xff] }
 0x146   : > { %5538 = vmatpush2.bf16.msra.mxu0 %v10178_v34  ;;  %v10216_v34 = vld [vmem:[%s12123_s26 + $0x484] ss:$8 sps:$4 sm:$0xff]  }
 0x147   : > { %5589 = vmatpush2.bf16.msra.mxu1 %v10179_v35  ;;  %5539 = vmatprep.subr.bf16.mxu0 %v10180_v36  ;;  %v10218_v35 = vld [vmem:[%s12123_s26 + $0x584] ss:$8 sps:$4 sm:$0xff]   ;;  %v10220_v36 = vld [vmem:[%s12123_s26 + $0x480] ss:$8 sps:$4 sm:$0xff]  }
 0x148   : > { %5590 = vmatprep.subr.bf16.mxu1 %v10182_v37  ;;  %v10221_v37 = vld [vmem:[%s12123_s26 + $0x580] ss:$8 sps:$4 sm:$0xff]  }
 0x14a   : > { %5540 = vmatpush2.bf16.msra.mxu0 %v10184_v38  ;;  %v4751_v38 = vor.u32 %v4750_v30, %v4746_v28  ;;  %v12286_v28 = vld [vmem:[%s12173_s6 + $0x70] sm:$0x11]  ;;  %v12293_v30 = vld [vmem:[%s12173_s6 + $0x18] sm:$0xff] }
 0x14b   : > { %5591 = vmatpush2.bf16.msra.mxu1 %v10185_v39  ;;  %5541 = vmatprep.subr.bf16.mxu0 %v10186_v40  ;;  %v4755_v39 = vrot.slane %v4753_v29, 1  ;;  %v4775_v40 = vor.u32 %v4774_v32, %v4770_v31  ;;  %v12296_v31 = vld [vmem:[%s12173_s6 + $0x38] sm:$0xff] }
 0x14c   : > { %5592 = vmatprep.subr.bf16.mxu1 %v10188_v41  ;;  %v4779_v41 = vrot.slane %v4777_v33, 1  ;;  %v12303_v33 = vld [vmem:[%s12173_s6 + $0x58] sm:$0xff] }
 0x14e   : > { %5542 = vmatpush2.bf16.msra.mxu0 %v10190_v42  ;;  %v10224_v42 = vld [vmem:[%s12123_s26 + $0x674] ss:$8 sps:$4 sm:$0xff]   ;;  %v4849_v63 = vor.u32 %v4847_v56, %v4779_v41 }
 0x14f   : > { %5593 = vmatpush2.bf16.msra.mxu1 %v10191_v43  ;;  %5543 = vmatprep.subr.bf16.mxu0 %v10192_v44  ;;  %v10227_v43 = vld [vmem:[%s12123_s26 + $0x774] ss:$8 sps:$4 sm:$0xff]   ;;  %v4844_v44 = vshrl.u32 %v12187_v55, 16  ;;  %v4841_v55 = vshrl.u32 %v12214_v17, 16 }
 0x150   : > { %5594 = vmatprep.subr.bf16.mxu1 %v10194_v45  ;;  %v4850_v45 = vshrl.u32 %v12198_v0, 16  ;;  %v10234_v0 = vld [vmem:[%s12123_s26 + $0x650] ss:$8 sps:$4 sm:$0xff]   ;;  %v10263_v17 = vld [vmem:[%s12123_s26 + $0x714] ss:$8 sps:$4 sm:$0xff]  }
 0x151   : > { %v4846_v52 = vor.u32 %v4844_v44, %v12206_v7  ;;  %v4843_v62 = vor.u32 %v4841_v55, %v4755_v39  ;;  %v10248_v7 = vld [vmem:[%s12123_s26 + $0x634] ss:$8 sps:$4 sm:$0xff]   ;;  %v10279_v55 = vld [vmem:[%s12123_s26 + $0x7e0] ss:$8 sps:$4 sm:$0xff]  }
 0x152   : > { %5544 = vmatpush2.bf16.msra.mxu0 %v10196_v46  ;;  %v4756_v46 = vsel %vm4744_vm0, %v4751_v38, %v4755_v39  ;;  %v4852_v53 = vor.u32 %v4850_v45, %v4791_v14  ;;  %v10252_v14 = vld [vmem:[%s12123_s26 + $0x620] ss:$8 sps:$4 sm:$0xff]   ;;  %v12313_v38 = vcombine.high %v12293_v30, %v12296_v31  ;;  %v10270_v39 = vld [vmem:[%s12123_s26 + $0x6f0] ss:$8 sps:$4 sm:$0xff]  }
 0x153   : > { %5595 = vmatpush2.bf16.msra.mxu1 %v10197_v47  ;;  %5545 = vmatprep.subr.bf16.mxu0 %v10198_v49  ;;  %v4780_v47 = vsel %vm4744_vm0, %v4775_v40, %v4779_v41  ;;  %v10225_v49 = vld [vmem:[%s12123_s26 + $0x770] ss:$8 sps:$4 sm:$0xff]  }
 0x154   : > { %5596 = vmatprep.subr.bf16.mxu1 %v10200_v50  ;;  %v10230_v50 = vld [vmem:[%s12123_s26 + $0x664] ss:$8 sps:$4 sm:$0xff]   ;;  %v4830_v44 = vshrl.u32 %v12313_v38, 16  ;;  %v4832_v45 = vshll.u32 %v12313_v38, 16 }
 0x156   : > { %5546 = vmatpush2.bf16.msra.mxu0 %v10202_v1  ;;  %v10237_v1 = vld [vmem:[%s12123_s26 + $0x750] ss:$8 sps:$4 sm:$0xff]  }
 0x157   : > { %5597 = vmatpush2.bf16.msra.mxu1 %v10203_v2  ;;  %5547 = vmatprep.subr.bf16.mxu0 %v10204_v10  ;;  %v10242_v2 = vld [vmem:[%s12123_s26 + $0x644] ss:$8 sps:$4 sm:$0xff]   ;;  %v10246_v10 = vld [vmem:[%s12123_s26 + $0x630] ss:$8 sps:$4 sm:$0xff]  }
 0x158   : > { %5598 = vmatprep.subr.bf16.mxu1 %v10206_v11  ;;  %v10249_v11 = vld [vmem:[%s12123_s26 + $0x730] ss:$8 sps:$4 sm:$0xff]  }
 0x15a   : > { %5548 = vmatpush2.bf16.msra.mxu0 %v10208_v15  ;;  %v10255_v15 = vld [vmem:[%s12123_s26 + $0x720] ss:$8 sps:$4 sm:$0xff]  }
 0x15b   : > { %5599 = vmatpush2.bf16.msra.mxu1 %v10209_v18  ;;  %5549 = vmatprep.subr.bf16.mxu0 %v10210_v23  ;;  %v10258_v18 = vld [vmem:[%s12123_s26 + $0x610] ss:$8 sps:$4 sm:$0xff]   ;;  %v10267_v23 = vld [vmem:[%s12123_s26 + $0x700] ss:$8 sps:$4 sm:$0xff]  }
 0x15c   : > { %5600 = vmatprep.subr.bf16.mxu1 %v10212_v24  ;;  %v12276_v24 = vld [vmem:[%s12173_s6 + $0x10] sm:$0xff] }
 0x15d   : > { %v12290_v29 = vcombine.high %v12276_v24, %v12279_v25 }
 0x15e   : > { %5550 = vmatpush2.bf16.msra.mxu0 %v10214_v26  ;;  %v12282_v26 = vld [vmem:[%s12173_s6 + $0x50] sm:$0xff] }
 0x15f   : > { %5601 = vmatpush2.bf16.msra.mxu1 %v10215_v27  ;;  %5551 = vmatprep.subr.bf16.mxu0 %v10216_v34  ;;  %v10272_v27 = vld [vmem:[%s12123_s26 + $0x6f4] ss:$8 sps:$4 sm:$0xff]   ;;  %v12300_v32 = vcombine.high %v12282_v26, %v12286_v28 }
 0x160   : > { %5602 = vmatprep.subr.bf16.mxu1 %v10218_v35  ;;  %v12306_v34 = vld [vmem:[%s12173_s6 + $0x78] sm:$0x11] }
 0x161   : > { %v10275_v35 = vld [vmem:[%s12123_s26 + $0x7f4] ss:$8 sps:$4 sm:$0xff]   ;;  %v4813_v40 = vshll.u32 %v12300_v32, 16  ;;  %v12319_v41 = vcombine.high %v12303_v33, %v12306_v34 }
 0x162   : > { %5552 = vmatpush2.bf16.msra.mxu0 %v10220_v36  ;;  %v4806_v36 = vshrl.u32 %v12290_v29, 16 }
 0x163   : > { %5603 = vmatpush2.bf16.msra.mxu1 %v10221_v37  ;;  %5623 = vmatprep.subr.bf16.mxu0 %v10224_v42  ;;  %v4808_v37 = vshll.u32 %v12290_v29, 16  ;;  %v10273_v42 = vld [vmem:[%s12123_s26 + $0x7f0] ss:$8 sps:$4 sm:$0xff]  }
 0x164   : > { %5674 = vmatprep.subr.bf16.mxu1 %v10227_v43 }
 0x165   : > { %5554 = vmatmul.mubr.bf16.vlgmr.msra.gmra.mxu0 %v4756_v46  ;;  %v4810_v43 = vrot.slane %v4808_v37, 1  ;;  %v10278_v46 = vld [vmem:[%s12123_s26 + $0x6e4] ss:$8 sps:$4 sm:$0xff]  }
 0x166   : > { %5605 = vmatmul.mubr.bf16.vlgmr.msra.gmra.mxu1 %v4780_v47  ;;  %5624 = vmatpush1.bf16.msra.mxu0 %v10222_v48  ;;  %v10281_v47 = vld [vmem:[%s12123_s26 + $0x7e4] ss:$8 sps:$4 sm:$0xff]   ;;  %v12326_v48 = vrot.slane %v4813_v40, 1 }
 0x167   : > { %5675 = vmatpush1.bf16.msra.mxu1 %v10225_v49  ;;  %5625 = vmatprep.subr.bf16.mxu0 %v10230_v50  ;;  %v4837_v49 = vshll.u32 %v12319_v41, 16  ;;  %v4811_v50 = vor.u32 %v4810_v43, %v4806_v36  ;;  %v10323_v43 = vld [vmem:[%s12123_s26 + $0x174] ss:$8 sps:$4 sm:$0xff]  }
 0x168   : > { %5676 = vmatprep.subr.bf16.mxu1 %v10233_v51  ;;  %5563 = vmatprep.mubr.bf16.mxu0 %v4846_v52  ;;  %v4834_v51 = vrot.slane %v4832_v45, 1  ;;  %v4862_v45 = vshrl.u32 %v12319_v41, 16 }
 0x169   : > { %5614 = vmatprep.mubr.bf16.mxu1 %v4852_v53  ;;  %v12329_v52 = vrot.slane %v4837_v49, 1  ;;  %v10276_v53 = vld [vmem:[%s12123_s26 + $0x6e0] ss:$8 sps:$4 sm:$0xff]   ;;  %v4816_v56 = vsel %vm4744_vm0, %v4811_v50, %v12326_v48 }
 0x16a   : > { %5626 = vmatpush1.bf16.msra.mxu0 %v10228_v57  ;;  %v4835_v57 = vor.u32 %v4834_v51, %v4830_v44  ;;  %v4856_v44 = vshrl.u32 %v12300_v32, 16  ;;  %v10326_v51 = vld [vmem:[%s12123_s26 + $0x64] ss:$8 sps:$4 sm:$0xff]  }
 0x16b   : > { %5677 = vmatpush1.bf16.msra.mxu1 %v10231_v58  ;;  %5627 = vmatprep.subr.bf16.mxu0 %v10236_v59  ;;  %v10284_v58 = vld [vmem:[%s12123_s26 + $0x6d4] ss:$8 sps:$4 sm:$0xff]   ;;  %v4864_v41 = vor.u32 %v4862_v45, %v12329_v52  ;;  %v10393_v45 = vld [vmem:[%s12123_s26 + $0x1b0] ss:$8 sps:$4 sm:$0xff]  }
 0x16c   : > { %5678 = vmatprep.subr.bf16.mxu1 %v10239_v61  ;;  %v10287_v59 = vld [vmem:[%s12123_s26 + $0x7d4] ss:$8 sps:$4 sm:$0xff]   ;;  %v4840_v61 = vsel %vm4744_vm0, %v4835_v57, %v12329_v52  ;;  %v4858_v32 = vor.u32 %v4856_v44, %v12326_v48  ;;  %v10390_v44 = vld [vmem:[%s12123_s26 + $0xb0] ss:$8 sps:$4 sm:$0xff]  }
 0x16d   : > { %5564 = vmatmul.mubr.bf16.gmra.mxu0 %v4843_v62  ;;  %v10282_v62 = vld [vmem:[%s12123_s26 + $0x6d0] ss:$8 sps:$4 sm:$0xff]   ;;  %v10335_v48 = vld [vmem:[%s12123_s26 + $0x154] ss:$8 sps:$4 sm:$0xff]  }
 0x16e   : > { %5615 = vmatmul.mubr.bf16.gmra.mxu1 %v4849_v63  ;;  %5628 = vmatpush1.bf16.msra.mxu0 %v10234_v0  ;;  %v10285_v63 = vld [vmem:[%s12123_s26 + $0x7d0] ss:$8 sps:$4 sm:$0xff]   ;;  %v10290_v0 = vld [vmem:[%s12123_s26 + $0x6c4] ss:$8 sps:$4 sm:$0xff]  }
 0x16f   : > { %5679 = vmatpush1.bf16.msra.mxu1 %v10237_v1  ;;  %5629 = vmatprep.subr.bf16.mxu0 %v10242_v2  ;;  %v10293_v1 = vld [vmem:[%s12123_s26 + $0x7c4] ss:$8 sps:$4 sm:$0xff]   ;;  %v10288_v2 = vld [vmem:[%s12123_s26 + $0x6c0] ss:$8 sps:$4 sm:$0xff]  }
 0x170   : > { %5680 = vmatprep.subr.bf16.mxu1 %v10245_v3  ;;  %5655 = vmatprep.mubr.bf16.mxu0 %v4816_v56  ;;  %v10291_v3 = vld [vmem:[%s12123_s26 + $0x7c0] ss:$8 sps:$4 sm:$0xff]  }
 0x171   : > { %5706 = vmatprep.mubr.bf16.mxu1 %v4840_v61  ;;  %v10327_v56 = vld [vmem:[%s12123_s26 + $0x160] ss:$8 sps:$4 sm:$0xff]   ;;  %v10330_v61 = vld [vmem:[%s12123_s26 + $0x50] ss:$8 sps:$4 sm:$0xff]  }
 0x172   : > { %5630 = vmatpush1.bf16.msra.mxu0 %v10240_v4  ;;  %v10296_v4 = vld [vmem:[%s12123_s26 + $0x6b4] ss:$8 sps:$4 sm:$0xff]  }
 0x173   : > { %5681 = vmatpush1.bf16.msra.mxu1 %v10243_v6  ;;  %5631 = vmatprep.subr.bf16.mxu0 %v10248_v7  ;;  %v10299_v6 = vld [vmem:[%s12123_s26 + $0x7b4] ss:$8 sps:$4 sm:$0xff]   ;;  %v10294_v7 = vld [vmem:[%s12123_s26 + $0x6b0] ss:$8 sps:$4 sm:$0xff]  }
 0x174   : > { %5682 = vmatprep.subr.bf16.mxu1 %v10251_v8  ;;  %v10297_v8 = vld [vmem:[%s12123_s26 + $0x7b0] ss:$8 sps:$4 sm:$0xff]  }
 0x176   : > { %5632 = vmatpush1.bf16.msra.mxu0 %v10246_v10  ;;  %v10302_v10 = vld [vmem:[%s12123_s26 + $0x6a4] ss:$8 sps:$4 sm:$0xff]  }
 0x177   : > { %5683 = vmatpush1.bf16.msra.mxu1 %v10249_v11  ;;  %5633 = vmatprep.subr.bf16.mxu0 %v10254_v12  ;;  %v12352_v11 = vcombine.low %v12276_v24, %v12279_v25  ;;  %v12356_v12 = vcombine.low %v12293_v30, %v12296_v31  ;;  %v10314_v24 = vld [vmem:[%s12123_s26 + $0x684] ss:$8 sps:$4 sm:$0xff]  }
 0x178   : > { %5684 = vmatprep.subr.bf16.mxu1 %v10257_v13  ;;  %v10305_v13 = vld [vmem:[%s12123_s26 + $0x7a4] ss:$8 sps:$4 sm:$0xff]  }
 0x179   : > { %v4794_v25 = vshrl.u32 %v12352_v11, 16 }
 0x17a   : > { %5634 = vmatpush1.bf16.msra.mxu0 %v10252_v14  ;;  %v10300_v14 = vld [vmem:[%s12123_s26 + $0x6a0] ss:$8 sps:$4 sm:$0xff]  }
 0x17b   : > { %5685 = vmatpush1.bf16.msra.mxu1 %v10255_v15  ;;  %5635 = vmatprep.subr.bf16.mxu0 %v10260_v16  ;;  %v10303_v15 = vld [vmem:[%s12123_s26 + $0x7a0] ss:$8 sps:$4 sm:$0xff]   ;;  %v12363_v16 = vcombine.low %v12282_v26, %v12286_v28  ;;  %v4818_v28 = vshrl.u32 %v12356_v12, 16 }
 0x17c   : > { %5686 = vmatprep.subr.bf16.mxu1 %v10263_v17  ;;  %v10308_v17 = vld [vmem:[%s12123_s26 + $0x694] ss:$8 sps:$4 sm:$0xff]  }
 0x17d   : > { %v4801_v26 = vshll.u32 %v12363_v16, 16  ;;  %v4853_v57 = vshrl.u32 %v12363_v16, 16  ;;  %v10354_v16 = vld [vmem:[%s12123_s26 + $0x10] ss:$8 sps:$4 sm:$0xff]  }
 0x17e   : > { %5636 = vmatpush1.bf16.msra.mxu0 %v10258_v18  ;;  %v12368_v18 = vcombine.low %v12303_v33, %v12306_v34  ;;  %v10317_v33 = vld [vmem:[%s12123_s26 + $0x784] ss:$8 sps:$4 sm:$0xff]   ;;  %v10312_v34 = vld [vmem:[%s12123_s26 + $0x680] ss:$8 sps:$4 sm:$0xff]  }
 0x17f   : > { %5687 = vmatpush1.bf16.msra.mxu1 %v10261_v19  ;;  %5637 = vmatprep.subr.bf16.mxu0 %v10266_v20  ;;  %v4796_v19 = vshll.u32 %v12352_v11, 16  ;;  %v4820_v20 = vshll.u32 %v12356_v12, 16  ;;  %v4803_v37 = vrot.slane %v4801_v26, 1  ;;  %v10374_v26 = vld [vmem:[%s12123_s26 + $0xe4] ss:$8 sps:$4 sm:$0xff]  }
 0x180   : > { %5688 = vmatprep.subr.bf16.mxu1 %v10269_v21  ;;  %v10311_v21 = vld [vmem:[%s12123_s26 + $0x794] ss:$8 sps:$4 sm:$0xff]   ;;  %v4825_v31 = vshll.u32 %v12368_v18, 16 }
 0x181   : > { %v4822_v30 = vrot.slane %v4820_v20, 1  ;;  %v4855_v52 = vor.u32 %v4853_v57, %v4803_v37  ;;  %v10360_v20 = vld [vmem:[%s12123_s26] ss:$8 sps:$4 sm:$0xff]  }
 0x182   : > { %5638 = vmatpush1.bf16.msra.mxu0 %v10264_v22  ;;  %v10306_v22 = vld [vmem:[%s12123_s26 + $0x690] ss:$8 sps:$4 sm:$0xff]   ;;  %v4827_v40 = vrot.slane %v4825_v31, 1  ;;  %v10380_v31 = vld [vmem:[%s12123_s26 + $0xd4] ss:$8 sps:$4 sm:$0xff]  }
 0x183   : > { %5689 = vmatpush1.bf16.msra.mxu1 %v10267_v23  ;;  %5639 = vmatprep.subr.bf16.mxu0 %v10272_v27  ;;  %v10309_v23 = vld [vmem:[%s12123_s26 + $0x790] ss:$8 sps:$4 sm:$0xff]   ;;  %v4798_v27 = vrot.slane %v4796_v19, 1  ;;  %v10365_v19 = vld [vmem:[%s12123_s26 + $0x104] ss:$8 sps:$4 sm:$0xff]  }
 0x184   : > { %5690 = vmatprep.subr.bf16.mxu1 %v10275_v35  ;;  %v10315_v35 = vld [vmem:[%s12123_s26 + $0x780] ss:$8 sps:$4 sm:$0xff]  }
 0x185   : > { %v4799_v36 = vor.u32 %v4798_v27, %v4794_v25  ;;  %v10369_v25 = vld [vmem:[%s12123_s26 + $0x1f0] ss:$8 sps:$4 sm:$0xff]   ;;  %v10377_v27 = vld [vmem:[%s12123_s26 + $0x1e4] ss:$8 sps:$4 sm:$0xff]   ;;  %v10408_v57 = vld [vmem:[%s12123_s26 + $0x80] ss:$8 sps:$4 sm:$0xff]  }
 0x186   : > { %5640 = vmatpush2.bf16.msra.mxu0 %v10270_v39  ;;  %v4823_v39 = vor.u32 %v4822_v30, %v4818_v28  ;;  %v10372_v28 = vld [vmem:[%s12123_s26 + $0xe0] ss:$8 sps:$4 sm:$0xff]  }
 0x187   : > { %5691 = vmatpush2.bf16.msra.mxu1 %v10273_v42  ;;  %5641 = vmatprep.subr.bf16.mxu0 %v10278_v46  ;;  %v10320_v42 = vld [vmem:[%s12123_s26 + $0x74] ss:$8 sps:$4 sm:$0xff]   ;;  %v10318_v46 = vld [vmem:[%s12123_s26 + $0x70] ss:$8 sps:$4 sm:$0xff]   ;;  %v4804_v49 = vsel %vm4744_vm0, %v4799_v36, %v4803_v37  ;;  %v10375_v30 = vld [vmem:[%s12123_s26 + $0x1e0] ss:$8 sps:$4 sm:$0xff]  }
 0x188   : > { %5692 = vmatprep.subr.bf16.mxu1 %v10281_v47  ;;  %v10321_v47 = vld [vmem:[%s12123_s26 + $0x170] ss:$8 sps:$4 sm:$0xff]   ;;  %v4828_v50 = vsel %vm4744_vm0, %v4823_v39, %v4827_v40  ;;  %v10386_v36 = vld [vmem:[%s12123_s26 + $0xc4] ss:$8 sps:$4 sm:$0xff]   ;;  %v10384_v39 = vld [vmem:[%s12123_s26 + $0xc0] ss:$8 sps:$4 sm:$0xff]  }
 0x189   : > { %v10389_v37 = vld [vmem:[%s12123_s26 + $0x1c4] ss:$8 sps:$4 sm:$0xff]  }
 0x18a   : > { %5642 = vmatpush2.bf16.msra.mxu0 %v10276_v53  ;;  %v10329_v53 = vld [vmem:[%s12123_s26 + $0x164] ss:$8 sps:$4 sm:$0xff]  }
 0x18b   : > { %5693 = vmatpush2.bf16.msra.mxu1 %v10279_v55  ;;  %5643 = vmatprep.subr.bf16.mxu0 %v10284_v58  ;;  %v10324_v55 = vld [vmem:[%s12123_s26 + $0x60] ss:$8 sps:$4 sm:$0xff]   ;;  %v4859_v58 = vshrl.u32 %v12368_v18, 16  ;;  %v10362_v18 = vld [vmem:[%s12123_s26 + $0x4] ss:$8 sps:$4 sm:$0xff]  }
 0x18c   : > { %5694 = vmatprep.subr.bf16.mxu1 %v10287_v59  ;;  %v10332_v59 = vld [vmem:[%s12123_s26 + $0x54] ss:$8 sps:$4 sm:$0xff]  }
 0x18e   : > { %5644 = vmatpush2.bf16.msra.mxu0 %v10282_v62  ;;  %v10333_v62 = vld [vmem:[%s12123_s26 + $0x150] ss:$8 sps:$4 sm:$0xff]  }
 0x18f   : > { %5695 = vmatpush2.bf16.msra.mxu1 %v10285_v63  ;;  %5645 = vmatprep.subr.bf16.mxu0 %v10290_v0  ;;  %v4861_v63 = vor.u32 %v4859_v58, %v4827_v40  ;;  %v10338_v0 = vld [vmem:[%s12123_s26 + $0x44] ss:$8 sps:$4 sm:$0xff]   ;;  %v10387_v40 = vld [vmem:[%s12123_s26 + $0x1c0] ss:$8 sps:$4 sm:$0xff]  }
 0x190   : > { %5696 = vmatprep.subr.bf16.mxu1 %v10293_v1  ;;  %v10341_v1 = vld [vmem:[%s12123_s26 + $0x144] ss:$8 sps:$4 sm:$0xff]   ;;  %v10411_v58 = vld [vmem:[%s12123_s26 + $0x180] ss:$8 sps:$4 sm:$0xff]  }
 0x192   : > { %5646 = vmatpush2.bf16.msra.mxu0 %v10288_v2  ;;  %v10336_v2 = vld [vmem:[%s12123_s26 + $0x40] ss:$8 sps:$4 sm:$0xff]  }
 0x193   : > { %5697 = vmatpush2.bf16.msra.mxu1 %v10291_v3  ;;  %5647 = vmatprep.subr.bf16.mxu0 %v10296_v4  ;;  %v10339_v3 = vld [vmem:[%s12123_s26 + $0x140] ss:$8 sps:$4 sm:$0xff]   ;;  %v10344_v4 = vld [vmem:[%s12123_s26 + $0x34] ss:$8 sps:$4 sm:$0xff]  }
 0x194   : > { %5698 = vmatprep.subr.bf16.mxu1 %v10299_v6  ;;  %v10347_v6 = vld [vmem:[%s12123_s26 + $0x134] ss:$8 sps:$4 sm:$0xff]  }
 0x196   : > { %5648 = vmatpush2.bf16.msra.mxu0 %v10294_v7  ;;  %v10342_v7 = vld [vmem:[%s12123_s26 + $0x30] ss:$8 sps:$4 sm:$0xff]  }
 0x197   : > { %5699 = vmatpush2.bf16.msra.mxu1 %v10297_v8  ;;  %5649 = vmatprep.subr.bf16.mxu0 %v10302_v10  ;;  %v10345_v8 = vld [vmem:[%s12123_s26 + $0x130] ss:$8 sps:$4 sm:$0xff]   ;;  %v10350_v10 = vld [vmem:[%s12123_s26 + $0x24] ss:$8 sps:$4 sm:$0xff]  }
 0x198   : > { %5700 = vmatprep.subr.bf16.mxu1 %v10305_v13  ;;  %v10353_v13 = vld [vmem:[%s12123_s26 + $0x124] ss:$8 sps:$4 sm:$0xff]  }
 0x19a   : > { %5650 = vmatpush2.bf16.msra.mxu0 %v10300_v14  ;;  %v10348_v14 = vld [vmem:[%s12123_s26 + $0x20] ss:$8 sps:$4 sm:$0xff]  }
 0x19b   : > { %5701 = vmatpush2.bf16.msra.mxu1 %v10303_v15  ;;  %5651 = vmatprep.subr.bf16.mxu0 %v10308_v17  ;;  %v10359_v15 = vld [vmem:[%s12123_s26 + $0x114] ss:$8 sps:$4 sm:$0xff]   ;;  %v10357_v17 = vld [vmem:[%s12123_s26 + $0x110] ss:$8 sps:$4 sm:$0xff]  }
 0x19c   : > { %5702 = vmatprep.subr.bf16.mxu1 %v10311_v21  ;;  %v10363_v21 = vld [vmem:[%s12123_s26 + $0x100] ss:$8 sps:$4 sm:$0xff]  }
 0x19e   : > { %5652 = vmatpush2.bf16.msra.mxu0 %v10306_v22  ;;  %v10368_v22 = vld [vmem:[%s12123_s26 + $0xf4] ss:$8 sps:$4 sm:$0xff]  }
 0x19f   : > { %5703 = vmatpush2.bf16.msra.mxu1 %v10309_v23  ;;  %5653 = vmatprep.subr.bf16.mxu0 %v10314_v24  ;;  %v10371_v23 = vld [vmem:[%s12123_s26 + $0x1f4] ss:$8 sps:$4 sm:$0xff]   ;;  %v10366_v24 = vld [vmem:[%s12123_s26 + $0xf0] ss:$8 sps:$4 sm:$0xff]  }
 0x1a0   : > { %5704 = vmatprep.subr.bf16.mxu1 %v10317_v33  ;;  %v10383_v33 = vld [vmem:[%s12123_s26 + $0x1d4] ss:$8 sps:$4 sm:$0xff]  }
 0x1a2   : > { %5654 = vmatpush2.bf16.msra.mxu0 %v10312_v34  ;;  %v10378_v34 = vld [vmem:[%s12123_s26 + $0xd0] ss:$8 sps:$4 sm:$0xff]  }
 0x1a3   : > { %5705 = vmatpush2.bf16.msra.mxu1 %v10315_v35  ;;  %6433 = vmatprep.subr.bf16.mxu0 %v10320_v42  ;;  %v10381_v35 = vld [vmem:[%s12123_s26 + $0x1d0] ss:$8 sps:$4 sm:$0xff]   ;;  %v10392_v42 = vld [vmem:[%s12123_s26 + $0xb4] ss:$8 sps:$4 sm:$0xff]  }
 0x1a4   : > { %6484 = vmatprep.subr.bf16.mxu1 %v10323_v43  ;;  %v10395_v43 = vld [vmem:[%s12123_s26 + $0x1b4] ss:$8 sps:$4 sm:$0xff]  }
 0x1a5   : > { %5656 = vmatmul.mubr.bf16.vlgmr.msra.gmra.mxu0 %v4804_v49  ;;  %v10396_v49 = vld [vmem:[%s12123_s26 + $0xa0] ss:$8 sps:$4 sm:$0xff]  }
 0x1a6   : > { %5707 = vmatmul.mubr.bf16.vlgmr.msra.gmra.mxu1 %v4828_v50  ;;  %6434 = vmatpush1.bf16.msra.mxu0 %v10318_v46  ;;  %v10398_v46 = vld [vmem:[%s12123_s26 + $0xa4] ss:$8 sps:$4 sm:$0xff]   ;;  %v10399_v50 = vld [vmem:[%s12123_s26 + $0x1a0] ss:$8 sps:$4 sm:$0xff]  }
 0x1a7   : > { %6485 = vmatpush1.bf16.msra.mxu1 %v10321_v47  ;;  %6435 = vmatprep.subr.bf16.mxu0 %v10326_v51  ;;  %v10401_v47 = vld [vmem:[%s12123_s26 + $0x1a4] ss:$8 sps:$4 sm:$0xff]   ;;  %v10404_v51 = vld [vmem:[%s12123_s26 + $0x94] ss:$8 sps:$4 sm:$0xff]  }
 0x1a8   : > { %6486 = vmatprep.subr.bf16.mxu1 %v10329_v53  ;;  %5665 = vmatprep.mubr.bf16.mxu0 %v4858_v32  ;;  %v10407_v53 = vld [vmem:[%s12123_s26 + $0x194] ss:$8 sps:$4 sm:$0xff]   ;;  %v10405_v32 = vld [vmem:[%s12123_s26 + $0x190] ss:$8 sps:$4 sm:$0xff]  }
 0x1a9   : > { %5716 = vmatprep.mubr.bf16.mxu1 %v4864_v41  ;;  %v10410_v41 = vld [vmem:[%s12123_s26 + $0x84] ss:$8 sps:$4 sm:$0xff]  }
 0x1aa   : > { %6436 = vmatpush1.bf16.msra.mxu0 %v10324_v55  ;;  %v10402_v55 = vld [vmem:[%s12123_s26 + $0x90] ss:$8 sps:$4 sm:$0xff]  }
 0x1ab   : > { %6487 = vmatpush1.bf16.msra.mxu1 %v10327_v56  ;;  %6437 = vmatprep.subr.bf16.mxu0 %v10332_v59  ;;  %v10413_v56 = vld [vmem:[%s12123_s26 + $0x184] ss:$8 sps:$4 sm:$0xff]   ;;  %v10416_v59 = vld [vmem:[%s12123_s26 + $0x274] ss:$8 sps:$4 sm:$0xff]  }
 0x1ac   : > { %6488 = vmatprep.subr.bf16.mxu1 %v10335_v48  ;;  %v10419_v48 = vld [vmem:[%s12123_s26 + $0x374] ss:$8 sps:$4 sm:$0xff]  }
 0x1ad   : > { %5666 = vmatmul.mubr.bf16.gmra.mxu0 %v4855_v52  ;;  %v4403_v52 = vld [vmem:[%s12173_s6 + $0x40] sm:$0xff] }
 0x1ae   : > { %5717 = vmatmul.mubr.bf16.gmra.mxu1 %v4861_v63  ;;  %6438 = vmatpush1.bf16.msra.mxu0 %v10330_v61  ;;  %v4404_v61 = vld [vmem:[%s12173_s6 + $0x48] sm:$0xff]  ;;  %v10417_v63 = vld [vmem:[%s12123_s26 + $0x370] ss:$8 sps:$4 sm:$0xff]  }
 0x1af   : > { %6489 = vmatpush1.bf16.msra.mxu1 %v10333_v62  ;;  %6439 = vmatprep.subr.bf16.mxu0 %v10338_v0  ;;  %v10414_v62 = vld [vmem:[%s12123_s26 + $0x270] ss:$8 sps:$4 sm:$0xff]   ;;  %v10422_v0 = vld [vmem:[%s12123_s26 + $0x264] ss:$8 sps:$4 sm:$0xff]  }
 0x1b0   : > { %6490 = vmatprep.subr.bf16.mxu1 %v10341_v1  ;;  %6465 = vmatprep.mubr.bf16.mxu0 %v12185_v54  ;;  %v10351_v54 = vld [vmem:[%s12123_s26 + $0x120] ss:$8 sps:$4 sm:$0xff]   ;;  %v10425_v1 = vld [vmem:[%s12123_s26 + $0x364] ss:$8 sps:$4 sm:$0xff]  }
 0x1b1   : > { %6516 = vmatprep.mubr.bf16.mxu1 %v12193_v60  ;;  %v10356_v60 = vld [vmem:[%s12123_s26 + $0x14] ss:$8 sps:$4 sm:$0xff]  }
 0x1b2   : > { %6440 = vmatpush1.bf16.msra.mxu0 %v10336_v2  ;;  %v9368_v2 = vcombine.high %v4403_v52, %v4403_v52 }
 0x1b3   : > { %6491 = vmatpush1.bf16.msra.mxu1 %v10339_v3  ;;  %6441 = vmatprep.subr.bf16.mxu0 %v10344_v4  ;;  %v9370_v3 = vcombine.high %v4404_v61, %v4404_v61  ;;  %v10420_v4 = vld [vmem:[%s12123_s26 + $0x260] ss:$8 sps:$4 sm:$0xff]  }
 0x1b4   : > { %6492 = vmatprep.subr.bf16.mxu1 %v10347_v6  ;;  %v10423_v6 = vld [vmem:[%s12123_s26 + $0x360] ss:$8 sps:$4 sm:$0xff]  }
 0x1b6   : > { %6442 = vmatpush1.bf16.msra.mxu0 %v10342_v7  ;;  %v10430_v7 = vld [vmem:[%s12123_s26 + $0x254] ss:$8 sps:$4 sm:$0xff]  }
 0x1b7   : > { %6493 = vmatpush1.bf16.msra.mxu1 %v10345_v8  ;;  %6443 = vmatprep.subr.bf16.mxu0 %v10350_v10  ;;  %v10433_v8 = vld [vmem:[%s12123_s26 + $0x354] ss:$8 sps:$4 sm:$0xff]   ;;  %v9367_v10 = vcombine.low %v4403_v52, %v4403_v52  ;;  %v10502_v52 = vld [vmem:[%s12123_s26 + $0x290] ss:$8 sps:$4 sm:$0xff]  }
 0x1b8   : > { %6494 = vmatprep.subr.bf16.mxu1 %v10353_v13  ;;  %v10431_v13 = vld [vmem:[%s12123_s26 + $0x350] ss:$8 sps:$4 sm:$0xff]  }
 0x1ba   : > { %6444 = vmatpush1.bf16.msra.mxu0 %v10348_v14  ;;  %v10438_v14 = vld [vmem:[%s12123_s26 + $0x244] ss:$8 sps:$4 sm:$0xff]  }
 0x1bb   : > { %6495 = vmatpush1.bf16.msra.mxu1 %v10351_v54  ;;  %6445 = vmatprep.subr.bf16.mxu0 %v10356_v60  ;;  %v10441_v54 = vld [vmem:[%s12123_s26 + $0x344] ss:$8 sps:$4 sm:$0xff]   ;;  %v10436_v60 = vld [vmem:[%s12123_s26 + $0x240] ss:$8 sps:$4 sm:$0xff]  }
 0x1bc   : > { %6496 = vmatprep.subr.bf16.mxu1 %v10359_v15  ;;  %v10439_v15 = vld [vmem:[%s12123_s26 + $0x340] ss:$8 sps:$4 sm:$0xff]  }
 0x1be   : > { %6446 = vmatpush1.bf16.msra.mxu0 %v10354_v16  ;;  %v10444_v16 = vld [vmem:[%s12123_s26 + $0x234] ss:$8 sps:$4 sm:$0xff]  }
 0x1bf   : > { %6497 = vmatpush1.bf16.msra.mxu1 %v10357_v17  ;;  %6447 = vmatprep.subr.bf16.mxu0 %v10362_v18  ;;  %v10447_v17 = vld [vmem:[%s12123_s26 + $0x334] ss:$8 sps:$4 sm:$0xff]   ;;  %v10442_v18 = vld [vmem:[%s12123_s26 + $0x230] ss:$8 sps:$4 sm:$0xff]  }
 0x1c0   : > { %6498 = vmatprep.subr.bf16.mxu1 %v10365_v19  ;;  %v10445_v19 = vld [vmem:[%s12123_s26 + $0x330] ss:$8 sps:$4 sm:$0xff]  }
 0x1c2   : > { %6448 = vmatpush1.bf16.msra.mxu0 %v10360_v20  ;;  %v10450_v20 = vld [vmem:[%s12123_s26 + $0x224] ss:$8 sps:$4 sm:$0xff]  }
 0x1c3   : > { %6499 = vmatpush1.bf16.msra.mxu1 %v10363_v21  ;;  %6449 = vmatprep.subr.bf16.mxu0 %v10368_v22  ;;  %v10453_v21 = vld [vmem:[%s12123_s26 + $0x324] ss:$8 sps:$4 sm:$0xff]   ;;  %v10448_v22 = vld [vmem:[%s12123_s26 + $0x220] ss:$8 sps:$4 sm:$0xff]  }
 0x1c4   : > { %6500 = vmatprep.subr.bf16.mxu1 %v10371_v23  ;;  %v10459_v23 = vld [vmem:[%s12123_s26 + $0x314] ss:$8 sps:$4 sm:$0xff]  }
 0x1c6   : > { %6450 = vmatpush2.bf16.msra.mxu0 %v10366_v24  ;;  %v10454_v24 = vld [vmem:[%s12123_s26 + $0x210] ss:$8 sps:$4 sm:$0xff]  }
 0x1c7   : > { %6501 = vmatpush2.bf16.msra.mxu1 %v10369_v25  ;;  %6451 = vmatprep.subr.bf16.mxu0 %v10374_v26  ;;  %v10457_v25 = vld [vmem:[%s12123_s26 + $0x310] ss:$8 sps:$4 sm:$0xff]   ;;  %v10462_v26 = vld [vmem:[%s12123_s26 + $0x204] ss:$8 sps:$4 sm:$0xff]  }
 0x1c8   : > { %6502 = vmatprep.subr.bf16.mxu1 %v10377_v27  ;;  %v10465_v27 = vld [vmem:[%s12123_s26 + $0x304] ss:$8 sps:$4 sm:$0xff]  }
 0x1ca   : > { %6452 = vmatpush2.bf16.msra.mxu0 %v10372_v28  ;;  %v10460_v28 = vld [vmem:[%s12123_s26 + $0x200] ss:$8 sps:$4 sm:$0xff]  }
 0x1cb   : > { %6503 = vmatpush2.bf16.msra.mxu1 %v10375_v30  ;;  %6453 = vmatprep.subr.bf16.mxu0 %v10380_v31  ;;  %v10463_v30 = vld [vmem:[%s12123_s26 + $0x300] ss:$8 sps:$4 sm:$0xff]   ;;  %v10468_v31 = vld [vmem:[%s12123_s26 + $0x2f4] ss:$8 sps:$4 sm:$0xff]  }
 0x1cc   : > { %6504 = vmatprep.subr.bf16.mxu1 %v10383_v33  ;;  %v10471_v33 = vld [vmem:[%s12123_s26 + $0x3f4] ss:$8 sps:$4 sm:$0xff]  }
 0x1ce   : > { %6454 = vmatpush2.bf16.msra.mxu0 %v10378_v34  ;;  %v10466_v34 = vld [vmem:[%s12123_s26 + $0x2f0] ss:$8 sps:$4 sm:$0xff]  }
 0x1cf   : > { %6505 = vmatpush2.bf16.msra.mxu1 %v10381_v35  ;;  %6455 = vmatprep.subr.bf16.mxu0 %v10386_v36  ;;  %v10469_v35 = vld [vmem:[%s12123_s26 + $0x3f0] ss:$8 sps:$4 sm:$0xff]   ;;  %v10474_v36 = vld [vmem:[%s12123_s26 + $0x2e4] ss:$8 sps:$4 sm:$0xff]  }
 0x1d0   : > { %6506 = vmatprep.subr.bf16.mxu1 %v10389_v37  ;;  %v10477_v37 = vld [vmem:[%s12123_s26 + $0x3e4] ss:$8 sps:$4 sm:$0xff]  }
 0x1d2   : > { %6456 = vmatpush2.bf16.msra.mxu0 %v10384_v39  ;;  %v10472_v39 = vld [vmem:[%s12123_s26 + $0x2e0] ss:$8 sps:$4 sm:$0xff]  }
 0x1d3   : > { %6507 = vmatpush2.bf16.msra.mxu1 %v10387_v40  ;;  %6457 = vmatprep.subr.bf16.mxu0 %v10392_v42  ;;  %v10475_v40 = vld [vmem:[%s12123_s26 + $0x3e0] ss:$8 sps:$4 sm:$0xff]   ;;  %v10480_v42 = vld [vmem:[%s12123_s26 + $0x2d4] ss:$8 sps:$4 sm:$0xff]  }
 0x1d4   : > { %6508 = vmatprep.subr.bf16.mxu1 %v10395_v43  ;;  %v10483_v43 = vld [vmem:[%s12123_s26 + $0x3d4] ss:$8 sps:$4 sm:$0xff]  }
 0x1d6   : > { %6458 = vmatpush2.bf16.msra.mxu0 %v10390_v44  ;;  %v10478_v44 = vld [vmem:[%s12123_s26 + $0x2d0] ss:$8 sps:$4 sm:$0xff]  }
 0x1d7   : > { %6509 = vmatpush2.bf16.msra.mxu1 %v10393_v45  ;;  %6459 = vmatprep.subr.bf16.mxu0 %v10398_v46  ;;  %v10481_v45 = vld [vmem:[%s12123_s26 + $0x3d0] ss:$8 sps:$4 sm:$0xff]   ;;  %v10486_v46 = vld [vmem:[%s12123_s26 + $0x2c4] ss:$8 sps:$4 sm:$0xff]  }
 0x1d8   : > { %6510 = vmatprep.subr.bf16.mxu1 %v10401_v47  ;;  %v10489_v47 = vld [vmem:[%s12123_s26 + $0x3c4] ss:$8 sps:$4 sm:$0xff]  }
 0x1da   : > { %6460 = vmatpush2.bf16.msra.mxu0 %v10396_v49  ;;  %v10484_v49 = vld [vmem:[%s12123_s26 + $0x2c0] ss:$8 sps:$4 sm:$0xff]  }
 0x1db   : > { %6511 = vmatpush2.bf16.msra.mxu1 %v10399_v50  ;;  %6461 = vmatprep.subr.bf16.mxu0 %v10404_v51  ;;  %v10487_v50 = vld [vmem:[%s12123_s26 + $0x3c0] ss:$8 sps:$4 sm:$0xff]   ;;  %v10492_v51 = vld [vmem:[%s12123_s26 + $0x2b4] ss:$8 sps:$4 sm:$0xff]  }
 0x1dc   : > { %6512 = vmatprep.subr.bf16.mxu1 %v10407_v53  ;;  %v10495_v53 = vld [vmem:[%s12123_s26 + $0x3b4] ss:$8 sps:$4 sm:$0xff]  }
 0x1de   : > { %6462 = vmatpush2.bf16.msra.mxu0 %v10402_v55  ;;  %v10490_v55 = vld [vmem:[%s12123_s26 + $0x2b0] ss:$8 sps:$4 sm:$0xff]  }
 0x1df   : > { %6513 = vmatpush2.bf16.msra.mxu1 %v10405_v32  ;;  %6463 = vmatprep.subr.bf16.mxu0 %v10410_v41  ;;  %v10493_v32 = vld [vmem:[%s12123_s26 + $0x3b0] ss:$8 sps:$4 sm:$0xff]   ;;  %v10498_v41 = vld [vmem:[%s12123_s26 + $0x2a4] ss:$8 sps:$4 sm:$0xff]  }
 0x1e0   : > { %6514 = vmatprep.subr.bf16.mxu1 %v10413_v56  ;;  %v10501_v56 = vld [vmem:[%s12123_s26 + $0x3a4] ss:$8 sps:$4 sm:$0xff]  }
 0x1e2   : > { %6464 = vmatpush2.bf16.msra.mxu0 %v10408_v57  ;;  %v10496_v57 = vld [vmem:[%s12123_s26 + $0x2a0] ss:$8 sps:$4 sm:$0xff]  }
 0x1e3   : > { %6515 = vmatpush2.bf16.msra.mxu1 %v10411_v58  ;;  %6535 = vmatprep.subr.bf16.mxu0 %v10416_v59  ;;  %v10499_v58 = vld [vmem:[%s12123_s26 + $0x3a0] ss:$8 sps:$4 sm:$0xff]   ;;  %v10504_v59 = vld [vmem:[%s12123_s26 + $0x294] ss:$8 sps:$4 sm:$0xff]  }
 0x1e4   : > { %6586 = vmatprep.subr.bf16.mxu1 %v10419_v48  ;;  %v10507_v48 = vld [vmem:[%s12123_s26 + $0x394] ss:$8 sps:$4 sm:$0xff]  }
 0x1e5   : > { %6466 = vmatmul.mubr.bf16.vlgmr.msra.gmra.mxu0 %v12204_v5  ;;  %v9369_v5 = vcombine.low %v4404_v61, %v4404_v61  ;;  %v10505_v61 = vld [vmem:[%s12123_s26 + $0x390] ss:$8 sps:$4 sm:$0xff]  }
 0x1e6   : > { %6517 = vmatmul.mubr.bf16.vlgmr.msra.gmra.mxu1 %v12209_v9  ;;  %6536 = vmatpush1.bf16.msra.mxu0 %v10414_v62  ;;  %v10428_v9 = vld [vmem:[%s12123_s26 + $0x250] ss:$8 sps:$4 sm:$0xff]   ;;  %v12524_v62 = vld [vmem:[%s12173_s6] sm:$0xcc] }
 0x1e7   : > { %6587 = vmatpush1.bf16.msra.mxu1 %v10417_v63  ;;  %6537 = vmatprep.subr.bf16.mxu0 %v10422_v0  ;;  %v10510_v63 = vld [vmem:[%s12123_s26 + $0x284] ss:$8 sps:$4 sm:$0xff]  }
 0x1e8   : > { %6588 = vmatprep.subr.bf16.mxu1 %v10425_v1  ;;  %6475 = vmatprep.mubr.bf16.mxu0 %v9368_v2  ;;  %v12528_v0 = vld [vmem:[%s12173_s6 + $0x60] sm:$0x77]  ;;  %v12531_v1 = vld [vmem:[%s12173_s6 + $0x8] sm:$0xcc] }
 0x1e9   : > { %6526 = vmatprep.mubr.bf16.mxu1 %v9370_v3  ;;  %v12534_v2 = vld [vmem:[%s12173_s6 + $0x68] sm:$0x77] }
 0x1ea   : > { %6538 = vmatpush1.bf16.msra.mxu0 %v10420_v4  ;;  %v10513_v3 = vld [vmem:[%s12123_s26 + $0x384] ss:$8 sps:$4 sm:$0xff]  }
 0x1eb   : > { %6589 = vmatpush1.bf16.msra.mxu1 %v10423_v6  ;;  %6539 = vmatprep.subr.bf16.mxu0 %v10430_v7  ;;  %v12538_v4 = vld [vmem:[%s12173_s6 + $0x20] sm:$0xff] }
 0x1ec   : > { %6590 = vmatprep.subr.bf16.mxu1 %v10433_v8  ;;  %v9632_v6 = vcombine.high %v12524_v62, %v12538_v4  ;;  %v12543_v7 = vld [vmem:[%s12173_s6 + $0x40] sm:$0xff] }
 0x1ed   : > { %6476 = vmatmul.mubr.bf16.gmra.mxu0 %v9367_v10  ;;  %v12547_v8 = vcombine.high %v12543_v7, %v12528_v0  ;;  %v10508_v10 = vld [vmem:[%s12123_s26 + $0x280] ss:$8 sps:$4 sm:$0xff]  }
 0x1ee   : > { %6527 = vmatmul.mubr.bf16.gmra.mxu1 %v9369_v5  ;;  %6540 = vmatpush1.bf16.msra.mxu0 %v10428_v9  ;;  %v10511_v5 = vld [vmem:[%s12123_s26 + $0x380] ss:$8 sps:$4 sm:$0xff]  }
 0x1ef   : > { %6591 = vmatpush1.bf16.msra.mxu1 %v10431_v13  ;;  %6541 = vmatprep.subr.bf16.mxu0 %v10438_v14  ;;  %v12552_v9 = vld [vmem:[%s12173_s6 + $0x28] sm:$0xff] }
 0x1f0   : > { %6592 = vmatprep.subr.bf16.mxu1 %v10441_v54  ;;  %6567 = vmatprep.mubr.bf16.mxu0 %v12290_v29  ;;  %v10451_v29 = vld [vmem:[%s12123_s26 + $0x320] ss:$8 sps:$4 sm:$0xff]   ;;  %v9634_v13 = vcombine.high %v12531_v1, %v12552_v9 }
 0x1f1   : > { %6618 = vmatprep.mubr.bf16.mxu1 %v12313_v38  ;;  %v10456_v38 = vld [vmem:[%s12123_s26 + $0x214] ss:$8 sps:$4 sm:$0xff]   ;;  %v12557_v14 = vld [vmem:[%s12173_s6 + $0x48] sm:$0xff] }
 0x1f2   : > { %6542 = vmatpush1.bf16.msra.mxu0 %v10436_v60  ;;  %v12561_v54 = vcombine.high %v12557_v14, %v12534_v2  ;;  %v10516_v60 = vld [vmem:[%s12123_s26 + $0x874] ss:$8 sps:$4 sm:$0xff]  }
 0x1f3   : > { %6593 = vmatpush1.bf16.msra.mxu1 %v10439_v15  ;;  %6543 = vmatprep.subr.bf16.mxu0 %v10444_v16  ;;  %v10519_v15 = vld [vmem:[%s12123_s26 + $0x974] ss:$8 sps:$4 sm:$0xff]   ;;  %v10514_v16 = vld [vmem:[%s12123_s26 + $0x870] ss:$8 sps:$4 sm:$0xff]  }
 0x1f4   : > { %6594 = vmatprep.subr.bf16.mxu1 %v10447_v17  ;;  %v10517_v17 = vld [vmem:[%s12123_s26 + $0x970] ss:$8 sps:$4 sm:$0xff]  }
 0x1f6   : > { %6544 = vmatpush1.bf16.msra.mxu0 %v10442_v18  ;;  %v6833_v18 = vshrl.u32 %v9632_v6, 16 }
 0x1f7   : > { %6595 = vmatpush1.bf16.msra.mxu1 %v10445_v19  ;;  %6545 = vmatprep.subr.bf16.mxu0 %v10450_v20  ;;  %v6836_v19 = vshll.u32 %v9632_v6, 16  ;;  %v6841_v20 = vshrl.u32 %v12547_v8, 16  ;;  %v10541_v6 = vld [vmem:[%s12123_s26 + $0x944] ss:$8 sps:$4 sm:$0xff]  }
 0x1f8   : > { %6596 = vmatprep.subr.bf16.mxu1 %v10453_v21  ;;  %v6844_v21 = vshll.u32 %v12547_v8, 16 }
 0x1fa   : > { %6546 = vmatpush1.bf16.msra.mxu0 %v10448_v22  ;;  %v6867_v22 = vshrl.u32 %v9634_v13, 16 }
 0x1fb   : > { %6597 = vmatpush1.bf16.msra.mxu1 %v10451_v29  ;;  %6547 = vmatprep.subr.bf16.mxu0 %v10456_v38  ;;  %v6870_v29 = vshll.u32 %v9634_v13, 16  ;;  %v6875_v38 = vshrl.u32 %v12561_v54, 16  ;;  %v10539_v13 = vld [vmem:[%s12123_s26 + $0x940] ss:$8 sps:$4 sm:$0xff]  }
 0x1fc   : > { %6598 = vmatprep.subr.bf16.mxu1 %v10459_v23  ;;  %v6878_v23 = vshll.u32 %v12561_v54, 16 }
 0x1fe   : > { %6548 = vmatpush1.bf16.msra.mxu0 %v10454_v24  ;;  %v10522_v24 = vld [vmem:[%s12123_s26 + $0x864] ss:$8 sps:$4 sm:$0xff]  }
 0x1ff   : > { %6599 = vmatpush1.bf16.msra.mxu1 %v10457_v25  ;;  %6549 = vmatprep.subr.bf16.mxu0 %v10462_v26  ;;  %v10525_v25 = vld [vmem:[%s12123_s26 + $0x964] ss:$8 sps:$4 sm:$0xff]   ;;  %v12574_v26 = vld [vmem:[%s12173_s6 + $0x50] sm:$0xff] }
 0x200   : > { %6600 = vmatprep.subr.bf16.mxu1 %v10465_v27  ;;  %v9372_v27 = vcombine.high %v12574_v26, %v12574_v26 }
 0x202   : > { %6550 = vmatpush1.bf16.msra.mxu0 %v10460_v28  ;;  %v12579_v28 = vld [vmem:[%s12173_s6 + $0x58] sm:$0xff] }
 0x203   : > { %6601 = vmatpush1.bf16.msra.mxu1 %v10463_v30  ;;  %6551 = vmatprep.subr.bf16.mxu0 %v10468_v31  ;;  %v9374_v30 = vcombine.high %v12579_v28, %v12579_v28  ;;  %v10520_v31 = vld [vmem:[%s12123_s26 + $0x860] ss:$8 sps:$4 sm:$0xff]  }
 0x204   : > { %6602 = vmatprep.subr.bf16.mxu1 %v10471_v33  ;;  %v10523_v33 = vld [vmem:[%s12123_s26 + $0x960] ss:$8 sps:$4 sm:$0xff]  }
 0x206   : > { %6552 = vmatpush2.bf16.msra.mxu0 %v10466_v34  ;;  %v6835_v34 = vrot.slane %v6833_v18, 2  ;;  %v10544_v18 = vld [vmem:[%s12123_s26 + $0x834] ss:$8 sps:$4 sm:$0xff]  }
 0x207   : > { %6603 = vmatpush2.bf16.msra.mxu1 %v10469_v35  ;;  %6553 = vmatprep.subr.bf16.mxu0 %v10474_v36  ;;  %v6838_v35 = vrot.slane %v6836_v19, 3  ;;  %v6843_v36 = vrot.slane %v6841_v20, 2  ;;  %v10547_v20 = vld [vmem:[%s12123_s26 + $0x934] ss:$8 sps:$4 sm:$0xff]  }
 0x208   : > { %6604 = vmatprep.subr.bf16.mxu1 %v10477_v37  ;;  %v6846_v37 = vrot.slane %v6844_v21, 3 }
 0x20a   : > { %6554 = vmatpush2.bf16.msra.mxu0 %v10472_v39 }
 0x20b   : > { %6605 = vmatpush2.bf16.msra.mxu1 %v10475_v40  ;;  %6555 = vmatprep.subr.bf16.mxu0 %v10480_v42  ;;  %v6869_v42 = vrot.slane %v6867_v22, 2 }
 0x20c   : > { %6606 = vmatprep.subr.bf16.mxu1 %v10483_v43  ;;  %v6872_v43 = vrot.slane %v6870_v29, 3 }
 0x20e   : > { %6556 = vmatpush2.bf16.msra.mxu0 %v10478_v44  ;;  %v6877_v44 = vrot.slane %v6875_v38, 2  ;;  %v10542_v38 = vld [vmem:[%s12123_s26 + $0x830] ss:$8 sps:$4 sm:$0xff]  }
 0x20f   : > { %6607 = vmatpush2.bf16.msra.mxu1 %v10481_v45  ;;  %6557 = vmatprep.subr.bf16.mxu0 %v10486_v46  ;;  %v6880_v45 = vrot.slane %v6878_v23, 3  ;;  %v10545_v23 = vld [vmem:[%s12123_s26 + $0x930] ss:$8 sps:$4 sm:$0xff]  }
 0x210   : > { %6608 = vmatprep.subr.bf16.mxu1 %v10489_v47  ;;  %v10530_v47 = vld [vmem:[%s12123_s26 + $0x854] ss:$8 sps:$4 sm:$0xff]  }
 0x212   : > { %6558 = vmatpush2.bf16.msra.mxu0 %v10484_v49 }
 0x213   : > { %6609 = vmatpush2.bf16.msra.mxu1 %v10487_v50  ;;  %6559 = vmatprep.subr.bf16.mxu0 %v10492_v51  ;;  %v10533_v51 = vld [vmem:[%s12123_s26 + $0x954] ss:$8 sps:$4 sm:$0xff]  }
 0x214   : > { %6610 = vmatprep.subr.bf16.mxu1 %v10495_v53 }
 0x216   : > { %6560 = vmatpush2.bf16.msra.mxu0 %v10490_v55 }
 0x217   : > { %6611 = vmatpush2.bf16.msra.mxu1 %v10493_v32  ;;  %6561 = vmatprep.subr.bf16.mxu0 %v10498_v41  ;;  %v10528_v41 = vld [vmem:[%s12123_s26 + $0x850] ss:$8 sps:$4 sm:$0xff]  }
 0x218   : > { %6612 = vmatprep.subr.bf16.mxu1 %v10501_v56  ;;  %v10531_v56 = vld [vmem:[%s12123_s26 + $0x950] ss:$8 sps:$4 sm:$0xff]  }
 0x21a   : > { %6562 = vmatpush2.bf16.msra.mxu0 %v10496_v57  ;;  %v6839_v57 = vor.u32 %v6838_v35, %v6835_v34  ;;  %v10548_v34 = vld [vmem:[%s12123_s26 + $0x820] ss:$8 sps:$4 sm:$0xff]  }
 0x21b   : > { %6613 = vmatpush2.bf16.msra.mxu1 %v10499_v58  ;;  %6563 = vmatprep.subr.bf16.mxu0 %v10504_v59  ;;  %v12599_v58 = vor.u32 %v6846_v37, %v6843_v36  ;;  %v6873_v59 = vor.u32 %v6872_v43, %v6869_v42  ;;  %v10551_v35 = vld [vmem:[%s12123_s26 + $0x920] ss:$8 sps:$4 sm:$0xff]   ;;  %v10556_v36 = vld [vmem:[%s12123_s26 + $0x814] ss:$8 sps:$4 sm:$0xff]   ;;  %v10562_v42 = vld [vmem:[%s12123_s26 + $0x804] ss:$8 sps:$4 sm:$0xff]  }
 0x21c   : > { %6614 = vmatprep.subr.bf16.mxu1 %v10507_v48  ;;  %v12601_v48 = vor.u32 %v6880_v45, %v6877_v44  ;;  %v10559_v37 = vld [vmem:[%s12123_s26 + $0x914] ss:$8 sps:$4 sm:$0xff]   ;;  %v10565_v43 = vld [vmem:[%s12123_s26 + $0x904] ss:$8 sps:$4 sm:$0xff]   ;;  %v10560_v44 = vld [vmem:[%s12123_s26 + $0x800] ss:$8 sps:$4 sm:$0xff]  }
 0x21d   : > { %v10563_v45 = vld [vmem:[%s12123_s26 + $0x900] ss:$8 sps:$4 sm:$0xff]  }
 0x21e   : > { %6564 = vmatpush2.bf16.msra.mxu0 %v10502_v52 }
 0x21f   : > { %6615 = vmatpush2.bf16.msra.mxu1 %v10505_v61  ;;  %6565 = vmatprep.subr.bf16.mxu0 %v10510_v63  ;;  %v10538_v61 = vld [vmem:[%s12123_s26 + $0x844] ss:$8 sps:$4 sm:$0xff]  }
 0x220   : > { %6616 = vmatprep.subr.bf16.mxu1 %v10513_v3 }
 0x222   : > { %6566 = vmatpush2.bf16.msra.mxu0 %v10508_v10 }
 0x223   : > { %6617 = vmatpush2.bf16.msra.mxu1 %v10511_v5  ;;  %7607 = vmatprep.subr.bf16.mxu0 %v10516_v60  ;;  %v10536_v5 = vld [vmem:[%s12123_s26 + $0x840] ss:$8 sps:$4 sm:$0xff]  }
 0x224   : > { %7658 = vmatprep.subr.bf16.mxu1 %v10519_v15 }
 0x225   : > { %v5555_v39 = vpop.f32.mrf.mxu0  ;;  %6568 = vmatmul.mubr.bf16.vlgmr.msra.gmra.mxu0 %v12352_v11  ;;  %v9371_v11 = vcombine.low %v12574_v26, %v12574_v26 }
 0x226   : > { %v5606_v40 = vpop.f32.mrf.mxu1  ;;  %6619 = vmatmul.mubr.bf16.vlgmr.msra.gmra.mxu1 %v12356_v12  ;;  %7608 = vmatpush1.bf16.msra.mxu0 %v10514_v16  ;;  %v9373_v12 = vcombine.low %v12579_v28, %v12579_v28  ;;  %v6848_v16 = vsel %vm6814_vm1, %v6839_v57, %v12599_v58  ;;  %v10578_v57 = vld [vmem:[%s12123_s26 + $0x8d0] ss:$8 sps:$4 sm:$0xff]  }
 0x227   : > { %v12587_v46 = vadd.f32 %v5606_v40, %v5555_v39  ;;  %7659 = vmatpush1.bf16.msra.mxu1 %v10517_v17  ;;  %v5557_v49 = vpop.f32.mrf.mxu0  ;;  %7609 = vmatprep.subr.bf16.mxu0 %v10522_v24  ;;  %v6882_v17 = vsel %vm6814_vm1, %v6873_v59, %v12601_v48  ;;  %v10554_v39 = vld [vmem:[%s12123_s26 + $0x810] ss:$8 sps:$4 sm:$0xff]  }
 0x228   : > { %v5608_v50 = vpop.f32.mrf.mxu1  ;;  %7660 = vmatprep.subr.bf16.mxu1 %v10525_v25  ;;  %6577 = vmatprep.mubr.bf16.mxu0 %v9372_v27  ;;  %v10550_v27 = vld [vmem:[%s12123_s26 + $0x824] ss:$8 sps:$4 sm:$0xff]   ;;  %v10557_v40 = vld [vmem:[%s12123_s26 + $0x910] ss:$8 sps:$4 sm:$0xff]  }
 0x229   : > { %v12591_v53 = vadd.f32 %v5608_v50, %v5557_v49  ;;  %6628 = vmatprep.mubr.bf16.mxu1 %v9374_v30  ;;  %v5559_v55 = vpop.f32.mrf.mxu0  ;;  %v10553_v30 = vld [vmem:[%s12123_s26 + $0x924] ss:$8 sps:$4 sm:$0xff]   ;;  %v10571_v49 = vld [vmem:[%s12123_s26 + $0x9f4] ss:$8 sps:$4 sm:$0xff]   ;;  %v10566_v50 = vld [vmem:[%s12123_s26 + $0x8f0] ss:$8 sps:$4 sm:$0xff]  }
 0x22a   : > { %v5610_v32 = vpop.f32.mrf.mxu1  ;;  %7610 = vmatpush1.bf16.msra.mxu0 %v10520_v31  ;;  %v10581_v59 = vld [vmem:[%s12123_s26 + $0x9d0] ss:$8 sps:$4 sm:$0xff]  }
 0x22b   : > { %v12603_v52 = vadd.f32 %v5610_v32, %v5559_v55  ;;  %7661 = vmatpush1.bf16.msra.mxu1 %v10523_v33  ;;  %v5561_v63 = vpop.f32.mrf.mxu0  ;;  %7611 = vmatprep.subr.bf16.mxu0 %v10530_v47  ;;  %v10568_v47 = vld [vmem:[%s12123_s26 + $0x8f4] ss:$8 sps:$4 sm:$0xff]   ;;  %v10572_v55 = vld [vmem:[%s12123_s26 + $0x8e0] ss:$8 sps:$4 sm:$0xff]  }
 0x22c   : > { %v5612_v3 = vpop.f32.mrf.mxu1  ;;  %7662 = vmatprep.subr.bf16.mxu1 %v10533_v51  ;;  %v10569_v51 = vld [vmem:[%s12123_s26 + $0x9f0] ss:$8 sps:$4 sm:$0xff]   ;;  %v10575_v32 = vld [vmem:[%s12123_s26 + $0x9e0] ss:$8 sps:$4 sm:$0xff]  }
 0x22d   : > { %v12607_v10 = vadd.f32 %v5612_v3, %v5561_v63  ;;  %6578 = vmatmul.mubr.bf16.gmra.mxu0 %v9371_v11  ;;  %v5565_v60 = vpop.f32.mrf.mxu0  ;;  %v10574_v11 = vld [vmem:[%s12123_s26 + $0x8e4] ss:$8 sps:$4 sm:$0xff]   ;;  %v10584_v3 = vld [vmem:[%s12123_s26 + $0x8c0] ss:$8 sps:$4 sm:$0xff]  }
 0x22e   : > { %6629 = vmatmul.mubr.bf16.gmra.mxu1 %v9373_v12  ;;  %v5616_v15 = vpop.f32.mrf.mxu1  ;;  %7612 = vmatpush1.bf16.msra.mxu0 %v10528_v41  ;;  %v10577_v12 = vld [vmem:[%s12123_s26 + $0x9e4] ss:$8 sps:$4 sm:$0xff]   ;;  %v10580_v41 = vld [vmem:[%s12123_s26 + $0x8d4] ss:$8 sps:$4 sm:$0xff]  }
 0x22f   : > { %7663 = vmatpush1.bf16.msra.mxu1 %v10531_v56  ;;  %v12616_v19 = vadd.f32 %v5616_v15, %v5565_v60  ;;  %7613 = vmatprep.subr.bf16.mxu0 %v10538_v61  ;;  %v5567_v21 = vpop.f32.mrf.mxu0  ;;  %v10583_v56 = vld [vmem:[%s12123_s26 + $0x9d4] ss:$8 sps:$4 sm:$0xff]   ;;  %v10586_v61 = vld [vmem:[%s12123_s26 + $0x8c4] ss:$8 sps:$4 sm:$0xff]   ;;  %v9631_v60 = vcombine.low %v12524_v62, %v12538_v4  ;;  %v12657_v15 = vcombine.low %v12543_v7, %v12528_v0  ;;  %v10596_v0 = vld [vmem:[%s12123_s26 + $0x8a0] ss:$8 sps:$4 sm:$0xff]  }
 0x230   : > { %7664 = vmatprep.subr.bf16.mxu1 %v10541_v6  ;;  %v5618_v22 = vpop.f32.mrf.mxu1  ;;  %7639 = vmatprep.mubr.bf16.mxu0 %v6848_v16  ;;  %v10589_v63 = vld [vmem:[%s12123_s26 + $0x9c4] ss:$8 sps:$4 sm:$0xff]   ;;  %v10587_v6 = vld [vmem:[%s12123_s26 + $0x9c0] ss:$8 sps:$4 sm:$0xff]   ;;  %v9633_v16 = vcombine.low %v12531_v1, %v12552_v9 }
 0x231   : > { %v12619_v29 = vadd.f32 %v5618_v22, %v5567_v21  ;;  %7690 = vmatprep.mubr.bf16.mxu1 %v6882_v17  ;;  %v5569_v24 = vpop.f32.mrf.mxu0  ;;  %v10590_v17 = vld [vmem:[%s12123_s26 + $0x8b0] ss:$8 sps:$4 sm:$0xff]   ;;  %v10598_v62 = vld [vmem:[%s12123_s26 + $0x8a4] ss:$8 sps:$4 sm:$0xff]   ;;  %v6816_v21 = vshrl.u32 %v9631_v60, 16  ;;  %v6819_v7 = vshll.u32 %v9631_v60, 16 }
 0x232   : > { %v5620_v25 = vpop.f32.mrf.mxu1  ;;  %7614 = vmatpush1.bf16.msra.mxu0 %v10536_v5  ;;  %v10592_v5 = vld [vmem:[%s12123_s26 + $0x8b4] ss:$8 sps:$4 sm:$0xff]   ;;  %v10601_v4 = vld [vmem:[%s12123_s26 + $0x9a4] ss:$8 sps:$4 sm:$0xff]   ;;  %v6824_v1 = vshrl.u32 %v12657_v15, 16  ;;  %v6827_v22 = vshll.u32 %v12657_v15, 16 }
 0x233   : > { %7665 = vmatpush1.bf16.msra.mxu1 %v10539_v13  ;;  %7615 = vmatprep.subr.bf16.mxu0 %v10544_v18  ;;  %v5570_v31 = vpop.f32.mrf.mxu0  ;;  %v10595_v13 = vld [vmem:[%s12123_s26 + $0x9b4] ss:$8 sps:$4 sm:$0xff]   ;;  %v10593_v18 = vld [vmem:[%s12123_s26 + $0x9b0] ss:$8 sps:$4 sm:$0xff]   ;;  %v10599_v9 = vld [vmem:[%s12123_s26 + $0x9a0] ss:$8 sps:$4 sm:$0xff]  }
 0x234   : > { %7666 = vmatprep.subr.bf16.mxu1 %v10547_v20  ;;  %v5621_v33 = vpop.f32.mrf.mxu1  ;;  %v12665_v20 = vcombine.low %v12557_v14, %v12534_v2  ;;  %v10604_v2 = vld [vmem:[%s12123_s26 + $0x894] ss:$8 sps:$4 sm:$0xff]   ;;  %v6853_v14 = vshll.u32 %v9633_v16, 16  ;;  %v10602_v31 = vld [vmem:[%s12123_s26 + $0x890] ss:$8 sps:$4 sm:$0xff]  }
 0x235   : > { %v10607_v25 = vld [vmem:[%s12123_s26 + $0x994] ss:$8 sps:$4 sm:$0xff]   ;;  %v10605_v33 = vld [vmem:[%s12123_s26 + $0x990] ss:$8 sps:$4 sm:$0xff]  }
 0x236   : > { %7616 = vmatpush1.bf16.msra.mxu0 %v10542_v38  ;;  %v6850_v38 = vshrl.u32 %v9633_v16, 16  ;;  %v6861_v24 = vshll.u32 %v12665_v20, 16  ;;  %v10617_v60 = vld [vmem:[%s12123_s26 + $0xb70] ss:$8 sps:$4 sm:$0xff]  }
 0x237   : > { %7667 = vmatpush1.bf16.msra.mxu1 %v10545_v23  ;;  %7617 = vmatprep.subr.bf16.mxu0 %v10550_v27  ;;  %v6858_v23 = vshrl.u32 %v12665_v20, 16  ;;  %v6818_v27 = vrot.slane %v6816_v21, 2 }
 0x238   : > { %7668 = vmatprep.subr.bf16.mxu1 %v10553_v30  ;;  %v12678_v30 = vld [vmem:[%s12173_s6 + $0x10] sm:$0xcc] }
 0x23a   : > { %7618 = vmatpush1.bf16.msra.mxu0 %v10548_v34  ;;  %v6821_v34 = vrot.slane %v6819_v7, 3 }
 0x23b   : > { %7669 = vmatpush1.bf16.msra.mxu1 %v10551_v35  ;;  %7619 = vmatprep.subr.bf16.mxu0 %v10556_v36  ;;  %v6826_v35 = vrot.slane %v6824_v1, 2  ;;  %v12683_v36 = vld [vmem:[%s12173_s6 + $0x70] sm:$0x77] }
 0x23c   : > { %7670 = vmatprep.subr.bf16.mxu1 %v10559_v37  ;;  %v6829_v37 = vrot.slane %v6827_v22, 3  ;;  %v10625_v22 = vld [vmem:[%s12123_s26 + $0xb64] ss:$8 sps:$4 sm:$0xff]  }
 0x23e   : > { %7620 = vmatpush1.bf16.msra.mxu0 %v10554_v39  ;;  %v6852_v39 = vrot.slane %v6850_v38, 2  ;;  %v10620_v38 = vld [vmem:[%s12123_s26 + $0xa60] ss:$8 sps:$4 sm:$0xff]  }
 0x23f   : > { %7671 = vmatpush1.bf16.msra.mxu1 %v10557_v40  ;;  %7621 = vmatprep.subr.bf16.mxu0 %v10562_v42  ;;  %v12686_v40 = vld [vmem:[%s12173_s6 + $0x18] sm:$0xcc]  ;;  %v6855_v42 = vrot.slane %v6853_v14, 3 }
 0x240   : > { %7672 = vmatprep.subr.bf16.mxu1 %v10565_v43  ;;  %v6860_v43 = vrot.slane %v6858_v23, 2 }
 0x242   : > { %7622 = vmatpush1.bf16.msra.mxu0 %v10560_v44  ;;  %v6863_v44 = vrot.slane %v6861_v24, 3 }
 0x243   : > { %7673 = vmatpush1.bf16.msra.mxu1 %v10563_v45  ;;  %7623 = vmatprep.subr.bf16.mxu0 %v10568_v47  ;;  %v12689_v45 = vld [vmem:[%s12173_s6 + $0x78] sm:$0x77]  ;;  %v10610_v47 = vld [vmem:[%s12123_s26 + $0x884] ss:$8 sps:$4 sm:$0xff]  }
 0x244   : > { %7674 = vmatprep.subr.bf16.mxu1 %v10571_v49  ;;  %v10613_v49 = vld [vmem:[%s12123_s26 + $0x984] ss:$8 sps:$4 sm:$0xff]  }
 0x246   : > { %7624 = vmatpush2.bf16.msra.mxu0 %v10566_v50  ;;  %v12694_v50 = vld [vmem:[%s12173_s6 + $0x30] sm:$0xff] }
 0x247   : > { %7675 = vmatpush2.bf16.msra.mxu1 %v10569_v51  ;;  %7625 = vmatprep.subr.bf16.mxu0 %v10574_v11  ;;  %v9636_v51 = vcombine.high %v12678_v30, %v12694_v50  ;;  %v12700_v11 = vcombine.high %v12574_v26, %v12683_v36 }
 0x248   : > { %7676 = vmatprep.subr.bf16.mxu1 %v10577_v12  ;;  %v12703_v12 = vld [vmem:[%s12173_s6 + $0x38] sm:$0xff] }
 0x249   : > { %v6904_v16 = vshll.u32 %v9636_v51, 16 }
 0x24a   : > { %7626 = vmatpush2.bf16.msra.mxu0 %v10572_v55  ;;  %v9638_v55 = vcombine.high %v12686_v40, %v12703_v12 }
 0x24b   : > { %7677 = vmatpush2.bf16.msra.mxu1 %v10575_v32  ;;  %7627 = vmatprep.subr.bf16.mxu0 %v10580_v41  ;;  %v6822_v32 = vor.u32 %v6821_v34, %v6818_v27  ;;  %v12709_v41 = vcombine.high %v12579_v28, %v12689_v45  ;;  %v6906_v23 = vrot.slane %v6904_v16, 3 }
 0x24c   : > { %7678 = vmatprep.subr.bf16.mxu1 %v10583_v56  ;;  %v10608_v56 = vld [vmem:[%s12123_s26 + $0x880] ss:$8 sps:$4 sm:$0xff]  }
 0x24d   : > { %v6943_v21 = vshrl.u32 %v12709_v41, 16 }
 0x24e   : > { %7628 = vmatpush2.bf16.msra.mxu0 %v10578_v57  ;;  %v10611_v57 = vld [vmem:[%s12123_s26 + $0x980] ss:$8 sps:$4 sm:$0xff]  }
 0x24f   : > { %7679 = vmatpush2.bf16.msra.mxu1 %v10581_v59  ;;  %7629 = vmatprep.subr.bf16.mxu0 %v10586_v61  ;;  %v12713_v59 = vor.u32 %v6829_v37, %v6826_v35  ;;  %v6856_v61 = vor.u32 %v6855_v42, %v6852_v39  ;;  %v6945_v35 = vrot.slane %v6943_v21, 2 }
 0x250   : > { %7680 = vmatprep.subr.bf16.mxu1 %v10589_v63  ;;  %v12715_v63 = vor.u32 %v6863_v44, %v6860_v43  ;;  %v10628_v44 = vld [vmem:[%s12123_s26 + $0xa54] ss:$8 sps:$4 sm:$0xff]  }
 0x251   : > { %v6831_v7 = vsel %vm6814_vm1, %v6822_v32, %v12713_v59  ;;  %v10629_v32 = vld [vmem:[%s12123_s26 + $0xb50] ss:$8 sps:$4 sm:$0xff]  }
 0x252   : > { %7630 = vmatpush2.bf16.msra.mxu0 %v10584_v3  ;;  %v10616_v3 = vld [vmem:[%s12123_s26 + $0xa74] ss:$8 sps:$4 sm:$0xff]   ;;  %v6865_v1 = vsel %vm6814_vm1, %v6856_v61, %v12715_v63 }
 0x253   : > { %7681 = vmatpush2.bf16.msra.mxu1 %v10587_v6  ;;  %7631 = vmatprep.subr.bf16.mxu0 %v10592_v5  ;;  %v10619_v6 = vld [vmem:[%s12123_s26 + $0xb74] ss:$8 sps:$4 sm:$0xff]   ;;  %v6901_v5 = vshrl.u32 %v9636_v51, 16 }
 0x254   : > { %7682 = vmatprep.subr.bf16.mxu1 %v10595_v13  ;;  %v10614_v13 = vld [vmem:[%s12123_s26 + $0xa70] ss:$8 sps:$4 sm:$0xff]  }
 0x255   : > { %v6903_v14 = vrot.slane %v6901_v5, 2 }
 0x256   : > { %7632 = vmatpush2.bf16.msra.mxu0 %v10590_v17  ;;  %v6909_v17 = vshrl.u32 %v12700_v11, 16 }
 0x257   : > { %7683 = vmatpush2.bf16.msra.mxu1 %v10593_v18  ;;  %7633 = vmatprep.subr.bf16.mxu0 %v10598_v62  ;;  %v6912_v18 = vshll.u32 %v12700_v11, 16  ;;  %v6935_v62 = vshrl.u32 %v9638_v55, 16 }
 0x258   : > { %7684 = vmatprep.subr.bf16.mxu1 %v10601_v4  ;;  %v6938_v4 = vshll.u32 %v9638_v55, 16  ;;  %v6911_v24 = vrot.slane %v6909_v17, 2  ;;  %v10626_v55 = vld [vmem:[%s12123_s26 + $0xa50] ss:$8 sps:$4 sm:$0xff]  }
 0x25a   : > { %7634 = vmatpush2.bf16.msra.mxu0 %v10596_v0  ;;  %v6946_v0 = vshll.u32 %v12709_v41, 16  ;;  %v6940_v34 = vrot.slane %v6938_v4, 3 }
 0x25b   : > { %7685 = vmatpush2.bf16.msra.mxu1 %v10599_v9  ;;  %7635 = vmatprep.subr.bf16.mxu0 %v10604_v2  ;;  %v10622_v9 = vld [vmem:[%s12123_s26 + $0xa64] ss:$8 sps:$4 sm:$0xff]   ;;  %v10623_v2 = vld [vmem:[%s12123_s26 + $0xb60] ss:$8 sps:$4 sm:$0xff]  }
 0x25c   : > { %7686 = vmatprep.subr.bf16.mxu1 %v10607_v25  ;;  %v6914_v25 = vrot.slane %v6912_v18, 3  ;;  %v6948_v37 = vrot.slane %v6946_v0, 3  ;;  %v10632_v18 = vld [vmem:[%s12123_s26 + $0xa40] ss:$8 sps:$4 sm:$0xff]  }
 0x25e   : > { %7636 = vmatpush2.bf16.msra.mxu0 %v10602_v31  ;;  %v12743_v61 = vor.u32 %v6914_v25, %v6911_v24  ;;  %v10641_v24 = vld [vmem:[%s12123_s26 + $0xb30] ss:$8 sps:$4 sm:$0xff]   ;;  %v10649_v25 = vld [vmem:[%s12123_s26 + $0xb24] ss:$8 sps:$4 sm:$0xff]  }
 0x25f   : > { %7687 = vmatpush2.bf16.msra.mxu1 %v10605_v33  ;;  %7637 = vmatprep.subr.bf16.mxu0 %v10610_v47  ;;  %v6937_v33 = vrot.slane %v6935_v62, 2  ;;  %v10631_v47 = vld [vmem:[%s12123_s26 + $0xb54] ss:$8 sps:$4 sm:$0xff]   ;;  %v10635_v62 = vld [vmem:[%s12123_s26 + $0xb40] ss:$8 sps:$4 sm:$0xff]  }
 0x260   : > { %7688 = vmatprep.subr.bf16.mxu1 %v10613_v49 }
 0x262   : > { %7638 = vmatpush2.bf16.msra.mxu0 %v10608_v56 }
 0x263   : > { %7689 = vmatpush2.bf16.msra.mxu1 %v10611_v57  ;;  %7709 = vmatprep.subr.bf16.mxu0 %v10616_v3  ;;  %v6907_v57 = vor.u32 %v6906_v23, %v6903_v14  ;;  %v6941_v3 = vor.u32 %v6940_v34, %v6937_v33  ;;  %v10638_v23 = vld [vmem:[%s12123_s26 + $0xa30] ss:$8 sps:$4 sm:$0xff]   ;;  %v10644_v33 = vld [vmem:[%s12123_s26 + $0xa20] ss:$8 sps:$4 sm:$0xff]  }
 0x264   : > { %7760 = vmatprep.subr.bf16.mxu1 %v10619_v6  ;;  %v12745_v6 = vor.u32 %v6948_v37, %v6945_v35  ;;  %v10647_v34 = vld [vmem:[%s12123_s26 + $0xb20] ss:$8 sps:$4 sm:$0xff]   ;;  %v10652_v35 = vld [vmem:[%s12123_s26 + $0xa14] ss:$8 sps:$4 sm:$0xff]  }
 0x265   : > { %v5657_v27 = vpop.f32.mrf.mxu0  ;;  %7640 = vmatmul.mubr.bf16.vlgmr.msra.gmra.mxu0 %v6831_v7  ;;  %v10655_v37 = vld [vmem:[%s12123_s26 + $0xb14] ss:$8 sps:$4 sm:$0xff]  }
 0x266   : > { %v5708_v31 = vpop.f32.mrf.mxu1  ;;  %7691 = vmatmul.mubr.bf16.vlgmr.msra.gmra.mxu1 %v6865_v1  ;;  %v5658_v39 = vadd.f32 %v5657_v27, %v12587_v46  ;;  %7710 = vmatpush1.bf16.msra.mxu0 %v10614_v13  ;;  %v6950_v0 = vsel %vm6814_vm1, %v6941_v3, %v12745_v6  ;;  %v10673_v3 = vld [vmem:[%s12123_s26 + $0xbe4] ss:$8 sps:$4 sm:$0xff]  }
 0x267   : > { %7761 = vmatpush1.bf16.msra.mxu1 %v10617_v60  ;;  %v5659_v42 = vpop.f32.mrf.mxu0  ;;  %7711 = vmatprep.subr.bf16.mxu0 %v10622_v9  ;;  %v10637_v60 = vld [vmem:[%s12123_s26 + $0xb44] ss:$8 sps:$4 sm:$0xff]  }
 0x268   : > { %v5710_v43 = vpop.f32.mrf.mxu1  ;;  %7762 = vmatprep.subr.bf16.mxu1 %v10625_v22  ;;  %v12736_v49 = vadd.f32 %v5708_v31, %v5658_v39  ;;  %v5660_v51 = vadd.f32 %v5659_v42, %v12591_v53  ;;  %7649 = vmatprep.mubr.bf16.mxu0 %v12599_v58  ;;  %v10650_v39 = vld [vmem:[%s12123_s26 + $0xa10] ss:$8 sps:$4 sm:$0xff]  }
 0x269   : > { %7700 = vmatprep.mubr.bf16.mxu1 %v12601_v48  ;;  %v5661_v46 = vpop.f32.mrf.mxu0  ;;  %v10634_v48 = vld [vmem:[%s12123_s26 + $0xa44] ss:$8 sps:$4 sm:$0xff]   ;;  %v10653_v42 = vld [vmem:[%s12123_s26 + $0xb10] ss:$8 sps:$4 sm:$0xff]  }
 0x26a   : > { %v5712_v56 = vpop.f32.mrf.mxu1  ;;  %v12747_v5 = vadd.f32 %v5710_v43, %v5660_v51  ;;  %v5662_v53 = vadd.f32 %v5661_v46, %v12603_v52  ;;  %7712 = vmatpush1.bf16.msra.mxu0 %v10620_v38  ;;  %v6916_v52 = vsel %vm6814_vm1, %v6907_v57, %v12743_v61  ;;  %v10658_v43 = vld [vmem:[%s12123_s26 + $0xa04] ss:$8 sps:$4 sm:$0xff]   ;;  %v10659_v51 = vld [vmem:[%s12123_s26 + $0xb00] ss:$8 sps:$4 sm:$0xff]   ;;  %v10662_v46 = vld [vmem:[%s12123_s26 + $0xaf0] ss:$8 sps:$4 sm:$0xff]  }
 0x26b   : > { %7763 = vmatpush1.bf16.msra.mxu1 %v10623_v2  ;;  %v5663_v58 = vpop.f32.mrf.mxu0  ;;  %7713 = vmatprep.subr.bf16.mxu0 %v10628_v44  ;;  %v10661_v44 = vld [vmem:[%s12123_s26 + $0xb04] ss:$8 sps:$4 sm:$0xff]  }
 0x26c   : > { %v5714_v13 = vpop.f32.mrf.mxu1  ;;  %7764 = vmatprep.subr.bf16.mxu1 %v10631_v47  ;;  %v12752_v16 = vadd.f32 %v5712_v56, %v5662_v53  ;;  %v5664_v17 = vadd.f32 %v5663_v58, %v12607_v10  ;;  %v10656_v47 = vld [vmem:[%s12123_s26 + $0xa00] ss:$8 sps:$4 sm:$0xff]   ;;  %v10665_v56 = vld [vmem:[%s12123_s26 + $0xbf0] ss:$8 sps:$4 sm:$0xff]   ;;  %v10670_v57 = vld [vmem:[%s12123_s26 + $0xae4] ss:$8 sps:$4 sm:$0xff]  }
 0x26d   : > { %v5667_v4 = vpop.f32.mrf.mxu0  ;;  %7650 = vmatmul.mubr.bf16.gmra.mxu0 %v12713_v59  ;;  %v10640_v59 = vld [vmem:[%s12123_s26 + $0xa34] ss:$8 sps:$4 sm:$0xff]   ;;  %v10668_v53 = vld [vmem:[%s12123_s26 + $0xae0] ss:$8 sps:$4 sm:$0xff]  }
 0x26e   : > { %v5718_v21 = vpop.f32.mrf.mxu1  ;;  %7701 = vmatmul.mubr.bf16.gmra.mxu1 %v12715_v63  ;;  %v12763_v7 = vadd.f32 %v5714_v13, %v5664_v17  ;;  %v5668_v10 = vadd.f32 %v5667_v4, %v12616_v19  ;;  %7714 = vmatpush1.bf16.msra.mxu0 %v10626_v55  ;;  %v10643_v63 = vld [vmem:[%s12123_s26 + $0xb34] ss:$8 sps:$4 sm:$0xff]   ;;  %v10671_v58 = vld [vmem:[%s12123_s26 + $0xbe0] ss:$8 sps:$4 sm:$0xff]   ;;  %v10677_v17 = vld [vmem:[%s12123_s26 + $0xbd0] ss:$8 sps:$4 sm:$0xff]  }
 0x26f   : > { %7765 = vmatpush1.bf16.msra.mxu1 %v10629_v32  ;;  %v5669_v1 = vpop.f32.mrf.mxu0  ;;  %7715 = vmatprep.subr.bf16.mxu0 %v10634_v48  ;;  %v10664_v55 = vld [vmem:[%s12123_s26 + $0xaf4] ss:$8 sps:$4 sm:$0xff]   ;;  %v10680_v4 = vld [vmem:[%s12123_s26 + $0xac0] ss:$8 sps:$4 sm:$0xff]  }
 0x270   : > { %v5720_v9 = vpop.f32.mrf.mxu1  ;;  %7766 = vmatprep.subr.bf16.mxu1 %v10637_v60  ;;  %v5670_v22 = vadd.f32 %v5669_v1, %v12619_v29  ;;  %v12769_v38 = vadd.f32 %v5718_v21, %v5668_v10  ;;  %7741 = vmatprep.mubr.bf16.mxu0 %v6916_v52  ;;  %v10646_v29 = vld [vmem:[%s12123_s26 + $0xa24] ss:$8 sps:$4 sm:$0xff]   ;;  %v10667_v32 = vld [vmem:[%s12123_s26 + $0xbf4] ss:$8 sps:$4 sm:$0xff]   ;;  %v10674_v60 = vld [vmem:[%s12123_s26 + $0xad0] ss:$8 sps:$4 sm:$0xff]   ;;  %v9635_v10 = vcombine.low %v12678_v30, %v12694_v50 }
 0x271   : > { %7792 = vmatprep.mubr.bf16.mxu1 %v6950_v0  ;;  %v5671_v19 = vpop.f32.mrf.mxu0  ;;  %v10676_v13 = vld [vmem:[%s12123_s26 + $0xad4] ss:$8 sps:$4 sm:$0xff]   ;;  %v10683_v21 = vld [vmem:[%s12123_s26 + $0xbc0] ss:$8 sps:$4 sm:$0xff]   ;;  %v12809_v1 = vcombine.low %v12574_v26, %v12683_v36  ;;  %v10697_v30 = vld [vmem:[%s12123_s26 + $0xba4] ss:$8 sps:$4 sm:$0xff]  }
 0x272   : > { %v5722_v2 = vpop.f32.mrf.mxu1  ;;  %v12771_v14 = vadd.f32 %v5720_v9, %v5670_v22  ;;  %7716 = vmatpush1.bf16.msra.mxu0 %v10632_v18  ;;  %v10679_v48 = vld [vmem:[%s12123_s26 + $0xbd4] ss:$8 sps:$4 sm:$0xff]   ;;  %v10682_v18 = vld [vmem:[%s12123_s26 + $0xac4] ss:$8 sps:$4 sm:$0xff]   ;;  %v10686_v9 = vld [vmem:[%s12123_s26 + $0xab0] ss:$8 sps:$4 sm:$0xff]   ;;  %v12817_v22 = vcombine.low %v12579_v28, %v12689_v45 }
 0x273   : > { %7767 = vmatpush1.bf16.msra.mxu1 %v10635_v62  ;;  %7717 = vmatprep.subr.bf16.mxu0 %v10640_v59  ;;  %v5672_v27 = vpop.f32.mrf.mxu0  ;;  %v10685_v62 = vld [vmem:[%s12123_s26 + $0xbc4] ss:$8 sps:$4 sm:$0xff]   ;;  %v10688_v52 = vld [vmem:[%s12123_s26 + $0xab4] ss:$8 sps:$4 sm:$0xff]   ;;  %v10689_v59 = vld [vmem:[%s12123_s26 + $0xbb0] ss:$8 sps:$4 sm:$0xff]  }
 0x274   : > { %7768 = vmatprep.subr.bf16.mxu1 %v10643_v63  ;;  %v5723_v31 = vpop.f32.mrf.mxu1  ;;  %v10691_v0 = vld [vmem:[%s12123_s26 + $0xbb4] ss:$8 sps:$4 sm:$0xff]   ;;  %v9637_v63 = vcombine.low %v12686_v40, %v12703_v12  ;;  %v10694_v19 = vld [vmem:[%s12123_s26 + $0xaa4] ss:$8 sps:$4 sm:$0xff]   ;;  %v10692_v26 = vld [vmem:[%s12123_s26 + $0xaa0] ss:$8 sps:$4 sm:$0xff]  }
 0x275   : > { %v6884_v36 = vshrl.u32 %v9635_v10, 16  ;;  %v6887_v2 = vshll.u32 %v9635_v10, 16  ;;  %v10695_v40 = vld [vmem:[%s12123_s26 + $0xba0] ss:$8 sps:$4 sm:$0xff]   ;;  %v10700_v27 = vld [vmem:[%s12123_s26 + $0xa94] ss:$8 sps:$4 sm:$0xff]  }
 0x276   : > { %7718 = vmatpush1.bf16.msra.mxu0 %v10638_v23  ;;  %v6892_v23 = vshrl.u32 %v12809_v1, 16  ;;  %v6918_v28 = vshrl.u32 %v9637_v63, 16  ;;  %v6921_v45 = vshll.u32 %v9637_v63, 16  ;;  %v10703_v31 = vld [vmem:[%s12123_s26 + $0xb94] ss:$8 sps:$4 sm:$0xff]  }
 0x277   : > { %7769 = vmatpush1.bf16.msra.mxu1 %v10641_v24  ;;  %7719 = vmatprep.subr.bf16.mxu0 %v10646_v29  ;;  %v6895_v24 = vshll.u32 %v12809_v1, 16  ;;  %v6926_v29 = vshrl.u32 %v12817_v22, 16 }
 0x278   : > { %7770 = vmatprep.subr.bf16.mxu1 %v10649_v25  ;;  %v6929_v25 = vshll.u32 %v12817_v22, 16 }
 0x27a   : > { %7720 = vmatpush1.bf16.msra.mxu0 %v10644_v33  ;;  %v10698_v33 = vld [vmem:[%s12123_s26 + $0xa90] ss:$8 sps:$4 sm:$0xff]  }
 0x27b   : > { %7771 = vmatpush1.bf16.msra.mxu1 %v10647_v34  ;;  %7721 = vmatprep.subr.bf16.mxu0 %v10652_v35  ;;  %v6886_v34 = vrot.slane %v6884_v36, 2  ;;  %v6889_v35 = vrot.slane %v6887_v2, 3  ;;  %v10716_v36 = vld [vmem:[%s12123_s26 + $0xc60] ss:$8 sps:$4 sm:$0xff]  }
 0x27c   : > { %7772 = vmatprep.subr.bf16.mxu1 %v10655_v37  ;;  %v6894_v37 = vrot.slane %v6892_v23, 2  ;;  %v10719_v2 = vld [vmem:[%s12123_s26 + $0xd60] ss:$8 sps:$4 sm:$0xff]  }
 0x27e   : > { %7722 = vmatpush1.bf16.msra.mxu0 %v10650_v39  ;;  %v6897_v39 = vrot.slane %v6895_v24, 3 }
 0x27f   : > { %7773 = vmatpush1.bf16.msra.mxu1 %v10653_v42  ;;  %7723 = vmatprep.subr.bf16.mxu0 %v10658_v43  ;;  %v10701_v42 = vld [vmem:[%s12123_s26 + $0xb90] ss:$8 sps:$4 sm:$0xff]   ;;  %v6920_v43 = vrot.slane %v6918_v28, 2  ;;  %v10727_v28 = vld [vmem:[%s12123_s26 + $0xd54] ss:$8 sps:$4 sm:$0xff]  }
 0x280   : > { %7774 = vmatprep.subr.bf16.mxu1 %v10661_v44  ;;  %v6923_v44 = vrot.slane %v6921_v45, 3 }
 0x282   : > { %7724 = vmatpush1.bf16.msra.mxu0 %v10656_v47  ;;  %v6928_v47 = vrot.slane %v6926_v29, 2 }
 0x283   : > { %7775 = vmatpush1.bf16.msra.mxu1 %v10659_v51  ;;  %7725 = vmatprep.subr.bf16.mxu0 %v10664_v55  ;;  %v6931_v51 = vrot.slane %v6929_v25, 3  ;;  %v10706_v55 = vld [vmem:[%s12123_s26 + $0xa84] ss:$8 sps:$4 sm:$0xff]  }
 0x284   : > { %7776 = vmatprep.subr.bf16.mxu1 %v10667_v32  ;;  %v10709_v32 = vld [vmem:[%s12123_s26 + $0xb84] ss:$8 sps:$4 sm:$0xff]  }
 0x286   : > { %7726 = vmatpush2.bf16.msra.mxu0 %v10662_v46  ;;  %v6890_v46 = vor.u32 %v6889_v35, %v6886_v34  ;;  %v7981_v34 = vrot.slane %v12561_v54, 3 }
 0x287   : > { %7777 = vmatpush2.bf16.msra.mxu1 %v10665_v56  ;;  %7727 = vmatprep.subr.bf16.mxu0 %v10670_v57  ;;  %v10704_v56 = vld [vmem:[%s12123_s26 + $0xa80] ss:$8 sps:$4 sm:$0xff]  }
 0x288   : > { %7778 = vmatprep.subr.bf16.mxu1 %v10673_v3  ;;  %v10707_v57 = vld [vmem:[%s12123_s26 + $0xb80] ss:$8 sps:$4 sm:$0xff]   ;;  %v12835_v3 = vor.u32 %v6897_v39, %v6894_v37 }
 0x28a   : > { %7728 = vmatpush2.bf16.msra.mxu0 %v10668_v53  ;;  %v6924_v53 = vor.u32 %v6923_v44, %v6920_v43  ;;  %v10733_v43 = vld [vmem:[%s12123_s26 + $0xd44] ss:$8 sps:$4 sm:$0xff]  }
 0x28b   : > { %7779 = vmatpush2.bf16.msra.mxu1 %v10671_v58  ;;  %7729 = vmatprep.subr.bf16.mxu0 %v10676_v13  ;;  %v12837_v58 = vor.u32 %v6931_v51, %v6928_v47  ;;  %v10712_v13 = vld [vmem:[%s12123_s26 + $0xc74] ss:$8 sps:$4 sm:$0xff]  }
 0x28c   : > { %7780 = vmatprep.subr.bf16.mxu1 %v10679_v48  ;;  %v10715_v48 = vld [vmem:[%s12123_s26 + $0xd74] ss:$8 sps:$4 sm:$0xff]  }
 0x28e   : > { %7730 = vmatpush2.bf16.msra.mxu0 %v10674_v60  ;;  %v10710_v60 = vld [vmem:[%s12123_s26 + $0xc70] ss:$8 sps:$4 sm:$0xff]  }
 0x28f   : > { %7781 = vmatpush2.bf16.msra.mxu1 %v10677_v17  ;;  %7731 = vmatprep.subr.bf16.mxu0 %v10682_v18  ;;  %v6899_v17 = vsel %vm6814_vm1, %v6890_v46, %v12835_v3  ;;  %v6933_v18 = vsel %vm6814_vm1, %v6924_v53, %v12837_v58 }
 0x290   : > { %7782 = vmatprep.subr.bf16.mxu1 %v10685_v62  ;;  %v10713_v62 = vld [vmem:[%s12123_s26 + $0xd70] ss:$8 sps:$4 sm:$0xff]  }
 0x292   : > { %7732 = vmatpush2.bf16.msra.mxu0 %v10680_v4  ;;  %v12848_v4 = vld [vmem:[%s12173_s6] sm:$0x88] }
 0x293   : > { %7783 = vmatpush2.bf16.msra.mxu1 %v10683_v21  ;;  %7733 = vmatprep.subr.bf16.mxu0 %v10688_v52  ;;  %v12851_v21 = vld [vmem:[%s12173_s6 + $0x8] sm:$0x88] }
 0x294   : > { %7784 = vmatprep.subr.bf16.mxu1 %v10691_v0  ;;  %v10718_v52 = vld [vmem:[%s12123_s26 + $0xc64] ss:$8 sps:$4 sm:$0xff]  }
 0x295   : > { %v10721_v0 = vld [vmem:[%s12123_s26 + $0xd64] ss:$8 sps:$4 sm:$0xff]  }
 0x296   : > { %7734 = vmatpush2.bf16.msra.mxu0 %v10686_v9 }
 0x297   : > { %7785 = vmatpush2.bf16.msra.mxu1 %v10689_v59  ;;  %7735 = vmatprep.subr.bf16.mxu0 %v10694_v19  ;;  %v12856_v59 = vld [vmem:[%s12173_s6 + $0x20] sm:$0xff]  ;;  %v12861_v19 = vld [vmem:[%s12173_s6 + $0x28] sm:$0xff] }
 0x298   : > { %7786 = vmatprep.subr.bf16.mxu1 %v10697_v30  ;;  %v9904_v63 = vcombine.high %v12848_v4, %v12856_v59  ;;  %v9906_v30 = vcombine.high %v12851_v21, %v12861_v19 }
 0x29a   : > { %7736 = vmatpush2.bf16.msra.mxu0 %v10692_v26 }
 0x29b   : > { %7787 = vmatpush2.bf16.msra.mxu1 %v10695_v40  ;;  %7737 = vmatprep.subr.bf16.mxu0 %v10700_v27  ;;  %v10724_v40 = vld [vmem:[%s12123_s26 + $0xc54] ss:$8 sps:$4 sm:$0xff]   ;;  %v7974_v27 = vrot.slane %v9904_v63, 3  ;;  %v10740_v63 = vld [vmem:[%s12123_s26 + $0xc20] ss:$8 sps:$4 sm:$0xff]  }
 0x29c   : > { %7788 = vmatprep.subr.bf16.mxu1 %v10703_v31  ;;  %v7975_v31 = vrot.slane %v12547_v8, 3  ;;  %v10818_v8 = vld [vmem:[%s12123_s26 + $0xe50] ss:$8 sps:$4 sm:$0xff]  }
 0x29e   : > { %7738 = vmatpush2.bf16.msra.mxu0 %v10698_v33  ;;  %v7980_v33 = vrot.slane %v9906_v30, 3  ;;  %v10743_v30 = vld [vmem:[%s12123_s26 + $0xd20] ss:$8 sps:$4 sm:$0xff]  }
 0x29f   : > { %7789 = vmatpush2.bf16.msra.mxu1 %v10701_v42  ;;  %7739 = vmatprep.subr.bf16.mxu0 %v10706_v55  ;;  %v10730_v42 = vld [vmem:[%s12123_s26 + $0xc44] ss:$8 sps:$4 sm:$0xff]   ;;  %v7976_v55 = vsel %vm7970_vm2, %v7974_v27, %v7975_v31  ;;  %v10758_v27 = vld [vmem:[%s12123_s26 + $0xcf0] ss:$8 sps:$4 sm:$0xff]  }
 0x2a0   : > { %7790 = vmatprep.subr.bf16.mxu1 %v10709_v32  ;;  %v7982_v32 = vsel %vm7970_vm2, %v7980_v33, %v7981_v34  ;;  %v10761_v33 = vld [vmem:[%s12123_s26 + $0xdf0] ss:$8 sps:$4 sm:$0xff]  }
 0x2a2   : > { %7740 = vmatpush2.bf16.msra.mxu0 %v10704_v56  ;;  %v10728_v56 = vld [vmem:[%s12123_s26 + $0xc40] ss:$8 sps:$4 sm:$0xff]  }
 0x2a3   : > { %7791 = vmatpush2.bf16.msra.mxu1 %v10707_v57  ;;  %8651 = vmatprep.subr.bf16.mxu0 %v10712_v13  ;;  %v10731_v57 = vld [vmem:[%s12123_s26 + $0xd40] ss:$8 sps:$4 sm:$0xff]   ;;  %v10739_v13 = vld [vmem:[%s12123_s26 + $0xd34] ss:$8 sps:$4 sm:$0xff]  }
 0x2a4   : > { %8702 = vmatprep.subr.bf16.mxu1 %v10715_v48 }
 0x2a5   : > { %v6467_v10 = vpop.f32.mrf.mxu0  ;;  %7742 = vmatmul.mubr.bf16.vlgmr.msra.gmra.mxu0 %v6899_v17 }
 0x2a6   : > { %v6518_v9 = vpop.f32.mrf.mxu1  ;;  %7793 = vmatmul.mubr.bf16.vlgmr.msra.gmra.mxu1 %v6933_v18  ;;  %v6468_v26 = vadd.f32 %v6467_v10, %v12736_v49  ;;  %8652 = vmatpush1.bf16.msra.mxu0 %v10710_v60 }
 0x2a7   : > { %8703 = vmatpush1.bf16.msra.mxu1 %v10713_v62  ;;  %v6469_v23 = vpop.f32.mrf.mxu0  ;;  %8653 = vmatprep.subr.bf16.mxu0 %v10718_v52  ;;  %v10734_v62 = vld [vmem:[%s12123_s26 + $0xc30] ss:$8 sps:$4 sm:$0xff]  }
 0x2a8   : > { %v6520_v24 = vpop.f32.mrf.mxu1  ;;  %8704 = vmatprep.subr.bf16.mxu1 %v10721_v0  ;;  %v12870_v45 = vadd.f32 %v6518_v9, %v6468_v26  ;;  %v6470_v29 = vadd.f32 %v6469_v23, %v12747_v5  ;;  %7751 = vmatprep.mubr.bf16.mxu0 %v12743_v61  ;;  %v10722_v5 = vld [vmem:[%s12123_s26 + $0xc50] ss:$8 sps:$4 sm:$0xff]   ;;  %v10745_v0 = vld [vmem:[%s12123_s26 + $0xd24] ss:$8 sps:$4 sm:$0xff]   ;;  %v10748_v26 = vld [vmem:[%s12123_s26 + $0xc14] ss:$8 sps:$4 sm:$0xff]  }
 0x2a9   : > { %7802 = vmatprep.mubr.bf16.mxu1 %v12745_v6  ;;  %v6471_v49 = vpop.f32.mrf.mxu0  ;;  %v10725_v61 = vld [vmem:[%s12123_s26 + $0xd50] ss:$8 sps:$4 sm:$0xff]  }
 0x2aa   : > { %v6522_v25 = vpop.f32.mrf.mxu1  ;;  %v12877_v35 = vadd.f32 %v6520_v24, %v6470_v29  ;;  %v6472_v37 = vadd.f32 %v6471_v49, %v12752_v16  ;;  %8654 = vmatpush1.bf16.msra.mxu0 %v10716_v36  ;;  %v10737_v52 = vld [vmem:[%s12123_s26 + $0xd30] ss:$8 sps:$4 sm:$0xff]   ;;  %v10751_v36 = vld [vmem:[%s12123_s26 + $0xd14] ss:$8 sps:$4 sm:$0xff]   ;;  %v10754_v24 = vld [vmem:[%s12123_s26 + $0xc04] ss:$8 sps:$4 sm:$0xff]  }
 0x2ab   : > { %8705 = vmatpush1.bf16.msra.mxu1 %v10719_v2  ;;  %v6473_v6 = vpop.f32.mrf.mxu0  ;;  %8655 = vmatprep.subr.bf16.mxu0 %v10724_v40  ;;  %v10746_v2 = vld [vmem:[%s12123_s26 + $0xc10] ss:$8 sps:$4 sm:$0xff]   ;;  %v10757_v40 = vld [vmem:[%s12123_s26 + $0xd04] ss:$8 sps:$4 sm:$0xff]   ;;  %v10755_v29 = vld [vmem:[%s12123_s26 + $0xd00] ss:$8 sps:$4 sm:$0xff]  }
 0x2ac   : > { %v6524_v39 = vpop.f32.mrf.mxu1  ;;  %8706 = vmatprep.subr.bf16.mxu1 %v10727_v28  ;;  %v12884_v44 = vadd.f32 %v6522_v25, %v6472_v37  ;;  %v6474_v47 = vadd.f32 %v6473_v6, %v12763_v7  ;;  %v10749_v23 = vld [vmem:[%s12123_s26 + $0xd10] ss:$8 sps:$4 sm:$0xff]   ;;  %v10752_v28 = vld [vmem:[%s12123_s26 + $0xc00] ss:$8 sps:$4 sm:$0xff]   ;;  %v10760_v49 = vld [vmem:[%s12123_s26 + $0xcf4] ss:$8 sps:$4 sm:$0xff]  }
 0x2ad   : > { %v6477_v51 = vpop.f32.mrf.mxu0  ;;  %7752 = vmatmul.mubr.bf16.gmra.mxu0 %v12835_v3  ;;  %v10763_v25 = vld [vmem:[%s12123_s26 + $0xdf4] ss:$8 sps:$4 sm:$0xff]   ;;  %v10766_v37 = vld [vmem:[%s12123_s26 + $0xce4] ss:$8 sps:$4 sm:$0xff]   ;;  %v10767_v6 = vld [vmem:[%s12123_s26 + $0xde0] ss:$8 sps:$4 sm:$0xff]  }
 0x2ae   : > { %v6528_v16 = vpop.f32.mrf.mxu1  ;;  %7803 = vmatmul.mubr.bf16.gmra.mxu1 %v12837_v58  ;;  %v12895_v46 = vadd.f32 %v6524_v39, %v6474_v47  ;;  %v6478_v7 = vadd.f32 %v6477_v51, %v12769_v38  ;;  %8656 = vmatpush1.bf16.msra.mxu0 %v10722_v5  ;;  %v10736_v58 = vld [vmem:[%s12123_s26 + $0xc34] ss:$8 sps:$4 sm:$0xff]   ;;  %v10769_v5 = vld [vmem:[%s12123_s26 + $0xde4] ss:$8 sps:$4 sm:$0xff]   ;;  %v10773_v47 = vld [vmem:[%s12123_s26 + $0xdd0] ss:$8 sps:$4 sm:$0xff]  }
 0x2af   : > { %8707 = vmatpush1.bf16.msra.mxu1 %v10725_v61  ;;  %v6479_v3 = vpop.f32.mrf.mxu0  ;;  %8657 = vmatprep.subr.bf16.mxu0 %v10730_v42  ;;  %v10764_v61 = vld [vmem:[%s12123_s26 + $0xce0] ss:$8 sps:$4 sm:$0xff]   ;;  %v10772_v39 = vld [vmem:[%s12123_s26 + $0xcd4] ss:$8 sps:$4 sm:$0xff]   ;;  %v10778_v51 = vld [vmem:[%s12123_s26 + $0xcc4] ss:$8 sps:$4 sm:$0xff]  }
 0x2b0   : > { %v6530_v53 = vpop.f32.mrf.mxu1  ;;  %8708 = vmatprep.subr.bf16.mxu1 %v10733_v43  ;;  %v6480_v48 = vadd.f32 %v6479_v3, %v12771_v14  ;;  %v12903_v60 = vadd.f32 %v6528_v16, %v6478_v7  ;;  %8683 = vmatprep.mubr.bf16.mxu0 %v7976_v55  ;;  %v10742_v14 = vld [vmem:[%s12123_s26 + $0xc24] ss:$8 sps:$4 sm:$0xff]   ;;  %v10775_v42 = vld [vmem:[%s12123_s26 + $0xdd4] ss:$8 sps:$4 sm:$0xff]   ;;  %v10770_v43 = vld [vmem:[%s12123_s26 + $0xcd0] ss:$8 sps:$4 sm:$0xff]  }
 0x2b1   : > { %8734 = vmatprep.mubr.bf16.mxu1 %v7982_v32  ;;  %v6481_v38 = vpop.f32.mrf.mxu0  ;;  %v10781_v16 = vld [vmem:[%s12123_s26 + $0xdc4] ss:$8 sps:$4 sm:$0xff]   ;;  %v10776_v55 = vld [vmem:[%s12123_s26 + $0xcc0] ss:$8 sps:$4 sm:$0xff]   ;;  %v10784_v7 = vld [vmem:[%s12123_s26 + $0xcb4] ss:$8 sps:$4 sm:$0xff]  }
 0x2b2   : > { %v6532_v17 = vpop.f32.mrf.mxu1  ;;  %v12905_v18 = vadd.f32 %v6530_v53, %v6480_v48  ;;  %8658 = vmatpush1.bf16.msra.mxu0 %v10728_v56  ;;  %v10779_v32 = vld [vmem:[%s12123_s26 + $0xdc0] ss:$8 sps:$4 sm:$0xff]   ;;  %v10787_v56 = vld [vmem:[%s12123_s26 + $0xdb4] ss:$8 sps:$4 sm:$0xff]   ;;  %v10785_v3 = vld [vmem:[%s12123_s26 + $0xdb0] ss:$8 sps:$4 sm:$0xff]  }
 0x2b3   : > { %8709 = vmatpush1.bf16.msra.mxu1 %v10731_v57  ;;  %8659 = vmatprep.subr.bf16.mxu0 %v10736_v58  ;;  %v6482_v10 = vpop.f32.mrf.mxu0  ;;  %v10782_v57 = vld [vmem:[%s12123_s26 + $0xcb0] ss:$8 sps:$4 sm:$0xff]   ;;  %v10790_v53 = vld [vmem:[%s12123_s26 + $0xca4] ss:$8 sps:$4 sm:$0xff]   ;;  %v10791_v48 = vld [vmem:[%s12123_s26 + $0xda0] ss:$8 sps:$4 sm:$0xff]  }
 0x2b4   : > { %8710 = vmatprep.subr.bf16.mxu1 %v10739_v13  ;;  %v6533_v9 = vpop.f32.mrf.mxu1  ;;  %v10793_v58 = vld [vmem:[%s12123_s26 + $0xda4] ss:$8 sps:$4 sm:$0xff]   ;;  %v10788_v13 = vld [vmem:[%s12123_s26 + $0xca0] ss:$8 sps:$4 sm:$0xff]   ;;  %v10796_v38 = vld [vmem:[%s12123_s26 + $0xc94] ss:$8 sps:$4 sm:$0xff]  }
 0x2b5   : > { %v10799_v17 = vld [vmem:[%s12123_s26 + $0xd94] ss:$8 sps:$4 sm:$0xff]   ;;  %v10802_v10 = vld [vmem:[%s12123_s26 + $0xc84] ss:$8 sps:$4 sm:$0xff]  }
 0x2b6   : > { %8660 = vmatpush1.bf16.msra.mxu0 %v10734_v62  ;;  %v10794_v62 = vld [vmem:[%s12123_s26 + $0xc90] ss:$8 sps:$4 sm:$0xff]   ;;  %v10805_v9 = vld [vmem:[%s12123_s26 + $0xd84] ss:$8 sps:$4 sm:$0xff]  }
 0x2b7   : > { %8711 = vmatpush1.bf16.msra.mxu1 %v10737_v52  ;;  %8661 = vmatprep.subr.bf16.mxu0 %v10742_v14  ;;  %v10797_v52 = vld [vmem:[%s12123_s26 + $0xd90] ss:$8 sps:$4 sm:$0xff]   ;;  %v9903_v14 = vcombine.low %v12848_v4, %v12856_v59  ;;  %v7972_v4 = vrot.slane %v12657_v15, 3  ;;  %v10808_v59 = vld [vmem:[%s12123_s26 + $0xe74] ss:$8 sps:$4 sm:$0xff]  }
 0x2b8   : > { %8712 = vmatprep.subr.bf16.mxu1 %v10745_v0  ;;  %v9905_v0 = vcombine.low %v12851_v21, %v12861_v19  ;;  %v7978_v21 = vrot.slane %v12665_v20, 3  ;;  %v10811_v19 = vld [vmem:[%s12123_s26 + $0xf74] ss:$8 sps:$4 sm:$0xff]   ;;  %v10814_v20 = vld [vmem:[%s12123_s26 + $0xe64] ss:$8 sps:$4 sm:$0xff]  }
 0x2b9   : > { %v12969_v15 = vld [vmem:[%s12173_s6 + $0x18] sm:$0x88] }
 0x2ba   : > { %8662 = vmatpush1.bf16.msra.mxu0 %v10740_v63  ;;  %v10800_v63 = vld [vmem:[%s12123_s26 + $0xc80] ss:$8 sps:$4 sm:$0xff]  }
 0x2bb   : > { %8713 = vmatpush1.bf16.msra.mxu1 %v10743_v30  ;;  %8663 = vmatprep.subr.bf16.mxu0 %v10748_v26  ;;  %v10803_v30 = vld [vmem:[%s12123_s26 + $0xd80] ss:$8 sps:$4 sm:$0xff]   ;;  %v7971_v26 = vrot.slane %v9903_v14, 3 }
 0x2bc   : > { %8714 = vmatprep.subr.bf16.mxu1 %v10751_v36  ;;  %v7977_v36 = vrot.slane %v9905_v0, 3  ;;  %v10832_v0 = vld [vmem:[%s12123_s26 + $0xe34] ss:$8 sps:$4 sm:$0xff]  }
 0x2be   : > { %8664 = vmatpush1.bf16.msra.mxu0 %v10746_v2  ;;  %v10806_v2 = vld [vmem:[%s12123_s26 + $0xe70] ss:$8 sps:$4 sm:$0xff]  }
 0x2bf   : > { %8715 = vmatpush1.bf16.msra.mxu1 %v10749_v23  ;;  %8665 = vmatprep.subr.bf16.mxu0 %v10754_v24  ;;  %v7973_v23 = vsel %vm7970_vm2, %v7971_v26, %v7972_v4  ;;  %v7979_v24 = vsel %vm7970_vm2, %v7977_v36, %v7978_v21  ;;  %v10830_v36 = vld [vmem:[%s12123_s26 + $0xe30] ss:$8 sps:$4 sm:$0xff]  }
 0x2c0   : > { %8716 = vmatprep.subr.bf16.mxu1 %v10757_v40  ;;  %v10809_v40 = vld [vmem:[%s12123_s26 + $0xf70] ss:$8 sps:$4 sm:$0xff]  }
 0x2c2   : > { %8666 = vmatpush1.bf16.msra.mxu0 %v10752_v28  ;;  %v12966_v28 = vld [vmem:[%s12173_s6 + $0x10] sm:$0x88] }
 0x2c3   : > { %8717 = vmatpush1.bf16.msra.mxu1 %v10755_v29  ;;  %8667 = vmatprep.subr.bf16.mxu0 %v10760_v49  ;;  %v10817_v29 = vld [vmem:[%s12123_s26 + $0xf64] ss:$8 sps:$4 sm:$0xff]  }
 0x2c4   : > { %8718 = vmatprep.subr.bf16.mxu1 %v10763_v25 }
 0x2c6   : > { %8668 = vmatpush2.bf16.msra.mxu0 %v10758_v27  ;;  %v9908_v27 = vcombine.high %v12966_v28, %v12694_v50 }
 0x2c7   : > { %8719 = vmatpush2.bf16.msra.mxu1 %v10761_v33  ;;  %8669 = vmatprep.subr.bf16.mxu0 %v10766_v37  ;;  %v9910_v33 = vcombine.high %v12969_v15, %v12703_v12 }
 0x2c8   : > { %8720 = vmatprep.subr.bf16.mxu1 %v10769_v5  ;;  %v10812_v5 = vld [vmem:[%s12123_s26 + $0xe60] ss:$8 sps:$4 sm:$0xff]  }
 0x2ca   : > { %8670 = vmatpush2.bf16.msra.mxu0 %v10764_v61  ;;  %v10815_v61 = vld [vmem:[%s12123_s26 + $0xf60] ss:$8 sps:$4 sm:$0xff]  }
 0x2cb   : > { %8721 = vmatpush2.bf16.msra.mxu1 %v10767_v6  ;;  %8671 = vmatprep.subr.bf16.mxu0 %v10772_v39 }
 0x2cc   : > { %8722 = vmatprep.subr.bf16.mxu1 %v10775_v42  ;;  %v10820_v42 = vld [vmem:[%s12123_s26 + $0xe54] ss:$8 sps:$4 sm:$0xff]  }
 0x2ce   : > { %8672 = vmatpush2.bf16.msra.mxu0 %v10770_v43  ;;  %v10823_v43 = vld [vmem:[%s12123_s26 + $0xf54] ss:$8 sps:$4 sm:$0xff]  }
 0x2cf   : > { %8723 = vmatpush2.bf16.msra.mxu1 %v10773_v47  ;;  %8673 = vmatprep.subr.bf16.mxu0 %v10778_v51  ;;  %v7986_v51 = vrot.slane %v9908_v27, 3  ;;  %v10848_v27 = vld [vmem:[%s12123_s26 + $0xe00] ss:$8 sps:$4 sm:$0xff]  }
 0x2d0   : > { %8724 = vmatprep.subr.bf16.mxu1 %v10781_v16  ;;  %v7987_v16 = vrot.slane %v12700_v11, 3 }
 0x2d2   : > { %8674 = vmatpush2.bf16.msra.mxu0 %v10776_v55  ;;  %v7992_v55 = vrot.slane %v9910_v33, 3  ;;  %v10851_v33 = vld [vmem:[%s12123_s26 + $0xf00] ss:$8 sps:$4 sm:$0xff]  }
 0x2d3   : > { %8725 = vmatpush2.bf16.msra.mxu1 %v10779_v32  ;;  %8675 = vmatprep.subr.bf16.mxu0 %v10784_v7  ;;  %v7993_v32 = vrot.slane %v12709_v41, 3 }
 0x2d4   : > { %8726 = vmatprep.subr.bf16.mxu1 %v10787_v56  ;;  %v10826_v56 = vld [vmem:[%s12123_s26 + $0xe44] ss:$8 sps:$4 sm:$0xff]  }
 0x2d6   : > { %8676 = vmatpush2.bf16.msra.mxu0 %v10782_v57  ;;  %v10829_v57 = vld [vmem:[%s12123_s26 + $0xf44] ss:$8 sps:$4 sm:$0xff]  }
 0x2d7   : > { %8727 = vmatpush2.bf16.msra.mxu1 %v10785_v3  ;;  %8677 = vmatprep.subr.bf16.mxu0 %v10790_v53 }
 0x2d8   : > { %8728 = vmatprep.subr.bf16.mxu1 %v10793_v58 }
 0x2da   : > { %8678 = vmatpush2.bf16.msra.mxu0 %v10788_v13 }
 0x2db   : > { %8729 = vmatpush2.bf16.msra.mxu1 %v10791_v48  ;;  %8679 = vmatprep.subr.bf16.mxu0 %v10796_v38  ;;  %v7994_v48 = vsel %vm7970_vm2, %v7992_v55, %v7993_v32  ;;  %v10869_v55 = vld [vmem:[%s12123_s26 + $0xfd0] ss:$8 sps:$4 sm:$0xff]  }
 0x2dc   : > { %8730 = vmatprep.subr.bf16.mxu1 %v10799_v17 }
 0x2de   : > { %8680 = vmatpush2.bf16.msra.mxu0 %v10794_v62  ;;  %v10827_v62 = vld [vmem:[%s12123_s26 + $0xf40] ss:$8 sps:$4 sm:$0xff]  }
 0x2df   : > { %8731 = vmatpush2.bf16.msra.mxu1 %v10797_v52  ;;  %8681 = vmatprep.subr.bf16.mxu0 %v10802_v10  ;;  %v10835_v10 = vld [vmem:[%s12123_s26 + $0xf34] ss:$8 sps:$4 sm:$0xff]  }
 0x2e0   : > { %8732 = vmatprep.subr.bf16.mxu1 %v10805_v9 }
 0x2e2   : > { %8682 = vmatpush2.bf16.msra.mxu0 %v10800_v63 }
 0x2e3   : > { %8733 = vmatpush2.bf16.msra.mxu1 %v10803_v30  ;;  %8753 = vmatprep.subr.bf16.mxu0 %v10808_v59 }
 0x2e4   : > { %8804 = vmatprep.subr.bf16.mxu1 %v10811_v19 }
 0x2e5   : > { %v6569_v49 = vpop.f32.mrf.mxu0  ;;  %8684 = vmatmul.mubr.bf16.vlgmr.msra.gmra.mxu0 %v7973_v23  ;;  %v10839_v23 = vld [vmem:[%s12123_s26 + $0xf20] ss:$8 sps:$4 sm:$0xff]  }
 0x2e6   : > { %v6620_v25 = vpop.f32.mrf.mxu1  ;;  %8735 = vmatmul.mubr.bf16.vlgmr.msra.gmra.mxu1 %v7979_v24  ;;  %v6570_v37 = vadd.f32 %v6569_v49, %v12870_v45  ;;  %8754 = vmatpush1.bf16.msra.mxu0 %v10806_v2  ;;  %v10836_v2 = vld [vmem:[%s12123_s26 + $0xe20] ss:$8 sps:$4 sm:$0xff]   ;;  %v10844_v24 = vld [vmem:[%s12123_s26 + $0xe14] ss:$8 sps:$4 sm:$0xff]   ;;  %v10850_v49 = vld [vmem:[%s12123_s26 + $0xe04] ss:$8 sps:$4 sm:$0xff]  }
 0x2e7   : > { %8805 = vmatpush1.bf16.msra.mxu1 %v10809_v40  ;;  %v6571_v6 = vpop.f32.mrf.mxu0  ;;  %8755 = vmatprep.subr.bf16.mxu0 %v10814_v20  ;;  %v10847_v40 = vld [vmem:[%s12123_s26 + $0xf14] ss:$8 sps:$4 sm:$0xff]   ;;  %v10842_v20 = vld [vmem:[%s12123_s26 + $0xe10] ss:$8 sps:$4 sm:$0xff]  }
 0x2e8   : > { %v6622_v39 = vpop.f32.mrf.mxu1  ;;  %8806 = vmatprep.subr.bf16.mxu1 %v10817_v29  ;;  %v12982_v47 = vadd.f32 %v6620_v25, %v6570_v37  ;;  %v6572_v50 = vadd.f32 %v6571_v6, %v12877_v35  ;;  %8693 = vmatprep.mubr.bf16.mxu0 %v7975_v31  ;;  %v10821_v31 = vld [vmem:[%s12123_s26 + $0xf50] ss:$8 sps:$4 sm:$0xff]   ;;  %v10853_v25 = vld [vmem:[%s12123_s26 + $0xf04] ss:$8 sps:$4 sm:$0xff]   ;;  %v10856_v37 = vld [vmem:[%s12123_s26 + $0xef4] ss:$8 sps:$4 sm:$0xff]  }
 0x2e9   : > { %8744 = vmatprep.mubr.bf16.mxu1 %v7981_v34  ;;  %v6573_v12 = vpop.f32.mrf.mxu0  ;;  %v10845_v29 = vld [vmem:[%s12123_s26 + $0xf10] ss:$8 sps:$4 sm:$0xff]  }
 0x2ea   : > { %v6624_v45 = vpop.f32.mrf.mxu1  ;;  %v12991_v7 = vadd.f32 %v6622_v39, %v6572_v50  ;;  %v6574_v35 = vadd.f32 %v6573_v12, %v12884_v44  ;;  %8756 = vmatpush1.bf16.msra.mxu0 %v10812_v5  ;;  %v7988_v44 = vsel %vm7970_vm2, %v7986_v51, %v7987_v16  ;;  %v10859_v5 = vld [vmem:[%s12123_s26 + $0xff4] ss:$8 sps:$4 sm:$0xff]   ;;  %v10857_v6 = vld [vmem:[%s12123_s26 + $0xff0] ss:$8 sps:$4 sm:$0xff]   ;;  %v10862_v39 = vld [vmem:[%s12123_s26 + $0xee4] ss:$8 sps:$4 sm:$0xff]  }
 0x2eb   : > { %8807 = vmatpush1.bf16.msra.mxu1 %v10815_v61  ;;  %v6575_v54 = vpop.f32.mrf.mxu0  ;;  %8757 = vmatprep.subr.bf16.mxu0 %v10820_v42  ;;  %v10854_v61 = vld [vmem:[%s12123_s26 + $0xef0] ss:$8 sps:$4 sm:$0xff]   ;;  %v10865_v42 = vld [vmem:[%s12123_s26 + $0xfe4] ss:$8 sps:$4 sm:$0xff]   ;;  %v10863_v50 = vld [vmem:[%s12123_s26 + $0xfe0] ss:$8 sps:$4 sm:$0xff]  }
 0x2ec   : > { %v6626_v34 = vpop.f32.mrf.mxu1  ;;  %8808 = vmatprep.subr.bf16.mxu1 %v10823_v43  ;;  %v12998_v3 = vadd.f32 %v6624_v45, %v6574_v35  ;;  %v6576_v53 = vadd.f32 %v6575_v54, %v12895_v46  ;;  %v10824_v46 = vld [vmem:[%s12123_s26 + $0xe40] ss:$8 sps:$4 sm:$0xff]   ;;  %v10868_v12 = vld [vmem:[%s12123_s26 + $0xed4] ss:$8 sps:$4 sm:$0xff]   ;;  %v10866_v51 = vld [vmem:[%s12123_s26 + $0xed0] ss:$8 sps:$4 sm:$0xff]  }
 0x2ed   : > { %v6579_v58 = vpop.f32.mrf.mxu0  ;;  %8694 = vmatmul.mubr.bf16.gmra.mxu0 %v7972_v4  ;;  %v10833_v4 = vld [vmem:[%s12123_s26 + $0xf30] ss:$8 sps:$4 sm:$0xff]   ;;  %v10860_v43 = vld [vmem:[%s12123_s26 + $0xee0] ss:$8 sps:$4 sm:$0xff]   ;;  %v10871_v45 = vld [vmem:[%s12123_s26 + $0xfd4] ss:$8 sps:$4 sm:$0xff]  }
 0x2ee   : > { %v6630_v13 = vpop.f32.mrf.mxu1  ;;  %8745 = vmatmul.mubr.bf16.gmra.mxu1 %v7978_v21  ;;  %v13007_v38 = vadd.f32 %v6626_v34, %v6576_v53  ;;  %v6580_v17 = vadd.f32 %v6579_v58, %v12903_v60  ;;  %8758 = vmatpush1.bf16.msra.mxu0 %v10818_v8  ;;  %v10841_v21 = vld [vmem:[%s12123_s26 + $0xf24] ss:$8 sps:$4 sm:$0xff]   ;;  %v10875_v54 = vld [vmem:[%s12123_s26 + $0xfc0] ss:$8 sps:$4 sm:$0xff]   ;;  %v10880_v34 = vld [vmem:[%s12123_s26 + $0xeb4] ss:$8 sps:$4 sm:$0xff]  }
 0x2ef   : > { %8809 = vmatpush1.bf16.msra.mxu1 %v10821_v31  ;;  %v6581_v52 = vpop.f32.mrf.mxu0  ;;  %8759 = vmatprep.subr.bf16.mxu0 %v10826_v56  ;;  %v10874_v35 = vld [vmem:[%s12123_s26 + $0xec4] ss:$8 sps:$4 sm:$0xff]   ;;  %v10872_v31 = vld [vmem:[%s12123_s26 + $0xec0] ss:$8 sps:$4 sm:$0xff]   ;;  %v10883_v56 = vld [vmem:[%s12123_s26 + $0xfb4] ss:$8 sps:$4 sm:$0xff]  }
 0x2f0   : > { %v6632_v14 = vpop.f32.mrf.mxu1  ;;  %8810 = vmatprep.subr.bf16.mxu1 %v10829_v57  ;;  %v6582_v9 = vadd.f32 %v6581_v52, %v12905_v18  ;;  %v13015_v63 = vadd.f32 %v6630_v13, %v6580_v17  ;;  %8785 = vmatprep.mubr.bf16.mxu0 %v7988_v44  ;;  %v10838_v18 = vld [vmem:[%s12123_s26 + $0xe24] ss:$8 sps:$4 sm:$0xff]   ;;  %v10878_v57 = vld [vmem:[%s12123_s26 + $0xeb0] ss:$8 sps:$4 sm:$0xff]   ;;  %v10884_v44 = vld [vmem:[%s12123_s26 + $0xea0] ss:$8 sps:$4 sm:$0xff]  }
 0x2f1   : > { %8836 = vmatprep.mubr.bf16.mxu1 %v7994_v48  ;;  %v6583_v60 = vpop.f32.mrf.mxu0  ;;  %v10877_v8 = vld [vmem:[%s12123_s26 + $0xfc4] ss:$8 sps:$4 sm:$0xff]   ;;  %v10881_v53 = vld [vmem:[%s12123_s26 + $0xfb0] ss:$8 sps:$4 sm:$0xff]   ;;  %v10887_v48 = vld [vmem:[%s12123_s26 + $0xfa0] ss:$8 sps:$4 sm:$0xff]  }
 0x2f2   : > { %v6634_v30 = vpop.f32.mrf.mxu1  ;;  %v13017_v26 = vadd.f32 %v6632_v14, %v6582_v9  ;;  %8760 = vmatpush1.bf16.msra.mxu0 %v10824_v46  ;;  %v10886_v58 = vld [vmem:[%s12123_s26 + $0xea4] ss:$8 sps:$4 sm:$0xff]   ;;  %v10892_v17 = vld [vmem:[%s12123_s26 + $0xe94] ss:$8 sps:$4 sm:$0xff]   ;;  %v10893_v52 = vld [vmem:[%s12123_s26 + $0xf90] ss:$8 sps:$4 sm:$0xff]  }
 0x2f3   : > { %8811 = vmatpush1.bf16.msra.mxu1 %v10827_v62  ;;  %8761 = vmatprep.subr.bf16.mxu0 %v10832_v0  ;;  %v6584_v59 = vpop.f32.mrf.mxu0  ;;  %v10889_v13 = vld [vmem:[%s12123_s26 + $0xfa4] ss:$8 sps:$4 sm:$0xff]   ;;  %v10895_v46 = vld [vmem:[%s12123_s26 + $0xf94] ss:$8 sps:$4 sm:$0xff]   ;;  %v10890_v62 = vld [vmem:[%s12123_s26 + $0xe90] ss:$8 sps:$4 sm:$0xff]  }
 0x2f4   : > { %8812 = vmatprep.subr.bf16.mxu1 %v10835_v10  ;;  %v6635_v19 = vpop.f32.mrf.mxu1  ;;  %v10912_v14 = vld [vmem:[%s12173_s6 + $0x30] sm:$0xff]  ;;  %v10913_v10 = vld [vmem:[%s12173_s6 + $0x38] sm:$0xff]  ;;  %v10898_v60 = vld [vmem:[%s12123_s26 + $0xe84] ss:$8 sps:$4 sm:$0xff]   ;;  %v7984_v59 = vrot.slane %v12809_v1, 3 }
 0x2f5   : > { %v9907_v0 = vcombine.low %v12966_v28, %v10912_v14  ;;  %v9909_v9 = vcombine.low %v12969_v15, %v10913_v10  ;;  %v10901_v30 = vld [vmem:[%s12123_s26 + $0xf84] ss:$8 sps:$4 sm:$0xff]   ;;  %v7990_v19 = vrot.slane %v12817_v22, 3 }
 0x2f6   : > { %8762 = vmatpush1.bf16.msra.mxu0 %v10830_v36  ;;  %v10896_v36 = vld [vmem:[%s12123_s26 + $0xe80] ss:$8 sps:$4 sm:$0xff]  }
 0x2f7   : > { %8813 = vmatpush1.bf16.msra.mxu1 %v10833_v4  ;;  %8763 = vmatprep.subr.bf16.mxu0 %v10838_v18  ;;  %v10899_v4 = vld [vmem:[%s12123_s26 + $0xf80] ss:$8 sps:$4 sm:$0xff]   ;;  %v7983_v18 = vrot.slane %v9907_v0, 3  ;;  %s10044_s26 = sshll.u32 (%p11074_p9), %s8929_s25, 2 }
 0x2f8   : > { %8814 = vmatprep.subr.bf16.mxu1 %v10841_v21  ;;  %v7989_v21 = vrot.slane %v9909_v9, 3  ;;  %s8931_s28 = scalar_lea.vmem (%p11074_p9), %s13147_s3, %s10044_s26 }
 0x2f9   : > { %v7985_v28 = vsel %vm7970_vm2, %v7983_v18, %v7984_v59 }
 0x2fa   : > { %8764 = vmatpush1.bf16.msra.mxu0 %v10836_v2  ;;  %v7991_v15 = vsel %vm7970_vm2, %v7989_v21, %v7990_v19 }
 0x2fb   : > { %8815 = vmatpush1.bf16.msra.mxu1 %v10839_v23  ;;  %8765 = vmatprep.subr.bf16.mxu0 %v10844_v24 }
 0x2fc   : > { %8816 = vmatprep.subr.bf16.mxu1 %v10847_v40 }
 0x2fe   : > { %8766 = vmatpush1.bf16.msra.mxu0 %v10842_v20 }
 0x2ff   : > { %8817 = vmatpush1.bf16.msra.mxu1 %v10845_v29  ;;  %8767 = vmatprep.subr.bf16.mxu0 %v10850_v49 }
 0x300   : > { %8818 = vmatprep.subr.bf16.mxu1 %v10853_v25 }
 0x302   : > { %8768 = vmatpush1.bf16.msra.mxu0 %v10848_v27 }
 0x303   : > { %8819 = vmatpush1.bf16.msra.mxu1 %v10851_v33  ;;  %8769 = vmatprep.subr.bf16.mxu0 %v10856_v37 }
 0x304   : > { %8820 = vmatprep.subr.bf16.mxu1 %v10859_v5 }
 0x306   : > { %8770 = vmatpush2.bf16.msra.mxu0 %v10854_v61 }
 0x307   : > { %8821 = vmatpush2.bf16.msra.mxu1 %v10857_v6  ;;  %8771 = vmatprep.subr.bf16.mxu0 %v10862_v39 }
 0x308   : > { %8822 = vmatprep.subr.bf16.mxu1 %v10865_v42 }
 0x30a   : > { %8772 = vmatpush2.bf16.msra.mxu0 %v10860_v43 }
 0x30b   : > { %8823 = vmatpush2.bf16.msra.mxu1 %v10863_v50  ;;  %8773 = vmatprep.subr.bf16.mxu0 %v10868_v12 }
 0x30c   : > { %8824 = vmatprep.subr.bf16.mxu1 %v10871_v45 }
 0x30e   : > { %8774 = vmatpush2.bf16.msra.mxu0 %v10866_v51 }
 0x30f   : > { %8825 = vmatpush2.bf16.msra.mxu1 %v10869_v55  ;;  %8775 = vmatprep.subr.bf16.mxu0 %v10874_v35 }
 0x310   : > { %8826 = vmatprep.subr.bf16.mxu1 %v10877_v8 }
 0x312   : > { %8776 = vmatpush2.bf16.msra.mxu0 %v10872_v31 }
 0x313   : > { %8827 = vmatpush2.bf16.msra.mxu1 %v10875_v54  ;;  %8777 = vmatprep.subr.bf16.mxu0 %v10880_v34 }
 0x314   : > { %8828 = vmatprep.subr.bf16.mxu1 %v10883_v56 }
 0x316   : > { %8778 = vmatpush2.bf16.msra.mxu0 %v10878_v57 }
 0x317   : > { %8829 = vmatpush2.bf16.msra.mxu1 %v10881_v53  ;;  %8779 = vmatprep.subr.bf16.mxu0 %v10886_v58 }
 0x318   : > { %8830 = vmatprep.subr.bf16.mxu1 %v10889_v13 }
 0x31a   : > { %8780 = vmatpush2.bf16.msra.mxu0 %v10884_v44 }
 0x31b   : > { %8831 = vmatpush2.bf16.msra.mxu1 %v10887_v48  ;;  %8781 = vmatprep.subr.bf16.mxu0 %v10892_v17 }
 0x31c   : > { %8832 = vmatprep.subr.bf16.mxu1 %v10895_v46 }
 0x31e   : > { %8782 = vmatpush2.bf16.msra.mxu0 %v10890_v62 }
 0x31f   : > { %8833 = vmatpush2.bf16.msra.mxu1 %v10893_v52  ;;  %8783 = vmatprep.subr.bf16.mxu0 %v10898_v60 }
 0x320   : > { %8834 = vmatprep.subr.bf16.mxu1 %v10901_v30 }
 0x322   : > { %8784 = vmatpush2.bf16.msra.mxu0 %v10896_v36 }
 0x323   : > { %8835 = vmatpush2.bf16.msra.mxu1 %v10899_v4 }
 0x325   : > { %v7641_v2 = vpop.f32.mrf.mxu0  ;;  %8786 = vmatmul.mubr.bf16.vlgmr.msra.gmra.mxu0 %v7985_v28 }
 0x326   : > { %v7692_v23 = vpop.f32.mrf.mxu1  ;;  %8837 = vmatmul.mubr.bf16.vlgmr.msra.gmra.mxu1 %v7991_v15  ;;  %8795 = vmatprep.mubr.bf16.mxu0 %v7987_v16 }
 0x327   : > { %v7693_v24 = vadd.f32 %v7692_v23, %v7641_v2  ;;  %8846 = vmatprep.mubr.bf16.mxu1 %v7993_v32  ;;  %v7643_v1 = vpop.f32.mrf.mxu0 }
 0x328   : > { %v7694_v22 = vpop.f32.mrf.mxu1 }
 0x329   : > { %v7695_v40 = vadd.f32 %v7694_v22, %v7643_v1  ;;  %v7645_v20 = vpop.f32.mrf.mxu0 }
 0x32a   : > { %v7696_v29 = vpop.f32.mrf.mxu1 }
 0x32b   : > { %v7697_v49 = vadd.f32 %v7696_v29, %v7645_v20  ;;  %v7647_v25 = vpop.f32.mrf.mxu0 }
 0x32c   : > { %v7698_v27 = vpop.f32.mrf.mxu1 }
 0x32d   : > { %v7699_v33 = vadd.f32 %v7698_v27, %v7647_v25  ;;  %8796 = vmatmul.mubr.bf16.gmra.mxu0 %v7984_v59  ;;  %v7651_v37 = vpop.f32.mrf.mxu0 }
 0x32e   : > { %8847 = vmatmul.mubr.bf16.gmra.mxu1 %v7990_v19  ;;  %v7702_v5 = vpop.f32.mrf.mxu1 }
 0x32f   : > { %v7703_v61 = vadd.f32 %v7702_v5, %v7651_v37  ;;  %v7653_v6 = vpop.f32.mrf.mxu0 }
 0x330   : > { %v7704_v11 = vpop.f32.mrf.mxu1 }
 0x331   : > { %v7705_v16 = vadd.f32 %v7704_v11, %v7653_v6  ;;  %v7655_v39 = vpop.f32.mrf.mxu0 }
 0x332   : > { %v7706_v41 = vpop.f32.mrf.mxu1 }
 0x333   : > { %v7656_v32 = vpop.f32.mrf.mxu0 }
 0x334   : > { %v7707_v42 = vpop.f32.mrf.mxu1 }
 0x365   : > { %v7743_v43 = vpop.f32.mrf.mxu0 }
 0x366   : > { %v7794_v50 = vpop.f32.mrf.mxu1  ;;  %v7744_v12 = vadd.f32 %v7743_v43, %v7693_v24 }
 0x367   : > { %v7745_v45 = vpop.f32.mrf.mxu0 }
 0x368   : > { %v7796_v51 = vpop.f32.mrf.mxu1  ;;  %v7795_v55 = vadd.f32 %v7794_v50, %v7744_v12  ;;  %v7746_v35 = vadd.f32 %v7745_v45, %v7695_v40  ;;  %v4394_v45 = vld [vmem:[%s4390_s11] sm:$0x3] }
 0x369   : > { %v7747_v8 = vpop.f32.mrf.mxu0 }
 0x36a   : > { %v7798_v31 = vpop.f32.mrf.mxu1  ;;  %v13078_v54 = vadd.f32 %v7795_v55, %v12982_v47  ;;  %v7797_v34 = vadd.f32 %v7796_v51, %v7746_v35  ;;  %v7748_v56 = vadd.f32 %v7747_v8, %v7697_v49 }
 0x36b   : > { %v7749_v57 = vpop.f32.mrf.mxu0 }
 0x36c   : > { %v7800_v53 = vpop.f32.mrf.mxu1  ;;  %v13081_v58 = vadd.f32 %v7797_v34, %v12991_v7  ;;  %v7799_v13 = vadd.f32 %v7798_v31, %v7748_v56  ;;  %v7750_v44 = vadd.f32 %v7749_v57, %v7699_v33  ;;  %v8880_v33 = vlaneseq }
 0x36d   : > { %v7753_v48 = vpop.f32.mrf.mxu0 }
 0x36e   : > { %v7804_v17 = vpop.f32.mrf.mxu1  ;;  %v13084_v46 = vadd.f32 %v7799_v13, %v12998_v3  ;;  %v7801_v62 = vadd.f32 %v7800_v53, %v7750_v44  ;;  %v7754_v52 = vadd.f32 %v7753_v48, %v7703_v61  ;;  %v8881_v61 = vshrl.u32 %v8880_v33, 7 }
 0x36f   : > { %v7755_v14 = vpop.f32.mrf.mxu0 }
 0x370   : > { %v7806_v0 = vpop.f32.mrf.mxu1  ;;  %v13087_v47 = vadd.f32 %v7801_v62, %v13007_v38  ;;  %v7756_v10 = vadd.f32 %v7755_v14, %v7705_v16  ;;  %v7805_v9 = vadd.f32 %v7804_v17, %v7754_v52  ;;  %v8882_v42 = vsub.s32 0, %v8881_v61 }
 0x371   : > { %v7757_v60 = vpop.f32.mrf.mxu0  ;;  %v8886_v43 = vsub.s32 1, %v8881_v61 }
 0x372   : > { %v7808_v30 = vpop.f32.mrf.mxu1  ;;  %v13090_v7 = vadd.f32 %v7805_v9, %v13015_v63  ;;  %v7807_v36 = vadd.f32 %v7806_v0, %v7756_v10  ;;  %v8883_v44 = vrot.slane %v4394_v45, %v8882_v42 }
 0x373   : > { %v7758_v4 = vpop.f32.mrf.mxu0  ;;  %v8887_v48 = vrot.slane %v4394_v45, %v8886_v43 }
 0x374   : > { %v7809_v18 = vpop.f32.mrf.mxu1  ;;  %v13093_v3 = vadd.f32 %v7807_v36, %v13017_v26 }
 0x3a5   : > { %v8685_v21 = vpop.f32.mrf.mxu0 }
 0x3a6   : > { %v8736_v59 = vpop.f32.mrf.mxu1 }
 0x3a7   : > { %v8737_v19 = vadd.f32 %v8736_v59, %v8685_v21  ;;  %v8687_v28 = vpop.f32.mrf.mxu0 }
 0x3a8   : > { %v8738_v38 = vpop.f32.mrf.mxu1 }
 0x3a9   : > { %v8689_v15 = vpop.f32.mrf.mxu0  ;;  %v8739_v6 = vadd.f32 %v8738_v38, %v8687_v28 }
 0x3aa   : > { %v8740_v2 = vpop.f32.mrf.mxu1 }
 0x3ab   : > { %v8741_v23 = vadd.f32 %v8740_v2, %v8689_v15  ;;  %v8691_v24 = vpop.f32.mrf.mxu0 }
 0x3ac   : > { %v8742_v1 = vpop.f32.mrf.mxu1 }
 0x3ad   : > { %v8695_v22 = vpop.f32.mrf.mxu0  ;;  %v8743_v8 = vadd.f32 %v8742_v1, %v8691_v24 }
 0x3ae   : > { %v8746_v63 = vpop.f32.mrf.mxu1 }
 0x3af   : > { %v8747_v40 = vadd.f32 %v8746_v63, %v8695_v22  ;;  %v8697_v20 = vpop.f32.mrf.mxu0 }
 0x3b0   : > { %v8748_v29 = vpop.f32.mrf.mxu1 }
 0x3b1   : > { %v8699_v49 = vpop.f32.mrf.mxu0  ;;  %v8749_v13 = vadd.f32 %v8748_v29, %v8697_v20 }
 0x3b2   : > { %v8750_v25 = vpop.f32.mrf.mxu1 }
 0x3b3   : > { %v8700_v26 = vpop.f32.mrf.mxu0 }
 0x3b4   : > { %v8751_v27 = vpop.f32.mrf.mxu1 }
 0x3e5   : > { %v8787_v37 = vpop.f32.mrf.mxu0 }
 0x3e6   : > { %v8838_v5 = vpop.f32.mrf.mxu1  ;;  %v8788_v11 = vadd.f32 %v8787_v37, %v8737_v19 }
 0x3e7   : > { %v8789_v16 = vpop.f32.mrf.mxu0 }
 0x3e8   : > { %v8840_v39 = vpop.f32.mrf.mxu1  ;;  %v8839_v41 = vadd.f32 %v8838_v5, %v8788_v11  ;;  %v8790_v32 = vadd.f32 %v8789_v16, %v8739_v6 }
 0x3e9   : > { %v8791_v50 = vpop.f32.mrf.mxu0 }
 0x3ea   : > { %v8842_v12 = vpop.f32.mrf.mxu1  ;;  %v8855_v51 = vadd.f32 %v8839_v41, %v13078_v54  ;;  %v8841_v55 = vadd.f32 %v8840_v39, %v8790_v32  ;;  %v8792_v35 = vadd.f32 %v8791_v50, %v8741_v23 }
 0x3eb   : > { %v8793_v31 = vpop.f32.mrf.mxu0 }
 0x3ec   : > { %v8844_v34 = vpop.f32.mrf.mxu1  ;;  %vm8861_vm3 = vcmp.ge.f32.partialorder %v8855_v51, 0.0  ;;  %v8867_v56 = vmul.f32 0.2, %v8855_v51  ;;  %v8856_v57 = vadd.f32 %v8841_v55, %v13081_v58  ;;  %v8843_v53 = vadd.f32 %v8842_v12, %v8792_v35 }
 0x3ed   : > { %v8794_v17 = vadd.f32 %v8793_v31, %v8743_v8  ;;  %v8797_v62 = vpop.f32.mrf.mxu0 }
 0x3ee   : > { %v8848_v52 = vpop.f32.mrf.mxu1  ;;  %v8873_v14 = vsel %vm8861_vm3, %v8855_v51, %v8867_v56  ;;  %vm8862_vm4 = vcmp.ge.f32.partialorder %v8856_v57, 0.0  ;;  %v8868_v54 = vmul.f32 0.2, %v8856_v57  ;;  %v8857_v0 = vadd.f32 %v8843_v53, %v13084_v46 }
 0x3ef   : > { %v8845_v10 = vadd.f32 %v8844_v34, %v8794_v17  ;;  %v8798_v9 = vadd.f32 %v8797_v62, %v8747_v40  ;;  %v8799_v60 = vpop.f32.mrf.mxu0  ;;  %v8890_v18 = vadd.f32 %v8883_v44, %v8873_v14 }
 0x3f0   : > { %v8850_v30 = vpop.f32.mrf.mxu1  ;;  %v8874_v36 = vsel %vm8862_vm4, %v8856_v57, %v8868_v54  ;;  %vm8863_vm5 = vcmp.ge.f32.partialorder %v8857_v0, 0.0  ;;  %v8869_v58 = vmul.f32 0.2, %v8857_v0  ;;  %v8800_v4 = vadd.f32 %v8799_v60, %v8749_v13 }
 0x3f1   : > { %v8891_v21 = vadd.f32 %v8887_v48, %v8874_v36  ;;  %v8858_v59 = vadd.f32 %v8845_v10, %v13087_v47  ;;  %v8849_v19 = vadd.f32 %v8848_v52, %v8798_v9  ;;  %v8801_v28 = vpop.f32.mrf.mxu0 }
 0x3f2   : > { %v8852_v38 = vpop.f32.mrf.mxu1  ;;  %v8875_v15 = vsel %vm8863_vm5, %v8857_v0, %v8869_v58  ;;  %v8851_v2 = vadd.f32 %v8850_v30, %v8800_v4 }
 0x3f3   : > { %v10049_v23 = vpack.c.bf16 %v8891_v21, %v8890_v18  ;;  %vm8864_vm6 = vcmp.ge.f32.partialorder %v8858_v59, 0.0  ;;  %v8870_v46 = vmul.f32 0.2, %v8858_v59  ;;  %v8802_v24 = vpop.f32.mrf.mxu0  ;;  %v8859_v22 = vadd.f32 %v8849_v19, %v13090_v7 }
 0x3f4   : > { %v8853_v1 = vpop.f32.mrf.mxu1  ;;  %v8860_v63 = vadd.f32 %v8851_v2, %v13093_v3  ;;  %v8892_v40 = vadd.f32 %v8883_v44, %v8875_v15 }
 0x3f5   : > { %8916 = vst [vmem:[%s4378_s12] sm:$0xff] %v10049_v23  ;;  %v8876_v20 = vsel %vm8864_vm6, %v8858_v59, %v8870_v46  ;;  %vm8865_vm7 = vcmp.ge.f32.partialorder %v8859_v22, 0.0  ;;  %v8871_v47 = vmul.f32 0.2, %v8859_v22 }
 0x3f6   : > { %v8893_v29 = vadd.f32 %v8887_v48, %v8876_v20  ;;  %vm8866_vm8 = vcmp.ge.f32.partialorder %v8860_v63, 0.0  ;;  %v8872_v49 = vmul.f32 0.2, %v8860_v63 }
 0x3f7   : > { %v8877_v26 = vsel %vm8865_vm7, %v8859_v22, %v8871_v47 }
 0x3f8   : > { %v10050_v25 = vpack.c.bf16 %v8893_v29, %v8892_v40  ;;  %v8878_v27 = vsel %vm8866_vm8, %v8860_v63, %v8872_v49  ;;  %v8894_v33 = vadd.f32 %v8883_v44, %v8877_v26 }
 0x3f9   : > { %v8895_v37 = vadd.f32 %v8887_v48, %v8878_v27  ;;  %8925 = sbr.rel (!%p11074_p9) target bundleno = 1030 (0x406), region = 88 }
 0x3fa   : > { %8917 = vst [vmem:[%s4378_s12 + $0x8] sm:$0xff] %v10050_v25 }
 0x3fb   : > { %v10051_v5 = vpack.c.bf16 %v8895_v37, %v8894_v33 }
 0x3fc   : > { %v8964_v7 = vld [vmem:[%s4378_s12] sm:$0xff] (%p11074_p9) }
 0x3fd   : > { %8918 = vst [vmem:[%s4378_s12 + $0x10] sm:$0xff] %v10051_v5  ;;  %8965 = vst [vmem:[%s8931_s28] sm:$0xff] (%p11074_p9), %v8964_v7 }
 0x401   : > { %v8966_v3 = vld [vmem:[%s4378_s12 + $0x8] sm:$0xff] }
 0x402   : > { %8967 = vst [vmem:[%s8931_s28 + $0x10] sm:$0xff] %v8966_v3 }
 0x404   : > { %v8968_v61 = vld [vmem:[%s4378_s12 + $0x10] sm:$0xff] }
 0x405   : > { %8969 = vst [vmem:[%s8931_s28 + $0x20] sm:$0xff] %v8968_v61 }
 0x406 PF: > { %s13_s20 = sadd.s32 1, %s10984_s20   ;;  %s13150_s12 = smov %s10956_s13 }
 0x407   : > { %p10_p2 = scmp.ge.s32.totalorder %s13_s20, 6   ;;  %s13151_s13 = smov %s11082_s5 }
 0x408   : > { %s13152_s14 = smov %s10964_s15  ;;  %s13153_s15 = smov %s11079_s4 }
 0x409   : > { %s13154_s16 = smov %s10976_s18  ;;  %s13155_s17 = smov %s10980_s19 }
 0x40a   : > { %s13156_s18 = smov %s13159_s21  ;;  %s13157_s19 = smov %s13163_s22 }
 0x40b   :  { %12 = sbr.rel (!%p10_p2) target bundleno = 5 (0x5), region = 172 }

// kernel: discriminator_forward.7
= control target key start
LH: loop header
LB: loop body
LE: loop exit
PB: predicated region body
PF: predicated region fallthrough
CT: control target
= control target key end

     0   :  { %v7658_v22 = vmov 1966171168   ;;  %v1067_v24 = vlaneseq  ;;  %vm5890_vm1 = vcmask 1041408   ;;  %vm5908_vm2 = vcmask 1024   ;;  %s9375_s1 = inlined_call_operand.vmem [shape: bf16[8192,128], index: 1, kind: input, shape index: {}]   ;;  %s9376_s0 = inlined_call_operand.vmem [shape: bf16[2,8192], index: 0, kind: input, shape index: {}]   ;;  %s9377_s4 = inlined_call_operand.<no memory space> [shape: f32[1,1], index: 4, kind: input, shape index: {}]   ;;  %s9378_s2 = inlined_call_operand.vmem [shape: f32[1,128], index: 2, kind: input, shape index: {}]   ;;  %s9379_s3 = inlined_call_operand.vmem [shape: f32[1,128], index: 3, kind: input, shape index: {}]   ;;  %s9380_s5 = inlined_call_operand.vmem [shape: f32[2,1], index: 5, kind: output, shape index: {}]  }
   0x1   :  { %v7134_v0 = vld [vmem:[%s9375_s1 + $0x78] sm:$0xff]   ;;  %v7138_v4 = vld [vmem:[%s9375_s1 + $0x70] sm:$0xff]   ;;  %v7142_v8 = vld [vmem:[%s9375_s1 + $0x68] sm:$0xff]   ;;  %v1065_v23 = vunpack.c.l.s4 %v7658_v22 }
   0x2   :  { %v7135_v1 = vld [vmem:[%s9375_s1 + $0xf8] sm:$0xff]   ;;  %6429 = vmatprep.subr.bf16.mxu0 %v7134_v0  ;;  %v7139_v5 = vld [vmem:[%s9375_s1 + $0xf0] sm:$0xff]   ;;  %v7143_v9 = vld [vmem:[%s9375_s1 + $0xe8] sm:$0xff]   ;;  %v1068_v30 = vshrl.u32 %v1067_v24, 7 }
   0x3   :  { %v7136_v2 = vld [vmem:[%s9375_s1 + $0x38] sm:$0xff]   ;;  %6451 = vmatprep.subr.bf16.mxu1 %v7135_v1  ;;  %v7140_v6 = vld [vmem:[%s9375_s1 + $0x30] sm:$0xff]   ;;  %v7144_v10 = vld [vmem:[%s9375_s1 + $0x28] sm:$0xff]   ;;  %v1066_v29 = vunpack.c.0.s8 %v1065_v23 }
   0x4   :  { %v7137_v3 = vld [vmem:[%s9375_s1 + $0xb8] sm:$0xff]   ;;  %6430 = vmatpush3.bf16.msra.mxu0 %v7136_v2  ;;  %v7141_v7 = vld [vmem:[%s9375_s1 + $0xb0] sm:$0xff]   ;;  %v7145_v11 = vld [vmem:[%s9375_s1 + $0xa8] sm:$0xff]  }
   0x5   :  { %6452 = vmatpush3.bf16.msra.mxu1 %v7137_v3  ;;  %6431 = vmatprep.subr.bf16.mxu0 %v7138_v4  ;;  %v7146_v12 = vld [vmem:[%s9375_s1 + $0x60] sm:$0xff]   ;;  %v7150_v16 = vld [vmem:[%s9375_s1 + $0x58] sm:$0xff]   ;;  %v7154_v20 = vld [vmem:[%s9375_s1 + $0x50] sm:$0xff]   ;;  %v7779_v35 = vsub.s32 %v1066_v29, %v1068_v30 }
   0x6   :  { %6453 = vmatprep.subr.bf16.mxu1 %v7139_v5  ;;  %v7147_v13 = vld [vmem:[%s9375_s1 + $0xe0] sm:$0xff]   ;;  %v7151_v17 = vld [vmem:[%s9375_s1 + $0xd8] sm:$0xff]   ;;  %v7155_v21 = vld [vmem:[%s9375_s1 + $0xd0] sm:$0xff]  }
   0x7   :  { %v7148_v14 = vld [vmem:[%s9375_s1 + $0x20] sm:$0xff]   ;;  %v7152_v18 = vld [vmem:[%s9375_s1 + $0x18] sm:$0xff]   ;;  %v7156_v25 = vld [vmem:[%s9375_s1 + $0x10] sm:$0xff]  }
   0x8   :  { %6432 = vmatpush3.bf16.msra.mxu0 %v7140_v6  ;;  %v7149_v15 = vld [vmem:[%s9375_s1 + $0xa0] sm:$0xff]   ;;  %v7153_v19 = vld [vmem:[%s9375_s1 + $0x98] sm:$0xff]   ;;  %v7157_v26 = vld [vmem:[%s9375_s1 + $0x90] sm:$0xff]  }
   0x9   :  { %6454 = vmatpush3.bf16.msra.mxu1 %v7141_v7  ;;  %6433 = vmatprep.subr.bf16.mxu0 %v7142_v8  ;;  %v7158_v27 = vld [vmem:[%s9375_s1 + $0x48] sm:$0xff]   ;;  %v7162_v33 = vld [vmem:[%s9375_s1 + $0x40] sm:$0xff]   ;;  %v7167_v41 = vld [vmem:[%s9375_s1 + $0x178] sm:$0xff]  }
   0xa   :  { %6455 = vmatprep.subr.bf16.mxu1 %v7143_v9  ;;  %v7159_v28 = vld [vmem:[%s9375_s1 + $0xc8] sm:$0xff]   ;;  %v7163_v34 = vld [vmem:[%s9375_s1 + $0xc0] sm:$0xff]   ;;  %v7168_v42 = vld [vmem:[%s9375_s1 + $0x1f8] sm:$0xff]  }
   0xb   :  { %v7160_v31 = vld [vmem:[%s9375_s1 + $0x8] sm:$0xff]   ;;  %v7164_v36 = vld [vmem:[%s9375_s1] sm:$0xff]   ;;  %v7169_v46 = vld [vmem:[%s9375_s1 + $0x138] sm:$0xff]  }
   0xc   :  { %6434 = vmatpush3.bf16.msra.mxu0 %v7144_v10  ;;  %v7161_v32 = vld [vmem:[%s9375_s1 + $0x88] sm:$0xff]   ;;  %v7165_v37 = vld [vmem:[%s9375_s1 + $0x80] sm:$0xff]   ;;  %v7170_v48 = vld [vmem:[%s9375_s1 + $0x1b8] sm:$0xff]  }
   0xd   :  { %6456 = vmatpush3.bf16.msra.mxu1 %v7145_v11  ;;  %6435 = vmatprep.subr.bf16.mxu0 %v7146_v12  ;;  %v23_v38 = vld [vmem:[%s9376_s0] sm:$0xff]  ;;  %v7171_v51 = vld [vmem:[%s9375_s1 + $0x170] sm:$0xff]   ;;  %v7175_v58 = vld [vmem:[%s9375_s1 + $0x168] sm:$0xff]  }
   0xe   :  { %6457 = vmatprep.subr.bf16.mxu1 %v7147_v13  ;;  %v1063_v39 = vcombine.high %v23_v38, %v23_v38  ;;  %v1070_v40 = vrot.slane %v23_v38, %v7779_v35  ;;  %v7172_v53 = vld [vmem:[%s9375_s1 + $0x1f0] sm:$0xff]   ;;  %v7176_v59 = vld [vmem:[%s9375_s1 + $0x1e8] sm:$0xff]   ;;  %v7179_v62 = vld [vmem:[%s9375_s1 + $0x160] sm:$0xff]  }
   0xf   :  { %v7173_v55 = vld [vmem:[%s9375_s1 + $0x130] sm:$0xff]   ;;  %v7177_v60 = vld [vmem:[%s9375_s1 + $0x128] sm:$0xff]   ;;  %v7180_v63 = vld [vmem:[%s9375_s1 + $0x1e0] sm:$0xff]  }
  0x10   :  { %6436 = vmatpush3.bf16.msra.mxu0 %v7148_v14  ;;  %v1078_v43 = vcombine.high %v1070_v40, %v1070_v40  ;;  %v1086_v44 = vrot.slane %v1070_v40, %v7779_v35  ;;  %v7799_v45 = vrot.slane %v1063_v39, %v7779_v35  ;;  %v7174_v56 = vld [vmem:[%s9375_s1 + $0x1b0] sm:$0xff]   ;;  %v7178_v61 = vld [vmem:[%s9375_s1 + $0x1a8] sm:$0xff]   ;;  %v7181_v0 = vld [vmem:[%s9375_s1 + $0x120] sm:$0xff]  }
  0x11   :  { %6458 = vmatpush3.bf16.msra.mxu1 %v7149_v15  ;;  %6437 = vmatprep.subr.bf16.mxu0 %v7150_v16  ;;  %v7182_v1 = vld [vmem:[%s9375_s1 + $0x1a0] sm:$0xff]   ;;  %v7183_v2 = vld [vmem:[%s9375_s1 + $0x158] sm:$0xff]   ;;  %v7187_v6 = vld [vmem:[%s9375_s1 + $0x150] sm:$0xff]  }
  0x12   :  { %6459 = vmatprep.subr.bf16.mxu1 %v7151_v17  ;;  %v1100_v47 = vrot.slane %v1078_v43, %v7779_v35  ;;  %v1079_v49 = vcombine.high %v7799_v45, %v7799_v45  ;;  %v1108_v50 = vcombine.high %v1086_v44, %v1086_v44  ;;  %v7184_v3 = vld [vmem:[%s9375_s1 + $0x1d8] sm:$0xff]   ;;  %v7188_v7 = vld [vmem:[%s9375_s1 + $0x1d0] sm:$0xff]   ;;  %v7191_v10 = vld [vmem:[%s9375_s1 + $0x148] sm:$0xff]  }
  0x13   :  { %v7185_v4 = vld [vmem:[%s9375_s1 + $0x118] sm:$0xff]   ;;  %v7189_v8 = vld [vmem:[%s9375_s1 + $0x110] sm:$0xff]   ;;  %v7192_v11 = vld [vmem:[%s9375_s1 + $0x1c8] sm:$0xff]  }
  0x14   :  { %6438 = vmatpush3.bf16.msra.mxu0 %v7152_v18  ;;  %4623 = vmatprep.mubr.bf16.mxu0 %v1100_v47  ;;  %v1110_v52 = vcombine.high %v1100_v47, %v1100_v47  ;;  %v1107_v54 = vrot.slane %v1079_v49, %v7779_v35  ;;  %v7186_v5 = vld [vmem:[%s9375_s1 + $0x198] sm:$0xff]   ;;  %v7190_v9 = vld [vmem:[%s9375_s1 + $0x190] sm:$0xff]   ;;  %v7193_v12 = vld [vmem:[%s9375_s1 + $0x108] sm:$0xff]   ;;  %v1093_v18 = vrot.slane %v7799_v45, %v7779_v35 }
  0x15   :  { %6460 = vmatpush3.bf16.msra.mxu1 %v7153_v19  ;;  %6439 = vmatprep.subr.bf16.mxu0 %v7154_v20  ;;  %v7194_v13 = vld [vmem:[%s9375_s1 + $0x188] sm:$0xff]   ;;  %v7195_v14 = vld [vmem:[%s9375_s1 + $0x140] sm:$0xff]   ;;  %v7199_v19 = vld [vmem:[%s9375_s1 + $0x278] sm:$0xff]  }
  0x16   :  { %6461 = vmatprep.subr.bf16.mxu1 %v7155_v21  ;;  %4663 = vmatprep.mubr.bf16.mxu1 %v1110_v52  ;;  %v1111_v57 = vcombine.high %v1107_v54, %v1107_v54  ;;  %v7196_v15 = vld [vmem:[%s9375_s1 + $0x1c0] sm:$0xff]   ;;  %v7200_v20 = vld [vmem:[%s9375_s1 + $0x2f8] sm:$0xff]   ;;  %v1109_v23 = vcombine.high %v1093_v18, %v1093_v18  ;;  %v7203_v24 = vld [vmem:[%s9375_s1 + $0x270] sm:$0xff]  }
  0x17   :  { %v7197_v16 = vld [vmem:[%s9375_s1 + $0x100] sm:$0xff]   ;;  %v7201_v21 = vld [vmem:[%s9375_s1 + $0x238] sm:$0xff]   ;;  %v7208_v29 = vld [vmem:[%s9375_s1 + $0x2e8] sm:$0xff]  }
  0x18   :  { %6440 = vmatpush3.bf16.msra.mxu0 %v7156_v25  ;;  %v7198_v17 = vld [vmem:[%s9375_s1 + $0x180] sm:$0xff]   ;;  %v7202_v22 = vld [vmem:[%s9375_s1 + $0x2b8] sm:$0xff]   ;;  %v7204_v25 = vld [vmem:[%s9375_s1 + $0x2f0] sm:$0xff]  }
  0x19   :  { %6462 = vmatpush3.bf16.msra.mxu1 %v7157_v26  ;;  %6441 = vmatprep.subr.bf16.mxu0 %v7158_v27  ;;  %v7205_v26 = vld [vmem:[%s9375_s1 + $0x230] sm:$0xff]   ;;  %v7209_v30 = vld [vmem:[%s9375_s1 + $0x228] sm:$0xff]   ;;  %v7216_v38 = vld [vmem:[%s9375_s1 + $0x2d8] sm:$0xff]  }
  0x1a   :  { %6463 = vmatprep.subr.bf16.mxu1 %v7159_v28  ;;  %v7206_v27 = vld [vmem:[%s9375_s1 + $0x2b0] sm:$0xff]   ;;  %v7207_v28 = vld [vmem:[%s9375_s1 + $0x268] sm:$0xff]   ;;  %v7217_v39 = vld [vmem:[%s9375_s1 + $0x218] sm:$0xff]  }
  0x1b   :  { %v7218_v40 = vld [vmem:[%s9375_s1 + $0x298] sm:$0xff]   ;;  %v7221_v43 = vld [vmem:[%s9375_s1 + $0x210] sm:$0xff]   ;;  %v7223_v45 = vld [vmem:[%s9375_s1 + $0x248] sm:$0xff]  }
  0x1c   :  { %6442 = vmatpush3.bf16.msra.mxu0 %v7160_v31  ;;  %v7210_v31 = vld [vmem:[%s9375_s1 + $0x2a8] sm:$0xff]   ;;  %v7227_v49 = vld [vmem:[%s9375_s1 + $0x240] sm:$0xff]  }
  0x1d   :  { %6464 = vmatpush3.bf16.msra.mxu1 %v7161_v32  ;;  %6443 = vmatprep.subr.bf16.mxu0 %v7162_v33  ;;  %v7211_v32 = vld [vmem:[%s9375_s1 + $0x260] sm:$0xff]   ;;  %v7225_v47 = vld [vmem:[%s9375_s1 + $0x208] sm:$0xff]  }
  0x1e   :  { %6465 = vmatprep.subr.bf16.mxu1 %v7163_v34  ;;  %v7212_v33 = vld [vmem:[%s9375_s1 + $0x2e0] sm:$0xff]   ;;  %v24_v52 = vld [vmem:[%s9376_s0 + $0x8] sm:$0xff] }
  0x1f   :  { %v7213_v34 = vld [vmem:[%s9375_s1 + $0x220] sm:$0xff]  }
  0x20   :  { %6444 = vmatpush3.bf16.msra.mxu0 %v7164_v36  ;;  %v7214_v36 = vld [vmem:[%s9375_s1 + $0x2a0] sm:$0xff]  }
  0x21   :  { %6466 = vmatpush3.bf16.msra.mxu1 %v7165_v37  ;;  %6473 = vmatprep.subr.bf16.mxu0 %v7167_v41  ;;  %v7215_v37 = vld [vmem:[%s9375_s1 + $0x258] sm:$0xff]   ;;  %v7219_v41 = vld [vmem:[%s9375_s1 + $0x250] sm:$0xff]  }
  0x22   :  { %6495 = vmatprep.subr.bf16.mxu1 %v7168_v42  ;;  %v7220_v42 = vld [vmem:[%s9375_s1 + $0x2d0] sm:$0xff]  }
  0x23   :  { %4624 = vmatmul.mubr.bf16.vlgmr.msra.gmra.mxu0 %v1086_v44  ;;  %v7222_v44 = vld [vmem:[%s9375_s1 + $0x290] sm:$0xff]  }
  0x24   :  { %6474 = vmatpush3.bf16.msra.mxu0 %v7169_v46  ;;  %4664 = vmatmul.mubr.bf16.vlgmr.msra.gmra.mxu1 %v1108_v50  ;;  %v7224_v46 = vld [vmem:[%s9375_s1 + $0x2c8] sm:$0xff]   ;;  %v7228_v50 = vld [vmem:[%s9375_s1 + $0x2c0] sm:$0xff]  }
  0x25   :  { %6475 = vmatprep.subr.bf16.mxu0 %v7171_v51  ;;  %6496 = vmatpush3.bf16.msra.mxu1 %v7170_v48  ;;  %v7226_v48 = vld [vmem:[%s9375_s1 + $0x288] sm:$0xff]   ;;  %v7229_v51 = vld [vmem:[%s9375_s1 + $0x200] sm:$0xff]  }
  0x26   :  { %4703 = vmatprep.mubr.bf16.mxu0 %v1107_v54  ;;  %6497 = vmatprep.subr.bf16.mxu1 %v7172_v53  ;;  %v7230_v53 = vld [vmem:[%s9375_s1 + $0x280] sm:$0xff]   ;;  %v1119_v54 = vrot.slane %v24_v52, %v7779_v35 }
  0x27   :  { %4743 = vmatprep.mubr.bf16.mxu1 %v1111_v57 }
  0x28   :  { %6476 = vmatpush3.bf16.msra.mxu0 %v7173_v55  ;;  %v1112_v55 = vcombine.high %v24_v52, %v24_v52  ;;  %v1127_v57 = vcombine.high %v1119_v54, %v1119_v54  ;;  %v7280_v52 = vld [vmem:[%s9375_s1 + $0x458] sm:$0xff]  }
  0x29   :  { %6477 = vmatprep.subr.bf16.mxu0 %v7175_v58  ;;  %6498 = vmatpush3.bf16.msra.mxu1 %v7174_v56  ;;  %v7231_v56 = vld [vmem:[%s9375_s1 + $0x378] sm:$0xff]   ;;  %v1135_v58 = vrot.slane %v1119_v54, %v7779_v35 }
  0x2a   :  { %6499 = vmatprep.subr.bf16.mxu1 %v7176_v59  ;;  %v7232_v59 = vld [vmem:[%s9375_s1 + $0x3f8] sm:$0xff]  }
  0x2b   :  { %v7282_v54 = vld [vmem:[%s9375_s1 + $0x418] sm:$0xff]  }
  0x2c   :  { %6478 = vmatpush3.bf16.msra.mxu0 %v7177_v60  ;;  %v8005_v60 = vrot.slane %v1112_v55, %v7779_v35  ;;  %v7283_v55 = vld [vmem:[%s9375_s1 + $0x498] sm:$0xff]  }
  0x2d   :  { %6479 = vmatprep.subr.bf16.mxu0 %v7179_v62  ;;  %6500 = vmatpush3.bf16.msra.mxu1 %v7178_v61  ;;  %v7233_v61 = vld [vmem:[%s9375_s1 + $0x338] sm:$0xff]   ;;  %v1149_v62 = vrot.slane %v1127_v57, %v7779_v35  ;;  %v7285_v57 = vld [vmem:[%s9375_s1 + $0x4d0] sm:$0xff]  }
  0x2e   :  { %6501 = vmatprep.subr.bf16.mxu1 %v7180_v63  ;;  %v7234_v63 = vld [vmem:[%s9375_s1 + $0x3b8] sm:$0xff]  }
  0x30   :  { %6480 = vmatpush3.bf16.msra.mxu0 %v7181_v0  ;;  %v1128_v0 = vcombine.high %v8005_v60, %v8005_v60 }
  0x31   :  { %6481 = vmatprep.subr.bf16.mxu0 %v7183_v2  ;;  %6502 = vmatpush3.bf16.msra.mxu1 %v7182_v1  ;;  %v1157_v1 = vcombine.high %v1135_v58, %v1135_v58  ;;  %v7235_v2 = vld [vmem:[%s9375_s1 + $0x370] sm:$0xff]  }
  0x32   :  { %6503 = vmatprep.subr.bf16.mxu1 %v7184_v3  ;;  %v1159_v3 = vcombine.high %v1149_v62, %v1149_v62 }
  0x34   :  { %6482 = vmatpush3.bf16.msra.mxu0 %v7185_v4  ;;  %v7236_v4 = vld [vmem:[%s9375_s1 + $0x3f0] sm:$0xff]  }
  0x35   :  { %6483 = vmatprep.subr.bf16.mxu0 %v7187_v6  ;;  %6504 = vmatpush3.bf16.msra.mxu1 %v7186_v5  ;;  %v1156_v5 = vrot.slane %v1128_v0, %v7779_v35  ;;  %v7237_v6 = vld [vmem:[%s9375_s1 + $0x330] sm:$0xff]   ;;  %v7292_v0 = vld [vmem:[%s9375_s1 + $0x440] sm:$0xff]  }
  0x36   :  { %6505 = vmatprep.subr.bf16.mxu1 %v7188_v7  ;;  %v7238_v7 = vld [vmem:[%s9375_s1 + $0x3b0] sm:$0xff]  }
  0x38   :  { %6484 = vmatpush3.bf16.msra.mxu0 %v7189_v8  ;;  %v1160_v8 = vcombine.high %v1156_v5, %v1156_v5 }
  0x39   :  { %6485 = vmatprep.subr.bf16.mxu0 %v7191_v10  ;;  %6506 = vmatpush3.bf16.msra.mxu1 %v7190_v9  ;;  %v7239_v9 = vld [vmem:[%s9375_s1 + $0x368] sm:$0xff]  }
  0x3a   :  { %6507 = vmatprep.subr.bf16.mxu1 %v7192_v11  ;;  %v7240_v10 = vld [vmem:[%s9375_s1 + $0x3e8] sm:$0xff]  }
  0x3b   :  { %v7241_v11 = vld [vmem:[%s9375_s1 + $0x328] sm:$0xff]  }
  0x3c   :  { %6486 = vmatpush3.bf16.msra.mxu0 %v7193_v12  ;;  %v7242_v12 = vld [vmem:[%s9375_s1 + $0x3a8] sm:$0xff]  }
  0x3d   :  { %6487 = vmatprep.subr.bf16.mxu0 %v7195_v14  ;;  %6508 = vmatpush3.bf16.msra.mxu1 %v7194_v13  ;;  %v7243_v13 = vld [vmem:[%s9375_s1 + $0x360] sm:$0xff]  }
  0x3e   :  { %6509 = vmatprep.subr.bf16.mxu1 %v7196_v15  ;;  %v7244_v14 = vld [vmem:[%s9375_s1 + $0x3e0] sm:$0xff]  }
  0x3f   :  { %v7245_v15 = vld [vmem:[%s9375_s1 + $0x320] sm:$0xff]  }
  0x40   :  { %6488 = vmatpush3.bf16.msra.mxu0 %v7197_v16  ;;  %v7246_v16 = vld [vmem:[%s9375_s1 + $0x3a0] sm:$0xff]  }
  0x41   :  { %6517 = vmatprep.subr.bf16.mxu0 %v7199_v19  ;;  %6510 = vmatpush3.bf16.msra.mxu1 %v7198_v17  ;;  %v7247_v17 = vld [vmem:[%s9375_s1 + $0x358] sm:$0xff]  }
  0x42   :  { %6539 = vmatprep.subr.bf16.mxu1 %v7200_v20  ;;  %v7249_v19 = vld [vmem:[%s9375_s1 + $0x318] sm:$0xff]  }
  0x43   :  { %4704 = vmatmul.mubr.bf16.vlgmr.msra.gmra.mxu0 %v1093_v18  ;;  %v7248_v18 = vld [vmem:[%s9375_s1 + $0x3d8] sm:$0xff]  }
  0x44   :  { %6518 = vmatpush3.bf16.msra.mxu0 %v7201_v21  ;;  %4744 = vmatmul.mubr.bf16.vlgmr.msra.gmra.mxu1 %v1109_v23  ;;  %v7250_v20 = vld [vmem:[%s9375_s1 + $0x398] sm:$0xff]   ;;  %v7251_v21 = vld [vmem:[%s9375_s1 + $0x350] sm:$0xff]  }
  0x45   :  { %6519 = vmatprep.subr.bf16.mxu0 %v7203_v24  ;;  %6540 = vmatpush3.bf16.msra.mxu1 %v7202_v22  ;;  %v7252_v22 = vld [vmem:[%s9375_s1 + $0x3d0] sm:$0xff]  }
  0x46   :  { %6541 = vmatprep.subr.bf16.mxu1 %v7204_v25  ;;  %4783 = vmatprep.mubr.bf16.mxu0 %v1149_v62  ;;  %v7253_v23 = vld [vmem:[%s9375_s1 + $0x310] sm:$0xff]   ;;  %v7255_v25 = vld [vmem:[%s9375_s1 + $0x348] sm:$0xff]  }
  0x47   :  { %4823 = vmatprep.mubr.bf16.mxu1 %v1159_v3  ;;  %v7254_v24 = vld [vmem:[%s9375_s1 + $0x390] sm:$0xff]   ;;  %v7290_v62 = vld [vmem:[%s9375_s1 + $0x408] sm:$0xff]  }
  0x48   :  { %6520 = vmatpush3.bf16.msra.mxu0 %v7205_v26  ;;  %v7256_v26 = vld [vmem:[%s9375_s1 + $0x3c8] sm:$0xff]   ;;  %v25_v3 = vld [vmem:[%s9376_s0 + $0x10] sm:$0xff] }
  0x49   :  { %6521 = vmatprep.subr.bf16.mxu0 %v7207_v28  ;;  %6542 = vmatpush3.bf16.msra.mxu1 %v7206_v27  ;;  %v7257_v27 = vld [vmem:[%s9375_s1 + $0x308] sm:$0xff]  }
  0x4a   :  { %6543 = vmatprep.subr.bf16.mxu1 %v7208_v29  ;;  %v7258_v28 = vld [vmem:[%s9375_s1 + $0x388] sm:$0xff]   ;;  %v7259_v29 = vld [vmem:[%s9375_s1 + $0x340] sm:$0xff]  }
  0x4c   :  { %6522 = vmatpush3.bf16.msra.mxu0 %v7209_v30  ;;  %v7260_v30 = vld [vmem:[%s9375_s1 + $0x3c0] sm:$0xff]  }
  0x4d   :  { %6523 = vmatprep.subr.bf16.mxu0 %v7211_v32  ;;  %6544 = vmatpush3.bf16.msra.mxu1 %v7210_v31  ;;  %v7261_v31 = vld [vmem:[%s9375_s1 + $0x300] sm:$0xff]  }
  0x4e   :  { %6545 = vmatprep.subr.bf16.mxu1 %v7212_v33  ;;  %v7262_v32 = vld [vmem:[%s9375_s1 + $0x380] sm:$0xff]   ;;  %v1142_v33 = vrot.slane %v8005_v60, %v7779_v35  ;;  %v7288_v60 = vld [vmem:[%s9375_s1 + $0x448] sm:$0xff]  }
  0x50   :  { %6524 = vmatpush3.bf16.msra.mxu0 %v7213_v34  ;;  %v7264_v34 = vld [vmem:[%s9375_s1 + $0x478] sm:$0xff]  }
  0x51   :  { %6525 = vmatprep.subr.bf16.mxu0 %v7215_v37  ;;  %6546 = vmatpush3.bf16.msra.mxu1 %v7214_v36  ;;  %v7265_v36 = vld [vmem:[%s9375_s1 + $0x4f8] sm:$0xff]  }
  0x52   :  { %6547 = vmatprep.subr.bf16.mxu1 %v7216_v38  ;;  %v7266_v37 = vld [vmem:[%s9375_s1 + $0x438] sm:$0xff]  }
  0x53   :  { %v7267_v38 = vld [vmem:[%s9375_s1 + $0x4b8] sm:$0xff]  }
  0x54   :  { %6526 = vmatpush3.bf16.msra.mxu0 %v7217_v39  ;;  %v1158_v39 = vcombine.high %v1142_v33, %v1142_v33 }
  0x55   :  { %6527 = vmatprep.subr.bf16.mxu0 %v7219_v41  ;;  %6548 = vmatpush3.bf16.msra.mxu1 %v7218_v40  ;;  %v7268_v40 = vld [vmem:[%s9375_s1 + $0x470] sm:$0xff]  }
  0x56   :  { %6549 = vmatprep.subr.bf16.mxu1 %v7220_v42  ;;  %v7269_v41 = vld [vmem:[%s9375_s1 + $0x4f0] sm:$0xff]  }
  0x57   :  { %v7270_v42 = vld [vmem:[%s9375_s1 + $0x430] sm:$0xff]  }
  0x58   :  { %6528 = vmatpush3.bf16.msra.mxu0 %v7221_v43  ;;  %v7271_v43 = vld [vmem:[%s9375_s1 + $0x4b0] sm:$0xff]  }
  0x59   :  { %6529 = vmatprep.subr.bf16.mxu0 %v7223_v45  ;;  %6550 = vmatpush3.bf16.msra.mxu1 %v7222_v44  ;;  %v7272_v44 = vld [vmem:[%s9375_s1 + $0x468] sm:$0xff]  }
  0x5a   :  { %6551 = vmatprep.subr.bf16.mxu1 %v7224_v46  ;;  %v7273_v45 = vld [vmem:[%s9375_s1 + $0x4e8] sm:$0xff]  }
  0x5b   :  { %v7274_v46 = vld [vmem:[%s9375_s1 + $0x428] sm:$0xff]  }
  0x5c   :  { %6530 = vmatpush3.bf16.msra.mxu0 %v7225_v47  ;;  %v7275_v47 = vld [vmem:[%s9375_s1 + $0x4a8] sm:$0xff]  }
  0x5d   :  { %6531 = vmatprep.subr.bf16.mxu0 %v7227_v49  ;;  %6552 = vmatpush3.bf16.msra.mxu1 %v7226_v48  ;;  %v7276_v48 = vld [vmem:[%s9375_s1 + $0x460] sm:$0xff]  }
  0x5e   :  { %6553 = vmatprep.subr.bf16.mxu1 %v7228_v50  ;;  %v7277_v49 = vld [vmem:[%s9375_s1 + $0x4e0] sm:$0xff]  }
  0x5f   :  { %v7278_v50 = vld [vmem:[%s9375_s1 + $0x420] sm:$0xff]  }
  0x60   :  { %6532 = vmatpush3.bf16.msra.mxu0 %v7229_v51  ;;  %v7279_v51 = vld [vmem:[%s9375_s1 + $0x4a0] sm:$0xff]  }
  0x61   :  { %6561 = vmatprep.subr.bf16.mxu0 %v7231_v56  ;;  %6554 = vmatpush3.bf16.msra.mxu1 %v7230_v53  ;;  %v7281_v53 = vld [vmem:[%s9375_s1 + $0x4d8] sm:$0xff]   ;;  %v7284_v56 = vld [vmem:[%s9375_s1 + $0x450] sm:$0xff]  }
  0x62   :  { %6583 = vmatprep.subr.bf16.mxu1 %v7232_v59  ;;  %v7287_v59 = vld [vmem:[%s9375_s1 + $0x490] sm:$0xff]  }
  0x63   :  { %4784 = vmatmul.mubr.bf16.vlgmr.msra.gmra.mxu0 %v1135_v58  ;;  %v7286_v58 = vld [vmem:[%s9375_s1 + $0x410] sm:$0xff]  }
  0x64   :  { %6562 = vmatpush3.bf16.msra.mxu0 %v7233_v61  ;;  %4824 = vmatmul.mubr.bf16.vlgmr.msra.gmra.mxu1 %v1157_v1  ;;  %v7289_v61 = vld [vmem:[%s9375_s1 + $0x4c8] sm:$0xff]   ;;  %v7293_v1 = vld [vmem:[%s9375_s1 + $0x4c0] sm:$0xff]  }
  0x65   :  { %6563 = vmatprep.subr.bf16.mxu0 %v7235_v2  ;;  %6584 = vmatpush3.bf16.msra.mxu1 %v7234_v63  ;;  %v7291_v63 = vld [vmem:[%s9375_s1 + $0x488] sm:$0xff]   ;;  %v7294_v2 = vld [vmem:[%s9375_s1 + $0x400] sm:$0xff]  }
  0x66   :  { %4863 = vmatprep.mubr.bf16.mxu0 %v1156_v5  ;;  %6585 = vmatprep.subr.bf16.mxu1 %v7236_v4  ;;  %v7295_v4 = vld [vmem:[%s9375_s1 + $0x480] sm:$0xff]   ;;  %v1168_v5 = vrot.slane %v25_v3, %v7779_v35 }
  0x67   :  { %4903 = vmatprep.mubr.bf16.mxu1 %v1160_v8 }
  0x68   :  { %6564 = vmatpush3.bf16.msra.mxu0 %v7237_v6  ;;  %v1161_v6 = vcombine.high %v25_v3, %v25_v3  ;;  %v1176_v8 = vcombine.high %v1168_v5, %v1168_v5  ;;  %v7345_v3 = vld [vmem:[%s9375_s1 + $0x658] sm:$0xff]  }
  0x69   :  { %6565 = vmatprep.subr.bf16.mxu0 %v7239_v9  ;;  %6586 = vmatpush3.bf16.msra.mxu1 %v7238_v7  ;;  %v7296_v7 = vld [vmem:[%s9375_s1 + $0x578] sm:$0xff]   ;;  %v1184_v9 = vrot.slane %v1168_v5, %v7779_v35 }
  0x6a   :  { %6587 = vmatprep.subr.bf16.mxu1 %v7240_v10  ;;  %v7297_v10 = vld [vmem:[%s9375_s1 + $0x5f8] sm:$0xff]  }
  0x6b   :  { %v7347_v5 = vld [vmem:[%s9375_s1 + $0x618] sm:$0xff]  }
  0x6c   :  { %6566 = vmatpush3.bf16.msra.mxu0 %v7241_v11  ;;  %v8211_v11 = vrot.slane %v1161_v6, %v7779_v35  ;;  %v7348_v6 = vld [vmem:[%s9375_s1 + $0x698] sm:$0xff]  }
  0x6d   :  { %6567 = vmatprep.subr.bf16.mxu0 %v7243_v13  ;;  %6588 = vmatpush3.bf16.msra.mxu1 %v7242_v12  ;;  %v7298_v12 = vld [vmem:[%s9375_s1 + $0x538] sm:$0xff]   ;;  %v1198_v13 = vrot.slane %v1176_v8, %v7779_v35  ;;  %v7350_v8 = vld [vmem:[%s9375_s1 + $0x6d0] sm:$0xff]  }
  0x6e   :  { %6589 = vmatprep.subr.bf16.mxu1 %v7244_v14  ;;  %v7299_v14 = vld [vmem:[%s9375_s1 + $0x5b8] sm:$0xff]  }
  0x70   :  { %6568 = vmatpush3.bf16.msra.mxu0 %v7245_v15  ;;  %v1177_v15 = vcombine.high %v8211_v11, %v8211_v11 }
  0x71   :  { %6569 = vmatprep.subr.bf16.mxu0 %v7247_v17  ;;  %6590 = vmatpush3.bf16.msra.mxu1 %v7246_v16  ;;  %v1206_v16 = vcombine.high %v1184_v9, %v1184_v9  ;;  %v7300_v17 = vld [vmem:[%s9375_s1 + $0x570] sm:$0xff]  }
  0x72   :  { %6591 = vmatprep.subr.bf16.mxu1 %v7248_v18  ;;  %v1208_v18 = vcombine.high %v1198_v13, %v1198_v13 }
  0x74   :  { %6570 = vmatpush3.bf16.msra.mxu0 %v7249_v19  ;;  %v7301_v19 = vld [vmem:[%s9375_s1 + $0x5f0] sm:$0xff]  }
  0x75   :  { %6571 = vmatprep.subr.bf16.mxu0 %v7251_v21  ;;  %6592 = vmatpush3.bf16.msra.mxu1 %v7250_v20  ;;  %v1205_v20 = vrot.slane %v1177_v15, %v7779_v35  ;;  %v7302_v21 = vld [vmem:[%s9375_s1 + $0x530] sm:$0xff]   ;;  %v7357_v15 = vld [vmem:[%s9375_s1 + $0x640] sm:$0xff]  }
  0x76   :  { %6593 = vmatprep.subr.bf16.mxu1 %v7252_v22  ;;  %v7303_v22 = vld [vmem:[%s9375_s1 + $0x5b0] sm:$0xff]  }
  0x78   :  { %6572 = vmatpush3.bf16.msra.mxu0 %v7253_v23  ;;  %v1209_v23 = vcombine.high %v1205_v20, %v1205_v20 }
  0x79   :  { %6573 = vmatprep.subr.bf16.mxu0 %v7255_v25  ;;  %6594 = vmatpush3.bf16.msra.mxu1 %v7254_v24  ;;  %v7304_v24 = vld [vmem:[%s9375_s1 + $0x568] sm:$0xff]  }
  0x7a   :  { %6595 = vmatprep.subr.bf16.mxu1 %v7256_v26  ;;  %v7305_v25 = vld [vmem:[%s9375_s1 + $0x5e8] sm:$0xff]  }
  0x7b   :  { %v7306_v26 = vld [vmem:[%s9375_s1 + $0x528] sm:$0xff]  }
  0x7c   :  { %6574 = vmatpush3.bf16.msra.mxu0 %v7257_v27  ;;  %v7307_v27 = vld [vmem:[%s9375_s1 + $0x5a8] sm:$0xff]  }
  0x7d   :  { %6575 = vmatprep.subr.bf16.mxu0 %v7259_v29  ;;  %6596 = vmatpush3.bf16.msra.mxu1 %v7258_v28  ;;  %v7308_v28 = vld [vmem:[%s9375_s1 + $0x560] sm:$0xff]  }
  0x7e   :  { %6597 = vmatprep.subr.bf16.mxu1 %v7260_v30  ;;  %v7309_v29 = vld [vmem:[%s9375_s1 + $0x5e0] sm:$0xff]  }
  0x7f   :  { %v7310_v30 = vld [vmem:[%s9375_s1 + $0x520] sm:$0xff]  }
  0x80   :  { %6576 = vmatpush3.bf16.msra.mxu0 %v7261_v31  ;;  %v7311_v31 = vld [vmem:[%s9375_s1 + $0x5a0] sm:$0xff]  }
  0x81   :  { %6605 = vmatprep.subr.bf16.mxu0 %v7264_v34  ;;  %6598 = vmatpush3.bf16.msra.mxu1 %v7262_v32  ;;  %v7312_v32 = vld [vmem:[%s9375_s1 + $0x558] sm:$0xff]  }
  0x82   :  { %6627 = vmatprep.subr.bf16.mxu1 %v7265_v36  ;;  %v7314_v34 = vld [vmem:[%s9375_s1 + $0x518] sm:$0xff]  }
  0x83   :  { %4864 = vmatmul.mubr.bf16.vlgmr.msra.gmra.mxu0 %v1142_v33  ;;  %v7313_v33 = vld [vmem:[%s9375_s1 + $0x5d8] sm:$0xff]  }
  0x84   :  { %6606 = vmatpush3.bf16.msra.mxu0 %v7266_v37  ;;  %4904 = vmatmul.mubr.bf16.vlgmr.msra.gmra.mxu1 %v1158_v39  ;;  %v7315_v36 = vld [vmem:[%s9375_s1 + $0x598] sm:$0xff]   ;;  %v7316_v37 = vld [vmem:[%s9375_s1 + $0x550] sm:$0xff]  }
  0x85   :  { %6607 = vmatprep.subr.bf16.mxu0 %v7268_v40  ;;  %6628 = vmatpush3.bf16.msra.mxu1 %v7267_v38  ;;  %v7317_v38 = vld [vmem:[%s9375_s1 + $0x5d0] sm:$0xff]  }
  0x86   :  { %6629 = vmatprep.subr.bf16.mxu1 %v7269_v41  ;;  %4943 = vmatprep.mubr.bf16.mxu0 %v1198_v13  ;;  %v7318_v39 = vld [vmem:[%s9375_s1 + $0x510] sm:$0xff]   ;;  %v7320_v41 = vld [vmem:[%s9375_s1 + $0x548] sm:$0xff]  }
  0x87   :  { %4983 = vmatprep.mubr.bf16.mxu1 %v1208_v18  ;;  %v7319_v40 = vld [vmem:[%s9375_s1 + $0x590] sm:$0xff]   ;;  %v7355_v13 = vld [vmem:[%s9375_s1 + $0x608] sm:$0xff]   ;;  %v26_v18 = vld [vmem:[%s9376_s0 + $0x18] sm:$0xff] }
  0x88   :  { %6608 = vmatpush3.bf16.msra.mxu0 %v7270_v42  ;;  %v7321_v42 = vld [vmem:[%s9375_s1 + $0x5c8] sm:$0xff]  }
  0x89   :  { %6609 = vmatprep.subr.bf16.mxu0 %v7272_v44  ;;  %6630 = vmatpush3.bf16.msra.mxu1 %v7271_v43  ;;  %v7322_v43 = vld [vmem:[%s9375_s1 + $0x508] sm:$0xff]  }
  0x8a   :  { %6631 = vmatprep.subr.bf16.mxu1 %v7273_v45  ;;  %v7323_v44 = vld [vmem:[%s9375_s1 + $0x588] sm:$0xff]   ;;  %v7324_v45 = vld [vmem:[%s9375_s1 + $0x540] sm:$0xff]  }
  0x8c   :  { %6610 = vmatpush3.bf16.msra.mxu0 %v7274_v46  ;;  %v7325_v46 = vld [vmem:[%s9375_s1 + $0x5c0] sm:$0xff]  }
  0x8d   :  { %6611 = vmatprep.subr.bf16.mxu0 %v7276_v48  ;;  %6632 = vmatpush3.bf16.msra.mxu1 %v7275_v47  ;;  %v7326_v47 = vld [vmem:[%s9375_s1 + $0x500] sm:$0xff]  }
  0x8e   :  { %6633 = vmatprep.subr.bf16.mxu1 %v7277_v49  ;;  %v7327_v48 = vld [vmem:[%s9375_s1 + $0x580] sm:$0xff]   ;;  %v1191_v49 = vrot.slane %v8211_v11, %v7779_v35  ;;  %v7353_v11 = vld [vmem:[%s9375_s1 + $0x648] sm:$0xff]  }
  0x90   :  { %6612 = vmatpush3.bf16.msra.mxu0 %v7278_v50  ;;  %v7329_v50 = vld [vmem:[%s9375_s1 + $0x678] sm:$0xff]  }
  0x91   :  { %6613 = vmatprep.subr.bf16.mxu0 %v7280_v52  ;;  %6634 = vmatpush3.bf16.msra.mxu1 %v7279_v51  ;;  %v7330_v51 = vld [vmem:[%s9375_s1 + $0x6f8] sm:$0xff]  }
  0x92   :  { %6635 = vmatprep.subr.bf16.mxu1 %v7281_v53  ;;  %v7331_v52 = vld [vmem:[%s9375_s1 + $0x638] sm:$0xff]  }
  0x93   :  { %v7332_v53 = vld [vmem:[%s9375_s1 + $0x6b8] sm:$0xff]  }
  0x94   :  { %6614 = vmatpush3.bf16.msra.mxu0 %v7282_v54  ;;  %v1207_v54 = vcombine.high %v1191_v49, %v1191_v49 }
  0x95   :  { %6615 = vmatprep.subr.bf16.mxu0 %v7284_v56  ;;  %6636 = vmatpush3.bf16.msra.mxu1 %v7283_v55  ;;  %v7333_v55 = vld [vmem:[%s9375_s1 + $0x670] sm:$0xff]  }
  0x96   :  { %6637 = vmatprep.subr.bf16.mxu1 %v7285_v57  ;;  %v7334_v56 = vld [vmem:[%s9375_s1 + $0x6f0] sm:$0xff]  }
  0x97   :  { %v7335_v57 = vld [vmem:[%s9375_s1 + $0x630] sm:$0xff]  }
  0x98   :  { %6616 = vmatpush3.bf16.msra.mxu0 %v7286_v58  ;;  %v7336_v58 = vld [vmem:[%s9375_s1 + $0x6b0] sm:$0xff]  }
  0x99   :  { %6617 = vmatprep.subr.bf16.mxu0 %v7288_v60  ;;  %6638 = vmatpush3.bf16.msra.mxu1 %v7287_v59  ;;  %v7337_v59 = vld [vmem:[%s9375_s1 + $0x668] sm:$0xff]  }
  0x9a   :  { %6639 = vmatprep.subr.bf16.mxu1 %v7289_v61  ;;  %v7338_v60 = vld [vmem:[%s9375_s1 + $0x6e8] sm:$0xff]  }
  0x9b   :  { %v7339_v61 = vld [vmem:[%s9375_s1 + $0x628] sm:$0xff]  }
  0x9c   :  { %6618 = vmatpush3.bf16.msra.mxu0 %v7290_v62  ;;  %v7340_v62 = vld [vmem:[%s9375_s1 + $0x6a8] sm:$0xff]  }
  0x9d   :  { %6619 = vmatprep.subr.bf16.mxu0 %v7292_v0  ;;  %6640 = vmatpush3.bf16.msra.mxu1 %v7291_v63  ;;  %v7341_v63 = vld [vmem:[%s9375_s1 + $0x660] sm:$0xff]  }
  0x9e   :  { %6641 = vmatprep.subr.bf16.mxu1 %v7293_v1  ;;  %v7342_v0 = vld [vmem:[%s9375_s1 + $0x6e0] sm:$0xff]  }
  0x9f   :  { %v7343_v1 = vld [vmem:[%s9375_s1 + $0x620] sm:$0xff]  }
  0xa0   :  { %6620 = vmatpush3.bf16.msra.mxu0 %v7294_v2  ;;  %v7344_v2 = vld [vmem:[%s9375_s1 + $0x6a0] sm:$0xff]  }
  0xa1   :  { %6649 = vmatprep.subr.bf16.mxu0 %v7296_v7  ;;  %6642 = vmatpush3.bf16.msra.mxu1 %v7295_v4  ;;  %v7346_v4 = vld [vmem:[%s9375_s1 + $0x6d8] sm:$0xff]   ;;  %v7349_v7 = vld [vmem:[%s9375_s1 + $0x650] sm:$0xff]  }
  0xa2   :  { %6671 = vmatprep.subr.bf16.mxu1 %v7297_v10  ;;  %v7352_v10 = vld [vmem:[%s9375_s1 + $0x690] sm:$0xff]  }
  0xa3   :  { %4944 = vmatmul.mubr.bf16.vlgmr.msra.gmra.mxu0 %v1184_v9  ;;  %v7351_v9 = vld [vmem:[%s9375_s1 + $0x610] sm:$0xff]  }
  0xa4   :  { %6650 = vmatpush3.bf16.msra.mxu0 %v7298_v12  ;;  %4984 = vmatmul.mubr.bf16.vlgmr.msra.gmra.mxu1 %v1206_v16  ;;  %v7354_v12 = vld [vmem:[%s9375_s1 + $0x6c8] sm:$0xff]   ;;  %v7358_v16 = vld [vmem:[%s9375_s1 + $0x6c0] sm:$0xff]  }
  0xa5   :  { %6651 = vmatprep.subr.bf16.mxu0 %v7300_v17  ;;  %6672 = vmatpush3.bf16.msra.mxu1 %v7299_v14  ;;  %v7356_v14 = vld [vmem:[%s9375_s1 + $0x688] sm:$0xff]   ;;  %v7359_v17 = vld [vmem:[%s9375_s1 + $0x600] sm:$0xff]  }
  0xa6   :  { %5023 = vmatprep.mubr.bf16.mxu0 %v1205_v20  ;;  %6673 = vmatprep.subr.bf16.mxu1 %v7301_v19  ;;  %v1217_v19 = vrot.slane %v26_v18, %v7779_v35  ;;  %v7361_v20 = vld [vmem:[%s9375_s1 + $0x778] sm:$0xff]  }
  0xa7   :  { %5063 = vmatprep.mubr.bf16.mxu1 %v1209_v23 }
  0xa8   :  { %6652 = vmatpush3.bf16.msra.mxu0 %v7302_v21  ;;  %v1210_v21 = vcombine.high %v26_v18, %v26_v18  ;;  %v1225_v23 = vcombine.high %v1217_v19, %v1217_v19 }
  0xa9   :  { %6653 = vmatprep.subr.bf16.mxu0 %v7304_v24  ;;  %6674 = vmatpush3.bf16.msra.mxu1 %v7303_v22  ;;  %v7360_v22 = vld [vmem:[%s9375_s1 + $0x680] sm:$0xff]   ;;  %v1233_v24 = vrot.slane %v1217_v19, %v7779_v35  ;;  %v7399_v19 = vld [vmem:[%s9375_s1 + $0x8f0] sm:$0xff]  }
  0xaa   :  { %6675 = vmatprep.subr.bf16.mxu1 %v7305_v25  ;;  %v7362_v25 = vld [vmem:[%s9375_s1 + $0x7f8] sm:$0xff]  }
  0xac   :  { %6654 = vmatpush3.bf16.msra.mxu0 %v7306_v26  ;;  %v8417_v26 = vrot.slane %v1210_v21, %v7779_v35 }
  0xad   :  { %6655 = vmatprep.subr.bf16.mxu0 %v7308_v28  ;;  %6676 = vmatpush3.bf16.msra.mxu1 %v7307_v27  ;;  %v7363_v27 = vld [vmem:[%s9375_s1 + $0x738] sm:$0xff]   ;;  %v1247_v28 = vrot.slane %v1225_v23, %v7779_v35  ;;  %v7401_v23 = vld [vmem:[%s9375_s1 + $0x8b0] sm:$0xff]  }
  0xae   :  { %6677 = vmatprep.subr.bf16.mxu1 %v7309_v29  ;;  %v7364_v29 = vld [vmem:[%s9375_s1 + $0x7b8] sm:$0xff]  }
  0xb0   :  { %6656 = vmatpush3.bf16.msra.mxu0 %v7310_v30  ;;  %v1226_v30 = vcombine.high %v8417_v26, %v8417_v26 }
  0xb1   :  { %6657 = vmatprep.subr.bf16.mxu0 %v7312_v32  ;;  %6678 = vmatpush3.bf16.msra.mxu1 %v7311_v31  ;;  %v1255_v31 = vcombine.high %v1233_v24, %v1233_v24  ;;  %v7365_v32 = vld [vmem:[%s9375_s1 + $0x770] sm:$0xff]  }
  0xb2   :  { %6679 = vmatprep.subr.bf16.mxu1 %v7313_v33  ;;  %v1257_v33 = vcombine.high %v1247_v28, %v1247_v28 }
  0xb4   :  { %6658 = vmatpush3.bf16.msra.mxu0 %v7314_v34 }
  0xb5   :  { %6659 = vmatprep.subr.bf16.mxu0 %v7316_v37  ;;  %6680 = vmatpush3.bf16.msra.mxu1 %v7315_v36  ;;  %v7366_v36 = vld [vmem:[%s9375_s1 + $0x7f0] sm:$0xff]   ;;  %v1254_v37 = vrot.slane %v1226_v30, %v7779_v35 }
  0xb6   :  { %6681 = vmatprep.subr.bf16.mxu1 %v7317_v38  ;;  %v7367_v38 = vld [vmem:[%s9375_s1 + $0x730] sm:$0xff]  }
  0xb8   :  { %6660 = vmatpush3.bf16.msra.mxu0 %v7318_v39 }
  0xb9   :  { %6661 = vmatprep.subr.bf16.mxu0 %v7320_v41  ;;  %6682 = vmatpush3.bf16.msra.mxu1 %v7319_v40  ;;  %v7368_v41 = vld [vmem:[%s9375_s1 + $0x7b0] sm:$0xff]  }
  0xba   :  { %6683 = vmatprep.subr.bf16.mxu1 %v7321_v42  ;;  %v1258_v42 = vcombine.high %v1254_v37, %v1254_v37 }
  0xbc   :  { %6662 = vmatpush3.bf16.msra.mxu0 %v7322_v43 }
  0xbd   :  { %6663 = vmatprep.subr.bf16.mxu0 %v7324_v45  ;;  %6684 = vmatpush3.bf16.msra.mxu1 %v7323_v44  ;;  %v7369_v44 = vld [vmem:[%s9375_s1 + $0x768] sm:$0xff]  }
  0xbe   :  { %6685 = vmatprep.subr.bf16.mxu1 %v7325_v46 }
  0xc0   :  { %6664 = vmatpush3.bf16.msra.mxu0 %v7326_v47  ;;  %v7370_v47 = vld [vmem:[%s9375_s1 + $0x7e8] sm:$0xff]  }
  0xc1   :  { %6693 = vmatprep.subr.bf16.mxu0 %v7329_v50  ;;  %6686 = vmatpush3.bf16.msra.mxu1 %v7327_v48 }
  0xc2   :  { %6715 = vmatprep.subr.bf16.mxu1 %v7330_v51 }
  0xc3   :  { %5024 = vmatmul.mubr.bf16.vlgmr.msra.gmra.mxu0 %v1191_v49  ;;  %v7371_v49 = vld [vmem:[%s9375_s1 + $0x728] sm:$0xff]  }
  0xc4   :  { %6694 = vmatpush3.bf16.msra.mxu0 %v7331_v52  ;;  %5064 = vmatmul.mubr.bf16.vlgmr.msra.gmra.mxu1 %v1207_v54  ;;  %v7372_v52 = vld [vmem:[%s9375_s1 + $0x7a8] sm:$0xff]   ;;  %v7373_v54 = vld [vmem:[%s9375_s1 + $0x760] sm:$0xff]  }
  0xc5   :  { %6695 = vmatprep.subr.bf16.mxu0 %v7333_v55  ;;  %6716 = vmatpush3.bf16.msra.mxu1 %v7332_v53 }
  0xc6   :  { %6717 = vmatprep.subr.bf16.mxu1 %v7334_v56  ;;  %5103 = vmatprep.mubr.bf16.mxu0 %v1247_v28  ;;  %v7374_v56 = vld [vmem:[%s9375_s1 + $0x7e0] sm:$0xff]   ;;  %v7403_v28 = vld [vmem:[%s9375_s1 + $0x8e8] sm:$0xff]  }
  0xc7   :  { %5143 = vmatprep.mubr.bf16.mxu1 %v1257_v33 }
  0xc8   :  { %6696 = vmatpush3.bf16.msra.mxu0 %v7335_v57  ;;  %v7375_v57 = vld [vmem:[%s9375_s1 + $0x720] sm:$0xff]  }
  0xc9   :  { %6697 = vmatprep.subr.bf16.mxu0 %v7337_v59  ;;  %6718 = vmatpush3.bf16.msra.mxu1 %v7336_v58  ;;  %v7376_v58 = vld [vmem:[%s9375_s1 + $0x7a0] sm:$0xff]   ;;  %v7377_v59 = vld [vmem:[%s9375_s1 + $0x758] sm:$0xff]  }
  0xca   :  { %6719 = vmatprep.subr.bf16.mxu1 %v7338_v60  ;;  %v7378_v60 = vld [vmem:[%s9375_s1 + $0x7d8] sm:$0xff]  }
  0xcc   :  { %6698 = vmatpush3.bf16.msra.mxu0 %v7339_v61  ;;  %v7379_v61 = vld [vmem:[%s9375_s1 + $0x718] sm:$0xff]  }
  0xcd   :  { %6699 = vmatprep.subr.bf16.mxu0 %v7341_v63  ;;  %6720 = vmatpush3.bf16.msra.mxu1 %v7340_v62  ;;  %v7380_v62 = vld [vmem:[%s9375_s1 + $0x798] sm:$0xff]   ;;  %v7381_v63 = vld [vmem:[%s9375_s1 + $0x750] sm:$0xff]  }
  0xce   :  { %6721 = vmatprep.subr.bf16.mxu1 %v7342_v0  ;;  %v7382_v0 = vld [vmem:[%s9375_s1 + $0x7d0] sm:$0xff]  }
  0xd0   :  { %6700 = vmatpush3.bf16.msra.mxu0 %v7343_v1  ;;  %v7383_v1 = vld [vmem:[%s9375_s1 + $0x710] sm:$0xff]  }
  0xd1   :  { %6701 = vmatprep.subr.bf16.mxu0 %v7345_v3  ;;  %6722 = vmatpush3.bf16.msra.mxu1 %v7344_v2  ;;  %v7384_v2 = vld [vmem:[%s9375_s1 + $0x790] sm:$0xff]   ;;  %v7385_v3 = vld [vmem:[%s9375_s1 + $0x748] sm:$0xff]  }
  0xd2   :  { %6723 = vmatprep.subr.bf16.mxu1 %v7346_v4  ;;  %v7386_v4 = vld [vmem:[%s9375_s1 + $0x7c8] sm:$0xff]  }
  0xd4   :  { %6702 = vmatpush3.bf16.msra.mxu0 %v7347_v5  ;;  %v7387_v5 = vld [vmem:[%s9375_s1 + $0x708] sm:$0xff]  }
  0xd5   :  { %6703 = vmatprep.subr.bf16.mxu0 %v7349_v7  ;;  %6724 = vmatpush3.bf16.msra.mxu1 %v7348_v6  ;;  %v7388_v6 = vld [vmem:[%s9375_s1 + $0x788] sm:$0xff]   ;;  %v7389_v7 = vld [vmem:[%s9375_s1 + $0x740] sm:$0xff]  }
  0xd6   :  { %6725 = vmatprep.subr.bf16.mxu1 %v7350_v8  ;;  %v7390_v8 = vld [vmem:[%s9375_s1 + $0x7c0] sm:$0xff]  }
  0xd8   :  { %6704 = vmatpush3.bf16.msra.mxu0 %v7351_v9  ;;  %v7391_v9 = vld [vmem:[%s9375_s1 + $0x700] sm:$0xff]  }
  0xd9   :  { %6705 = vmatprep.subr.bf16.mxu0 %v7353_v11  ;;  %6726 = vmatpush3.bf16.msra.mxu1 %v7352_v10  ;;  %v7392_v10 = vld [vmem:[%s9375_s1 + $0x780] sm:$0xff]   ;;  %v1240_v11 = vrot.slane %v8417_v26, %v7779_v35 }
  0xda   :  { %6727 = vmatprep.subr.bf16.mxu1 %v7354_v12  ;;  %v7394_v12 = vld [vmem:[%s9375_s1 + $0x878] sm:$0xff]  }
  0xdc   :  { %6706 = vmatpush3.bf16.msra.mxu0 %v7355_v13  ;;  %v7395_v13 = vld [vmem:[%s9375_s1 + $0x8f8] sm:$0xff]  }
  0xdd   :  { %6707 = vmatprep.subr.bf16.mxu0 %v7357_v15  ;;  %6728 = vmatpush3.bf16.msra.mxu1 %v7356_v14  ;;  %v7396_v14 = vld [vmem:[%s9375_s1 + $0x838] sm:$0xff]  }
  0xde   :  { %6729 = vmatprep.subr.bf16.mxu1 %v7358_v16  ;;  %v7397_v15 = vld [vmem:[%s9375_s1 + $0x8b8] sm:$0xff]   ;;  %v1256_v16 = vcombine.high %v1240_v11, %v1240_v11 }
  0xe0   :  { %6708 = vmatpush3.bf16.msra.mxu0 %v7359_v17  ;;  %v7398_v17 = vld [vmem:[%s9375_s1 + $0x870] sm:$0xff]  }
  0xe1   :  { %6737 = vmatprep.subr.bf16.mxu0 %v7361_v20  ;;  %6730 = vmatpush3.bf16.msra.mxu1 %v7360_v22  ;;  %v7400_v20 = vld [vmem:[%s9375_s1 + $0x830] sm:$0xff]  }
  0xe2   :  { %6759 = vmatprep.subr.bf16.mxu1 %v7362_v25  ;;  %v7402_v25 = vld [vmem:[%s9375_s1 + $0x868] sm:$0xff]  }
  0xe3   :  { %v6445_v34 = vpop.f32.mrf.mxu0  ;;  %5104 = vmatmul.mubr.bf16.vlgmr.msra.gmra.mxu0 %v1233_v24 }
  0xe4   :  { %v6467_v39 = vpop.f32.mrf.mxu1  ;;  %6738 = vmatpush3.bf16.msra.mxu0 %v7363_v27  ;;  %5144 = vmatmul.mubr.bf16.vlgmr.msra.gmra.mxu1 %v1255_v31  ;;  %v7404_v31 = vld [vmem:[%s9375_s1 + $0x828] sm:$0xff]  }
  0xe5   :  { %v6446_v40 = vpop.f32.mrf.mxu0  ;;  %6739 = vmatprep.subr.bf16.mxu0 %v7365_v32  ;;  %6760 = vmatpush3.bf16.msra.mxu1 %v7364_v29 }
  0xe6   :  { %v6447_v43 = vadd.f32 %v6446_v40, %v6445_v34  ;;  %v6468_v45 = vpop.f32.mrf.mxu1  ;;  %5183 = vmatprep.mubr.bf16.mxu0 %v1254_v37  ;;  %6761 = vmatprep.subr.bf16.mxu1 %v7366_v36  ;;  %v7405_v34 = vld [vmem:[%s9375_s1 + $0x8a8] sm:$0xff]   ;;  %v7406_v37 = vld [vmem:[%s9375_s1 + $0x860] sm:$0xff]  }
  0xe7   :  { %v6448_v46 = vpop.f32.mrf.mxu0  ;;  %v6469_v48 = vadd.f32 %v6468_v45, %v6467_v39  ;;  %5223 = vmatprep.mubr.bf16.mxu1 %v1258_v42  ;;  %v7407_v39 = vld [vmem:[%s9375_s1 + $0x8e0] sm:$0xff]   ;;  %v7410_v42 = vld [vmem:[%s9375_s1 + $0x858] sm:$0xff]  }
  0xe8   :  { %v6470_v50 = vpop.f32.mrf.mxu1  ;;  %6740 = vmatpush3.bf16.msra.mxu0 %v7367_v38  ;;  %v7408_v40 = vld [vmem:[%s9375_s1 + $0x820] sm:$0xff]   ;;  %v7413_v45 = vld [vmem:[%s9375_s1 + $0x898] sm:$0xff]   ;;  %v7414_v46 = vld [vmem:[%s9375_s1 + $0x850] sm:$0xff]  }
  0xe9   :  { %v6449_v51 = vpop.f32.mrf.mxu0  ;;  %v8453_v53 = vadd.f32 %v6469_v48, %v6447_v43  ;;  %6741 = vmatprep.subr.bf16.mxu0 %v7369_v44  ;;  %6762 = vmatpush3.bf16.msra.mxu1 %v7368_v41  ;;  %v7409_v41 = vld [vmem:[%s9375_s1 + $0x8a0] sm:$0xff]   ;;  %v7411_v43 = vld [vmem:[%s9375_s1 + $0x8d8] sm:$0xff]   ;;  %v7416_v48 = vld [vmem:[%s9375_s1 + $0x810] sm:$0xff]  }
  0xea   :  { %v6471_v55 = vpop.f32.mrf.mxu1  ;;  %6763 = vmatprep.subr.bf16.mxu1 %v7370_v47  ;;  %v7412_v44 = vld [vmem:[%s9375_s1 + $0x818] sm:$0xff]   ;;  %v7415_v47 = vld [vmem:[%s9375_s1 + $0x8d0] sm:$0xff]   ;;  %v7418_v50 = vld [vmem:[%s9375_s1 + $0x848] sm:$0xff]  }
  0xeb   :  { %v7419_v51 = vld [vmem:[%s9375_s1 + $0x8c8] sm:$0xff]   ;;  %v7423_v55 = vld [vmem:[%s9375_s1 + $0x8c0] sm:$0xff]  }
  0xec   :  { %6742 = vmatpush3.bf16.msra.mxu0 %v7371_v49  ;;  %v7417_v49 = vld [vmem:[%s9375_s1 + $0x890] sm:$0xff]  }
  0xed   :  { %6743 = vmatprep.subr.bf16.mxu0 %v7373_v54  ;;  %6764 = vmatpush3.bf16.msra.mxu1 %v7372_v52  ;;  %v7420_v52 = vld [vmem:[%s9375_s1 + $0x808] sm:$0xff]   ;;  %v7422_v54 = vld [vmem:[%s9375_s1 + $0x840] sm:$0xff]  }
  0xee   :  { %6765 = vmatprep.subr.bf16.mxu1 %v7374_v56  ;;  %v7424_v56 = vld [vmem:[%s9375_s1 + $0x800] sm:$0xff]  }
  0xf0   :  { %6744 = vmatpush3.bf16.msra.mxu0 %v7375_v57  ;;  %v27_v57 = vld [vmem:[%s9376_s0 + $0x20] sm:$0xff] }
  0xf1   :  { %6745 = vmatprep.subr.bf16.mxu0 %v7377_v59  ;;  %6766 = vmatpush3.bf16.msra.mxu1 %v7376_v58  ;;  %v7425_v58 = vld [vmem:[%s9375_s1 + $0x880] sm:$0xff]   ;;  %v1266_v59 = vrot.slane %v27_v57, %v7779_v35 }
  0xf2   :  { %6767 = vmatprep.subr.bf16.mxu1 %v7378_v60  ;;  %v1259_v60 = vcombine.high %v27_v57, %v27_v57  ;;  %v7463_v57 = vld [vmem:[%s9375_s1 + $0xa70] sm:$0xff]  }
  0xf4   :  { %6746 = vmatpush3.bf16.msra.mxu0 %v7379_v61  ;;  %v7426_v61 = vld [vmem:[%s9375_s1 + $0x978] sm:$0xff]  }
  0xf5   :  { %6747 = vmatprep.subr.bf16.mxu0 %v7381_v63  ;;  %6768 = vmatpush3.bf16.msra.mxu1 %v7380_v62  ;;  %v1274_v62 = vcombine.high %v1266_v59, %v1266_v59  ;;  %v1282_v63 = vrot.slane %v1266_v59, %v7779_v35  ;;  %v7464_v59 = vld [vmem:[%s9375_s1 + $0xaf0] sm:$0xff]  }
  0xf6   :  { %6769 = vmatprep.subr.bf16.mxu1 %v7382_v0  ;;  %v7427_v0 = vld [vmem:[%s9375_s1 + $0x9f8] sm:$0xff]  }
  0xf8   :  { %6748 = vmatpush3.bf16.msra.mxu0 %v7383_v1  ;;  %v8628_v1 = vrot.slane %v1259_v60, %v7779_v35  ;;  %v7465_v60 = vld [vmem:[%s9375_s1 + $0xa30] sm:$0xff]  }
  0xf9   :  { %6749 = vmatprep.subr.bf16.mxu0 %v7385_v3  ;;  %6770 = vmatpush3.bf16.msra.mxu1 %v7384_v2  ;;  %v7428_v2 = vld [vmem:[%s9375_s1 + $0x938] sm:$0xff]   ;;  %v1296_v3 = vrot.slane %v1274_v62, %v7779_v35 }
  0xfa   :  { %6771 = vmatprep.subr.bf16.mxu1 %v7386_v4  ;;  %v7429_v4 = vld [vmem:[%s9375_s1 + $0x9b8] sm:$0xff]  }
  0xfc   :  { %6750 = vmatpush3.bf16.msra.mxu0 %v7387_v5  ;;  %v1275_v5 = vcombine.high %v8628_v1, %v8628_v1 }
  0xfd   :  { %6751 = vmatprep.subr.bf16.mxu0 %v7389_v7  ;;  %6772 = vmatpush3.bf16.msra.mxu1 %v7388_v6  ;;  %v1304_v6 = vcombine.high %v1282_v63, %v1282_v63  ;;  %v7430_v7 = vld [vmem:[%s9375_s1 + $0x970] sm:$0xff]  }
  0xfe   :  { %6773 = vmatprep.subr.bf16.mxu1 %v7390_v8  ;;  %v1306_v8 = vcombine.high %v1296_v3, %v1296_v3 }
 0x100   :  { %6752 = vmatpush3.bf16.msra.mxu0 %v7391_v9 }
 0x101   :  { %6781 = vmatprep.subr.bf16.mxu0 %v7394_v12  ;;  %6774 = vmatpush3.bf16.msra.mxu1 %v7392_v10  ;;  %v7431_v10 = vld [vmem:[%s9375_s1 + $0x9f0] sm:$0xff]  }
 0x102   :  { %6803 = vmatprep.subr.bf16.mxu1 %v7395_v13  ;;  %v7432_v12 = vld [vmem:[%s9375_s1 + $0x930] sm:$0xff]  }
 0x103   :  { %v6489_v18 = vpop.f32.mrf.mxu0  ;;  %5184 = vmatmul.mubr.bf16.vlgmr.msra.gmra.mxu0 %v1240_v11  ;;  %v1303_v11 = vrot.slane %v1275_v5, %v7779_v35 }
 0x104   :  { %v6511_v21 = vpop.f32.mrf.mxu1  ;;  %6782 = vmatpush3.bf16.msra.mxu0 %v7396_v14  ;;  %5224 = vmatmul.mubr.bf16.vlgmr.msra.gmra.mxu1 %v1256_v16 }
 0x105   :  { %v6490_v22 = vpop.f32.mrf.mxu0  ;;  %6783 = vmatprep.subr.bf16.mxu0 %v7398_v17  ;;  %6804 = vmatpush3.bf16.msra.mxu1 %v7397_v15  ;;  %v7433_v15 = vld [vmem:[%s9375_s1 + $0x9b0] sm:$0xff]   ;;  %v1307_v16 = vcombine.high %v1303_v11, %v1303_v11 }
 0x106   :  { %v6491_v24 = vadd.f32 %v6490_v22, %v6489_v18  ;;  %v6512_v26 = vpop.f32.mrf.mxu1  ;;  %6805 = vmatprep.subr.bf16.mxu1 %v7399_v19  ;;  %5263 = vmatprep.mubr.bf16.mxu0 %v1296_v3  ;;  %v7434_v18 = vld [vmem:[%s9375_s1 + $0x968] sm:$0xff]  }
 0x107   :  { %v6492_v27 = vpop.f32.mrf.mxu0  ;;  %v6513_v30 = vadd.f32 %v6512_v26, %v6511_v21  ;;  %5303 = vmatprep.mubr.bf16.mxu1 %v1306_v8  ;;  %v7435_v21 = vld [vmem:[%s9375_s1 + $0x9e8] sm:$0xff]  }
 0x108   :  { %v4706_v29 = vadd.f32 %v6491_v24, %v8453_v53  ;;  %v6514_v32 = vpop.f32.mrf.mxu1  ;;  %6784 = vmatpush3.bf16.msra.mxu0 %v7400_v20  ;;  %v7421_v53 = vld [vmem:[%s9375_s1 + $0x888] sm:$0xff]  }
 0x109   :  { %v6493_v33 = vpop.f32.mrf.mxu0  ;;  %6785 = vmatprep.subr.bf16.mxu0 %v7402_v25  ;;  %6806 = vmatpush3.bf16.msra.mxu1 %v7401_v23  ;;  %v7436_v24 = vld [vmem:[%s9375_s1 + $0x928] sm:$0xff]   ;;  %v7440_v32 = vld [vmem:[%s9375_s1 + $0x920] sm:$0xff]  }
 0x10a   :  { %v8554_v36 = vadd.f32 %v6513_v30, %v4706_v29  ;;  %v6515_v38 = vpop.f32.mrf.mxu1  ;;  %6807 = vmatprep.subr.bf16.mxu1 %v7403_v28  ;;  %v7437_v27 = vld [vmem:[%s9375_s1 + $0x9a8] sm:$0xff]   ;;  %v7438_v29 = vld [vmem:[%s9375_s1 + $0x960] sm:$0xff]  }
 0x10b   :  { %v7441_v33 = vld [vmem:[%s9375_s1 + $0x9a0] sm:$0xff]   ;;  %v7445_v38 = vld [vmem:[%s9375_s1 + $0x998] sm:$0xff]  }
 0x10c   :  { %6786 = vmatpush3.bf16.msra.mxu0 %v7404_v31  ;;  %v7439_v31 = vld [vmem:[%s9375_s1 + $0x9e0] sm:$0xff]  }
 0x10d   :  { %6787 = vmatprep.subr.bf16.mxu0 %v7406_v37  ;;  %6808 = vmatpush3.bf16.msra.mxu1 %v7405_v34  ;;  %v7442_v34 = vld [vmem:[%s9375_s1 + $0x958] sm:$0xff]  }
 0x10e   :  { %6809 = vmatprep.subr.bf16.mxu1 %v7407_v39  ;;  %v7444_v37 = vld [vmem:[%s9375_s1 + $0x918] sm:$0xff]   ;;  %v7446_v39 = vld [vmem:[%s9375_s1 + $0x950] sm:$0xff]  }
 0x110   :  { %6788 = vmatpush3.bf16.msra.mxu0 %v7408_v40  ;;  %v7447_v40 = vld [vmem:[%s9375_s1 + $0x9d0] sm:$0xff]  }
 0x111   :  { %6789 = vmatprep.subr.bf16.mxu0 %v7410_v42  ;;  %6810 = vmatpush3.bf16.msra.mxu1 %v7409_v41  ;;  %v7448_v41 = vld [vmem:[%s9375_s1 + $0x910] sm:$0xff]  }
 0x112   :  { %6811 = vmatprep.subr.bf16.mxu1 %v7411_v43  ;;  %v7449_v42 = vld [vmem:[%s9375_s1 + $0x990] sm:$0xff]   ;;  %v7450_v43 = vld [vmem:[%s9375_s1 + $0x948] sm:$0xff]  }
 0x114   :  { %6790 = vmatpush3.bf16.msra.mxu0 %v7412_v44  ;;  %v7451_v44 = vld [vmem:[%s9375_s1 + $0x9c8] sm:$0xff]  }
 0x115   :  { %6791 = vmatprep.subr.bf16.mxu0 %v7414_v46  ;;  %6812 = vmatpush3.bf16.msra.mxu1 %v7413_v45  ;;  %v7452_v45 = vld [vmem:[%s9375_s1 + $0x908] sm:$0xff]  }
 0x116   :  { %6813 = vmatprep.subr.bf16.mxu1 %v7415_v47  ;;  %v7453_v46 = vld [vmem:[%s9375_s1 + $0x988] sm:$0xff]   ;;  %v7454_v47 = vld [vmem:[%s9375_s1 + $0x940] sm:$0xff]  }
 0x118   :  { %6792 = vmatpush3.bf16.msra.mxu0 %v7416_v48  ;;  %v7455_v48 = vld [vmem:[%s9375_s1 + $0x9c0] sm:$0xff]  }
 0x119   :  { %6793 = vmatprep.subr.bf16.mxu0 %v7418_v50  ;;  %6814 = vmatpush3.bf16.msra.mxu1 %v7417_v49  ;;  %v7456_v49 = vld [vmem:[%s9375_s1 + $0x900] sm:$0xff]  }
 0x11a   :  { %6815 = vmatprep.subr.bf16.mxu1 %v7419_v51  ;;  %v7457_v50 = vld [vmem:[%s9375_s1 + $0x980] sm:$0xff]   ;;  %v1289_v51 = vrot.slane %v8628_v1, %v7779_v35  ;;  %v7467_v1 = vld [vmem:[%s9375_s1 + $0xa68] sm:$0xff]  }
 0x11c   :  { %6794 = vmatpush3.bf16.msra.mxu0 %v7420_v52  ;;  %v7459_v52 = vld [vmem:[%s9375_s1 + $0xa78] sm:$0xff]  }
 0x11d   :  { %6795 = vmatprep.subr.bf16.mxu0 %v7422_v54  ;;  %6816 = vmatpush3.bf16.msra.mxu1 %v7421_v53  ;;  %v7460_v53 = vld [vmem:[%s9375_s1 + $0xaf8] sm:$0xff]  }
 0x11e   :  { %6817 = vmatprep.subr.bf16.mxu1 %v7423_v55  ;;  %v7461_v54 = vld [vmem:[%s9375_s1 + $0xa38] sm:$0xff]  }
 0x11f   :  { %v7462_v55 = vld [vmem:[%s9375_s1 + $0xab8] sm:$0xff]  }
 0x120   :  { %6796 = vmatpush3.bf16.msra.mxu0 %v7424_v56  ;;  %v1305_v56 = vcombine.high %v1289_v51, %v1289_v51 }
 0x121   :  { %6825 = vmatprep.subr.bf16.mxu0 %v7426_v61  ;;  %6818 = vmatpush3.bf16.msra.mxu1 %v7425_v58 }
 0x122   :  { %6847 = vmatprep.subr.bf16.mxu1 %v7427_v0 }
 0x123   :  { %v6533_v9 = vpop.f32.mrf.mxu0  ;;  %5264 = vmatmul.mubr.bf16.vlgmr.msra.gmra.mxu0 %v1282_v63  ;;  %v7466_v63 = vld [vmem:[%s9375_s1 + $0xab0] sm:$0xff]  }
 0x124   :  { %v6555_v13 = vpop.f32.mrf.mxu1  ;;  %6826 = vmatpush3.bf16.msra.mxu0 %v7428_v2  ;;  %5304 = vmatmul.mubr.bf16.vlgmr.msra.gmra.mxu1 %v1304_v6 }
 0x125   :  { %v6534_v14 = vpop.f32.mrf.mxu0  ;;  %6827 = vmatprep.subr.bf16.mxu0 %v7430_v7  ;;  %6848 = vmatpush3.bf16.msra.mxu1 %v7429_v4  ;;  %v7468_v4 = vld [vmem:[%s9375_s1 + $0xae8] sm:$0xff]  }
 0x126   :  { %v6535_v17 = vadd.f32 %v6534_v14, %v6533_v9  ;;  %v6556_v19 = vpop.f32.mrf.mxu1  ;;  %5343 = vmatprep.mubr.bf16.mxu0 %v1303_v11  ;;  %6849 = vmatprep.subr.bf16.mxu1 %v7431_v10  ;;  %v7469_v7 = vld [vmem:[%s9375_s1 + $0xa28] sm:$0xff]   ;;  %v7472_v14 = vld [vmem:[%s9375_s1 + $0xae0] sm:$0xff]  }
 0x127   :  { %v6536_v20 = vpop.f32.mrf.mxu0  ;;  %v6557_v23 = vadd.f32 %v6556_v19, %v6555_v13  ;;  %5383 = vmatprep.mubr.bf16.mxu1 %v1307_v16  ;;  %v7470_v10 = vld [vmem:[%s9375_s1 + $0xaa8] sm:$0xff]   ;;  %v7474_v16 = vld [vmem:[%s9375_s1 + $0xaa0] sm:$0xff]   ;;  %v7477_v19 = vld [vmem:[%s9375_s1 + $0xa18] sm:$0xff]  }
 0x128   :  { %v4786_v22 = vadd.f32 %v6535_v17, %v8554_v36  ;;  %v6558_v25 = vpop.f32.mrf.mxu1  ;;  %6828 = vmatpush3.bf16.msra.mxu0 %v7432_v12  ;;  %v7443_v36 = vld [vmem:[%s9375_s1 + $0x9d8] sm:$0xff]   ;;  %v7471_v12 = vld [vmem:[%s9375_s1 + $0xa60] sm:$0xff]  }
 0x129   :  { %v6537_v26 = vpop.f32.mrf.mxu0  ;;  %6829 = vmatprep.subr.bf16.mxu0 %v7434_v18  ;;  %6850 = vmatpush3.bf16.msra.mxu1 %v7433_v15  ;;  %v7473_v15 = vld [vmem:[%s9375_s1 + $0xa20] sm:$0xff]   ;;  %v7475_v17 = vld [vmem:[%s9375_s1 + $0xa58] sm:$0xff]   ;;  %v7483_v25 = vld [vmem:[%s9375_s1 + $0xa48] sm:$0xff]  }
 0x12a   :  { %v8665_v28 = vadd.f32 %v6557_v23, %v4786_v22  ;;  %v6559_v30 = vpop.f32.mrf.mxu1  ;;  %6851 = vmatprep.subr.bf16.mxu1 %v7435_v21  ;;  %v7476_v18 = vld [vmem:[%s9375_s1 + $0xad8] sm:$0xff]   ;;  %v7479_v21 = vld [vmem:[%s9375_s1 + $0xa50] sm:$0xff]   ;;  %v7484_v26 = vld [vmem:[%s9375_s1 + $0xac8] sm:$0xff]  }
 0x12b   :  { %v7478_v20 = vld [vmem:[%s9375_s1 + $0xa98] sm:$0xff]   ;;  %v7480_v22 = vld [vmem:[%s9375_s1 + $0xad0] sm:$0xff]   ;;  %v7488_v30 = vld [vmem:[%s9375_s1 + $0xac0] sm:$0xff]  }
 0x12c   :  { %6830 = vmatpush3.bf16.msra.mxu0 %v7436_v24  ;;  %v7481_v23 = vld [vmem:[%s9375_s1 + $0xa10] sm:$0xff]  }
 0x12d   :  { %6831 = vmatprep.subr.bf16.mxu0 %v7438_v29  ;;  %6852 = vmatpush3.bf16.msra.mxu1 %v7437_v27  ;;  %v7482_v24 = vld [vmem:[%s9375_s1 + $0xa90] sm:$0xff]   ;;  %v7485_v27 = vld [vmem:[%s9375_s1 + $0xa08] sm:$0xff]   ;;  %v7487_v29 = vld [vmem:[%s9375_s1 + $0xa40] sm:$0xff]  }
 0x12e   :  { %6853 = vmatprep.subr.bf16.mxu1 %v7439_v31  ;;  %v7489_v31 = vld [vmem:[%s9375_s1 + $0xa00] sm:$0xff]  }
 0x130   :  { %6832 = vmatpush3.bf16.msra.mxu0 %v7440_v32  ;;  %v28_v32 = vld [vmem:[%s9376_s0 + $0x28] sm:$0xff] }
 0x131   :  { %6833 = vmatprep.subr.bf16.mxu0 %v7442_v34  ;;  %6854 = vmatpush3.bf16.msra.mxu1 %v7441_v33  ;;  %v7490_v33 = vld [vmem:[%s9375_s1 + $0xa80] sm:$0xff]   ;;  %v1315_v34 = vrot.slane %v28_v32, %v7779_v35 }
 0x132   :  { %6855 = vmatprep.subr.bf16.mxu1 %v7443_v36  ;;  %v1308_v36 = vcombine.high %v28_v32, %v28_v32  ;;  %v7528_v32 = vld [vmem:[%s9375_s1 + $0xc70] sm:$0xff]  }
 0x134   :  { %6834 = vmatpush3.bf16.msra.mxu0 %v7444_v37  ;;  %v7491_v37 = vld [vmem:[%s9375_s1 + $0xb78] sm:$0xff]  }
 0x135   :  { %6835 = vmatprep.subr.bf16.mxu0 %v7446_v39  ;;  %6856 = vmatpush3.bf16.msra.mxu1 %v7445_v38  ;;  %v1323_v38 = vcombine.high %v1315_v34, %v1315_v34  ;;  %v1331_v39 = vrot.slane %v1315_v34, %v7779_v35  ;;  %v7529_v34 = vld [vmem:[%s9375_s1 + $0xcf0] sm:$0xff]  }
 0x136   :  { %6857 = vmatprep.subr.bf16.mxu1 %v7447_v40  ;;  %v7492_v40 = vld [vmem:[%s9375_s1 + $0xbf8] sm:$0xff]  }
 0x138   :  { %6836 = vmatpush3.bf16.msra.mxu0 %v7448_v41  ;;  %v8840_v41 = vrot.slane %v1308_v36, %v7779_v35  ;;  %v7530_v36 = vld [vmem:[%s9375_s1 + $0xc30] sm:$0xff]  }
 0x139   :  { %6837 = vmatprep.subr.bf16.mxu0 %v7450_v43  ;;  %6858 = vmatpush3.bf16.msra.mxu1 %v7449_v42  ;;  %v7493_v42 = vld [vmem:[%s9375_s1 + $0xb38] sm:$0xff]   ;;  %v1345_v43 = vrot.slane %v1323_v38, %v7779_v35 }
 0x13a   :  { %6859 = vmatprep.subr.bf16.mxu1 %v7451_v44  ;;  %v7494_v44 = vld [vmem:[%s9375_s1 + $0xbb8] sm:$0xff]  }
 0x13c   :  { %6838 = vmatpush3.bf16.msra.mxu0 %v7452_v45  ;;  %v1324_v45 = vcombine.high %v8840_v41, %v8840_v41 }
 0x13d   :  { %6839 = vmatprep.subr.bf16.mxu0 %v7454_v47  ;;  %6860 = vmatpush3.bf16.msra.mxu1 %v7453_v46  ;;  %v1353_v46 = vcombine.high %v1331_v39, %v1331_v39  ;;  %v7495_v47 = vld [vmem:[%s9375_s1 + $0xb70] sm:$0xff]  }
 0x13e   :  { %6861 = vmatprep.subr.bf16.mxu1 %v7455_v48  ;;  %v1355_v48 = vcombine.high %v1345_v43, %v1345_v43 }
 0x140   :  { %6840 = vmatpush3.bf16.msra.mxu0 %v7456_v49 }
 0x141   :  { %6869 = vmatprep.subr.bf16.mxu0 %v7459_v52  ;;  %6862 = vmatpush3.bf16.msra.mxu1 %v7457_v50  ;;  %v7496_v50 = vld [vmem:[%s9375_s1 + $0xbf0] sm:$0xff]  }
 0x142   :  { %6891 = vmatprep.subr.bf16.mxu1 %v7460_v53  ;;  %v7497_v52 = vld [vmem:[%s9375_s1 + $0xb30] sm:$0xff]  }
 0x143   :  { %v6577_v58 = vpop.f32.mrf.mxu0  ;;  %5344 = vmatmul.mubr.bf16.vlgmr.msra.gmra.mxu0 %v1289_v51  ;;  %v1352_v51 = vrot.slane %v1324_v45, %v7779_v35 }
 0x144   :  { %v6599_v61 = vpop.f32.mrf.mxu1  ;;  %6870 = vmatpush3.bf16.msra.mxu0 %v7461_v54  ;;  %5384 = vmatmul.mubr.bf16.vlgmr.msra.gmra.mxu1 %v1305_v56 }
 0x145   :  { %v6578_v62 = vpop.f32.mrf.mxu0  ;;  %6871 = vmatprep.subr.bf16.mxu0 %v7463_v57  ;;  %6892 = vmatpush3.bf16.msra.mxu1 %v7462_v55  ;;  %v7498_v55 = vld [vmem:[%s9375_s1 + $0xbb0] sm:$0xff]   ;;  %v1356_v56 = vcombine.high %v1352_v51, %v1352_v51 }
 0x146   :  { %v6579_v0 = vadd.f32 %v6578_v62, %v6577_v58  ;;  %v6600_v2 = vpop.f32.mrf.mxu1  ;;  %6893 = vmatprep.subr.bf16.mxu1 %v7464_v59  ;;  %5423 = vmatprep.mubr.bf16.mxu0 %v1345_v43  ;;  %v7499_v58 = vld [vmem:[%s9375_s1 + $0xb68] sm:$0xff]  }
 0x147   :  { %v6580_v3 = vpop.f32.mrf.mxu0  ;;  %v6601_v6 = vadd.f32 %v6600_v2, %v6599_v61  ;;  %5463 = vmatprep.mubr.bf16.mxu1 %v1355_v48  ;;  %v7500_v61 = vld [vmem:[%s9375_s1 + $0xbe8] sm:$0xff]  }
 0x148   :  { %v4866_v5 = vadd.f32 %v6579_v0, %v8665_v28  ;;  %v6602_v8 = vpop.f32.mrf.mxu1  ;;  %6872 = vmatpush3.bf16.msra.mxu0 %v7465_v60  ;;  %v7486_v28 = vld [vmem:[%s9375_s1 + $0xa88] sm:$0xff]  }
 0x149   :  { %v6581_v9 = vpop.f32.mrf.mxu0  ;;  %6873 = vmatprep.subr.bf16.mxu0 %v7467_v1  ;;  %6894 = vmatpush3.bf16.msra.mxu1 %v7466_v63  ;;  %v7501_v0 = vld [vmem:[%s9375_s1 + $0xb28] sm:$0xff]   ;;  %v7505_v8 = vld [vmem:[%s9375_s1 + $0xb20] sm:$0xff]  }
 0x14a   :  { %v8766_v11 = vadd.f32 %v6601_v6, %v4866_v5  ;;  %v6603_v13 = vpop.f32.mrf.mxu1  ;;  %6895 = vmatprep.subr.bf16.mxu1 %v7468_v4  ;;  %v7502_v3 = vld [vmem:[%s9375_s1 + $0xba8] sm:$0xff]   ;;  %v7503_v5 = vld [vmem:[%s9375_s1 + $0xb60] sm:$0xff]  }
 0x14b   :  { %v7506_v9 = vld [vmem:[%s9375_s1 + $0xba0] sm:$0xff]   ;;  %v7510_v13 = vld [vmem:[%s9375_s1 + $0xb98] sm:$0xff]  }
 0x14c   :  { %6874 = vmatpush3.bf16.msra.mxu0 %v7469_v7  ;;  %v7504_v7 = vld [vmem:[%s9375_s1 + $0xbe0] sm:$0xff]  }
 0x14d   :  { %6875 = vmatprep.subr.bf16.mxu0 %v7471_v12  ;;  %6896 = vmatpush3.bf16.msra.mxu1 %v7470_v10  ;;  %v7507_v10 = vld [vmem:[%s9375_s1 + $0xb58] sm:$0xff]  }
 0x14e   :  { %6897 = vmatprep.subr.bf16.mxu1 %v7472_v14  ;;  %v7509_v12 = vld [vmem:[%s9375_s1 + $0xb18] sm:$0xff]   ;;  %v7511_v14 = vld [vmem:[%s9375_s1 + $0xb50] sm:$0xff]  }
 0x150   :  { %6876 = vmatpush3.bf16.msra.mxu0 %v7473_v15  ;;  %v7512_v15 = vld [vmem:[%s9375_s1 + $0xbd0] sm:$0xff]  }
 0x151   :  { %6877 = vmatprep.subr.bf16.mxu0 %v7475_v17  ;;  %6898 = vmatpush3.bf16.msra.mxu1 %v7474_v16  ;;  %v7513_v16 = vld [vmem:[%s9375_s1 + $0xb10] sm:$0xff]  }
 0x152   :  { %6899 = vmatprep.subr.bf16.mxu1 %v7476_v18  ;;  %v7514_v17 = vld [vmem:[%s9375_s1 + $0xb90] sm:$0xff]   ;;  %v7515_v18 = vld [vmem:[%s9375_s1 + $0xb48] sm:$0xff]  }
 0x154   :  { %6878 = vmatpush3.bf16.msra.mxu0 %v7477_v19  ;;  %v7516_v19 = vld [vmem:[%s9375_s1 + $0xbc8] sm:$0xff]  }
 0x155   :  { %6879 = vmatprep.subr.bf16.mxu0 %v7479_v21  ;;  %6900 = vmatpush3.bf16.msra.mxu1 %v7478_v20  ;;  %v7517_v20 = vld [vmem:[%s9375_s1 + $0xb08] sm:$0xff]  }
 0x156   :  { %6901 = vmatprep.subr.bf16.mxu1 %v7480_v22  ;;  %v7518_v21 = vld [vmem:[%s9375_s1 + $0xb88] sm:$0xff]   ;;  %v7519_v22 = vld [vmem:[%s9375_s1 + $0xb40] sm:$0xff]  }
 0x158   :  { %6880 = vmatpush3.bf16.msra.mxu0 %v7481_v23  ;;  %v7520_v23 = vld [vmem:[%s9375_s1 + $0xbc0] sm:$0xff]  }
 0x159   :  { %6881 = vmatprep.subr.bf16.mxu0 %v7483_v25  ;;  %6902 = vmatpush3.bf16.msra.mxu1 %v7482_v24  ;;  %v7521_v24 = vld [vmem:[%s9375_s1 + $0xb00] sm:$0xff]  }
 0x15a   :  { %6903 = vmatprep.subr.bf16.mxu1 %v7484_v26  ;;  %v7522_v25 = vld [vmem:[%s9375_s1 + $0xb80] sm:$0xff]   ;;  %v1338_v26 = vrot.slane %v8840_v41, %v7779_v35  ;;  %v7532_v41 = vld [vmem:[%s9375_s1 + $0xc68] sm:$0xff]  }
 0x15c   :  { %6882 = vmatpush3.bf16.msra.mxu0 %v7485_v27  ;;  %v7524_v27 = vld [vmem:[%s9375_s1 + $0xc78] sm:$0xff]  }
 0x15d   :  { %6883 = vmatprep.subr.bf16.mxu0 %v7487_v29  ;;  %6904 = vmatpush3.bf16.msra.mxu1 %v7486_v28  ;;  %v7525_v28 = vld [vmem:[%s9375_s1 + $0xcf8] sm:$0xff]  }
 0x15e   :  { %6905 = vmatprep.subr.bf16.mxu1 %v7488_v30  ;;  %v7526_v29 = vld [vmem:[%s9375_s1 + $0xc38] sm:$0xff]  }
 0x15f   :  { %v7527_v30 = vld [vmem:[%s9375_s1 + $0xcb8] sm:$0xff]  }
 0x160   :  { %6884 = vmatpush3.bf16.msra.mxu0 %v7489_v31  ;;  %v1354_v31 = vcombine.high %v1338_v26, %v1338_v26 }
 0x161   :  { %6913 = vmatprep.subr.bf16.mxu0 %v7491_v37  ;;  %6906 = vmatpush3.bf16.msra.mxu1 %v7490_v33 }
 0x162   :  { %6935 = vmatprep.subr.bf16.mxu1 %v7492_v40 }
 0x163   :  { %v6621_v49 = vpop.f32.mrf.mxu0  ;;  %5424 = vmatmul.mubr.bf16.vlgmr.msra.gmra.mxu0 %v1331_v39  ;;  %v7531_v39 = vld [vmem:[%s9375_s1 + $0xcb0] sm:$0xff]  }
 0x164   :  { %v6643_v53 = vpop.f32.mrf.mxu1  ;;  %6914 = vmatpush3.bf16.msra.mxu0 %v7493_v42  ;;  %5464 = vmatmul.mubr.bf16.vlgmr.msra.gmra.mxu1 %v1353_v46 }
 0x165   :  { %v6622_v54 = vpop.f32.mrf.mxu0  ;;  %6915 = vmatprep.subr.bf16.mxu0 %v7495_v47  ;;  %6936 = vmatpush3.bf16.msra.mxu1 %v7494_v44  ;;  %v7533_v44 = vld [vmem:[%s9375_s1 + $0xce8] sm:$0xff]  }
 0x166   :  { %v6623_v57 = vadd.f32 %v6622_v54, %v6621_v49  ;;  %v6644_v59 = vpop.f32.mrf.mxu1  ;;  %5503 = vmatprep.mubr.bf16.mxu0 %v1352_v51  ;;  %6937 = vmatprep.subr.bf16.mxu1 %v7496_v50  ;;  %v7534_v47 = vld [vmem:[%s9375_s1 + $0xc28] sm:$0xff]   ;;  %v7537_v54 = vld [vmem:[%s9375_s1 + $0xce0] sm:$0xff]  }
 0x167   :  { %v6624_v60 = vpop.f32.mrf.mxu0  ;;  %v6645_v63 = vadd.f32 %v6644_v59, %v6643_v53  ;;  %5543 = vmatprep.mubr.bf16.mxu1 %v1356_v56  ;;  %v7535_v50 = vld [vmem:[%s9375_s1 + $0xca8] sm:$0xff]   ;;  %v7539_v56 = vld [vmem:[%s9375_s1 + $0xca0] sm:$0xff]   ;;  %v7542_v59 = vld [vmem:[%s9375_s1 + $0xc18] sm:$0xff]  }
 0x168   :  { %v4946_v62 = vadd.f32 %v6623_v57, %v8766_v11  ;;  %v6646_v1 = vpop.f32.mrf.mxu1  ;;  %6916 = vmatpush3.bf16.msra.mxu0 %v7497_v52  ;;  %v7508_v11 = vld [vmem:[%s9375_s1 + $0xbd8] sm:$0xff]   ;;  %v7536_v52 = vld [vmem:[%s9375_s1 + $0xc60] sm:$0xff]  }
 0x169   :  { %v6625_v2 = vpop.f32.mrf.mxu0  ;;  %6917 = vmatprep.subr.bf16.mxu0 %v7499_v58  ;;  %6938 = vmatpush3.bf16.msra.mxu1 %v7498_v55  ;;  %v7538_v55 = vld [vmem:[%s9375_s1 + $0xc20] sm:$0xff]   ;;  %v7540_v57 = vld [vmem:[%s9375_s1 + $0xc58] sm:$0xff]   ;;  %v7548_v1 = vld [vmem:[%s9375_s1 + $0xc48] sm:$0xff]  }
 0x16a   :  { %v8877_v4 = vadd.f32 %v6645_v63, %v4946_v62  ;;  %v6647_v6 = vpop.f32.mrf.mxu1  ;;  %6939 = vmatprep.subr.bf16.mxu1 %v7500_v61  ;;  %v7541_v58 = vld [vmem:[%s9375_s1 + $0xcd8] sm:$0xff]   ;;  %v7544_v61 = vld [vmem:[%s9375_s1 + $0xc50] sm:$0xff]   ;;  %v7549_v2 = vld [vmem:[%s9375_s1 + $0xcc8] sm:$0xff]  }
 0x16b   :  { %v7543_v60 = vld [vmem:[%s9375_s1 + $0xc98] sm:$0xff]   ;;  %v7545_v62 = vld [vmem:[%s9375_s1 + $0xcd0] sm:$0xff]   ;;  %v7553_v6 = vld [vmem:[%s9375_s1 + $0xcc0] sm:$0xff]  }
 0x16c   :  { %6918 = vmatpush3.bf16.msra.mxu0 %v7501_v0  ;;  %v7546_v63 = vld [vmem:[%s9375_s1 + $0xc10] sm:$0xff]  }
 0x16d   :  { %6919 = vmatprep.subr.bf16.mxu0 %v7503_v5  ;;  %6940 = vmatpush3.bf16.msra.mxu1 %v7502_v3  ;;  %v7547_v0 = vld [vmem:[%s9375_s1 + $0xc90] sm:$0xff]   ;;  %v7550_v3 = vld [vmem:[%s9375_s1 + $0xc08] sm:$0xff]   ;;  %v7552_v5 = vld [vmem:[%s9375_s1 + $0xc40] sm:$0xff]  }
 0x16e   :  { %6941 = vmatprep.subr.bf16.mxu1 %v7504_v7  ;;  %v7554_v7 = vld [vmem:[%s9375_s1 + $0xc00] sm:$0xff]  }
 0x170   :  { %6920 = vmatpush3.bf16.msra.mxu0 %v7505_v8  ;;  %v29_v8 = vld [vmem:[%s9376_s0 + $0x30] sm:$0xff] }
 0x171   :  { %6921 = vmatprep.subr.bf16.mxu0 %v7507_v10  ;;  %6942 = vmatpush3.bf16.msra.mxu1 %v7506_v9  ;;  %v1364_v9 = vrot.slane %v29_v8, %v7779_v35  ;;  %v7556_v10 = vld [vmem:[%s9375_s1 + $0xd78] sm:$0xff]  }
 0x172   :  { %6943 = vmatprep.subr.bf16.mxu1 %v7508_v11  ;;  %v1357_v11 = vcombine.high %v29_v8, %v29_v8 }
 0x174   :  { %6922 = vmatpush3.bf16.msra.mxu0 %v7509_v12  ;;  %v7555_v12 = vld [vmem:[%s9375_s1 + $0xc80] sm:$0xff]  }
 0x175   :  { %6923 = vmatprep.subr.bf16.mxu0 %v7511_v14  ;;  %6944 = vmatpush3.bf16.msra.mxu1 %v7510_v13  ;;  %v1372_v13 = vcombine.high %v1364_v9, %v1364_v9  ;;  %v1380_v14 = vrot.slane %v1364_v9, %v7779_v35  ;;  %v7592_v9 = vld [vmem:[%s9375_s1 + $0xeb8] sm:$0xff]  }
 0x176   :  { %6945 = vmatprep.subr.bf16.mxu1 %v7512_v15  ;;  %v7557_v15 = vld [vmem:[%s9375_s1 + $0xdf8] sm:$0xff]  }
 0x178   :  { %6924 = vmatpush3.bf16.msra.mxu0 %v7513_v16  ;;  %v9052_v16 = vrot.slane %v1357_v11, %v7779_v35 }
 0x179   :  { %6925 = vmatprep.subr.bf16.mxu0 %v7515_v18  ;;  %6946 = vmatpush3.bf16.msra.mxu1 %v7514_v17  ;;  %v1394_v17 = vrot.slane %v1372_v13, %v7779_v35  ;;  %v7558_v18 = vld [vmem:[%s9375_s1 + $0xd38] sm:$0xff]   ;;  %v7595_v13 = vld [vmem:[%s9375_s1 + $0xe30] sm:$0xff]  }
 0x17a   :  { %6947 = vmatprep.subr.bf16.mxu1 %v7516_v19  ;;  %v1373_v19 = vcombine.high %v9052_v16, %v9052_v16 }
 0x17c   :  { %6926 = vmatpush3.bf16.msra.mxu0 %v7517_v20  ;;  %v1402_v20 = vcombine.high %v1380_v14, %v1380_v14 }
 0x17d   :  { %6927 = vmatprep.subr.bf16.mxu0 %v7519_v22  ;;  %6948 = vmatpush3.bf16.msra.mxu1 %v7518_v21  ;;  %v7560_v21 = vld [vmem:[%s9375_s1 + $0xd70] sm:$0xff]   ;;  %v1404_v22 = vcombine.high %v1394_v17, %v1394_v17 }
 0x17e   :  { %6949 = vmatprep.subr.bf16.mxu1 %v7520_v23 }
 0x180   :  { %6928 = vmatpush3.bf16.msra.mxu0 %v7521_v24  ;;  %v7559_v24 = vld [vmem:[%s9375_s1 + $0xdb8] sm:$0xff]  }
 0x181   :  { %6957 = vmatprep.subr.bf16.mxu0 %v7524_v27  ;;  %6950 = vmatpush3.bf16.msra.mxu1 %v7522_v25  ;;  %v1401_v25 = vrot.slane %v1373_v19, %v7779_v35 }
 0x182   :  { %6979 = vmatprep.subr.bf16.mxu1 %v7525_v28 }
 0x183   :  { %v6665_v33 = vpop.f32.mrf.mxu0  ;;  %5504 = vmatmul.mubr.bf16.vlgmr.msra.gmra.mxu0 %v1338_v26  ;;  %v7561_v26 = vld [vmem:[%s9375_s1 + $0xdf0] sm:$0xff]  }
 0x184   :  { %v6687_v37 = vpop.f32.mrf.mxu1  ;;  %6958 = vmatpush3.bf16.msra.mxu0 %v7526_v29  ;;  %5544 = vmatmul.mubr.bf16.vlgmr.msra.gmra.mxu1 %v1354_v31  ;;  %v7562_v29 = vld [vmem:[%s9375_s1 + $0xd30] sm:$0xff]  }
 0x185   :  { %v6666_v38 = vpop.f32.mrf.mxu0  ;;  %6959 = vmatprep.subr.bf16.mxu0 %v7528_v32  ;;  %6980 = vmatpush3.bf16.msra.mxu1 %v7527_v30  ;;  %v1405_v30 = vcombine.high %v1401_v25, %v1401_v25  ;;  %v7564_v32 = vld [vmem:[%s9375_s1 + $0xd68] sm:$0xff]  }
 0x186   :  { %v6667_v40 = vadd.f32 %v6666_v38, %v6665_v33  ;;  %v6688_v42 = vpop.f32.mrf.mxu1  ;;  %6981 = vmatprep.subr.bf16.mxu1 %v7529_v34  ;;  %5583 = vmatprep.mubr.bf16.mxu0 %v1394_v17 }
 0x187   :  { %v6668_v43 = vpop.f32.mrf.mxu0  ;;  %v6689_v46 = vadd.f32 %v6688_v42, %v6687_v37  ;;  %5623 = vmatprep.mubr.bf16.mxu1 %v1404_v22  ;;  %v7566_v42 = vld [vmem:[%s9375_s1 + $0xd28] sm:$0xff]  }
 0x188   :  { %v5026_v45 = vadd.f32 %v6667_v40, %v8877_v4  ;;  %v6690_v48 = vpop.f32.mrf.mxu1  ;;  %6960 = vmatpush3.bf16.msra.mxu0 %v7530_v36  ;;  %v7551_v4 = vld [vmem:[%s9375_s1 + $0xc88] sm:$0xff]   ;;  %v7563_v36 = vld [vmem:[%s9375_s1 + $0xdb0] sm:$0xff]  }
 0x189   :  { %v6669_v49 = vpop.f32.mrf.mxu0  ;;  %6961 = vmatprep.subr.bf16.mxu0 %v7532_v41  ;;  %6982 = vmatpush3.bf16.msra.mxu1 %v7531_v39  ;;  %v7565_v39 = vld [vmem:[%s9375_s1 + $0xde8] sm:$0xff]   ;;  %v7570_v48 = vld [vmem:[%s9375_s1 + $0xd20] sm:$0xff]  }
 0x18a   :  { %v8978_v51 = vadd.f32 %v6689_v46, %v5026_v45  ;;  %v6691_v53 = vpop.f32.mrf.mxu1  ;;  %6983 = vmatprep.subr.bf16.mxu1 %v7533_v44  ;;  %v7568_v44 = vld [vmem:[%s9375_s1 + $0xd60] sm:$0xff]   ;;  %v7567_v46 = vld [vmem:[%s9375_s1 + $0xda8] sm:$0xff]   ;;  %v7572_v49 = vld [vmem:[%s9375_s1 + $0xd58] sm:$0xff]  }
 0x18b   :  { %v7576_v53 = vld [vmem:[%s9375_s1 + $0xd50] sm:$0xff]  }
 0x18c   :  { %6962 = vmatpush3.bf16.msra.mxu0 %v7534_v47  ;;  %v7569_v47 = vld [vmem:[%s9375_s1 + $0xde0] sm:$0xff]  }
 0x18d   :  { %6963 = vmatprep.subr.bf16.mxu0 %v7536_v52  ;;  %6984 = vmatpush3.bf16.msra.mxu1 %v7535_v50  ;;  %v7571_v50 = vld [vmem:[%s9375_s1 + $0xda0] sm:$0xff]   ;;  %v7574_v52 = vld [vmem:[%s9375_s1 + $0xd18] sm:$0xff]  }
 0x18e   :  { %6985 = vmatprep.subr.bf16.mxu1 %v7537_v54  ;;  %v7575_v54 = vld [vmem:[%s9375_s1 + $0xd98] sm:$0xff]  }
 0x190   :  { %6964 = vmatpush3.bf16.msra.mxu0 %v7538_v55  ;;  %v7577_v55 = vld [vmem:[%s9375_s1 + $0xdd0] sm:$0xff]  }
 0x191   :  { %6965 = vmatprep.subr.bf16.mxu0 %v7540_v57  ;;  %6986 = vmatpush3.bf16.msra.mxu1 %v7539_v56  ;;  %v7578_v56 = vld [vmem:[%s9375_s1 + $0xd10] sm:$0xff]   ;;  %v7580_v57 = vld [vmem:[%s9375_s1 + $0xd48] sm:$0xff]  }
 0x192   :  { %6987 = vmatprep.subr.bf16.mxu1 %v7541_v58  ;;  %v7579_v58 = vld [vmem:[%s9375_s1 + $0xd90] sm:$0xff]  }
 0x194   :  { %6966 = vmatpush3.bf16.msra.mxu0 %v7542_v59  ;;  %v7581_v59 = vld [vmem:[%s9375_s1 + $0xdc8] sm:$0xff]  }
 0x195   :  { %6967 = vmatprep.subr.bf16.mxu0 %v7544_v61  ;;  %6988 = vmatpush3.bf16.msra.mxu1 %v7543_v60  ;;  %v7582_v60 = vld [vmem:[%s9375_s1 + $0xd08] sm:$0xff]   ;;  %v7584_v61 = vld [vmem:[%s9375_s1 + $0xd40] sm:$0xff]  }
 0x196   :  { %6989 = vmatprep.subr.bf16.mxu1 %v7545_v62  ;;  %v7583_v62 = vld [vmem:[%s9375_s1 + $0xd88] sm:$0xff]  }
 0x198   :  { %6968 = vmatpush3.bf16.msra.mxu0 %v7546_v63  ;;  %v7585_v63 = vld [vmem:[%s9375_s1 + $0xdc0] sm:$0xff]  }
 0x199   :  { %6969 = vmatprep.subr.bf16.mxu0 %v7548_v1  ;;  %6990 = vmatpush3.bf16.msra.mxu1 %v7547_v0  ;;  %v7586_v0 = vld [vmem:[%s9375_s1 + $0xd00] sm:$0xff]   ;;  %v1387_v1 = vrot.slane %v9052_v16, %v7779_v35 }
 0x19a   :  { %6991 = vmatprep.subr.bf16.mxu1 %v7549_v2  ;;  %v7589_v2 = vld [vmem:[%s9375_s1 + $0xe78] sm:$0xff]  }
 0x19c   :  { %6970 = vmatpush3.bf16.msra.mxu0 %v7550_v3  ;;  %v7587_v3 = vld [vmem:[%s9375_s1 + $0xd80] sm:$0xff]  }
 0x19d   :  { %6971 = vmatprep.subr.bf16.mxu0 %v7552_v5  ;;  %6992 = vmatpush3.bf16.msra.mxu1 %v7551_v4  ;;  %v7590_v4 = vld [vmem:[%s9375_s1 + $0xef8] sm:$0xff]  }
 0x19e   :  { %6993 = vmatprep.subr.bf16.mxu1 %v7553_v6  ;;  %v7591_v5 = vld [vmem:[%s9375_s1 + $0xe38] sm:$0xff]   ;;  %v1403_v6 = vcombine.high %v1387_v1, %v1387_v1 }
 0x1a0   :  { %6972 = vmatpush3.bf16.msra.mxu0 %v7554_v7  ;;  %v7593_v7 = vld [vmem:[%s9375_s1 + $0xe70] sm:$0xff]  }
 0x1a1   :  { %7001 = vmatprep.subr.bf16.mxu0 %v7556_v10  ;;  %6994 = vmatpush3.bf16.msra.mxu1 %v7555_v12  ;;  %v7594_v10 = vld [vmem:[%s9375_s1 + $0xef0] sm:$0xff]  }
 0x1a2   :  { %7023 = vmatprep.subr.bf16.mxu1 %v7557_v15  ;;  %v7597_v15 = vld [vmem:[%s9375_s1 + $0xe68] sm:$0xff]  }
 0x1a3   :  { %v6709_v23 = vpop.f32.mrf.mxu0  ;;  %5584 = vmatmul.mubr.bf16.vlgmr.msra.gmra.mxu0 %v1380_v14 }
 0x1a4   :  { %v6731_v27 = vpop.f32.mrf.mxu1  ;;  %7002 = vmatpush3.bf16.msra.mxu0 %v7558_v18  ;;  %5624 = vmatmul.mubr.bf16.vlgmr.msra.gmra.mxu1 %v1402_v20  ;;  %v7596_v18 = vld [vmem:[%s9375_s1 + $0xeb0] sm:$0xff]  }
 0x1a5   :  { %v6710_v28 = vpop.f32.mrf.mxu0  ;;  %7003 = vmatprep.subr.bf16.mxu0 %v7560_v21  ;;  %7024 = vmatpush3.bf16.msra.mxu1 %v7559_v24  ;;  %v7598_v21 = vld [vmem:[%s9375_s1 + $0xee8] sm:$0xff]  }
 0x1a6   :  { %v6711_v31 = vadd.f32 %v6710_v28, %v6709_v23  ;;  %v6732_v33 = vpop.f32.mrf.mxu1  ;;  %5663 = vmatprep.mubr.bf16.mxu0 %v1401_v25  ;;  %7025 = vmatprep.subr.bf16.mxu1 %v7561_v26  ;;  %v7599_v24 = vld [vmem:[%s9375_s1 + $0xe28] sm:$0xff]   ;;  %v7601_v26 = vld [vmem:[%s9375_s1 + $0xe60] sm:$0xff]  }
 0x1a7   :  { %v6712_v34 = vpop.f32.mrf.mxu0  ;;  %v6733_v38 = vadd.f32 %v6732_v33, %v6731_v27  ;;  %5703 = vmatprep.mubr.bf16.mxu1 %v1405_v30  ;;  %v7600_v28 = vld [vmem:[%s9375_s1 + $0xea8] sm:$0xff]   ;;  %v7603_v30 = vld [vmem:[%s9375_s1 + $0xe20] sm:$0xff]   ;;  %v7606_v33 = vld [vmem:[%s9375_s1 + $0xed8] sm:$0xff]  }
 0x1a8   :  { %v5106_v37 = vadd.f32 %v6711_v31, %v8978_v51  ;;  %v6734_v40 = vpop.f32.mrf.mxu1  ;;  %7004 = vmatpush3.bf16.msra.mxu0 %v7562_v29  ;;  %v7573_v51 = vld [vmem:[%s9375_s1 + $0xdd8] sm:$0xff]   ;;  %v7602_v29 = vld [vmem:[%s9375_s1 + $0xee0] sm:$0xff]  }
 0x1a9   :  { %v6713_v41 = vpop.f32.mrf.mxu0  ;;  %7005 = vmatprep.subr.bf16.mxu0 %v7564_v32  ;;  %7026 = vmatpush3.bf16.msra.mxu1 %v7563_v36  ;;  %v7605_v31 = vld [vmem:[%s9375_s1 + $0xe58] sm:$0xff]   ;;  %v7604_v32 = vld [vmem:[%s9375_s1 + $0xea0] sm:$0xff]   ;;  %v7609_v36 = vld [vmem:[%s9375_s1 + $0xe50] sm:$0xff]  }
 0x1aa   :  { %v9086_v43 = vadd.f32 %v6733_v38, %v5106_v37  ;;  %v6735_v45 = vpop.f32.mrf.mxu1  ;;  %7027 = vmatprep.subr.bf16.mxu1 %v7565_v39  ;;  %v7607_v34 = vld [vmem:[%s9375_s1 + $0xe18] sm:$0xff]   ;;  %v7610_v38 = vld [vmem:[%s9375_s1 + $0xed0] sm:$0xff]   ;;  %v7613_v40 = vld [vmem:[%s9375_s1 + $0xe48] sm:$0xff]  }
 0x1ab   :  { %v7608_v37 = vld [vmem:[%s9375_s1 + $0xe98] sm:$0xff]   ;;  %v7611_v39 = vld [vmem:[%s9375_s1 + $0xe10] sm:$0xff]   ;;  %v7616_v45 = vld [vmem:[%s9375_s1 + $0xe88] sm:$0xff]  }
 0x1ac   :  { %7006 = vmatpush3.bf16.msra.mxu0 %v7566_v42  ;;  %v7612_v41 = vld [vmem:[%s9375_s1 + $0xe90] sm:$0xff]   ;;  %v7614_v42 = vld [vmem:[%s9375_s1 + $0xec8] sm:$0xff]  }
 0x1ad   :  { %7007 = vmatprep.subr.bf16.mxu0 %v7568_v44  ;;  %7028 = vmatpush3.bf16.msra.mxu1 %v7567_v46  ;;  %v7617_v44 = vld [vmem:[%s9375_s1 + $0xe40] sm:$0xff]  }
 0x1ae   :  { %7029 = vmatprep.subr.bf16.mxu1 %v7569_v47  ;;  %v7618_v46 = vld [vmem:[%s9375_s1 + $0xec0] sm:$0xff]   ;;  %v30_v47 = vld [vmem:[%s9376_s0 + $0x38] sm:$0xff] }
 0x1b0   :  { %7008 = vmatpush3.bf16.msra.mxu0 %v7570_v48  ;;  %v7619_v48 = vld [vmem:[%s9375_s1 + $0xe00] sm:$0xff]  }
 0x1b1   :  { %7009 = vmatprep.subr.bf16.mxu0 %v7572_v49  ;;  %7030 = vmatpush3.bf16.msra.mxu1 %v7571_v50  ;;  %v1413_v49 = vrot.slane %v30_v47, %v7779_v35  ;;  %v1406_v50 = vcombine.high %v30_v47, %v30_v47 }
 0x1b2   :  { %7031 = vmatprep.subr.bf16.mxu1 %v7573_v51  ;;  %v7621_v51 = vld [vmem:[%s9375_s1 + $0xf78] sm:$0xff]  }
 0x1b4   :  { %7010 = vmatpush3.bf16.msra.mxu0 %v7574_v52  ;;  %v7620_v52 = vld [vmem:[%s9375_s1 + $0xe80] sm:$0xff]  }
 0x1b5   :  { %7011 = vmatprep.subr.bf16.mxu0 %v7576_v53  ;;  %7032 = vmatpush3.bf16.msra.mxu1 %v7575_v54  ;;  %v1421_v53 = vcombine.high %v1413_v49, %v1413_v49  ;;  %v1429_v54 = vrot.slane %v1413_v49, %v7779_v35 }
 0x1b6   :  { %7033 = vmatprep.subr.bf16.mxu1 %v7577_v55  ;;  %v9261_v55 = vrot.slane %v1406_v50, %v7779_v35 }
 0x1b8   :  { %7012 = vmatpush3.bf16.msra.mxu0 %v7578_v56  ;;  %v7622_v56 = vld [vmem:[%s9375_s1 + $0xff8] sm:$0xff]  }
 0x1b9   :  { %7013 = vmatprep.subr.bf16.mxu0 %v7580_v57  ;;  %7034 = vmatpush3.bf16.msra.mxu1 %v7579_v58  ;;  %v1443_v57 = vrot.slane %v1421_v53, %v7779_v35  ;;  %v7623_v58 = vld [vmem:[%s9375_s1 + $0xf38] sm:$0xff]  }
 0x1ba   :  { %7035 = vmatprep.subr.bf16.mxu1 %v7581_v59  ;;  %v1422_v59 = vcombine.high %v9261_v55, %v9261_v55 }
 0x1bc   :  { %7014 = vmatpush3.bf16.msra.mxu0 %v7582_v60  ;;  %v1451_v60 = vcombine.high %v1429_v54, %v1429_v54 }
 0x1bd   :  { %7015 = vmatprep.subr.bf16.mxu0 %v7584_v61  ;;  %7036 = vmatpush3.bf16.msra.mxu1 %v7583_v62  ;;  %v7625_v61 = vld [vmem:[%s9375_s1 + $0xf70] sm:$0xff]   ;;  %v1453_v62 = vcombine.high %v1443_v57, %v1443_v57 }
 0x1be   :  { %7037 = vmatprep.subr.bf16.mxu1 %v7585_v63 }
 0x1c0   :  { %7016 = vmatpush3.bf16.msra.mxu0 %v7586_v0  ;;  %v7624_v0 = vld [vmem:[%s9375_s1 + $0xfb8] sm:$0xff]  }
 0x1c1   :  { %7045 = vmatprep.subr.bf16.mxu0 %v7589_v2  ;;  %7038 = vmatpush3.bf16.msra.mxu1 %v7587_v3  ;;  %v7626_v2 = vld [vmem:[%s9375_s1 + $0xff0] sm:$0xff]  }
 0x1c2   :  { %7067 = vmatprep.subr.bf16.mxu1 %v7590_v4 }
 0x1c3   :  { %v6753_v8 = vpop.f32.mrf.mxu0  ;;  %5664 = vmatmul.mubr.bf16.vlgmr.msra.gmra.mxu0 %v1387_v1  ;;  %v1450_v1 = vrot.slane %v1422_v59, %v7779_v35 }
 0x1c4   :  { %v6775_v11 = vpop.f32.mrf.mxu1  ;;  %7046 = vmatpush3.bf16.msra.mxu0 %v7591_v5  ;;  %5704 = vmatmul.mubr.bf16.vlgmr.msra.gmra.mxu1 %v1403_v6  ;;  %v7627_v5 = vld [vmem:[%s9375_s1 + $0xf30] sm:$0xff]  }
 0x1c5   :  { %v6754_v12 = vpop.f32.mrf.mxu0  ;;  %7047 = vmatprep.subr.bf16.mxu0 %v7593_v7  ;;  %7068 = vmatpush3.bf16.msra.mxu1 %v7592_v9  ;;  %v1454_v6 = vcombine.high %v1450_v1, %v1450_v1 }
 0x1c6   :  { %v6755_v14 = vadd.f32 %v6754_v12, %v6753_v8  ;;  %v6776_v16 = vpop.f32.mrf.mxu1  ;;  %7069 = vmatprep.subr.bf16.mxu1 %v7594_v10  ;;  %5743 = vmatprep.mubr.bf16.mxu0 %v1443_v57  ;;  %v7629_v8 = vld [vmem:[%s9375_s1 + $0xf68] sm:$0xff]  }
 0x1c7   :  { %v6756_v17 = vpop.f32.mrf.mxu0  ;;  %v6777_v20 = vadd.f32 %v6776_v16, %v6775_v11  ;;  %5783 = vmatprep.mubr.bf16.mxu1 %v1453_v62  ;;  %v7628_v11 = vld [vmem:[%s9375_s1 + $0xfb0] sm:$0xff]  }
 0x1c8   :  { %v5186_v19 = vadd.f32 %v6755_v14, %v9086_v43  ;;  %v6778_v22 = vpop.f32.mrf.mxu1  ;;  %7048 = vmatpush3.bf16.msra.mxu0 %v7595_v13  ;;  %v7615_v43 = vld [vmem:[%s9375_s1 + $0xe08] sm:$0xff]  }
 0x1c9   :  { %v6757_v23 = vpop.f32.mrf.mxu0  ;;  %7049 = vmatprep.subr.bf16.mxu0 %v7597_v15  ;;  %7070 = vmatpush3.bf16.msra.mxu1 %v7596_v18  ;;  %v7630_v14 = vld [vmem:[%s9375_s1 + $0xfe8] sm:$0xff]   ;;  %v7634_v22 = vld [vmem:[%s9375_s1 + $0xfe0] sm:$0xff]  }
 0x1ca   :  { %v9187_v25 = vadd.f32 %v6777_v20, %v5186_v19  ;;  %v6779_v27 = vpop.f32.mrf.mxu1  ;;  %7071 = vmatprep.subr.bf16.mxu1 %v7598_v21  ;;  %v7631_v17 = vld [vmem:[%s9375_s1 + $0xf28] sm:$0xff]   ;;  %v7633_v19 = vld [vmem:[%s9375_s1 + $0xf60] sm:$0xff]  }
 0x1cb   :  { %v7632_v21 = vld [vmem:[%s9375_s1 + $0xfa8] sm:$0xff]   ;;  %v7635_v23 = vld [vmem:[%s9375_s1 + $0xf20] sm:$0xff]   ;;  %v7639_v27 = vld [vmem:[%s9375_s1 + $0xf18] sm:$0xff]  }
 0x1cc   :  { %7050 = vmatpush3.bf16.msra.mxu0 %v7599_v24  ;;  %v7637_v24 = vld [vmem:[%s9375_s1 + $0xf58] sm:$0xff]  }
 0x1cd   :  { %7051 = vmatprep.subr.bf16.mxu0 %v7601_v26  ;;  %7072 = vmatpush3.bf16.msra.mxu1 %v7600_v28  ;;  %v7638_v26 = vld [vmem:[%s9375_s1 + $0xfd8] sm:$0xff]   ;;  %v7641_v28 = vld [vmem:[%s9375_s1 + $0xf50] sm:$0xff]  }
 0x1ce   :  { %7073 = vmatprep.subr.bf16.mxu1 %v7602_v29  ;;  %v7640_v29 = vld [vmem:[%s9375_s1 + $0xf98] sm:$0xff]  }
 0x1d0   :  { %7052 = vmatpush3.bf16.msra.mxu0 %v7603_v30  ;;  %v7642_v30 = vld [vmem:[%s9375_s1 + $0xfd0] sm:$0xff]  }
 0x1d1   :  { %7053 = vmatprep.subr.bf16.mxu0 %v7605_v31  ;;  %7074 = vmatpush3.bf16.msra.mxu1 %v7604_v32  ;;  %v7643_v31 = vld [vmem:[%s9375_s1 + $0xf10] sm:$0xff]   ;;  %v7645_v32 = vld [vmem:[%s9375_s1 + $0xf48] sm:$0xff]  }
 0x1d2   :  { %7075 = vmatprep.subr.bf16.mxu1 %v7606_v33  ;;  %v7644_v33 = vld [vmem:[%s9375_s1 + $0xf90] sm:$0xff]  }
 0x1d4   :  { %7054 = vmatpush3.bf16.msra.mxu0 %v7607_v34  ;;  %v7646_v34 = vld [vmem:[%s9375_s1 + $0xfc8] sm:$0xff]  }
 0x1d5   :  { %7055 = vmatprep.subr.bf16.mxu0 %v7609_v36  ;;  %7076 = vmatpush3.bf16.msra.mxu1 %v7608_v37  ;;  %v7647_v36 = vld [vmem:[%s9375_s1 + $0xf08] sm:$0xff]   ;;  %v7649_v37 = vld [vmem:[%s9375_s1 + $0xf40] sm:$0xff]  }
 0x1d6   :  { %7077 = vmatprep.subr.bf16.mxu1 %v7610_v38  ;;  %v7648_v38 = vld [vmem:[%s9375_s1 + $0xf88] sm:$0xff]  }
 0x1d8   :  { %7056 = vmatpush3.bf16.msra.mxu0 %v7611_v39  ;;  %v7650_v39 = vld [vmem:[%s9375_s1 + $0xfc0] sm:$0xff]  }
 0x1d9   :  { %7057 = vmatprep.subr.bf16.mxu0 %v7613_v40  ;;  %7078 = vmatpush3.bf16.msra.mxu1 %v7612_v41  ;;  %v7651_v40 = vld [vmem:[%s9375_s1 + $0xf00] sm:$0xff]   ;;  %v1436_v41 = vrot.slane %v9261_v55, %v7779_v35 }
 0x1da   :  { %7079 = vmatprep.subr.bf16.mxu1 %v7614_v42  ;;  %v7652_v42 = vld [vmem:[%s9375_s1 + $0xf80] sm:$0xff]  }
 0x1dc   :  { %7058 = vmatpush3.bf16.msra.mxu0 %v7615_v43  ;;  %v1452_v43 = vcombine.high %v1436_v41, %v1436_v41 }
 0x1dd   :  { %7059 = vmatprep.subr.bf16.mxu0 %v7617_v44  ;;  %7080 = vmatpush3.bf16.msra.mxu1 %v7616_v45 }
 0x1de   :  { %7081 = vmatprep.subr.bf16.mxu1 %v7618_v46 }
 0x1e0   :  { %7060 = vmatpush3.bf16.msra.mxu0 %v7619_v48 }
 0x1e1   :  { %7089 = vmatprep.subr.bf16.mxu0 %v7621_v51  ;;  %7082 = vmatpush3.bf16.msra.mxu1 %v7620_v52 }
 0x1e2   :  { %7111 = vmatprep.subr.bf16.mxu1 %v7622_v56 }
 0x1e3   :  { %v6797_v63 = vpop.f32.mrf.mxu0  ;;  %5744 = vmatmul.mubr.bf16.vlgmr.msra.gmra.mxu0 %v1429_v54 }
 0x1e4   :  { %v6819_v3 = vpop.f32.mrf.mxu1  ;;  %7090 = vmatpush3.bf16.msra.mxu0 %v7623_v58  ;;  %5784 = vmatmul.mubr.bf16.vlgmr.msra.gmra.mxu1 %v1451_v60 }
 0x1e5   :  { %v6798_v4 = vpop.f32.mrf.mxu0  ;;  %7091 = vmatprep.subr.bf16.mxu0 %v7625_v61  ;;  %7112 = vmatpush3.bf16.msra.mxu1 %v7624_v0 }
 0x1e6   :  { %v6799_v7 = vadd.f32 %v6798_v4, %v6797_v63  ;;  %v6820_v9 = vpop.f32.mrf.mxu1  ;;  %5823 = vmatprep.mubr.bf16.mxu0 %v1450_v1  ;;  %7113 = vmatprep.subr.bf16.mxu1 %v7626_v2 }
 0x1e7   :  { %v6800_v10 = vpop.f32.mrf.mxu0  ;;  %v6821_v13 = vadd.f32 %v6820_v9, %v6819_v3  ;;  %5863 = vmatprep.mubr.bf16.mxu1 %v1454_v6 }
 0x1e8   :  { %v5266_v12 = vadd.f32 %v6799_v7, %v9187_v25  ;;  %v6822_v15 = vpop.f32.mrf.mxu1  ;;  %7092 = vmatpush3.bf16.msra.mxu0 %v7627_v5  ;;  %v7636_v25 = vld [vmem:[%s9375_s1 + $0xfa0] sm:$0xff]  }
 0x1e9   :  { %v6801_v16 = vpop.f32.mrf.mxu0  ;;  %7093 = vmatprep.subr.bf16.mxu0 %v7629_v8  ;;  %7114 = vmatpush3.bf16.msra.mxu1 %v7628_v11  ;;  %v10_v15 = vstv %s9377_s4 }
 0x1ea   :  { %v5306_v18 = vadd.f32 %v6821_v13, %v5266_v12  ;;  %v6823_v20 = vpop.f32.mrf.mxu1  ;;  %7115 = vmatprep.subr.bf16.mxu1 %v7630_v14  ;;  %11 = vst [vmem:[#allocation2] sm:$0x1] %v10_v15 }
 0x1ec   :  { %7094 = vmatpush3.bf16.msra.mxu0 %v7631_v17 }
 0x1ed   :  { %7095 = vmatprep.subr.bf16.mxu0 %v7633_v19  ;;  %7116 = vmatpush3.bf16.msra.mxu1 %v7632_v21 }
 0x1ee   :  { %7117 = vmatprep.subr.bf16.mxu1 %v7634_v22 }
 0x1f0   :  { %7096 = vmatpush3.bf16.msra.mxu0 %v7635_v23 }
 0x1f1   :  { %7097 = vmatprep.subr.bf16.mxu0 %v7637_v24  ;;  %7118 = vmatpush3.bf16.msra.mxu1 %v7636_v25 }
 0x1f2   :  { %7119 = vmatprep.subr.bf16.mxu1 %v7638_v26 }
 0x1f4   :  { %7098 = vmatpush3.bf16.msra.mxu0 %v7639_v27 }
 0x1f5   :  { %7099 = vmatprep.subr.bf16.mxu0 %v7641_v28  ;;  %7120 = vmatpush3.bf16.msra.mxu1 %v7640_v29 }
 0x1f6   :  { %7121 = vmatprep.subr.bf16.mxu1 %v7642_v30 }
 0x1f8   :  { %7100 = vmatpush3.bf16.msra.mxu0 %v7643_v31 }
 0x1f9   :  { %7101 = vmatprep.subr.bf16.mxu0 %v7645_v32  ;;  %7122 = vmatpush3.bf16.msra.mxu1 %v7644_v33 }
 0x1fa   :  { %7123 = vmatprep.subr.bf16.mxu1 %v7646_v34 }
 0x1fc   :  { %7102 = vmatpush3.bf16.msra.mxu0 %v7647_v36 }
 0x1fd   :  { %7103 = vmatprep.subr.bf16.mxu0 %v7649_v37  ;;  %7124 = vmatpush3.bf16.msra.mxu1 %v7648_v38 }
 0x1fe   :  { %7125 = vmatprep.subr.bf16.mxu1 %v7650_v39 }
 0x200   :  { %7104 = vmatpush3.bf16.msra.mxu0 %v7651_v40 }
 0x201   :  { %7126 = vmatpush3.bf16.msra.mxu1 %v7652_v42 }
 0x203   :  { %v6841_v44 = vpop.f32.mrf.mxu0  ;;  %5824 = vmatmul.mubr.bf16.vlgmr.msra.gmra.mxu0 %v1436_v41 }
 0x204   :  { %v6863_v45 = vpop.f32.mrf.mxu1  ;;  %5864 = vmatmul.mubr.bf16.vlgmr.msra.gmra.mxu1 %v1452_v43 }
 0x205   :  { %v6842_v46 = vpop.f32.mrf.mxu0 }
 0x206   :  { %v6843_v47 = vadd.f32 %v6842_v46, %v6841_v44  ;;  %v6864_v48 = vpop.f32.mrf.mxu1 }
 0x207   :  { %v6844_v49 = vpop.f32.mrf.mxu0  ;;  %v6865_v51 = vadd.f32 %v6864_v48, %v6863_v45 }
 0x208   :  { %v5346_v50 = vadd.f32 %v6843_v47, %v5306_v18  ;;  %v6866_v35 = vpop.f32.mrf.mxu1 }
 0x209   :  { %v6845_v52 = vpop.f32.mrf.mxu0 }
 0x20a   :  { %v5386_v53 = vadd.f32 %v6865_v51, %v5346_v50  ;;  %v6867_v54 = vpop.f32.mrf.mxu1 }
 0x223   :  { %v6885_v55 = vpop.f32.mrf.mxu0 }
 0x224   :  { %v6907_v56 = vpop.f32.mrf.mxu1 }
 0x225   :  { %v6886_v57 = vpop.f32.mrf.mxu0 }
 0x226   :  { %v6887_v58 = vadd.f32 %v6886_v57, %v6885_v55  ;;  %v6908_v59 = vpop.f32.mrf.mxu1 }
 0x227   :  { %v6888_v60 = vpop.f32.mrf.mxu0  ;;  %v6909_v62 = vadd.f32 %v6908_v59, %v6907_v56 }
 0x228   :  { %v5426_v61 = vadd.f32 %v6887_v58, %v5386_v53  ;;  %v6910_v63 = vpop.f32.mrf.mxu1 }
 0x229   :  { %v6889_v0 = vpop.f32.mrf.mxu0 }
 0x22a   :  { %v5466_v1 = vadd.f32 %v6909_v62, %v5426_v61  ;;  %v6911_v2 = vpop.f32.mrf.mxu1 }
 0x243   :  { %v6929_v3 = vpop.f32.mrf.mxu0 }
 0x244   :  { %v6951_v4 = vpop.f32.mrf.mxu1 }
 0x245   :  { %v6930_v5 = vpop.f32.mrf.mxu0 }
 0x246   :  { %v6931_v6 = vadd.f32 %v6930_v5, %v6929_v3  ;;  %v6952_v7 = vpop.f32.mrf.mxu1  ;;  %v6427_v3 = vld [vmem:[%s9379_s3] ss:$0 sm:$0xff] }
 0x247   :  { %v6932_v8 = vpop.f32.mrf.mxu0  ;;  %v6953_v10 = vadd.f32 %v6952_v7, %v6951_v4  ;;  %v6428_v7 = vld [vmem:[#allocation2] ss:$0 sm:$0xff] }
 0x248   :  { %v5506_v9 = vadd.f32 %v6931_v6, %v5466_v1  ;;  %v6954_v11 = vpop.f32.mrf.mxu1  ;;  %v6426_v1 = vld [vmem:[%s9378_s2] ss:$0 sm:$0xff] }
 0x249   :  { %v6933_v12 = vpop.f32.mrf.mxu0 }
 0x24a   :  { %v5546_v13 = vadd.f32 %v6953_v10, %v5506_v9  ;;  %v6955_v14 = vpop.f32.mrf.mxu1 }
 0x263   :  { %v6973_v16 = vpop.f32.mrf.mxu0 }
 0x264   :  { %v6995_v17 = vpop.f32.mrf.mxu1 }
 0x265   :  { %v6974_v18 = vpop.f32.mrf.mxu0 }
 0x266   :  { %v6975_v19 = vadd.f32 %v6974_v18, %v6973_v16  ;;  %v6996_v20 = vpop.f32.mrf.mxu1 }
 0x267   :  { %v6976_v21 = vpop.f32.mrf.mxu0  ;;  %v6997_v23 = vadd.f32 %v6996_v20, %v6995_v17 }
 0x268   :  { %v5586_v22 = vadd.f32 %v6975_v19, %v5546_v13  ;;  %v6998_v24 = vpop.f32.mrf.mxu1 }
 0x269   :  { %v6977_v25 = vpop.f32.mrf.mxu0 }
 0x26a   :  { %v5626_v26 = vadd.f32 %v6997_v23, %v5586_v22  ;;  %v6999_v27 = vpop.f32.mrf.mxu1 }
 0x283   :  { %v7017_v28 = vpop.f32.mrf.mxu0 }
 0x284   :  { %v7039_v29 = vpop.f32.mrf.mxu1 }
 0x285   :  { %v7018_v30 = vpop.f32.mrf.mxu0 }
 0x286   :  { %v7040_v31 = vpop.f32.mrf.mxu1  ;;  %v7019_v45 = vadd.f32 %v7018_v30, %v7017_v28 }
 0x287   :  { %v7020_v32 = vpop.f32.mrf.mxu0  ;;  %v7041_v47 = vadd.f32 %v7040_v31, %v7039_v29 }
 0x288   :  { %v7042_v33 = vpop.f32.mrf.mxu1  ;;  %v5666_v46 = vadd.f32 %v7019_v45, %v5626_v26 }
 0x289   :  { %v7021_v34 = vpop.f32.mrf.mxu0 }
 0x28a   :  { %v7043_v36 = vpop.f32.mrf.mxu1  ;;  %v5706_v49 = vadd.f32 %v7041_v47, %v5666_v46 }
 0x2a3   :  { %v7061_v37 = vpop.f32.mrf.mxu0 }
 0x2a4   :  { %v7083_v38 = vpop.f32.mrf.mxu1 }
 0x2a5   :  { %v7062_v39 = vpop.f32.mrf.mxu0 }
 0x2a6   :  { %v7084_v40 = vpop.f32.mrf.mxu1  ;;  %v7063_v48 = vadd.f32 %v7062_v39, %v7061_v37 }
 0x2a7   :  { %v7064_v41 = vpop.f32.mrf.mxu0  ;;  %v7085_v51 = vadd.f32 %v7084_v40, %v7083_v38 }
 0x2a8   :  { %v7086_v42 = vpop.f32.mrf.mxu1  ;;  %v5746_v50 = vadd.f32 %v7063_v48, %v5706_v49 }
 0x2a9   :  { %v7065_v43 = vpop.f32.mrf.mxu0 }
 0x2aa   :  { %v7087_v44 = vpop.f32.mrf.mxu1  ;;  %v5786_v54 = vadd.f32 %v7085_v51, %v5746_v50 }
 0x2c3   :  { %v7105_v35 = vpop.f32.mrf.mxu0 }
 0x2c4   :  { %v7127_v52 = vpop.f32.mrf.mxu1 }
 0x2c5   :  { %v7106_v53 = vpop.f32.mrf.mxu0 }
 0x2c6   :  { %v7107_v55 = vadd.f32 %v7106_v53, %v7105_v35  ;;  %v7128_v56 = vpop.f32.mrf.mxu1 }
 0x2c7   :  { %v7108_v57 = vpop.f32.mrf.mxu0  ;;  %v7129_v59 = vadd.f32 %v7128_v56, %v7127_v52 }
 0x2c8   :  { %v5826_v58 = vadd.f32 %v7107_v55, %v5786_v54  ;;  %v7130_v60 = vpop.f32.mrf.mxu1 }
 0x2c9   :  { %v7109_v61 = vpop.f32.mrf.mxu0 }
 0x2ca   :  { %v5866_v62 = vadd.f32 %v7129_v59, %v5826_v58  ;;  %v7131_v63 = vpop.f32.mrf.mxu1 }
 0x2cc   :  { %v5872_v0 = vmul.f32 0.2, %v5866_v62  ;;  %vm5871_vm0 = vcmp.ge.f32.partialorder %v5866_v62, 0.0 }
 0x2ce   :  { %v5873_v2 = vsel %vm5871_vm0, %v5866_v62, %v5872_v0 }
 0x2cf   :  { %v5881_v4 = vadd.f32 %v6426_v1, %v5873_v2 }
 0x2d1   :  { %v5889_v5 = vmul.f32 %v6427_v3, %v5881_v4 }
 0x2d3   :  { %v5891_v6 = vsel %vm5890_vm1, %v5889_v5, 0.0 }
 0x2d4   :  { %5892 = vadd.xlane.f32.xlu0 %v5891_v6 }
 0x35d   :  { %v5893_v8 = vpop.xlane.xlu0 %5892 }
 0x35e   :  { %v5901_v9 = vadd.f32 %v6428_v7, %v5893_v8 }
 0x360   :  { %v5902_v10 = vsub.f32 0.0, %v5901_v9 }
 0x362   :  { %v5903_v11 = vmul.f32 1.442695, %v5902_v10 }
 0x364   :  { %7654 = vpow2.f32 %v5903_v11 }
 0x371   :  { %v7655_v12 = vpop.eup %7654 }
 0x372   :  { %v5905_v13 = vadd.f32 1.0, %v7655_v12 }
 0x374   :  { %7656 = vrcp.f32 %v5905_v13 }
 0x381   :  { %v7657_v14 = vpop.eup %7656 }
 0x382   :  { %5909 = vst.msk [vmem:[%s9380_s5] sm:$0x3] %vm5908_vm2, %v7657_v14 }

</bundles_post_ra>
